<compile_context>
chip_gen: v5e
topology: v5e:2x2
jax: 0.10.0
libtpu: 0.0.40
codegen_flags: <defaults>
</compile_context>

<pallas_src>
import functools

import jax
import jax.numpy as jnp
from jax.experimental import pallas as pl
from jax.experimental.pallas import tpu as pltpu

# ---- synthetic (small) sizes consistent with the module ----
N_INST    = 200   # number of instances / cells (deliberately not a TILE_N multiple)
IN_DIM    = 512   # stands in for 5000
D_MODEL   = 128   # stands in for 256
D_FF      = 256   # stands in for 2048
D_ATTN    = 64    # fc2 output dim (= L of Attn_Net_Gated)
D_GATE    = 64    # gated-attention hidden D
N_CLASSES = 3
N_LAYERS  = 2
TILE_N    = 128   # instance rows per grid step (fills MXU rows)
LN_EPS    = 1e-5

N_WEIGHTS = 3 + 4 * N_LAYERS      # W1, (Wv, Wo, Wf1, Wf2) x layers, W2, Wab

# ---- bias / small-param slab layout (one f32 array, lane width = D_FF) ----
SLAB_W          = D_FF
ROW_B1          = 0
ROW_LAYER0      = 1
ROWS_PER_LAYER  = 8               # bv, bo, ln1_g, ln1_b, bf1, bf2, ln2_g, ln2_b
ROW_B2          = ROW_LAYER0 + N_LAYERS * ROWS_PER_LAYER
ROW_BAB         = ROW_B2 + 1      # fused gated-attention bias (width 2*D_GATE)
ROW_WC          = ROW_BAB + 1     # attention_c weight row (width D_GATE)
ROW_BC          = ROW_WC + 1      # attention_c bias (width 1)
ROW_BCLS        = ROW_BC + 1      # classifier bias (width N_CLASSES)
N_BROWS         = ((ROW_BCLS + 1 + 7) // 8) * 8


def _layernorm(x, g, b):
    mu = jnp.mean(x, axis=-1, keepdims=True)
    var = jnp.mean((x - mu) ** 2, axis=-1, keepdims=True)
    return (x - mu) * jax.lax.rsqrt(var + LN_EPS) * g + b


def scmil_kernel(*refs, n_valid):
    """Fused per-tile forward + online-softmax attention pooling.

    Grid axis 0 tiles the instances; (max, sum-exp, weighted-h2) accumulators
    live in VMEM scratch across grid steps; logits / M are finalized on the
    last step (P3 accumulator pattern)."""
    x_ref     = refs[0]
    w_refs    = refs[1:1 + N_WEIGHTS]
    wcls_ref  = refs[1 + N_WEIGHTS]
    bias_ref  = refs[2 + N_WEIGHTS]
    logits_ref, m_out_ref = refs[3 + N_WEIGHTS], refs[4 + N_WEIGHTS]
    m_sc, l_sc, acc_sc = refs[5 + N_WEIGHTS:]

    i = pl.program_id(0)

    @pl.when(i == 0)
    def _():
        m_sc[...] = jnp.full_like(m_sc, -jnp.inf)
        l_sc[...] = jnp.zeros_like(l_sc)
        acc_sc[...] = jnp.zeros_like(acc_sc)

    def brow(r, width):                       # (1, width) f32 row from the slab
        return bias_ref[r:r + 1, :width]

    def bdot(a, w_ref):                       # bf16 MXU matmul, f32 accumulate
        return jnp.dot(a.astype(jnp.bfloat16), w_ref[...],
                       preferred_element_type=jnp.float32)

    it = iter(w_refs)
    w1_ref = next(it)

    x = x_ref[...]                            # (TILE_N, IN_DIM) f32

    # fc1: Linear(IN_DIM, D_MODEL) + ReLU (+ Dropout -> identity at inference)
    h = jnp.maximum(bdot(x, w1_ref) + brow(ROW_B1, D_MODEL), 0.0)

    # TransformerEncoder (num_layers=2, post-norm, ReLU FFN). torch feeds shape
    # (1, N, d_model), i.e. seq_len == 1, so softmax over keys is identically 1
    # and MHA reduces to out_proj(v_proj(h)).
    for layer in range(N_LAYERS):
        wv_ref, wo_ref, wfa_ref, wfb_ref = next(it), next(it), next(it), next(it)
        base = ROW_LAYER0 + layer * ROWS_PER_LAYER
        bv, bo   = brow(base + 0, D_MODEL), brow(base + 1, D_MODEL)
        g1, be1  = brow(base + 2, D_MODEL), brow(base + 3, D_MODEL)
        bf1, bf2 = brow(base + 4, D_FF),    brow(base + 5, D_MODEL)
        g2, be2  = brow(base + 6, D_MODEL), brow(base + 7, D_MODEL)

        sa = bdot(bdot(h, wv_ref) + bv, wo_ref) + bo
        h = _layernorm(h + sa, g1, be1)
        ff = bdot(jnp.maximum(bdot(h, wfa_ref) + bf1, 0.0), wfb_ref) + bf2
        h = _layernorm(h + ff, g2, be2)

    # fc2: Linear(D_MODEL, D_ATTN) + ReLU
    w2_ref = next(it)
    h2 = jnp.maximum(bdot(h, w2_ref) + brow(ROW_B2, D_ATTN), 0.0)

    # Attn_Net_Gated, fused: one lane-dense (D_ATTN, 2*D_GATE) projection,
    # split into the tanh / sigmoid branches, then the (D_GATE -> 1) score as
    # a lane reduction against the attention_c weight row.
    wab_ref = next(it)
    ab = bdot(h2, wab_ref) + brow(ROW_BAB, 2 * D_GATE)
    gated = jnp.tanh(ab[:, :D_GATE]) * jax.nn.sigmoid(ab[:, D_GATE:])
    s = jnp.sum(gated * brow(ROW_WC, D_GATE), axis=-1, keepdims=True)
    s = s + brow(ROW_BC, 1)                   # (TILE_N, 1) raw attention scores

    # Mask padded instances out of the softmax.
    row = i * TILE_N + jax.lax.broadcasted_iota(jnp.int32, (TILE_N, 1), 0)
    valid = row < n_valid
    s = jnp.where(valid, s, -jnp.inf)

    # Online softmax pooling: M = softmax(A)^T @ h2, accumulated across tiles.
    m_old = m_sc[...]                                        # (1, 1)
    m_new = jnp.maximum(m_old, jnp.max(s, axis=0, keepdims=True))
    alpha = jnp.exp(m_old - m_new)
    p = jnp.where(valid, jnp.exp(s - m_new), 0.0)            # (TILE_N, 1)
    l_sc[...] = alpha * l_sc[...] + jnp.sum(p, axis=0, keepdims=True)
    acc_sc[...] = alpha * acc_sc[...] + jnp.sum(p * h2, axis=0, keepdims=True)
    m_sc[...] = m_new

    @pl.when(i == pl.num_programs(0) - 1)
    def _():
        M = acc_sc[...] / l_sc[...]                          # (1, D_ATTN)
        m_out_ref[...] = M
        logits_ref[...] = (jnp.dot(M, wcls_ref[...],
                                   preferred_element_type=jnp.float32)
                           + brow(ROW_BCLS, N_CLASSES))


def make_params(key):
    """Deterministic synthetic params: xavier-normal Linear weights (bf16),
    zero biases, LayerNorm gamma=1 / beta=0, packed into the kernel layout."""
    def xavier(k, shape):
        std = (2.0 / (shape[0] + shape[1])) ** 0.5
        return std * jax.random.normal(k, shape, dtype=jnp.float32)

    keys = iter(jax.random.split(key, 32))

    weights = [xavier(next(keys), (IN_DIM, D_MODEL))]                  # fc1
    for _ in range(N_LAYERS):
        weights += [xavier(next(keys), (D_MODEL, D_MODEL)),            # Wv
                    xavier(next(keys), (D_MODEL, D_MODEL)),            # Wo
                    xavier(next(keys), (D_MODEL, D_FF)),               # FFN lin1
                    xavier(next(keys), (D_FF, D_MODEL))]               # FFN lin2
    weights += [xavier(next(keys), (D_MODEL, D_ATTN))]                 # fc2
    wa = xavier(next(keys), (D_ATTN, D_GATE))                          # attention_a
    wb = xavier(next(keys), (D_ATTN, D_GATE))                          # attention_b
    weights += [jnp.concatenate([wa, wb], axis=1)]                     # fused gate
    weights = tuple(w.astype(jnp.bfloat16) for w in weights)

    wcls = xavier(next(keys), (D_ATTN, N_CLASSES))                     # classifier (f32)

    slab = jnp.zeros((N_BROWS, SLAB_W), jnp.float32)
    for layer in range(N_LAYERS):                                      # LN gammas = 1
        base = ROW_LAYER0 + layer * ROWS_PER_LAYER
        slab = slab.at[base + 2, :D_MODEL].set(1.0)
        slab = slab.at[base + 6, :D_MODEL].set(1.0)
    wc_row = xavier(next(keys), (1, D_GATE))                           # attention_c weight
    slab = slab.at[ROW_WC, :D_GATE].set(wc_row[0])
    # all Linear biases are zero-initialized in the torch model.
    return weights, wcls, slab


def scmil_forward(x, weights, wcls, bias_slab):
    n = x.shape[0]
    n_pad = int(pl.cdiv(n, TILE_N)) * TILE_N
    if n_pad != n:
        x = jnp.pad(x, ((0, n_pad - n), (0, 0)))
    grid = (n_pad // TILE_N,)

    full = lambda a: pl.BlockSpec(a.shape, lambda i: (0, 0))
    in_specs = [pl.BlockSpec((TILE_N, IN_DIM), lambda i: (i, 0))]
    in_specs += [full(w) for w in weights]
    in_specs += [full(wcls), full(bias_slab)]

    kernel = functools.partial(scmil_kernel, n_valid=n)

    logits, M = pl.pallas_call(
        kernel,
        out_shape=(jax.ShapeDtypeStruct((1, N_CLASSES), jnp.float32),
                   jax.ShapeDtypeStruct((1, D_ATTN), jnp.float32)),
        grid=grid,
        in_specs=in_specs,
        out_specs=(pl.BlockSpec((1, N_CLASSES), lambda i: (0, 0)),
                   pl.BlockSpec((1, D_ATTN), lambda i: (0, 0))),
        scratch_shapes=[pltpu.VMEM((1, 1), jnp.float32),        # running max
                        pltpu.VMEM((1, 1), jnp.float32),        # running sum-exp
                        pltpu.VMEM((1, D_ATTN), jnp.float32)],  # weighted h2 accum
        compiler_params=pltpu.CompilerParams(
            dimension_semantics=("arbitrary",)),   # accumulator across the grid
    )(x, *weights, wcls, bias_slab)
    return logits, M


if __name__ == "__main__":
    key = jax.random.PRNGKey(0)
    kx, kp = jax.random.split(key)
    x = jax.random.normal(kx, (N_INST, IN_DIM), dtype=jnp.float32)
    weights, wcls, bias_slab = make_params(kp)

    logits, M = jax.jit(scmil_forward)(x, weights, wcls, bias_slab)
    logits = jax.block_until_ready(logits)
    M = jax.block_until_ready(M)

    assert logits.shape == (1, N_CLASSES) and M.shape == (1, D_ATTN)
    assert bool(jnp.all(jnp.isfinite(logits))) and bool(jnp.all(jnp.isfinite(M)))
    print("KERNEL_OK")
</pallas_src>

<mosaic_0001>
module attributes {stable_mosaic.version = 11 : i64} {
  func.func @scmil_kernel(%arg0: i32, %arg1: memref<128x512xf32, #tpu.memory_space<vmem>>, %arg2: memref<512x128xbf16, #tpu.memory_space<vmem>>, %arg3: memref<128x128xbf16, #tpu.memory_space<vmem>>, %arg4: memref<128x128xbf16, #tpu.memory_space<vmem>>, %arg5: memref<128x256xbf16, #tpu.memory_space<vmem>>, %arg6: memref<256x128xbf16, #tpu.memory_space<vmem>>, %arg7: memref<128x128xbf16, #tpu.memory_space<vmem>>, %arg8: memref<128x128xbf16, #tpu.memory_space<vmem>>, %arg9: memref<128x256xbf16, #tpu.memory_space<vmem>>, %arg10: memref<256x128xbf16, #tpu.memory_space<vmem>>, %arg11: memref<128x64xbf16, #tpu.memory_space<vmem>>, %arg12: memref<64x128xbf16, #tpu.memory_space<vmem>>, %arg13: memref<64x3xf32, #tpu.memory_space<vmem>>, %arg14: memref<24x256xf32, #tpu.memory_space<vmem>>, %arg15: memref<1x3xf32, #tpu.memory_space<vmem>>, %arg16: memref<1x64xf32, #tpu.memory_space<vmem>>, %arg17: memref<1x1xf32, #tpu.memory_space<vmem>>, %arg18: memref<1x1xf32, #tpu.memory_space<vmem>>, %arg19: memref<1x64xf32, #tpu.memory_space<vmem>>) attributes {dimension_semantics = [#tpu.dimension_semantics<arbitrary>], iteration_bounds = array<i64: 2>, scalar_prefetch = 0 : i64, scratch_operands = 3 : i64, tpu.core_type = #tpu.core_type<tc>, window_params = [{transform_indices = @transform_0, window_bounds = array<i64: 128, 512>}, {pipeline_mode = #tpu.pipeline_mode<synchronous>, transform_indices = @transform_1, window_bounds = array<i64: 512, 128>}, {pipeline_mode = #tpu.pipeline_mode<synchronous>, transform_indices = @transform_2, window_bounds = array<i64: 128, 128>}, {pipeline_mode = #tpu.pipeline_mode<synchronous>, transform_indices = @transform_3, window_bounds = array<i64: 128, 128>}, {pipeline_mode = #tpu.pipeline_mode<synchronous>, transform_indices = @transform_4, window_bounds = array<i64: 128, 256>}, {pipeline_mode = #tpu.pipeline_mode<synchronous>, transform_indices = @transform_5, window_bounds = array<i64: 256, 128>}, {pipeline_mode = #tpu.pipeline_mode<synchronous>, transform_indices = @transform_6, window_bounds = array<i64: 128, 128>}, {pipeline_mode = #tpu.pipeline_mode<synchronous>, transform_indices = @transform_7, window_bounds = array<i64: 128, 128>}, {pipeline_mode = #tpu.pipeline_mode<synchronous>, transform_indices = @transform_8, window_bounds = array<i64: 128, 256>}, {pipeline_mode = #tpu.pipeline_mode<synchronous>, transform_indices = @transform_9, window_bounds = array<i64: 256, 128>}, {pipeline_mode = #tpu.pipeline_mode<synchronous>, transform_indices = @transform_10, window_bounds = array<i64: 128, 64>}, {pipeline_mode = #tpu.pipeline_mode<synchronous>, transform_indices = @transform_11, window_bounds = array<i64: 64, 128>}, {pipeline_mode = #tpu.pipeline_mode<synchronous>, transform_indices = @transform_12, window_bounds = array<i64: 64, 3>}, {pipeline_mode = #tpu.pipeline_mode<synchronous>, transform_indices = @transform_13, window_bounds = array<i64: 24, 256>}, {pipeline_mode = #tpu.pipeline_mode<synchronous>, transform_indices = @transform_14, window_bounds = array<i64: 1, 3>}, {pipeline_mode = #tpu.pipeline_mode<synchronous>, transform_indices = @transform_15, window_bounds = array<i64: 1, 64>}]} {
    %c0_i32 = arith.constant 0 : i32
    %0 = arith.cmpi eq, %arg0, %c0_i32 : i32
    %1 = arith.extui %0 : i1 to i32
    %c0_i32_0 = arith.constant 0 : i32
    %2 = arith.cmpi ne, %1, %c0_i32_0 : i32
    scf.if %2 {
      %cst_100 = arith.constant 0xFF800000 : f32
      %233 = vector.broadcast %cst_100 : f32 to vector<1x1xf32>
      %c0_101 = arith.constant 0 : index
      %c0_102 = arith.constant 0 : index
      %234 = vector.load %arg17[%c0_101, %c0_102] : memref<1x1xf32, #tpu.memory_space<vmem>>, vector<1x1xf32>
      tpu.vector_store %arg17[%c0_101, %c0_102], %233 {strides = array<i32>} : memref<1x1xf32, #tpu.memory_space<vmem>>, vector<1x1xf32>,
      %cst_103 = arith.constant 0.000000e+00 : f32
      %235 = vector.broadcast %cst_103 : f32 to vector<1x1xf32>
      %c0_104 = arith.constant 0 : index
      %c0_105 = arith.constant 0 : index
      %236 = vector.load %arg18[%c0_104, %c0_105] : memref<1x1xf32, #tpu.memory_space<vmem>>, vector<1x1xf32>
      tpu.vector_store %arg18[%c0_104, %c0_105], %235 {strides = array<i32>} : memref<1x1xf32, #tpu.memory_space<vmem>>, vector<1x1xf32>,
      %cst_106 = arith.constant 0.000000e+00 : f32
      %237 = vector.broadcast %cst_106 : f32 to vector<1x64xf32>
      %c0_107 = arith.constant 0 : index
      %c0_108 = arith.constant 0 : index
      %238 = vector.load %arg19[%c0_107, %c0_108] : memref<1x64xf32, #tpu.memory_space<vmem>>, vector<1x64xf32>
      tpu.vector_store %arg19[%c0_107, %c0_108], %237 {strides = array<i32>} : memref<1x64xf32, #tpu.memory_space<vmem>>, vector<1x64xf32>,
    } else {
    }
    %c0 = arith.constant 0 : index
    %c0_1 = arith.constant 0 : index
    %3 = vector.load %arg1[%c0, %c0_1] : memref<128x512xf32, #tpu.memory_space<vmem>>, vector<128x512xf32>
    %4 = arith.truncf %3 : vector<128x512xf32> to vector<128x512xbf16>
    %c0_2 = arith.constant 0 : index
    %c0_3 = arith.constant 0 : index
    %5 = vector.load %arg2[%c0_2, %c0_3] : memref<512x128xbf16, #tpu.memory_space<vmem>>, vector<512x128xbf16>
    %cst = arith.constant dense<0.000000e+00> : vector<128x128xf32>
    %6 = tpu.matmul %4, %5, %cst {dimension_numbers = #tpu.dot_dimension_numbers<[1], [0], [0], [1], [0, 0, 1, 1], [], []>} : vector<128x512xbf16>, vector<512x128xbf16>, vector<128x128xf32> -> vector<128x128xf32>
    %c0_4 = arith.constant 0 : index
    %c0_5 = arith.constant 0 : index
    %7 = vector.load %arg14[%c0_4, %c0_5] : memref<24x256xf32, #tpu.memory_space<vmem>>, vector<1x128xf32>
    %8 = vector.broadcast %7 : vector<1x128xf32> to vector<128x128xf32>
    %9 = arith.addf %6, %8 : vector<128x128xf32>
    %cst_6 = arith.constant 0.000000e+00 : f32
    %10 = vector.broadcast %cst_6 : f32 to vector<128x128xf32>
    %11 = arith.maximumf %9, %10 : vector<128x128xf32>
    %c1 = arith.constant 1 : index
    %c0_7 = arith.constant 0 : index
    %12 = vector.load %arg14[%c1, %c0_7] : memref<24x256xf32, #tpu.memory_space<vmem>>, vector<1x128xf32>
    %c2 = arith.constant 2 : index
    %c0_8 = arith.constant 0 : index
    %13 = vector.load %arg14[%c2, %c0_8] : memref<24x256xf32, #tpu.memory_space<vmem>>, vector<1x128xf32>
    %c3 = arith.constant 3 : index
    %c0_9 = arith.constant 0 : index
    %14 = vector.load %arg14[%c3, %c0_9] : memref<24x256xf32, #tpu.memory_space<vmem>>, vector<1x128xf32>
    %c4 = arith.constant 4 : index
    %c0_10 = arith.constant 0 : index
    %15 = vector.load %arg14[%c4, %c0_10] : memref<24x256xf32, #tpu.memory_space<vmem>>, vector<1x128xf32>
    %c5 = arith.constant 5 : index
    %c0_11 = arith.constant 0 : index
    %16 = vector.load %arg14[%c5, %c0_11] : memref<24x256xf32, #tpu.memory_space<vmem>>, vector<1x256xf32>
    %c6 = arith.constant 6 : index
    %c0_12 = arith.constant 0 : index
    %17 = vector.load %arg14[%c6, %c0_12] : memref<24x256xf32, #tpu.memory_space<vmem>>, vector<1x128xf32>
    %c7 = arith.constant 7 : index
    %c0_13 = arith.constant 0 : index
    %18 = vector.load %arg14[%c7, %c0_13] : memref<24x256xf32, #tpu.memory_space<vmem>>, vector<1x128xf32>
    %c8 = arith.constant 8 : index
    %c0_14 = arith.constant 0 : index
    %19 = vector.load %arg14[%c8, %c0_14] : memref<24x256xf32, #tpu.memory_space<vmem>>, vector<1x128xf32>
    %20 = arith.truncf %11 : vector<128x128xf32> to vector<128x128xbf16>
    %c0_15 = arith.constant 0 : index
    %c0_16 = arith.constant 0 : index
    %21 = vector.load %arg3[%c0_15, %c0_16] : memref<128x128xbf16, #tpu.memory_space<vmem>>, vector<128x128xbf16>
    %cst_17 = arith.constant dense<0.000000e+00> : vector<128x128xf32>
    %22 = tpu.matmul %20, %21, %cst_17 {dimension_numbers = #tpu.dot_dimension_numbers<[1], [0], [0], [1], [0, 0, 1, 1], [], []>} : vector<128x128xbf16>, vector<128x128xbf16>, vector<128x128xf32> -> vector<128x128xf32>
    %23 = vector.broadcast %12 : vector<1x128xf32> to vector<128x128xf32>
    %24 = arith.addf %22, %23 : vector<128x128xf32>
    %25 = arith.truncf %24 : vector<128x128xf32> to vector<128x128xbf16>
    %c0_18 = arith.constant 0 : index
    %c0_19 = arith.constant 0 : index
    %26 = vector.load %arg4[%c0_18, %c0_19] : memref<128x128xbf16, #tpu.memory_space<vmem>>, vector<128x128xbf16>
    %cst_20 = arith.constant dense<0.000000e+00> : vector<128x128xf32>
    %27 = tpu.matmul %25, %26, %cst_20 {dimension_numbers = #tpu.dot_dimension_numbers<[1], [0], [0], [1], [0, 0, 1, 1], [], []>} : vector<128x128xbf16>, vector<128x128xbf16>, vector<128x128xf32> -> vector<128x128xf32>
    %28 = vector.broadcast %13 : vector<1x128xf32> to vector<128x128xf32>
    %29 = arith.addf %27, %28 : vector<128x128xf32>
    %30 = arith.addf %11, %29 : vector<128x128xf32>
    %cst_21 = arith.constant dense<0.000000e+00> : vector<128xf32>
    %31 = vector.multi_reduction <add>, %30, %cst_21 [1] : vector<128x128xf32> to vector<128xf32>
    %32 = vector.shape_cast %31 : vector<128xf32> to vector<128x1xf32>
    %cst_22 = arith.constant 1.280000e+02 : f32
    %33 = vector.broadcast %cst_22 : f32 to vector<128x1xf32>
    %34 = arith.divf %32, %33 : vector<128x1xf32>
    %35 = vector.broadcast %34 : vector<128x1xf32> to vector<128x128xf32>
    %36 = arith.subf %30, %35 : vector<128x128xf32>
    %37 = arith.mulf %36, %36 : vector<128x128xf32>
    %cst_23 = arith.constant dense<0.000000e+00> : vector<128xf32>
    %38 = vector.multi_reduction <add>, %37, %cst_23 [1] : vector<128x128xf32> to vector<128xf32>
    %39 = vector.shape_cast %38 : vector<128xf32> to vector<128x1xf32>
    %cst_24 = arith.constant 1.280000e+02 : f32
    %40 = vector.broadcast %cst_24 : f32 to vector<128x1xf32>
    %41 = arith.divf %39, %40 : vector<128x1xf32>
    %42 = vector.broadcast %34 : vector<128x1xf32> to vector<128x128xf32>
    %43 = arith.subf %30, %42 : vector<128x128xf32>
    %cst_25 = arith.constant 9.99999974E-6 : f32
    %44 = vector.broadcast %cst_25 : f32 to vector<128x1xf32>
    %45 = arith.addf %41, %44 : vector<128x1xf32>
    %46 = math.rsqrt %45 : vector<128x1xf32>
    %47 = vector.broadcast %46 : vector<128x1xf32> to vector<128x128xf32>
    %48 = arith.mulf %43, %47 : vector<128x128xf32>
    %49 = vector.broadcast %14 : vector<1x128xf32> to vector<128x128xf32>
    %50 = arith.mulf %48, %49 : vector<128x128xf32>
    %51 = vector.broadcast %15 : vector<1x128xf32> to vector<128x128xf32>
    %52 = arith.addf %50, %51 : vector<128x128xf32>
    %53 = arith.truncf %52 : vector<128x128xf32> to vector<128x128xbf16>
    %c0_26 = arith.constant 0 : index
    %c0_27 = arith.constant 0 : index
    %54 = vector.load %arg5[%c0_26, %c0_27] : memref<128x256xbf16, #tpu.memory_space<vmem>>, vector<128x256xbf16>
    %cst_28 = arith.constant dense<0.000000e+00> : vector<128x256xf32>
    %55 = tpu.matmul %53, %54, %cst_28 {dimension_numbers = #tpu.dot_dimension_numbers<[1], [0], [0], [1], [0, 0, 1, 1], [], []>} : vector<128x128xbf16>, vector<128x256xbf16>, vector<128x256xf32> -> vector<128x256xf32>
    %56 = vector.broadcast %16 : vector<1x256xf32> to vector<128x256xf32>
    %57 = arith.addf %55, %56 : vector<128x256xf32>
    %cst_29 = arith.constant 0.000000e+00 : f32
    %58 = vector.broadcast %cst_29 : f32 to vector<128x256xf32>
    %59 = arith.maximumf %57, %58 : vector<128x256xf32>
    %60 = arith.truncf %59 : vector<128x256xf32> to vector<128x256xbf16>
    %c0_30 = arith.constant 0 : index
    %c0_31 = arith.constant 0 : index
    %61 = vector.load %arg6[%c0_30, %c0_31] : memref<256x128xbf16, #tpu.memory_space<vmem>>, vector<256x128xbf16>
    %cst_32 = arith.constant dense<0.000000e+00> : vector<128x128xf32>
    %62 = tpu.matmul %60, %61, %cst_32 {dimension_numbers = #tpu.dot_dimension_numbers<[1], [0], [0], [1], [0, 0, 1, 1], [], []>} : vector<128x256xbf16>, vector<256x128xbf16>, vector<128x128xf32> -> vector<128x128xf32>
    %63 = vector.broadcast %17 : vector<1x128xf32> to vector<128x128xf32>
    %64 = arith.addf %62, %63 : vector<128x128xf32>
    %65 = arith.addf %52, %64 : vector<128x128xf32>
    %cst_33 = arith.constant dense<0.000000e+00> : vector<128xf32>
    %66 = vector.multi_reduction <add>, %65, %cst_33 [1] : vector<128x128xf32> to vector<128xf32>
    %67 = vector.shape_cast %66 : vector<128xf32> to vector<128x1xf32>
    %cst_34 = arith.constant 1.280000e+02 : f32
    %68 = vector.broadcast %cst_34 : f32 to vector<128x1xf32>
    %69 = arith.divf %67, %68 : vector<128x1xf32>
    %70 = vector.broadcast %69 : vector<128x1xf32> to vector<128x128xf32>
    %71 = arith.subf %65, %70 : vector<128x128xf32>
    %72 = arith.mulf %71, %71 : vector<128x128xf32>
    %cst_35 = arith.constant dense<0.000000e+00> : vector<128xf32>
    %73 = vector.multi_reduction <add>, %72, %cst_35 [1] : vector<128x128xf32> to vector<128xf32>
    %74 = vector.shape_cast %73 : vector<128xf32> to vector<128x1xf32>
    %cst_36 = arith.constant 1.280000e+02 : f32
    %75 = vector.broadcast %cst_36 : f32 to vector<128x1xf32>
    %76 = arith.divf %74, %75 : vector<128x1xf32>
    %77 = vector.broadcast %69 : vector<128x1xf32> to vector<128x128xf32>
    %78 = arith.subf %65, %77 : vector<128x128xf32>
    %cst_37 = arith.constant 9.99999974E-6 : f32
    %79 = vector.broadcast %cst_37 : f32 to vector<128x1xf32>
    %80 = arith.addf %76, %79 : vector<128x1xf32>
    %81 = math.rsqrt %80 : vector<128x1xf32>
    %82 = vector.broadcast %81 : vector<128x1xf32> to vector<128x128xf32>
    %83 = arith.mulf %78, %82 : vector<128x128xf32>
    %84 = vector.broadcast %18 : vector<1x128xf32> to vector<128x128xf32>
    %85 = arith.mulf %83, %84 : vector<128x128xf32>
    %86 = vector.broadcast %19 : vector<1x128xf32> to vector<128x128xf32>
    %87 = arith.addf %85, %86 : vector<128x128xf32>
    %c9 = arith.constant 9 : index
    %c0_38 = arith.constant 0 : index
    %88 = vector.load %arg14[%c9, %c0_38] : memref<24x256xf32, #tpu.memory_space<vmem>>, vector<1x128xf32>
    %c10 = arith.constant 10 : index
    %c0_39 = arith.constant 0 : index
    %89 = vector.load %arg14[%c10, %c0_39] : memref<24x256xf32, #tpu.memory_space<vmem>>, vector<1x128xf32>
    %c11 = arith.constant 11 : index
    %c0_40 = arith.constant 0 : index
    %90 = vector.load %arg14[%c11, %c0_40] : memref<24x256xf32, #tpu.memory_space<vmem>>, vector<1x128xf32>
    %c12 = arith.constant 12 : index
    %c0_41 = arith.constant 0 : index
    %91 = vector.load %arg14[%c12, %c0_41] : memref<24x256xf32, #tpu.memory_space<vmem>>, vector<1x128xf32>
    %c13 = arith.constant 13 : index
    %c0_42 = arith.constant 0 : index
    %92 = vector.load %arg14[%c13, %c0_42] : memref<24x256xf32, #tpu.memory_space<vmem>>, vector<1x256xf32>
    %c14 = arith.constant 14 : index
    %c0_43 = arith.constant 0 : index
    %93 = vector.load %arg14[%c14, %c0_43] : memref<24x256xf32, #tpu.memory_space<vmem>>, vector<1x128xf32>
    %c15 = arith.constant 15 : index
    %c0_44 = arith.constant 0 : index
    %94 = vector.load %arg14[%c15, %c0_44] : memref<24x256xf32, #tpu.memory_space<vmem>>, vector<1x128xf32>
    %c16 = arith.constant 16 : index
    %c0_45 = arith.constant 0 : index
    %95 = vector.load %arg14[%c16, %c0_45] : memref<24x256xf32, #tpu.memory_space<vmem>>, vector<1x128xf32>
    %96 = arith.truncf %87 : vector<128x128xf32> to vector<128x128xbf16>
    %c0_46 = arith.constant 0 : index
    %c0_47 = arith.constant 0 : index
    %97 = vector.load %arg7[%c0_46, %c0_47] : memref<128x128xbf16, #tpu.memory_space<vmem>>, vector<128x128xbf16>
    %cst_48 = arith.constant dense<0.000000e+00> : vector<128x128xf32>
    %98 = tpu.matmul %96, %97, %cst_48 {dimension_numbers = #tpu.dot_dimension_numbers<[1], [0], [0], [1], [0, 0, 1, 1], [], []>} : vector<128x128xbf16>, vector<128x128xbf16>, vector<128x128xf32> -> vector<128x128xf32>
    %99 = vector.broadcast %88 : vector<1x128xf32> to vector<128x128xf32>
    %100 = arith.addf %98, %99 : vector<128x128xf32>
    %101 = arith.truncf %100 : vector<128x128xf32> to vector<128x128xbf16>
    %c0_49 = arith.constant 0 : index
    %c0_50 = arith.constant 0 : index
    %102 = vector.load %arg8[%c0_49, %c0_50] : memref<128x128xbf16, #tpu.memory_space<vmem>>, vector<128x128xbf16>
    %cst_51 = arith.constant dense<0.000000e+00> : vector<128x128xf32>
    %103 = tpu.matmul %101, %102, %cst_51 {dimension_numbers = #tpu.dot_dimension_numbers<[1], [0], [0], [1], [0, 0, 1, 1], [], []>} : vector<128x128xbf16>, vector<128x128xbf16>, vector<128x128xf32> -> vector<128x128xf32>
    %104 = vector.broadcast %89 : vector<1x128xf32> to vector<128x128xf32>
    %105 = arith.addf %103, %104 : vector<128x128xf32>
    %106 = arith.addf %87, %105 : vector<128x128xf32>
    %cst_52 = arith.constant dense<0.000000e+00> : vector<128xf32>
    %107 = vector.multi_reduction <add>, %106, %cst_52 [1] : vector<128x128xf32> to vector<128xf32>
    %108 = vector.shape_cast %107 : vector<128xf32> to vector<128x1xf32>
    %cst_53 = arith.constant 1.280000e+02 : f32
    %109 = vector.broadcast %cst_53 : f32 to vector<128x1xf32>
    %110 = arith.divf %108, %109 : vector<128x1xf32>
    %111 = vector.broadcast %110 : vector<128x1xf32> to vector<128x128xf32>
    %112 = arith.subf %106, %111 : vector<128x128xf32>
    %113 = arith.mulf %112, %112 : vector<128x128xf32>
    %cst_54 = arith.constant dense<0.000000e+00> : vector<128xf32>
    %114 = vector.multi_reduction <add>, %113, %cst_54 [1] : vector<128x128xf32> to vector<128xf32>
    %115 = vector.shape_cast %114 : vector<128xf32> to vector<128x1xf32>
    %cst_55 = arith.constant 1.280000e+02 : f32
    %116 = vector.broadcast %cst_55 : f32 to vector<128x1xf32>
    %117 = arith.divf %115, %116 : vector<128x1xf32>
    %118 = vector.broadcast %110 : vector<128x1xf32> to vector<128x128xf32>
    %119 = arith.subf %106, %118 : vector<128x128xf32>
    %cst_56 = arith.constant 9.99999974E-6 : f32
    %120 = vector.broadcast %cst_56 : f32 to vector<128x1xf32>
    %121 = arith.addf %117, %120 : vector<128x1xf32>
    %122 = math.rsqrt %121 : vector<128x1xf32>
    %123 = vector.broadcast %122 : vector<128x1xf32> to vector<128x128xf32>
    %124 = arith.mulf %119, %123 : vector<128x128xf32>
    %125 = vector.broadcast %90 : vector<1x128xf32> to vector<128x128xf32>
    %126 = arith.mulf %124, %125 : vector<128x128xf32>
    %127 = vector.broadcast %91 : vector<1x128xf32> to vector<128x128xf32>
    %128 = arith.addf %126, %127 : vector<128x128xf32>
    %129 = arith.truncf %128 : vector<128x128xf32> to vector<128x128xbf16>
    %c0_57 = arith.constant 0 : index
    %c0_58 = arith.constant 0 : index
    %130 = vector.load %arg9[%c0_57, %c0_58] : memref<128x256xbf16, #tpu.memory_space<vmem>>, vector<128x256xbf16>
    %cst_59 = arith.constant dense<0.000000e+00> : vector<128x256xf32>
    %131 = tpu.matmul %129, %130, %cst_59 {dimension_numbers = #tpu.dot_dimension_numbers<[1], [0], [0], [1], [0, 0, 1, 1], [], []>} : vector<128x128xbf16>, vector<128x256xbf16>, vector<128x256xf32> -> vector<128x256xf32>
    %132 = vector.broadcast %92 : vector<1x256xf32> to vector<128x256xf32>
    %133 = arith.addf %131, %132 : vector<128x256xf32>
    %cst_60 = arith.constant 0.000000e+00 : f32
    %134 = vector.broadcast %cst_60 : f32 to vector<128x256xf32>
    %135 = arith.maximumf %133, %134 : vector<128x256xf32>
    %136 = arith.truncf %135 : vector<128x256xf32> to vector<128x256xbf16>
    %c0_61 = arith.constant 0 : index
    %c0_62 = arith.constant 0 : index
    %137 = vector.load %arg10[%c0_61, %c0_62] : memref<256x128xbf16, #tpu.memory_space<vmem>>, vector<256x128xbf16>
    %cst_63 = arith.constant dense<0.000000e+00> : vector<128x128xf32>
    %138 = tpu.matmul %136, %137, %cst_63 {dimension_numbers = #tpu.dot_dimension_numbers<[1], [0], [0], [1], [0, 0, 1, 1], [], []>} : vector<128x256xbf16>, vector<256x128xbf16>, vector<128x128xf32> -> vector<128x128xf32>
    %139 = vector.broadcast %93 : vector<1x128xf32> to vector<128x128xf32>
    %140 = arith.addf %138, %139 : vector<128x128xf32>
    %141 = arith.addf %128, %140 : vector<128x128xf32>
    %cst_64 = arith.constant dense<0.000000e+00> : vector<128xf32>
    %142 = vector.multi_reduction <add>, %141, %cst_64 [1] : vector<128x128xf32> to vector<128xf32>
    %143 = vector.shape_cast %142 : vector<128xf32> to vector<128x1xf32>
    %cst_65 = arith.constant 1.280000e+02 : f32
    %144 = vector.broadcast %cst_65 : f32 to vector<128x1xf32>
    %145 = arith.divf %143, %144 : vector<128x1xf32>
    %146 = vector.broadcast %145 : vector<128x1xf32> to vector<128x128xf32>
    %147 = arith.subf %141, %146 : vector<128x128xf32>
    %148 = arith.mulf %147, %147 : vector<128x128xf32>
    %cst_66 = arith.constant dense<0.000000e+00> : vector<128xf32>
    %149 = vector.multi_reduction <add>, %148, %cst_66 [1] : vector<128x128xf32> to vector<128xf32>
    %150 = vector.shape_cast %149 : vector<128xf32> to vector<128x1xf32>
    %cst_67 = arith.constant 1.280000e+02 : f32
    %151 = vector.broadcast %cst_67 : f32 to vector<128x1xf32>
    %152 = arith.divf %150, %151 : vector<128x1xf32>
    %153 = vector.broadcast %145 : vector<128x1xf32> to vector<128x128xf32>
    %154 = arith.subf %141, %153 : vector<128x128xf32>
    %cst_68 = arith.constant 9.99999974E-6 : f32
    %155 = vector.broadcast %cst_68 : f32 to vector<128x1xf32>
    %156 = arith.addf %152, %155 : vector<128x1xf32>
    %157 = math.rsqrt %156 : vector<128x1xf32>
    %158 = vector.broadcast %157 : vector<128x1xf32> to vector<128x128xf32>
    %159 = arith.mulf %154, %158 : vector<128x128xf32>
    %160 = vector.broadcast %94 : vector<1x128xf32> to vector<128x128xf32>
    %161 = arith.mulf %159, %160 : vector<128x128xf32>
    %162 = vector.broadcast %95 : vector<1x128xf32> to vector<128x128xf32>
    %163 = arith.addf %161, %162 : vector<128x128xf32>
    %164 = arith.truncf %163 : vector<128x128xf32> to vector<128x128xbf16>
    %c0_69 = arith.constant 0 : index
    %c0_70 = arith.constant 0 : index
    %165 = vector.load %arg11[%c0_69, %c0_70] : memref<128x64xbf16, #tpu.memory_space<vmem>>, vector<128x64xbf16>
    %cst_71 = arith.constant dense<0.000000e+00> : vector<128x64xf32>
    %166 = tpu.matmul %164, %165, %cst_71 {dimension_numbers = #tpu.dot_dimension_numbers<[1], [0], [0], [1], [0, 0, 1, 1], [], []>} : vector<128x128xbf16>, vector<128x64xbf16>, vector<128x64xf32> -> vector<128x64xf32>
    %c17 = arith.constant 17 : index
    %c0_72 = arith.constant 0 : index
    %167 = vector.load %arg14[%c17, %c0_72] : memref<24x256xf32, #tpu.memory_space<vmem>>, vector<1x64xf32>
    %168 = vector.broadcast %167 : vector<1x64xf32> to vector<128x64xf32>
    %169 = arith.addf %166, %168 : vector<128x64xf32>
    %cst_73 = arith.constant 0.000000e+00 : f32
    %170 = vector.broadcast %cst_73 : f32 to vector<128x64xf32>
    %171 = arith.maximumf %169, %170 : vector<128x64xf32>
    %172 = arith.truncf %171 : vector<128x64xf32> to vector<128x64xbf16>
    %c0_74 = arith.constant 0 : index
    %c0_75 = arith.constant 0 : index
    %173 = vector.load %arg12[%c0_74, %c0_75] : memref<64x128xbf16, #tpu.memory_space<vmem>>, vector<64x128xbf16>
    %cst_76 = arith.constant dense<0.000000e+00> : vector<128x128xf32>
    %174 = tpu.matmul %172, %173, %cst_76 {dimension_numbers = #tpu.dot_dimension_numbers<[1], [0], [0], [1], [0, 0, 1, 1], [], []>} : vector<128x64xbf16>, vector<64x128xbf16>, vector<128x128xf32> -> vector<128x128xf32>
    %c18 = arith.constant 18 : index
    %c0_77 = arith.constant 0 : index
    %175 = vector.load %arg14[%c18, %c0_77] : memref<24x256xf32, #tpu.memory_space<vmem>>, vector<1x128xf32>
    %176 = vector.broadcast %175 : vector<1x128xf32> to vector<128x128xf32>
    %177 = arith.addf %174, %176 : vector<128x128xf32>
    %178 = vector.extract_strided_slice %177 {offsets = [0, 0], sizes = [128, 64], strides = [1, 1]} : vector<128x128xf32> to vector<128x64xf32>
    %179 = math.tanh %178 : vector<128x64xf32>
    %180 = vector.extract_strided_slice %177 {offsets = [0, 64], sizes = [128, 64], strides = [1, 1]} : vector<128x128xf32> to vector<128x64xf32>
    %181 = arith.negf %180 : vector<128x64xf32>
    %182 = math.exp %181 : vector<128x64xf32>
    %cst_78 = arith.constant 1.000000e+00 : f32
    %183 = vector.broadcast %cst_78 : f32 to vector<128x64xf32>
    %184 = arith.addf %183, %182 : vector<128x64xf32>
    %185 = arith.divf %183, %184 : vector<128x64xf32>
    %186 = arith.mulf %179, %185 : vector<128x64xf32>
    %c19 = arith.constant 19 : index
    %c0_79 = arith.constant 0 : index
    %187 = vector.load %arg14[%c19, %c0_79] : memref<24x256xf32, #tpu.memory_space<vmem>>, vector<1x64xf32>
    %188 = vector.broadcast %187 : vector<1x64xf32> to vector<128x64xf32>
    %189 = arith.mulf %186, %188 : vector<128x64xf32>
    %cst_80 = arith.constant dense<0.000000e+00> : vector<128xf32>
    %190 = vector.multi_reduction <add>, %189, %cst_80 [1] : vector<128x64xf32> to vector<128xf32>
    %191 = vector.shape_cast %190 : vector<128xf32> to vector<128x1xf32>
    %c20 = arith.constant 20 : index
    %c0_81 = arith.constant 0 : index
    %192 = vector.load %arg14[%c20, %c0_81] : memref<24x256xf32, #tpu.memory_space<vmem>>, vector<1x1xf32>
    %193 = vector.broadcast %192 : vector<1x1xf32> to vector<128x1xf32>
    %194 = arith.addf %191, %193 : vector<128x1xf32>
    %c128_i32 = arith.constant 128 : i32
    %195 = arith.muli %arg0, %c128_i32 : i32
    %196 = tpu.iota {dimensions = array<i32: 0>} : vector<128x1xi32>
    %197 = vector.broadcast %195 : i32 to vector<128x1xi32>
    %198 = arith.addi %197, %196 : vector<128x1xi32>
    %c200_i32 = arith.constant 200 : i32
    %199 = vector.broadcast %c200_i32 : i32 to vector<128x1xi32>
    %200 = arith.cmpi slt, %198, %199 : vector<128x1xi32>
    %cst_82 = arith.constant 0xFF800000 : f32
    %201 = vector.broadcast %cst_82 : f32 to vector<128x1xf32>
    %202 = arith.select %200, %194, %201 : vector<128x1xi1>, vector<128x1xf32>
    %c0_83 = arith.constant 0 : index
    %c0_84 = arith.constant 0 : index
    %203 = vector.load %arg17[%c0_83, %c0_84] : memref<1x1xf32, #tpu.memory_space<vmem>>, vector<1x1xf32>
    %cst_85 = arith.constant dense<0xFF800000> : vector<1xf32>
    %204 = vector.multi_reduction <maximumf>, %202, %cst_85 [0] : vector<128x1xf32> to vector<1xf32>
    %205 = vector.shape_cast %204 : vector<1xf32> to vector<1x1xf32>
    %206 = arith.maximumf %203, %205 : vector<1x1xf32>
    %207 = arith.subf %203, %206 : vector<1x1xf32>
    %208 = math.exp %207 : vector<1x1xf32>
    %209 = vector.broadcast %206 : vector<1x1xf32> to vector<128x1xf32>
    %210 = arith.subf %202, %209 : vector<128x1xf32>
    %211 = math.exp %210 : vector<128x1xf32>
    %cst_86 = arith.constant 0.000000e+00 : f32
    %212 = vector.broadcast %cst_86 : f32 to vector<128x1xf32>
    %213 = arith.select %200, %211, %212 : vector<128x1xi1>, vector<128x1xf32>
    %c0_87 = arith.constant 0 : index
    %c0_88 = arith.constant 0 : index
    %214 = vector.load %arg18[%c0_87, %c0_88] : memref<1x1xf32, #tpu.memory_space<vmem>>, vector<1x1xf32>
    %215 = arith.mulf %208, %214 : vector<1x1xf32>
    %cst_89 = arith.constant dense<0.000000e+00> : vector<1xf32>
    %216 = vector.multi_reduction <add>, %213, %cst_89 [0] : vector<128x1xf32> to vector<1xf32>
    %217 = vector.shape_cast %216 : vector<1xf32> to vector<1x1xf32>
    %218 = arith.addf %215, %217 : vector<1x1xf32>
    %c0_90 = arith.constant 0 : index
    %c0_91 = arith.constant 0 : index
    %219 = vector.load %arg18[%c0_90, %c0_91] : memref<1x1xf32, #tpu.memory_space<vmem>>, vector<1x1xf32>
    tpu.vector_store %arg18[%c0_90, %c0_91], %218 {strides = array<i32>} : memref<1x1xf32, #tpu.memory_space<vmem>>, vector<1x1xf32>,
    %c0_92 = arith.constant 0 : index
    %c0_93 = arith.constant 0 : index
    %220 = vector.load %arg19[%c0_92, %c0_93] : memref<1x64xf32, #tpu.memory_space<vmem>>, vector<1x64xf32>
    %221 = vector.broadcast %208 : vector<1x1xf32> to vector<1x64xf32>
    %222 = arith.mulf %221, %220 : vector<1x64xf32>
    %223 = vector.broadcast %213 : vector<128x1xf32> to vector<128x64xf32>
    %224 = arith.mulf %223, %171 : vector<128x64xf32>
    %cst_94 = arith.constant dense<0.000000e+00> : vector<64xf32>
    %225 = vector.multi_reduction <add>, %224, %cst_94 [0] : vector<128x64xf32> to vector<64xf32>
    %226 = vector.shape_cast %225 : vector<64xf32> to vector<1x64xf32>
    %227 = arith.addf %222, %226 : vector<1x64xf32>
    %c0_95 = arith.constant 0 : index
    %c0_96 = arith.constant 0 : index
    %228 = vector.load %arg19[%c0_95, %c0_96] : memref<1x64xf32, #tpu.memory_space<vmem>>, vector<1x64xf32>
    tpu.vector_store %arg19[%c0_95, %c0_96], %227 {strides = array<i32>} : memref<1x64xf32, #tpu.memory_space<vmem>>, vector<1x64xf32>,
    %c0_97 = arith.constant 0 : index
    %c0_98 = arith.constant 0 : index
    %229 = vector.load %arg17[%c0_97, %c0_98] : memref<1x1xf32, #tpu.memory_space<vmem>>, vector<1x1xf32>
    tpu.vector_store %arg17[%c0_97, %c0_98], %206 {strides = array<i32>} : memref<1x1xf32, #tpu.memory_space<vmem>>, vector<1x1xf32>,
    %c1_i32 = arith.constant 1 : i32
    %230 = arith.cmpi eq, %arg0, %c1_i32 : i32
    %231 = arith.extui %230 : i1 to i32
    %c0_i32_99 = arith.constant 0 : i32
    %232 = arith.cmpi ne, %231, %c0_i32_99 : i32
    scf.if %232 {
      %c0_100 = arith.constant 0 : index
      %c0_101 = arith.constant 0 : index
      %233 = vector.load %arg19[%c0_100, %c0_101] : memref<1x64xf32, #tpu.memory_space<vmem>>, vector<1x64xf32>
      %c0_102 = arith.constant 0 : index
      %c0_103 = arith.constant 0 : index
      %234 = vector.load %arg18[%c0_102, %c0_103] : memref<1x1xf32, #tpu.memory_space<vmem>>, vector<1x1xf32>
      %235 = vector.broadcast %234 : vector<1x1xf32> to vector<1x64xf32>
      %236 = arith.divf %233, %235 : vector<1x64xf32>
      %c0_104 = arith.constant 0 : index
      %c0_105 = arith.constant 0 : index
      %237 = vector.load %arg16[%c0_104, %c0_105] : memref<1x64xf32, #tpu.memory_space<vmem>>, vector<1x64xf32>
      tpu.vector_store %arg16[%c0_104, %c0_105], %236 {strides = array<i32>} : memref<1x64xf32, #tpu.memory_space<vmem>>, vector<1x64xf32>,
      %c0_106 = arith.constant 0 : index
      %c0_107 = arith.constant 0 : index
      %238 = vector.load %arg13[%c0_106, %c0_107] : memref<64x3xf32, #tpu.memory_space<vmem>>, vector<64x3xf32>
      %cst_108 = arith.constant dense<0.000000e+00> : vector<1x3xf32>
      %239 = tpu.matmul %236, %238, %cst_108 {dimension_numbers = #tpu.dot_dimension_numbers<[1], [0], [0], [1], [0, 0, 1, 1], [], []>} : vector<1x64xf32>, vector<64x3xf32>, vector<1x3xf32> -> vector<1x3xf32>
      %c21 = arith.constant 21 : index
      %c0_109 = arith.constant 0 : index
      %240 = vector.load %arg14[%c21, %c0_109] : memref<24x256xf32, #tpu.memory_space<vmem>>, vector<1x3xf32>
      %241 = arith.addf %239, %240 : vector<1x3xf32>
      %c0_110 = arith.constant 0 : index
      %c0_111 = arith.constant 0 : index
      %242 = vector.load %arg15[%c0_110, %c0_111] : memref<1x3xf32, #tpu.memory_space<vmem>>, vector<1x3xf32>
      tpu.vector_store %arg15[%c0_110, %c0_111], %241 {strides = array<i32>} : memref<1x3xf32, #tpu.memory_space<vmem>>, vector<1x3xf32>,
    } else {
    }
    return
  }
  func.func @transform_0(%arg0: i32) -> (i32, i32) {
    %c0_i32 = arith.constant 0 : i32
    %c0_i32_0 = arith.constant 0 : i32
    return %arg0, %c0_i32 : i32, i32
  }
  func.func @transform_1(%arg0: i32) -> (i32, i32) {
    %c0_i32 = arith.constant 0 : i32
    %c0_i32_0 = arith.constant 0 : i32
    %c0_i32_1 = arith.constant 0 : i32
    return %c0_i32, %c0_i32_0 : i32, i32
  }
  func.func @transform_2(%arg0: i32) -> (i32, i32) {
    %c0_i32 = arith.constant 0 : i32
    %c0_i32_0 = arith.constant 0 : i32
    %c0_i32_1 = arith.constant 0 : i32
    return %c0_i32, %c0_i32_0 : i32, i32
  }
  func.func @transform_3(%arg0: i32) -> (i32, i32) {
    %c0_i32 = arith.constant 0 : i32
    %c0_i32_0 = arith.constant 0 : i32
    %c0_i32_1 = arith.constant 0 : i32
    return %c0_i32, %c0_i32_0 : i32, i32
  }
  func.func @transform_4(%arg0: i32) -> (i32, i32) {
    %c0_i32 = arith.constant 0 : i32
    %c0_i32_0 = arith.constant 0 : i32
    %c0_i32_1 = arith.constant 0 : i32
    return %c0_i32, %c0_i32_0 : i32, i32
  }
  func.func @transform_5(%arg0: i32) -> (i32, i32) {
    %c0_i32 = arith.constant 0 : i32
    %c0_i32_0 = arith.constant 0 : i32
    %c0_i32_1 = arith.constant 0 : i32
    return %c0_i32, %c0_i32_0 : i32, i32
  }
  func.func @transform_6(%arg0: i32) -> (i32, i32) {
    %c0_i32 = arith.constant 0 : i32
    %c0_i32_0 = arith.constant 0 : i32
    %c0_i32_1 = arith.constant 0 : i32
    return %c0_i32, %c0_i32_0 : i32, i32
  }
  func.func @transform_7(%arg0: i32) -> (i32, i32) {
    %c0_i32 = arith.constant 0 : i32
    %c0_i32_0 = arith.constant 0 : i32
    %c0_i32_1 = arith.constant 0 : i32
    return %c0_i32, %c0_i32_0 : i32, i32
  }
  func.func @transform_8(%arg0: i32) -> (i32, i32) {
    %c0_i32 = arith.constant 0 : i32
    %c0_i32_0 = arith.constant 0 : i32
    %c0_i32_1 = arith.constant 0 : i32
    return %c0_i32, %c0_i32_0 : i32, i32
  }
  func.func @transform_9(%arg0: i32) -> (i32, i32) {
    %c0_i32 = arith.constant 0 : i32
    %c0_i32_0 = arith.constant 0 : i32
    %c0_i32_1 = arith.constant 0 : i32
    return %c0_i32, %c0_i32_0 : i32, i32
  }
  func.func @transform_10(%arg0: i32) -> (i32, i32) {
    %c0_i32 = arith.constant 0 : i32
    %c0_i32_0 = arith.constant 0 : i32
    %c0_i32_1 = arith.constant 0 : i32
    return %c0_i32, %c0_i32_0 : i32, i32
  }
  func.func @transform_11(%arg0: i32) -> (i32, i32) {
    %c0_i32 = arith.constant 0 : i32
    %c0_i32_0 = arith.constant 0 : i32
    %c0_i32_1 = arith.constant 0 : i32
    return %c0_i32, %c0_i32_0 : i32, i32
  }
  func.func @transform_12(%arg0: i32) -> (i32, i32) {
    %c0_i32 = arith.constant 0 : i32
    %c0_i32_0 = arith.constant 0 : i32
    %c0_i32_1 = arith.constant 0 : i32
    return %c0_i32, %c0_i32_0 : i32, i32
  }
  func.func @transform_13(%arg0: i32) -> (i32, i32) {
    %c0_i32 = arith.constant 0 : i32
    %c0_i32_0 = arith.constant 0 : i32
    %c0_i32_1 = arith.constant 0 : i32
    return %c0_i32, %c0_i32_0 : i32, i32
  }
  func.func @transform_14(%arg0: i32) -> (i32, i32) {
    %c0_i32 = arith.constant 0 : i32
    %c0_i32_0 = arith.constant 0 : i32
    %c0_i32_1 = arith.constant 0 : i32
    return %c0_i32, %c0_i32_0 : i32, i32
  }
  func.func @transform_15(%arg0: i32) -> (i32, i32) {
    %c0_i32 = arith.constant 0 : i32
    %c0_i32_0 = arith.constant 0 : i32
    %c0_i32_1 = arith.constant 0 : i32
    return %c0_i32, %c0_i32_0 : i32, i32
  }
}

</mosaic_0001>

<bundles_post_ra>
// kernel: scmil_forward.1
= control target key start
LH: loop header
LB: loop body
LE: loop exit
PB: predicated region body
PF: predicated region fallthrough
CT: control target
= control target key end

     0   :  { %21 = vsyncpa [#allocation6], 0  ;;  %s9153_s0 = inlined_call_operand.vmem [shape: f32[256,512], index: 0, kind: input, shape index: {}]   ;;  %s9154_s1 = inlined_call_operand.vmem [shape: bf16[512,128], index: 1, kind: input, shape index: {}]   ;;  %s9155_s2 = inlined_call_operand.vmem [shape: bf16[128,128], index: 2, kind: input, shape index: {}]   ;;  %s9156_s3 = inlined_call_operand.vmem [shape: bf16[128,128], index: 3, kind: input, shape index: {}]   ;;  %s9157_s4 = inlined_call_operand.vmem [shape: bf16[128,256], index: 4, kind: input, shape index: {}]   ;;  %s9158_s5 = inlined_call_operand.vmem [shape: bf16[256,128], index: 5, kind: input, shape index: {}]   ;;  %s9159_s6 = inlined_call_operand.vmem [shape: bf16[128,128], index: 6, kind: input, shape index: {}]   ;;  %s9160_s7 = inlined_call_operand.vmem [shape: bf16[128,128], index: 7, kind: input, shape index: {}]   ;;  %s9161_s8 = inlined_call_operand.vmem [shape: bf16[128,256], index: 8, kind: input, shape index: {}]   ;;  %s9162_s9 = inlined_call_operand.vmem [shape: bf16[256,128], index: 9, kind: input, shape index: {}]   ;;  %s9163_s10 = inlined_call_operand.vmem [shape: bf16[128,64], index: 10, kind: input, shape index: {}]   ;;  %s9164_s11 = inlined_call_operand.vmem [shape: bf16[64,128], index: 11, kind: input, shape index: {}]   ;;  %s9165_s12 = inlined_call_operand.vmem [shape: f32[64,3], index: 12, kind: input, shape index: {}]   ;;  %s9166_s13 = inlined_call_operand.vmem [shape: f32[24,256], index: 13, kind: input, shape index: {}]   ;;  %s9167_s14 = inlined_call_operand.hbm [shape: f32[1,3], index: 14, kind: output, shape index: {0}]   ;;  %s9168_s15 = inlined_call_operand.hbm [shape: f32[1,64], index: 15, kind: output, shape index: {1}]  }
   0x1   :  { %22 = vsyncpa [#allocation8], 0  ;;  %s6450_s18 = smov 0  }
   0x2 LB: > { %s6456_s19 = sadd.s32 4294967295, %s6360_s18   ;;  %p5239_p0 = scmp.ge.s32.totalorder %s6360_s18, 1  ;;  %s6360_s18 = sphi %s6450_s18, %s28_s18  }
   0x3   : > { %p434_p1 = scmp.lt.s32.totalorder %s6360_s18, 3 }
   0x5   : > { %p435_p2 = pnand %p5239_p0, %p434_p1 }
   0x7   : > { %438 = sbr.rel (%p435_p2) target bundleno = 3773 (0xebd), region = 76 }
   0xc   : > { %s5240_s20 = sshll.u32 %s6456_s19, 4  ;;  %p5243_p4 = scmp.ne.s32.totalorder %s6456_s19, 0 }
   0xd   : > { %p479_p3 = scmp.lt.s32.totalorder %s5240_s20, 31 }
   0xe   : > { %489 = sbr.rel (%p5243_p4) target bundleno = 23 (0x17), region = 80 }
   0xf   : > { %s9254_s20 = smov (!%p479_p3, %s5240_s20), 31 }
  0x10   : > { %s5839_s21 = sshll.u32 %s9254_s20, 5 }
  0x11   : > { %s6464_s24 = scalar_lea.vmem %s9153_s0, %s5839_s21 }
  0x13   : > { %vm490_vm0 = vcmask 0   ;;  %vm493_vm1 = vcmask 516096   ;;  %v6362_v0 = vmov -inf   ;;  %v6363_v1 = vmov 0.0  }
  0x14   : > { %491 = vst.msk [vmem:[#allocation2] sm:$0x1] %vm490_vm0, %v6362_v0 }
  0x15   : > { %492 = vst.msk [vmem:[#allocation3] sm:$0x1] %vm490_vm0, %v6363_v1 }
  0x16   : > { %494 = vst.msk [vmem:[#allocation4] sm:$0x1] %vm493_vm1, %v6363_v1 }
  0x17 PF: > { %v5847_v2 = vld [vmem:[%s9154_s1 + $0x38] sm:$0xff]  ;;  %v5846_v4 = vld [vmem:[%s9154_s1 + $0x30] sm:$0xff]  ;;  %v5845_v6 = vld [vmem:[%s9154_s1 + $0x28] sm:$0xff]  ;;  %s6365_s22 = smov 64   ;;  %s5830_s26 = sshll.u32 %s6456_s19, 7 }
  0x18   : > { %v5855_v3 = vld [vmem:[%s9154_s1 + $0x78] sm:$0xff]  ;;  %5980 = vmatpush.bf16.msra.mxu2 %v5847_v2  ;;  %v5854_v5 = vld [vmem:[%s9154_s1 + $0x70] sm:$0xff]  ;;  %848 = vmatpush.bf16.msra.mxu0 %v5847_v2  ;;  %v5853_v7 = vld [vmem:[%s9154_s1 + $0x68] sm:$0xff]  ;;  %p5831_p5 = scmp.ne.s32.totalorder %s6456_s19, 1 }
  0x19   : > { %5988 = vmatpush.bf16.msra.mxu3 %v5855_v3  ;;  %897 = vmatpush.bf16.msra.mxu1 %v5855_v3  ;;  %v5844_v8 = vld [vmem:[%s9154_s1 + $0x20] sm:$0xff]  ;;  %v5843_v10 = vld [vmem:[%s9154_s1 + $0x18] sm:$0xff]  ;;  %v5842_v12 = vld [vmem:[%s9154_s1 + $0x10] sm:$0xff] }
  0x1a   : > { %v5852_v9 = vld [vmem:[%s9154_s1 + $0x60] sm:$0xff]  ;;  %v5851_v11 = vld [vmem:[%s9154_s1 + $0x58] sm:$0xff]  ;;  %v5850_v13 = vld [vmem:[%s9154_s1 + $0x50] sm:$0xff] }
  0x1b   : > { %v5841_v14 = vld [vmem:[%s9154_s1 + $0x8] sm:$0xff]  ;;  %v5840_v16 = vld [vmem:[%s9154_s1] sm:$0xff]  ;;  %v5863_v22 = vld [vmem:[%s9154_s1 + $0xb8] sm:$0xff] }
  0x1c   : > { %5981 = vmatpush.bf16.msra.mxu2 %v5846_v4  ;;  %849 = vmatpush.bf16.msra.mxu0 %v5846_v4  ;;  %v5849_v15 = vld [vmem:[%s9154_s1 + $0x48] sm:$0xff]  ;;  %v5848_v17 = vld [vmem:[%s9154_s1 + $0x40] sm:$0xff]  ;;  %v5871_v23 = vld [vmem:[%s9154_s1 + $0xf8] sm:$0xff] }
  0x1d   : > { %5989 = vmatpush.bf16.msra.mxu3 %v5854_v5  ;;  %898 = vmatpush.bf16.msra.mxu1 %v5854_v5  ;;  %v527_v18 = vld [vmem:[%s6464_s24 + $0x100] sm:$0xff]  ;;  %v528_v20 = vld [vmem:[%s6464_s24 + $0x108] sm:$0xff]  ;;  %v5862_v26 = vld [vmem:[%s9154_s1 + $0xb0] sm:$0xff] }
  0x1e   : > { %v531_v19 = vld [vmem:[%s6464_s24 + $0x120] sm:$0xff]  ;;  %v532_v21 = vld [vmem:[%s6464_s24 + $0x128] sm:$0xff]  ;;  %v5870_v27 = vld [vmem:[%s9154_s1 + $0xf0] sm:$0xff] }
  0x1f   : > { %v575_v24 = vpack.c.bf16 %v531_v19, %v527_v18  ;;  %v576_v25 = vpack.c.bf16 %v532_v21, %v528_v20  ;;  %v5861_v28 = vld [vmem:[%s9154_s1 + $0xa8] sm:$0xff]  ;;  %v5860_v30 = vld [vmem:[%s9154_s1 + $0xa0] sm:$0xff]  ;;  %v5859_v36 = vld [vmem:[%s9154_s1 + $0x98] sm:$0xff] }
  0x20   : > { %5982 = vmatpush.bf16.msra.mxu2 %v5845_v6  ;;  %850 = vmatpush.bf16.msra.mxu0 %v5845_v6  ;;  %v5869_v29 = vld [vmem:[%s9154_s1 + $0xe8] sm:$0xff]  ;;  %v5868_v31 = vld [vmem:[%s9154_s1 + $0xe0] sm:$0xff]  ;;  %v5867_v37 = vld [vmem:[%s9154_s1 + $0xd8] sm:$0xff] }
  0x21   : > { %5990 = vmatpush.bf16.msra.mxu3 %v5853_v7  ;;  %899 = vmatpush.bf16.msra.mxu1 %v5853_v7  ;;  %v535_v32 = vld [vmem:[%s6464_s24 + $0x140] sm:$0xff]  ;;  %v536_v34 = vld [vmem:[%s6464_s24 + $0x148] sm:$0xff]  ;;  %v5858_v40 = vld [vmem:[%s9154_s1 + $0x90] sm:$0xff] }
  0x22   : > { %v539_v33 = vld [vmem:[%s6464_s24 + $0x160] sm:$0xff]  ;;  %v540_v35 = vld [vmem:[%s6464_s24 + $0x168] sm:$0xff]  ;;  %v5866_v41 = vld [vmem:[%s9154_s1 + $0xd0] sm:$0xff] }
  0x23   : > { %v579_v38 = vpack.c.bf16 %v539_v33, %v535_v32  ;;  %v580_v39 = vpack.c.bf16 %v540_v35, %v536_v34  ;;  %v5857_v42 = vld [vmem:[%s9154_s1 + $0x88] sm:$0xff]  ;;  %v495_v43 = vld [vmem:[%s6464_s24] sm:$0xff]  ;;  %v497_v6 = vld [vmem:[%s6464_s24 + $0x10] sm:$0xff] }
  0x24   : > { %5983 = vmatpush.bf16.msra.mxu2 %v5844_v8  ;;  %851 = vmatpush.bf16.msra.mxu0 %v5844_v8  ;;  %v499_v44 = vld [vmem:[%s6464_s24 + $0x20] sm:$0xff]  ;;  %v5865_v45 = vld [vmem:[%s9154_s1 + $0xc8] sm:$0xff]  ;;  %v501_v7 = vld [vmem:[%s6464_s24 + $0x30] sm:$0xff] }
  0x25   : > { %5991 = vmatpush.bf16.msra.mxu3 %v5852_v9  ;;  %900 = vmatpush.bf16.msra.mxu1 %v5852_v9  ;;  %v559_v46 = vpack.c.bf16 %v499_v44, %v495_v43  ;;  %v496_v47 = vld [vmem:[%s6464_s24 + $0x8] sm:$0xff]  ;;  %v5856_v50 = vld [vmem:[%s9154_s1 + $0x80] sm:$0xff]  ;;  %v498_v8 = vld [vmem:[%s6464_s24 + $0x18] sm:$0xff] }
  0x26   : > { %v500_v48 = vld [vmem:[%s6464_s24 + $0x28] sm:$0xff]  ;;  %v5864_v51 = vld [vmem:[%s9154_s1 + $0xc0] sm:$0xff]  ;;  %v502_v9 = vld [vmem:[%s6464_s24 + $0x38] sm:$0xff] }
  0x27   : > { %v560_v49 = vpack.c.bf16 %v500_v48, %v496_v47  ;;  %v543_v52 = vld [vmem:[%s6464_s24 + $0x180] sm:$0xff]  ;;  %v544_v54 = vld [vmem:[%s6464_s24 + $0x188] sm:$0xff]  ;;  %v505_v18 = vld [vmem:[%s6464_s24 + $0x50] sm:$0xff] }
  0x28   : > { %5984 = vmatpush.bf16.msra.mxu2 %v5843_v10  ;;  %852 = vmatpush.bf16.msra.mxu0 %v5843_v10  ;;  %v547_v53 = vld [vmem:[%s6464_s24 + $0x1a0] sm:$0xff]  ;;  %v548_v55 = vld [vmem:[%s6464_s24 + $0x1a8] sm:$0xff]  ;;  %v561_v10 = vpack.c.bf16 %v501_v7, %v497_v6  ;;  %v509_v19 = vld [vmem:[%s6464_s24 + $0x70] sm:$0xff] }
  0x29   : > { %5992 = vmatpush.bf16.msra.mxu3 %v5851_v11  ;;  %901 = vmatpush.bf16.msra.mxu1 %v5851_v11  ;;  %v583_v56 = vpack.c.bf16 %v547_v53, %v543_v52  ;;  %v584_v57 = vpack.c.bf16 %v548_v55, %v544_v54  ;;  %v503_v58 = vld [vmem:[%s6464_s24 + $0x40] sm:$0xff]  ;;  %v504_v60 = vld [vmem:[%s6464_s24 + $0x48] sm:$0xff]  ;;  %v562_v11 = vpack.c.bf16 %v502_v9, %v498_v8  ;;  %v506_v20 = vld [vmem:[%s6464_s24 + $0x58] sm:$0xff] }
  0x2a   : > { %v507_v59 = vld [vmem:[%s6464_s24 + $0x60] sm:$0xff]  ;;  %v508_v62 = vld [vmem:[%s6464_s24 + $0x68] sm:$0xff]  ;;  %v510_v21 = vld [vmem:[%s6464_s24 + $0x78] sm:$0xff] }
  0x2b   : > { %v563_v61 = vpack.c.bf16 %v507_v59, %v503_v58  ;;  %v564_v63 = vpack.c.bf16 %v508_v62, %v504_v60  ;;  %v551_v0 = vld [vmem:[%s6464_s24 + $0x1c0] sm:$0xff]  ;;  %v552_v2 = vld [vmem:[%s6464_s24 + $0x1c8] sm:$0xff]  ;;  %v514_v32 = vld [vmem:[%s6464_s24 + $0x98] sm:$0xff] }
  0x2c   : > { %5985 = vmatpush.bf16.msra.mxu2 %v5842_v12  ;;  %853 = vmatpush.bf16.msra.mxu0 %v5842_v12  ;;  %v555_v1 = vld [vmem:[%s6464_s24 + $0x1e0] sm:$0xff]  ;;  %v556_v3 = vld [vmem:[%s6464_s24 + $0x1e8] sm:$0xff]  ;;  %v518_v33 = vld [vmem:[%s6464_s24 + $0xb8] sm:$0xff] }
  0x2d   : > { %5993 = vmatpush.bf16.msra.mxu3 %v5850_v13  ;;  %902 = vmatpush.bf16.msra.mxu1 %v5850_v13  ;;  %v587_v4 = vpack.c.bf16 %v555_v1, %v551_v0  ;;  %v588_v5 = vpack.c.bf16 %v556_v3, %v552_v2  ;;  %v511_v12 = vld [vmem:[%s6464_s24 + $0x80] sm:$0xff]  ;;  %v570_v35 = vpack.c.bf16 %v518_v33, %v514_v32  ;;  %v529_v43 = vld [vmem:[%s6464_s24 + $0x110] sm:$0xff]  ;;  %v5877_v55 = vld [vmem:[%s9155_s2 + $0x28] sm:$0xff] }
  0x2e   : > { %v515_v13 = vld [vmem:[%s6464_s24 + $0xa0] sm:$0xff]  ;;  %v533_v44 = vld [vmem:[%s6464_s24 + $0x130] sm:$0xff]  ;;  %v538_v58 = vld [vmem:[%s6464_s24 + $0x158] sm:$0xff] }
  0x2f   : > { %v577_v47 = vpack.c.bf16 %v533_v44, %v529_v43  ;;  %v542_v59 = vld [vmem:[%s6464_s24 + $0x178] sm:$0xff]  ;;  %v5876_v0 = vld [vmem:[%s9155_s2 + $0x20] sm:$0xff]  ;;  %v545_v6 = vld [vmem:[%s6464_s24 + $0x190] sm:$0xff] }
  0x30   : > { %5986 = vmatpush.bf16.msra.mxu2 %v5841_v14  ;;  %854 = vmatpush.bf16.msra.mxu0 %v5841_v14  ;;  %v567_v14 = vpack.c.bf16 %v515_v13, %v511_v12  ;;  %v549_v7 = vld [vmem:[%s6464_s24 + $0x1b0] sm:$0xff]  ;;  %v546_v8 = vld [vmem:[%s6464_s24 + $0x198] sm:$0xff] }
  0x31   : > { %5994 = vmatpush.bf16.msra.mxu3 %v5849_v15  ;;  %903 = vmatpush.bf16.msra.mxu1 %v5849_v15  ;;  %v512_v15 = vld [vmem:[%s6464_s24 + $0x88] sm:$0xff]  ;;  %v550_v9 = vld [vmem:[%s6464_s24 + $0x1b8] sm:$0xff]  ;;  %v585_v12 = vpack.c.bf16 %v549_v7, %v545_v6 }
  0x32   : > { %v586_v13 = vpack.c.bf16 %v550_v9, %v546_v8 }
  0x34   : > { %5987 = vmatpush.bf16.msra.mxu2 %v5840_v16  ;;  %855 = vmatpush.bf16.msra.mxu0 %v5840_v16  ;;  %v516_v16 = vld [vmem:[%s6464_s24 + $0xa8] sm:$0xff] }
  0x35   : > { %5995 = vmatpush.bf16.msra.mxu3 %v5848_v17  ;;  %904 = vmatpush.bf16.msra.mxu1 %v5848_v17  ;;  %v568_v17 = vpack.c.bf16 %v516_v16, %v512_v15 }
  0x37   : > { %876 = vmatmul.bf16.vlgmr.msra.gmra.mxu2 %v575_v24  ;;  %856 = vmatmul.bf16.vlgmr.msra.gmra.mxu0 %v559_v46  ;;  %v519_v24 = vld [vmem:[%s6464_s24 + $0xc0] sm:$0xff]  ;;  %v534_v46 = vld [vmem:[%s6464_s24 + $0x138] sm:$0xff] }
  0x38   : > { %946 = vmatpush.bf16.msrb.mxu2 %v5863_v22  ;;  %925 = vmatmul.bf16.vlgmr.msra.gmra.mxu3 %v576_v25  ;;  %v565_v22 = vpack.c.bf16 %v509_v19, %v505_v18  ;;  %v523_v25 = vld [vmem:[%s6464_s24 + $0xe0] sm:$0xff]  ;;  %v553_v19 = vld [vmem:[%s6464_s24 + $0x1d0] sm:$0xff] }
  0x39   : > { %995 = vmatpush.bf16.msrb.mxu3 %v5871_v23  ;;  %905 = vmatmul.bf16.vlgmr.msra.gmra.mxu1 %v560_v49  ;;  %v566_v23 = vpack.c.bf16 %v510_v21, %v506_v20  ;;  %v5878_v49 = vld [vmem:[%s9155_s2 + $0x30] sm:$0xff]  ;;  %v5873_v20 = vld [vmem:[%s9155_s2 + $0x8] sm:$0xff] }
  0x3a   : > { %v557_v21 = vld [vmem:[%s6464_s24 + $0x1f0] sm:$0xff] }
  0x3c   : > { %947 = vmatpush.bf16.msrb.mxu2 %v5862_v26  ;;  %v571_v26 = vpack.c.bf16 %v523_v25, %v519_v24 }
  0x3d   : > { %996 = vmatpush.bf16.msrb.mxu3 %v5870_v27  ;;  %v520_v27 = vld [vmem:[%s6464_s24 + $0xc8] sm:$0xff] }
  0x40   : > { %948 = vmatpush.bf16.msrb.mxu2 %v5861_v28  ;;  %v524_v28 = vld [vmem:[%s6464_s24 + $0xe8] sm:$0xff] }
  0x41   : > { %997 = vmatpush.bf16.msrb.mxu3 %v5869_v29  ;;  %v572_v29 = vpack.c.bf16 %v524_v28, %v520_v27 }
  0x44   : > { %949 = vmatpush.bf16.msrb.mxu2 %v5860_v30  ;;  %v513_v30 = vld [vmem:[%s6464_s24 + $0x90] sm:$0xff] }
  0x45   : > { %998 = vmatpush.bf16.msrb.mxu3 %v5868_v31  ;;  %v517_v31 = vld [vmem:[%s6464_s24 + $0xb0] sm:$0xff] }
  0x46   : > { %v569_v34 = vpack.c.bf16 %v517_v31, %v513_v30 }
  0x47   : > { %881 = vmatmul.bf16.gmra.mxu2 %v579_v38  ;;  %861 = vmatmul.bf16.gmra.mxu0 %v563_v61  ;;  %v522_v38 = vld [vmem:[%s6464_s24 + $0xd8] sm:$0xff] }
  0x48   : > { %950 = vmatpush.bf16.msrb.mxu2 %v5859_v36  ;;  %930 = vmatmul.bf16.gmra.mxu3 %v580_v39  ;;  %v521_v36 = vld [vmem:[%s6464_s24 + $0xd0] sm:$0xff]  ;;  %v526_v39 = vld [vmem:[%s6464_s24 + $0xf8] sm:$0xff] }
  0x49   : > { %999 = vmatpush.bf16.msrb.mxu3 %v5867_v37  ;;  %910 = vmatmul.bf16.gmra.mxu1 %v564_v63  ;;  %v525_v37 = vld [vmem:[%s6464_s24 + $0xf0] sm:$0xff]  ;;  %v582_v63 = vpack.c.bf16 %v542_v59, %v538_v58 }
  0x4c   : > { %951 = vmatpush.bf16.msrb.mxu2 %v5858_v40  ;;  %v573_v40 = vpack.c.bf16 %v525_v37, %v521_v36 }
  0x4d   : > { %1000 = vmatpush.bf16.msrb.mxu3 %v5866_v41  ;;  %v574_v41 = vpack.c.bf16 %v526_v39, %v522_v38 }
  0x50   : > { %952 = vmatpush.bf16.msrb.mxu2 %v5857_v42  ;;  %v5879_v42 = vld [vmem:[%s9155_s2 + $0x38] sm:$0xff] }
  0x51   : > { %1001 = vmatpush.bf16.msrb.mxu3 %v5865_v45  ;;  %1141 = vmatpush.bf16.msrb.mxu0 %v5879_v42  ;;  %v530_v45 = vld [vmem:[%s6464_s24 + $0x118] sm:$0xff] }
  0x52   : > { %v578_v48 = vpack.c.bf16 %v534_v46, %v530_v45 }
  0x54   : > { %953 = vmatpush.bf16.msrb.mxu2 %v5856_v50  ;;  %v6624_v50 = vld [vmem:[%s9166_s13] ss:$0 sm:$0xff] }
  0x55   : > { %1002 = vmatpush.bf16.msrb.mxu3 %v5864_v51  ;;  %1142 = vmatpush.bf16.msrb.mxu0 %v5878_v49 }
  0x57   : > { %886 = vmatmul.bf16.gmra.mxu2 %v583_v56  ;;  %866 = vmatmul.bf16.gmra.mxu0 %v567_v14  ;;  %v537_v56 = vld [vmem:[%s6464_s24 + $0x150] sm:$0xff] }
  0x58   : > { %935 = vmatmul.bf16.gmra.mxu3 %v584_v57  ;;  %v541_v57 = vld [vmem:[%s6464_s24 + $0x170] sm:$0xff] }
  0x59   : > { %915 = vmatmul.bf16.gmra.mxu1 %v568_v17  ;;  %1143 = vmatpush.bf16.msrb.mxu0 %v5877_v55  ;;  %v581_v62 = vpack.c.bf16 %v541_v57, %v537_v56  ;;  %v5874_v14 = vld [vmem:[%s9155_s2 + $0x10] sm:$0xff] }
  0x5d   : > { %1144 = vmatpush.bf16.msrb.mxu0 %v5876_v0 }
  0x67   : > { %891 = vmatmul.bf16.gmra.mxu2 %v587_v4  ;;  %871 = vmatmul.bf16.gmra.mxu0 %v571_v26  ;;  %v589_v26 = vpack.c.bf16 %v557_v21, %v553_v19 }
  0x68   : > { %940 = vmatmul.bf16.gmra.mxu3 %v588_v5  ;;  %v5875_v5 = vld [vmem:[%s9155_s2 + $0x18] sm:$0xff] }
  0x69   : > { %920 = vmatmul.bf16.gmra.mxu1 %v572_v29  ;;  %1145 = vmatpush.bf16.msrb.mxu0 %v5875_v5  ;;  %v5872_v29 = vld [vmem:[%s9155_s2] sm:$0xff] }
  0x6d   : > { %1146 = vmatpush.bf16.msrb.mxu0 %v5874_v14 }
  0x71   : > { %1147 = vmatpush.bf16.msrb.mxu0 %v5873_v20 }
  0x75   : > { %1148 = vmatpush.bf16.msrb.mxu0 %v5872_v29 }
  0x77   : > { %954 = vmatmul.bf16.vlgmr.msrb.gmra.mxu2 %v561_v10 }
  0x78   : > { %1003 = vmatmul.bf16.vlgmr.msrb.gmra.mxu3 %v562_v11 }
  0x87   : > { %959 = vmatmul.bf16.gmra.mxu2 %v565_v22  ;;  %v554_v22 = vld [vmem:[%s6464_s24 + $0x1d8] sm:$0xff] }
  0x88   : > { %1008 = vmatmul.bf16.gmra.mxu3 %v566_v23  ;;  %v558_v23 = vld [vmem:[%s6464_s24 + $0x1f8] sm:$0xff] }
  0x89   : > { %v590_v27 = vpack.c.bf16 %v558_v23, %v554_v22 }
  0x97   : > { %964 = vmatmul.bf16.gmra.mxu2 %v569_v34 }
  0x98   : > { %1013 = vmatmul.bf16.gmra.mxu3 %v570_v35 }
  0xa7   : > { %969 = vmatmul.bf16.gmra.mxu2 %v573_v40 }
  0xa8   : > { %1018 = vmatmul.bf16.gmra.mxu3 %v574_v41 }
  0xb4   : > { %v857_v28 = vpop.f32.mrf.mxu0 }
  0xb5   : > { %v858_v39 = vadd.f32 %v857_v28, %v6624_v50 }
  0xb6   : > { %v906_v30 = vpop.f32.mrf.mxu1 }
  0xb7   : > { %974 = vmatmul.bf16.gmra.mxu2 %v577_v47  ;;  %v907_v43 = vadd.f32 %v906_v30, %v858_v39 }
  0xb8   : > { %1023 = vmatmul.bf16.gmra.mxu3 %v578_v48 }
  0xba   : > { %v877_v51 = vpop.f32.mrf.mxu2 }
  0xbb   : > { %v926_v52 = vpop.f32.mrf.mxu3  ;;  %v878_v53 = vadd.f32 %v877_v51, %v6624_v50 }
  0xbc   : > { %v859_v35 = vpop.f32.mrf.mxu0 }
  0xbd   : > { %v6627_v54 = vadd.f32 %v926_v52, %v878_v53  ;;  %v860_v45 = vadd.f32 %v859_v35, %v6624_v50 }
  0xbe   : > { %v908_v36 = vpop.f32.mrf.mxu1 }
  0xbf   : > { %v909_v47 = vadd.f32 %v908_v36, %v860_v45 }
  0xc2   : > { %v6636_v60 = vpop.f32.mrf.mxu2 }
  0xc3   : > { %v6638_v61 = vpop.f32.mrf.mxu3 }
  0xc4   : > { %v862_v40 = vpop.f32.mrf.mxu0 }
  0xc5   : > { %v863_v58 = vadd.f32 %v862_v40, %v6624_v50 }
  0xc6   : > { %v911_v44 = vpop.f32.mrf.mxu1 }
  0xc7   : > { %979 = vmatmul.bf16.gmra.mxu2 %v581_v62 }
  0xc8   : > { %1028 = vmatmul.bf16.gmra.mxu3 %v582_v63 }
  0xca   : > { %v882_v1 = vpop.f32.mrf.mxu2 }
  0xcb   : > { %v931_v2 = vpop.f32.mrf.mxu3  ;;  %v883_v3 = vadd.f32 %v882_v1, %v6624_v50 }
  0xcc   : > { %v864_v48 = vpop.f32.mrf.mxu0 }
  0xcd   : > { %v6644_v4 = vadd.f32 %v931_v2, %v883_v3  ;;  %v912_v2 = vadd.f32 %v911_v44, %v863_v58  ;;  %v865_v3 = vadd.f32 %v864_v48, %v6624_v50 }
  0xce   : > { %v913_v56 = vpop.f32.mrf.mxu1 }
  0xcf   : > { %v914_v7 = vadd.f32 %v913_v56, %v865_v3  ;;  %v5887_v3 = vld [vmem:[%s9156_s3 + $0x38] sm:$0xff] }
  0xd0   : > { %1262 = vmatpush.bf16.msrb.mxu1 %v5887_v3 }
  0xd2   : > { %v6653_v10 = vpop.f32.mrf.mxu2 }
  0xd3   : > { %v6655_v11 = vpop.f32.mrf.mxu3 }
  0xd4   : > { %v867_v63 = vpop.f32.mrf.mxu0 }
  0xd6   : > { %v916_v5 = vpop.f32.mrf.mxu1 }
  0xd7   : > { %984 = vmatmul.bf16.gmra.mxu2 %v585_v12 }
  0xd8   : > { %1033 = vmatmul.bf16.gmra.mxu3 %v586_v13 }
  0xda   : > { %v887_v15 = vpop.f32.mrf.mxu2 }
  0xdb   : > { %v936_v16 = vpop.f32.mrf.mxu3  ;;  %v888_v17 = vadd.f32 %v887_v15, %v6624_v50 }
  0xdc   : > { %v869_v14 = vpop.f32.mrf.mxu0 }
  0xdd   : > { %v6661_v18 = vadd.f32 %v936_v16, %v888_v17  ;;  %v868_v16 = vadd.f32 %v867_v63, %v6624_v50 }
  0xde   : > { %v918_v20 = vpop.f32.mrf.mxu1 }
  0xdf   : > { %v917_v21 = vadd.f32 %v916_v5, %v868_v16 }
  0xe2   : > { %v6670_v24 = vpop.f32.mrf.mxu2 }
  0xe3   : > { %v6672_v25 = vpop.f32.mrf.mxu3 }
  0xe4   : > { %v872_v29 = vpop.f32.mrf.mxu0 }
  0xe7   : > { %989 = vmatmul.bf16.gmra.mxu2 %v589_v26 }
  0xe8   : > { %1038 = vmatmul.bf16.gmra.mxu3 %v590_v27  ;;  %v870_v27 = vadd.f32 %v869_v14, %v6624_v50 }
  0xea   : > { %v892_v31 = vpop.f32.mrf.mxu2  ;;  %v919_v30 = vadd.f32 %v918_v20, %v870_v27 }
  0xeb   : > { %v941_v32 = vpop.f32.mrf.mxu3  ;;  %v893_v33 = vadd.f32 %v892_v31, %v6624_v50 }
  0xed   : > { %v6678_v34 = vadd.f32 %v941_v32, %v893_v33  ;;  %v921_v32 = vpop.f32.mrf.mxu1 }
  0xf2   : > { %v6680_v37 = vpop.f32.mrf.mxu2 }
  0xf3   : > { %v6682_v38 = vpop.f32.mrf.mxu3 }
  0xfa   : > { %v955_v41 = vpop.f32.mrf.mxu2 }
  0xfb   : > { %v1004_v42 = vpop.f32.mrf.mxu3  ;;  %v956_v46 = vadd.f32 %v955_v41, %v907_v43  ;;  %v873_v41 = vadd.f32 %v872_v29, %v6624_v50  ;;  %v874_v43 = vpop.f32.mrf.mxu0  ;;  %v885_v29 = vadd.f32 %v6653_v10, %v6624_v50 }
  0xfc   : > { %v875_v48 = vadd.f32 %v874_v43, %v6624_v50 }
  0xfd   : > { %v6686_v52 = vadd.f32 %v1004_v42, %v956_v46  ;;  %v922_v44 = vadd.f32 %v921_v32, %v873_v41  ;;  %v5884_v32 = vld [vmem:[%s9156_s3 + $0x20] sm:$0xff] }
  0xff   : > { %v1044_v57 = vmax.f32 %v6686_v52, 0.0 }
 0x102   : > { %v957_v49 = vpop.f32.mrf.mxu2 }
 0x103   : > { %v1006_v51 = vpop.f32.mrf.mxu3  ;;  %v958_v53 = vadd.f32 %v957_v49, %v909_v47  ;;  %v923_v49 = vpop.f32.mrf.mxu1 }
 0x105   : > { %v6688_v55 = vadd.f32 %v1006_v51, %v958_v53  ;;  %v924_v53 = vadd.f32 %v923_v49, %v875_v48  ;;  %v5882_v48 = vld [vmem:[%s9156_s3 + $0x10] sm:$0xff]  ;;  %v890_v49 = vadd.f32 %v6670_v24, %v6624_v50 }
 0x107   : > { %v1045_v59 = vmax.f32 %v6688_v55, 0.0 }
 0x109   : > { %v1069_v62 = vpack.c.bf16 %v1045_v59, %v1044_v57 }
 0x10a   : > { %v960_v0 = vpop.f32.mrf.mxu2 }
 0x10b   : > { %v1009_v1 = vpop.f32.mrf.mxu3  ;;  %1149 = vmatmul.bf16.vlgmr.msrb.gmra.mxu0 %v1069_v62  ;;  %v961_v6 = vadd.f32 %v960_v0, %v912_v2 }
 0x10d   : > { %v6698_v12 = vadd.f32 %v1009_v1, %v961_v6 }
 0x10f   : > { %v1046_v17 = vmax.f32 %v6698_v12, 0.0 }
 0x112   : > { %v962_v8 = vpop.f32.mrf.mxu2 }
 0x113   : > { %v1011_v9 = vpop.f32.mrf.mxu3  ;;  %v963_v13 = vadd.f32 %v962_v8, %v914_v7  ;;  %v880_v8 = vadd.f32 %v6636_v60, %v6624_v50 }
 0x115   : > { %v6700_v15 = vadd.f32 %v1011_v9, %v963_v13  ;;  %v5886_v13 = vld [vmem:[%s9156_s3 + $0x30] sm:$0xff]  ;;  %v929_v14 = vadd.f32 %v6638_v61, %v880_v8 }
 0x116   : > { %1263 = vmatpush.bf16.msrb.mxu1 %v5886_v13  ;;  %v895_v13 = vadd.f32 %v6680_v37, %v6624_v50  ;;  %v1060_v37 = vld [vmem:[%s9166_s13 + $0x1] ss:$0 sm:$0xff] }
 0x117   : > { %v1047_v19 = vmax.f32 %v6700_v15, 0.0 }
 0x119   : > { %v1070_v22 = vpack.c.bf16 %v1047_v19, %v1046_v17 }
 0x11a   : > { %v965_v23 = vpop.f32.mrf.mxu2 }
 0x11b   : > { %v1014_v26 = vpop.f32.mrf.mxu3  ;;  %1154 = vmatmul.bf16.gmra.mxu0 %v1070_v22  ;;  %v966_v28 = vadd.f32 %v965_v23, %v917_v21 }
 0x11d   : > { %v6710_v31 = vadd.f32 %v1014_v26, %v966_v28 }
 0x11f   : > { %v1048_v39 = vmax.f32 %v6710_v31, 0.0  ;;  %v6364_v31 = vmov 128.0  }
 0x120   : > { %6027 = vrcp.f32 %v6364_v31  ;;  %v5479_v31 = vld [vmem:[%s9157_s4 + $0x50] sm:$0xf] }
 0x122   : > { %v967_v33 = vpop.f32.mrf.mxu2 }
 0x123   : > { %v1016_v35 = vpop.f32.mrf.mxu3  ;;  %v968_v36 = vadd.f32 %v967_v33, %v919_v30  ;;  %v934_v33 = vadd.f32 %v6655_v11, %v885_v29 }
 0x125   : > { %v6713_v40 = vadd.f32 %v1016_v35, %v968_v36 }
 0x127   : > { %v1049_v42 = vmax.f32 %v6713_v40, 0.0 }
 0x129   : > { %v1071_v45 = vpack.c.bf16 %v1049_v42, %v1048_v39 }
 0x12a   : > { %v970_v46 = vpop.f32.mrf.mxu2 }
 0x12b   : > { %v1019_v47 = vpop.f32.mrf.mxu3  ;;  %1159 = vmatmul.bf16.gmra.mxu0 %v1071_v45  ;;  %v971_v51 = vadd.f32 %v970_v46, %v922_v44 }
 0x12d   : > { %v6722_v56 = vadd.f32 %v1019_v47, %v971_v51  ;;  %v5881_v51 = vld [vmem:[%s9156_s3 + $0x8] sm:$0xff] }
 0x12f   : > { %v1050_v0 = vmax.f32 %v6722_v56, 0.0  ;;  %v5495_v56 = vld [vmem:[%s9157_s4 + $0x70] sm:$0xf] }
 0x132   : > { %v972_v58 = vpop.f32.mrf.mxu2 }
 0x133   : > { %v1021_v62 = vpop.f32.mrf.mxu3  ;;  %v973_v63 = vadd.f32 %v972_v58, %v924_v53  ;;  %v939_v58 = vadd.f32 %v6672_v25, %v890_v49 }
 0x135   : > { %v6725_v1 = vadd.f32 %v1021_v62, %v973_v63 }
 0x137   : > { %v1051_v2 = vmax.f32 %v6725_v1, 0.0  ;;  %v5901_v1 = vld [vmem:[%s9157_s4 + $0x64] sm:$0xf0] }
 0x139   : > { %v1072_v5 = vpack.c.bf16 %v1051_v2, %v1050_v0 }
 0x13a   : > { %v975_v6 = vpop.f32.mrf.mxu2 }
 0x13b   : > { %v1024_v7 = vpop.f32.mrf.mxu3  ;;  %1164 = vmatmul.bf16.gmra.mxu0 %v1072_v5  ;;  %v976_v9 = vadd.f32 %v975_v6, %v6627_v54  ;;  %v5885_v54 = vld [vmem:[%s9156_s3 + $0x28] sm:$0xff] }
 0x13c   : > { %1264 = vmatpush.bf16.msrb.mxu1 %v5885_v54 }
 0x13d   : > { %v6742_v21 = vadd.f32 %v1024_v7, %v976_v9 }
 0x13f   : > { %v1052_v26 = vmax.f32 %v6742_v21, 0.0 }
 0x140   : > { %1265 = vmatpush.bf16.msrb.mxu1 %v5884_v32 }
 0x142   : > { %v977_v16 = vpop.f32.mrf.mxu2 }
 0x143   : > { %v1026_v20 = vpop.f32.mrf.mxu3  ;;  %v978_v22 = vadd.f32 %v977_v16, %v929_v14  ;;  %v944_v16 = vadd.f32 %v6682_v38, %v895_v13 }
 0x145   : > { %v6744_v23 = vadd.f32 %v1026_v20, %v978_v22 }
 0x147   : > { %v1053_v60 = vmax.f32 %v6744_v23, 0.0 }
 0x149   : > { %v1073_v61 = vpack.c.bf16 %v1053_v60, %v1052_v26 }
 0x14a   : > { %v980_v27 = vpop.f32.mrf.mxu2 }
 0x14b   : > { %v1029_v28 = vpop.f32.mrf.mxu3  ;;  %1169 = vmatmul.bf16.gmra.mxu0 %v1073_v61  ;;  %v981_v30 = vadd.f32 %v980_v27, %v6644_v4  ;;  %v5883_v4 = vld [vmem:[%s9156_s3 + $0x18] sm:$0xff] }
 0x14c   : > { %1266 = vmatpush.bf16.msrb.mxu1 %v5883_v4 }
 0x14d   : > { %v6762_v41 = vadd.f32 %v1029_v28, %v981_v30 }
 0x14f   : > { %v1054_v45 = vmax.f32 %v6762_v41, 0.0  ;;  %v5473_v41 = vld [vmem:[%s9157_s4 + $0x48] sm:$0xf0] }
 0x150   : > { %1267 = vmatpush.bf16.msrb.mxu1 %v5882_v48 }
 0x152   : > { %v982_v35 = vpop.f32.mrf.mxu2 }
 0x153   : > { %v1031_v36 = vpop.f32.mrf.mxu3  ;;  %v983_v43 = vadd.f32 %v982_v35, %v934_v33 }
 0x154   : > { %1268 = vmatpush.bf16.msrb.mxu1 %v5881_v51 }
 0x155   : > { %v6764_v44 = vadd.f32 %v1031_v36, %v983_v43 }
 0x157   : > { %v1055_v10 = vmax.f32 %v6764_v44, 0.0 }
 0x159   : > { %v1074_v11 = vpack.c.bf16 %v1055_v10, %v1054_v45 }
 0x15a   : > { %v985_v46 = vpop.f32.mrf.mxu2 }
 0x15b   : > { %v1034_v47 = vpop.f32.mrf.mxu3  ;;  %1174 = vmatmul.bf16.gmra.mxu0 %v1074_v11  ;;  %v986_v53 = vadd.f32 %v985_v46, %v6661_v18  ;;  %v5880_v18 = vld [vmem:[%s9156_s3] sm:$0xff] }
 0x15c   : > { %1269 = vmatpush.bf16.msrb.mxu1 %v5880_v18 }
 0x15d   : > { %v6785_v3 = vadd.f32 %v1034_v47, %v986_v53 }
 0x15f   : > { %v1056_v7 = vmax.f32 %v6785_v3, 0.0 }
 0x162   : > { %v987_v62 = vpop.f32.mrf.mxu2 }
 0x163   : > { %v1036_v63 = vpop.f32.mrf.mxu3  ;;  %v988_v5 = vadd.f32 %v987_v62, %v939_v58 }
 0x165   : > { %v6787_v6 = vadd.f32 %v1036_v63, %v988_v5 }
 0x167   : > { %v1057_v24 = vmax.f32 %v6787_v6, 0.0  ;;  %v5891_v6 = vld [vmem:[%s9157_s4 + $0x14] sm:$0xf0] }
 0x169   : > { %v1075_v8 = vpack.c.bf16 %v1057_v24, %v1056_v7 }
 0x16a   : > { %v990_v25 = vpop.f32.mrf.mxu2 }
 0x16b   : > { %v1039_v9 = vpop.f32.mrf.mxu3  ;;  %1179 = vmatmul.bf16.gmra.mxu0 %v1075_v8  ;;  %v991_v14 = vadd.f32 %v990_v25, %v6678_v34 }
 0x16d   : > { %v6802_v54 = vadd.f32 %v1039_v9, %v991_v14 }
 0x16f   : > { %v1058_v28 = vmax.f32 %v6802_v54, 0.0  ;;  %v5449_v54 = vld [vmem:[%s9157_s4 + $0x18] sm:$0xf0] }
 0x172   : > { %v992_v20 = vpop.f32.mrf.mxu2 }
 0x173   : > { %v1041_v22 = vpop.f32.mrf.mxu3  ;;  %v993_v61 = vadd.f32 %v992_v20, %v944_v16 }
 0x175   : > { %v6804_v27 = vadd.f32 %v1041_v22, %v993_v61 }
 0x177   : > { %v1059_v29 = vmax.f32 %v6804_v27, 0.0 }
 0x179   : > { %v1076_v50 = vpack.c.bf16 %v1059_v29, %v1058_v28 }
 0x17b   : > { %1184 = vmatmul.bf16.gmra.mxu0 %v1076_v50 }
 0x188   : > { %v1150_v34 = vpop.f32.mrf.mxu0 }
 0x189   : > { %v1151_v30 = vadd.f32 %v1150_v34, %v1060_v37 }
 0x190   : > { %v1152_v38 = vpop.f32.mrf.mxu0 }
 0x191   : > { %v1153_v32 = vadd.f32 %v1152_v38, %v1060_v37 }
 0x193   : > { %v1190_v33 = vpack.c.bf16 %v1153_v32, %v1151_v30 }
 0x195   : > { %1270 = vmatmul.bf16.vlgmr.msrb.gmra.mxu1 %v1190_v33 }
 0x198   : > { %v1155_v35 = vpop.f32.mrf.mxu0 }
 0x199   : > { %v1156_v43 = vadd.f32 %v1155_v35, %v1060_v37 }
 0x1a0   : > { %v1157_v36 = vpop.f32.mrf.mxu0 }
 0x1a1   : > { %v1158_v4 = vadd.f32 %v1157_v36, %v1060_v37 }
 0x1a3   : > { %v1191_v11 = vpack.c.bf16 %v1158_v4, %v1156_v43 }
 0x1a5   : > { %1275 = vmatmul.bf16.gmra.mxu1 %v1191_v11  ;;  %v6818_v11 = vld [vmem:[%s9166_s13 + $0x2] ss:$0 sm:$0xff] }
 0x1a8   : > { %v1160_v46 = vpop.f32.mrf.mxu0 }
 0x1a9   : > { %v1161_v47 = vadd.f32 %v1160_v46, %v1060_v37 }
 0x1b0   : > { %v1162_v48 = vpop.f32.mrf.mxu0 }
 0x1b1   : > { %v1163_v49 = vadd.f32 %v1162_v48, %v1060_v37 }
 0x1b3   : > { %v1192_v51 = vpack.c.bf16 %v1163_v49, %v1161_v47 }
 0x1b5   : > { %1280 = vmatmul.bf16.gmra.mxu1 %v1192_v51 }
 0x1b8   : > { %v1165_v53 = vpop.f32.mrf.mxu0 }
 0x1b9   : > { %v1166_v58 = vadd.f32 %v1165_v53, %v1060_v37 }
 0x1c0   : > { %v1167_v62 = vpop.f32.mrf.mxu0 }
 0x1c1   : > { %v1168_v63 = vadd.f32 %v1167_v62, %v1060_v37 }
 0x1c3   : > { %v1193_v5 = vpack.c.bf16 %v1168_v63, %v1166_v58 }
 0x1c5   : > { %1285 = vmatmul.bf16.gmra.mxu1 %v1193_v5 }
 0x1c8   : > { %v1170_v8 = vpop.f32.mrf.mxu0 }
 0x1c9   : > { %v1171_v25 = vadd.f32 %v1170_v8, %v1060_v37 }
 0x1d0   : > { %v1172_v18 = vpop.f32.mrf.mxu0 }
 0x1d1   : > { %v1173_v9 = vadd.f32 %v1172_v18, %v1060_v37 }
 0x1d3   : > { %v1194_v13 = vpack.c.bf16 %v1173_v9, %v1171_v25 }
 0x1d5   : > { %1290 = vmatmul.bf16.gmra.mxu1 %v1194_v13 }
 0x1d8   : > { %v1175_v14 = vpop.f32.mrf.mxu0 }
 0x1d9   : > { %v1176_v20 = vadd.f32 %v1175_v14, %v1060_v37 }
 0x1e0   : > { %v1177_v16 = vpop.f32.mrf.mxu0 }
 0x1e1   : > { %v1178_v22 = vadd.f32 %v1177_v16, %v1060_v37 }
 0x1e3   : > { %v1195_v61 = vpack.c.bf16 %v1178_v22, %v1176_v20  ;;  %v5902_v22 = vld [vmem:[%s9157_s4 + $0x74] sm:$0xf] }
 0x1e5   : > { %1295 = vmatmul.bf16.gmra.mxu1 %v1195_v61 }
 0x1e8   : > { %v1180_v50 = vpop.f32.mrf.mxu0 }
 0x1e9   : > { %v1181_v38 = vadd.f32 %v1180_v50, %v1060_v37 }
 0x1f0   : > { %v1182_v34 = vpop.f32.mrf.mxu0 }
 0x1f1   : > { %v1183_v30 = vadd.f32 %v1182_v34, %v1060_v37  ;;  %v5497_v34 = vld [vmem:[%s9157_s4 + $0x78] sm:$0xf0] }
 0x1f3   : > { %v1196_v32 = vpack.c.bf16 %v1183_v30, %v1181_v38  ;;  %v5500_v30 = vor.u32 %v5902_v22, %v5497_v34  ;;  %v5896_v22 = vld [vmem:[%s9157_s4 + $0x44] sm:$0xf]  ;;  %v5895_v34 = vld [vmem:[%s9157_s4 + $0x34] sm:$0xf0] }
 0x1f5   : > { %1300 = vmatmul.bf16.gmra.mxu1 %v1196_v32  ;;  %1844 = vmatpush.bf16.msra.mxu3 %v5500_v30 }
 0x1f8   : > { %v1185_v33 = vpop.f32.mrf.mxu0 }
 0x1f9   : > { %v1186_v36 = vadd.f32 %v1185_v33, %v1060_v37 }
 0x200   : > { %v1187_v35 = vpop.f32.mrf.mxu0 }
 0x201   : > { %v1188_v43 = vadd.f32 %v1187_v35, %v1060_v37 }
 0x203   : > { %v1197_v4 = vpack.c.bf16 %v1188_v43, %v1186_v36 }
 0x205   : > { %1305 = vmatmul.bf16.gmra.mxu1 %v1197_v4 }
 0x212   : > { %v1271_v46 = vpop.f32.mrf.mxu1 }
 0x213   : > { %v1272_v47 = vadd.f32 %v1271_v46, %v6818_v11 }
 0x215   : > { %v1311_v48 = vadd.f32 %v1272_v47, %v1044_v57 }
 0x217   : > { %1327 = vadd.xlane.f32.xlu0 %v1311_v48 }
 0x21a   : > { %v1273_v49 = vpop.f32.mrf.mxu1 }
 0x21b   : > { %v1274_v51 = vadd.f32 %v1273_v49, %v6818_v11 }
 0x21d   : > { %v1312_v37 = vadd.f32 %v1274_v51, %v1045_v59 }
 0x21f   : > { %1329 = vadd.xlane.f32.xlu0 %v1312_v37 }
 0x222   : > { %v1276_v53 = vpop.f32.mrf.mxu1 }
 0x223   : > { %v1277_v58 = vadd.f32 %v1276_v53, %v6818_v11 }
 0x225   : > { %v1313_v62 = vadd.f32 %v1277_v58, %v1046_v17  ;;  %v5489_v58 = vld [vmem:[%s9157_s4 + $0x68] sm:$0xf0] }
 0x227   : > { %1331 = vadd.xlane.f32.xlu1 %v1313_v62 }
 0x22a   : > { %v1278_v63 = vpop.f32.mrf.mxu1 }
 0x22b   : > { %v1279_v5 = vadd.f32 %v1278_v63, %v6818_v11 }
 0x22d   : > { %v6832_v52 = vadd.f32 %v1279_v5, %v1047_v19 }
 0x22f   : > { %1333 = vadd.xlane.f32.xlu1 %v6832_v52 }
 0x232   : > { %v1281_v57 = vpop.f32.mrf.mxu1 }
 0x233   : > { %v1282_v55 = vadd.f32 %v1281_v57, %v6818_v11 }
 0x235   : > { %v6838_v59 = vadd.f32 %v1282_v55, %v1048_v39  ;;  %v6028_v39 = vpop.eup %6027 }
 0x236   : > { %v1360_v25 = vmul.f32 128.0, %v6028_v39  ;;  %vm1364_vm2 = vweird.f32 %v6028_v39 }
 0x237   : > { %1335 = vadd.xlane.f32.xlu2 %v6838_v59 }
 0x238   : > { %v1361_v9 = vsub.f32 1.0, %v1360_v25 }
 0x23a   : > { %v1283_v12 = vpop.f32.mrf.mxu1  ;;  %v1362_v13 = vmul.f32 %v6028_v39, %v1361_v9 }
 0x23b   : > { %v1284_v17 = vadd.f32 %v1283_v12, %v6818_v11 }
 0x23d   : > { %v6844_v8 = vadd.f32 %v1284_v17, %v1049_v42  ;;  %v1363_v42 = vadd.f32 %v6028_v39, %v1362_v13 }
 0x23f   : > { %1337 = vadd.xlane.f32.xlu2 %v6844_v8  ;;  %v6853_v14 = vsel %vm1364_vm2, %v6028_v39, %v1363_v42  ;;  %v5899_v39 = vld [vmem:[%s9157_s4 + $0x54] sm:$0xf0] }
 0x240   : > { %v5480_v23 = vor.u32 %v5899_v39, %v5479_v31 }
 0x242   : > { %v1286_v15 = vpop.f32.mrf.mxu1 }
 0x243   : > { %v1287_v19 = vadd.f32 %v1286_v15, %v6818_v11 }
 0x245   : > { %v6850_v18 = vadd.f32 %v1287_v19, %v1050_v0  ;;  %v5903_v0 = vld [vmem:[%s9157_s4 + $0x74] sm:$0xf0] }
 0x246   : > { %v5496_v50 = vor.u32 %v5903_v0, %v5495_v56  ;;  %v5471_v0 = vld [vmem:[%s9157_s4 + $0x40] sm:$0xf] }
 0x247   : > { %1339 = vadd.xlane.f32.xlu2 %v6850_v18 }
 0x248   : > { %1795 = vmatpush.bf16.msra.mxu2 %v5496_v50 }
 0x24a   : > { %v1288_v40 = vpop.f32.mrf.mxu1 }
 0x24b   : > { %v1289_v35 = vadd.f32 %v1288_v40, %v6818_v11 }
 0x24d   : > { %v6878_v46 = vadd.f32 %v1289_v35, %v1051_v2  ;;  %v5900_v2 = vld [vmem:[%s9157_s4 + $0x64] sm:$0xf]  ;;  %v5894_v35 = vld [vmem:[%s9157_s4 + $0x34] sm:$0xf] }
 0x24e   : > { %v5492_v5 = vor.u32 %v5900_v2, %v5489_v58 }
 0x250   : > { %1845 = vmatpush.bf16.msra.mxu3 %v5492_v5 }
 0x252   : > { %v1291_v61 = vpop.f32.mrf.mxu1 }
 0x253   : > { %v1292_v49 = vadd.f32 %v1291_v61, %v6818_v11 }
 0x255   : > { %v6901_v57 = vadd.f32 %v1292_v49, %v1052_v26  ;;  %v5455_v49 = vld [vmem:[%s9157_s4 + $0x20] sm:$0xf] }
 0x25a   : > { %v1293_v4 = vpop.f32.mrf.mxu1 }
 0x25b   : > { %v1294_v15 = vadd.f32 %v1293_v4, %v6818_v11 }
 0x25d   : > { %v6915_v26 = vadd.f32 %v1294_v15, %v1053_v60  ;;  %v5481_v60 = vld [vmem:[%s9157_s4 + $0x58] sm:$0xf0] }
 0x262   : > { %v1296_v12 = vpop.f32.mrf.mxu1 }
 0x263   : > { %v1297_v13 = vadd.f32 %v1296_v12, %v6818_v11 }
 0x265   : > { %v6939_v56 = vadd.f32 %v1297_v13, %v1054_v45  ;;  %v5463_v45 = vld [vmem:[%s9157_s4 + $0x30] sm:$0xf]  ;;  %v5888_v13 = vld [vmem:[%s9157_s4 + $0x4] sm:$0xf] }
 0x26a   : > { %v1298_v25 = vpop.f32.mrf.mxu1 }
 0x26b   : > { %v1299_v30 = vadd.f32 %v1298_v25, %v6818_v11 }
 0x272   : > { %v1301_v4 = vpop.f32.mrf.mxu1 }
 0x28a   : > { %v1328_v16 = vpop.xlane.xlu0 %1327 }
 0x28b   : > { %v1366_v20 = vmul.f32 %v6853_v14, %v1328_v16 }
 0x28d   : > { %v6868_v38 = vsub.f32 %v1311_v48, %v1366_v20 }
 0x28f   : > { %v1398_v32 = vmul.f32 %v6868_v38, %v6868_v38 }
 0x291   : > { %1414 = vadd.xlane.f32.xlu0 %v1398_v32 }
 0x292   : > { %v1330_v33 = vpop.xlane.xlu0 %1329 }
 0x293   : > { %v1367_v36 = vmul.f32 %v6853_v14, %v1330_v33  ;;  %v5476_v33 = vor.u32 %v5896_v22, %v5473_v41 }
 0x295   : > { %v6874_v43 = vsub.f32 %v1312_v37, %v1367_v36  ;;  %v5487_v37 = vld [vmem:[%s9157_s4 + $0x60] sm:$0xf]  ;;  %v5465_v36 = vld [vmem:[%s9157_s4 + $0x38] sm:$0xf0] }
 0x296   : > { %v5488_v53 = vor.u32 %v5901_v1, %v5487_v37  ;;  %v5468_v37 = vor.u32 %v5894_v35, %v5465_v36  ;;  %v6979_v1 = vadd.f32 %v1299_v30, %v1055_v10  ;;  %v1302_v10 = vadd.f32 %v1301_v4, %v6818_v11 }
 0x297   : > { %v1399_v47 = vmul.f32 %v6874_v43, %v6874_v43 }
 0x298   : > { %1796 = vmatpush.bf16.msra.mxu2 %v5488_v53  ;;  %v5457_v53 = vld [vmem:[%s9157_s4 + $0x28] sm:$0xf0]  ;;  %v6997_v15 = vadd.f32 %v1302_v10, %v1056_v7  ;;  %v5447_v7 = vld [vmem:[%s9157_s4 + $0x10] sm:$0xf] }
 0x299   : > { %1341 = vadd.xlane.f32.xlu0 %v6878_v46  ;;  %1416 = vadd.xlane.f32.xlu1 %v1399_v47  ;;  %v5464_v47 = vor.u32 %v5895_v34, %v5463_v45 }
 0x29a   : > { %v1332_v48 = vpop.xlane.xlu1 %1331 }
 0x29b   : > { %v1368_v51 = vmul.f32 %v6853_v14, %v1332_v48 }
 0x29c   : > { %1797 = vmatpush.bf16.msra.mxu2 %v5480_v23  ;;  %v5439_v23 = vld [vmem:[%s9157_s4] sm:$0xf] }
 0x29d   : > { %v6897_v63 = vsub.f32 %v1313_v62, %v1368_v51  ;;  %v5893_v51 = vld [vmem:[%s9157_s4 + $0x24] sm:$0xf0] }
 0x29e   : > { %v5456_v58 = vor.u32 %v5893_v51, %v5455_v49 }
 0x29f   : > { %v1400_v55 = vmul.f32 %v6897_v63, %v6897_v63 }
 0x2a1   : > { %1343 = vadd.xlane.f32.xlu0 %v6901_v57  ;;  %1418 = vadd.xlane.f32.xlu1 %v1400_v55 }
 0x2a2   : > { %v1334_v17 = vpop.xlane.xlu1 %1333 }
 0x2a3   : > { %v1369_v62 = vmul.f32 %v6853_v14, %v1334_v17  ;;  %v1303_v17 = vpop.f32.mrf.mxu1 }
 0x2a5   : > { %v6909_v19 = vsub.f32 %v6832_v52, %v1369_v62  ;;  %v5898_v52 = vld [vmem:[%s9157_s4 + $0x54] sm:$0xf] }
 0x2a6   : > { %v5484_v42 = vor.u32 %v5898_v52, %v5481_v60  ;;  %v5890_v52 = vld [vmem:[%s9157_s4 + $0x14] sm:$0xf]  ;;  %v5889_v60 = vld [vmem:[%s9157_s4 + $0x4] sm:$0xf0] }
 0x2a7   : > { %v1401_v21 = vmul.f32 %v6909_v19, %v6909_v19 }
 0x2a8   : > { %1846 = vmatpush.bf16.msra.mxu3 %v5484_v42  ;;  %v5441_v42 = vld [vmem:[%s9157_s4 + $0x8] sm:$0xf0] }
 0x2a9   : > { %1420 = vadd.xlane.f32.xlu2 %v1401_v21  ;;  %1345 = vadd.xlane.f32.xlu1 %v6915_v26  ;;  %v1304_v21 = vadd.f32 %v1303_v17, %v6818_v11 }
 0x2aa   : > { %v1336_v9 = vpop.xlane.xlu2 %1335 }
 0x2ab   : > { %v1370_v40 = vmul.f32 %v6853_v14, %v1336_v9  ;;  %v7005_v31 = vadd.f32 %v1304_v21, %v1057_v24  ;;  %v5448_v24 = vor.u32 %v5891_v6, %v5447_v7 }
 0x2ac   : > { %1847 = vmatpush.bf16.msra.mxu3 %v5476_v33 }
 0x2ad   : > { %v6933_v16 = vsub.f32 %v6838_v59, %v1370_v40  ;;  %v5897_v59 = vld [vmem:[%s9157_s4 + $0x44] sm:$0xf0]  ;;  %v5440_v40 = vor.u32 %v5889_v60, %v5439_v23 }
 0x2ae   : > { %v5472_v50 = vor.u32 %v5897_v59, %v5471_v0  ;;  %v5444_v0 = vor.u32 %v5888_v13, %v5441_v42 }
 0x2af   : > { %v1402_v20 = vmul.f32 %v6933_v16, %v6933_v16 }
 0x2b0   : > { %1798 = vmatpush.bf16.msra.mxu2 %v5472_v50  ;;  %1848 = vmatpush.bf16.msra.mxu3 %v5468_v37 }
 0x2b1   : > { %1422 = vadd.xlane.f32.xlu2 %v1402_v20  ;;  %1347 = vadd.xlane.f32.xlu1 %v6939_v56 }
 0x2b2   : > { %v1338_v61 = vpop.xlane.xlu2 %1337 }
 0x2b3   : > { %v1371_v32 = vmul.f32 %v6853_v14, %v1338_v61 }
 0x2b4   : > { %1799 = vmatpush.bf16.msra.mxu2 %v5464_v47 }
 0x2b5   : > { %v6969_v48 = vsub.f32 %v6844_v8, %v1371_v32  ;;  %v5892_v8 = vld [vmem:[%s9157_s4 + $0x24] sm:$0xf] }
 0x2b6   : > { %v5460_v44 = vor.u32 %v5892_v8, %v5457_v53 }
 0x2b7   : > { %v1403_v2 = vmul.f32 %v6969_v48, %v6969_v48 }
 0x2b8   : > { %1800 = vmatpush.bf16.msra.mxu2 %v5456_v58  ;;  %1849 = vmatpush.bf16.msra.mxu3 %v5460_v44 }
 0x2b9   : > { %1349 = vadd.xlane.f32.xlu2 %v6979_v1  ;;  %1424 = vadd.xlane.f32.xlu0 %v1403_v2 }
 0x2ba   : > { %v1340_v5 = vpop.xlane.xlu2 %1339 }
 0x2bb   : > { %v1372_v55 = vmul.f32 %v6853_v14, %v1340_v5 }
 0x2bc   : > { %1801 = vmatpush.bf16.msra.mxu2 %v5448_v24 }
 0x2bd   : > { %v6993_v12 = vsub.f32 %v6850_v18, %v1372_v55  ;;  %v1306_v18 = vpop.f32.mrf.mxu1 }
 0x2be   : > { %v1307_v39 = vadd.f32 %v1306_v18, %v6818_v11 }
 0x2bf   : > { %v1404_v62 = vmul.f32 %v6993_v12, %v6993_v12 }
 0x2c0   : > { %v7011_v3 = vadd.f32 %v1307_v39, %v1058_v28  ;;  %v5452_v28 = vor.u32 %v5890_v52, %v5449_v54  ;;  %1802 = vmatpush.bf16.msra.mxu2 %v5440_v40  ;;  %v7065_v54 = vld [vmem:[%s9166_s13 + $0x3] ss:$0 sm:$0xff] }
 0x2c1   : > { %1351 = vadd.xlane.f32.xlu2 %v6997_v15  ;;  %1426 = vadd.xlane.f32.xlu0 %v1404_v62 }
 0x2c2   : > { %1850 = vmatpush.bf16.msra.mxu3 %v5452_v28 }
 0x2c5   : > { %v1308_v5 = vpop.f32.mrf.mxu1 }
 0x2c6   : > { %1851 = vmatpush.bf16.msra.mxu3 %v5444_v0  ;;  %v1309_v21 = vadd.f32 %v1308_v5, %v6818_v11 }
 0x2c9   : > { %1353 = vadd.xlane.f32.xlu0 %v7005_v31 }
 0x2d1   : > { %1355 = vadd.xlane.f32.xlu0 %v7011_v3 }
 0x304   : > { %v1415_v25 = vpop.xlane.xlu0 %1414 }
 0x305   : > { %v1446_v9 = vmul.f32 %v1415_v25, %v6853_v14 }
 0x307   : > { %v1462_v20 = vadd.f32 1e-05, %v1446_v9 }
 0x309   : > { %6029 = vrsqrt.f32 %v1462_v20  ;;  %vm1484_vm4 = vweird.f32 %v1462_v20 }
 0x30c   : > { %v1417_v59 = vpop.xlane.xlu1 %1416  ;;  %v1342_v22 = vpop.xlane.xlu0 %1341 }
 0x30d   : > { %v1447_v61 = vmul.f32 %v1417_v59, %v6853_v14  ;;  %v1373_v50 = vmul.f32 %v6853_v14, %v1342_v22 }
 0x30f   : > { %v6030_v41 = vpop.eup %6029  ;;  %v1463_v45 = vadd.f32 1e-05, %v1447_v61  ;;  %v7042_v34 = vsub.f32 %v6878_v46, %v1373_v50 }
 0x310   : > { %v1479_v30 = vmul.f32 %v6030_v41, %v1462_v20  ;;  %vm1485_vm3 = vweird.f32 %v6030_v41  ;;  %v7080_v20 = vld [vmem:[%s9166_s13 + $0x4] ss:$0 sm:$0xff] }
 0x311   : > { %6031 = vrsqrt.f32 %v1463_v45  ;;  %v1405_v32 = vmul.f32 %v7042_v34, %v7042_v34  ;;  %vm1486_vm5 = vmor %vm1484_vm4, %vm1485_vm3  ;;  %vm1494_vm7 = vweird.f32 %v1463_v45 }
 0x312   : > { %v1480_v33 = vmul.f32 %v6030_v41, %v1479_v30 }
 0x313   : > { %1428 = vadd.xlane.f32.xlu1 %v1405_v32 }
 0x314   : > { %v1481_v35 = vmul.f32 0.5, %v1480_v33  ;;  %v1419_v36 = vpop.xlane.xlu1 %1418  ;;  %v1344_v4 = vpop.xlane.xlu0 %1343 }
 0x315   : > { %v1448_v47 = vmul.f32 %v1419_v36, %v6853_v14  ;;  %v1374_v49 = vmul.f32 %v6853_v14, %v1344_v4  ;;  %v5919_v36 = vld [vmem:[%s9158_s5 + $0x78] sm:$0xff] }
 0x316   : > { %v1482_v51 = vsub.f32 1.5, %v1481_v35  ;;  %v5911_v35 = vld [vmem:[%s9158_s5 + $0x38] sm:$0xff]  ;;  %2118 = vmatpush.bf16.msra.mxu1 %v5919_v36 }
 0x317   : > { %v6032_v37 = vpop.eup %6031  ;;  %v1464_v2 = vadd.f32 1e-05, %v1448_v47  ;;  %v7049_v46 = vsub.f32 %v6901_v57, %v1374_v49  ;;  %2069 = vmatpush.bf16.msra.mxu0 %v5911_v35 }
 0x318   : > { %v1483_v8 = vmul.f32 %v6030_v41, %v1482_v51  ;;  %v1489_v53 = vmul.f32 %v6032_v37, %v1463_v45  ;;  %vm1495_vm6 = vweird.f32 %v6032_v37 }
 0x319   : > { %6033 = vrsqrt.f32 %v1464_v2  ;;  %v1406_v58 = vmul.f32 %v7049_v46, %v7049_v46  ;;  %vm1496_vm8 = vmor %vm1494_vm7, %vm1495_vm6  ;;  %vm1504_vm10 = vweird.f32 %v1464_v2 }
 0x31a   : > { %v1490_v44 = vmul.f32 %v6032_v37, %v1489_v53  ;;  %v1487_v10 = vsel %vm1486_vm5, %v6030_v41, %v1483_v8 }
 0x31b   : > { %1430 = vadd.xlane.f32.xlu1 %v1406_v58  ;;  %v1638_v6 = vmul.f32 %v1487_v10, %v6868_v38  ;;  %v7072_v38 = vadd.f32 %v1309_v21, %v1059_v29  ;;  %v5918_v58 = vld [vmem:[%s9158_s5 + $0x70] sm:$0xff] }
 0x31c   : > { %v1491_v55 = vmul.f32 0.5, %v1490_v44  ;;  %v1421_v17 = vpop.xlane.xlu2 %1420  ;;  %v1346_v62 = vpop.xlane.xlu1 %1345  ;;  %2119 = vmatpush.bf16.msra.mxu1 %v5918_v58 }
 0x31d   : > { %v1449_v57 = vmul.f32 %v1421_v17, %v6853_v14  ;;  %v1375_v18 = vmul.f32 %v6853_v14, %v1346_v62  ;;  %v1654_v23 = vmul.f32 %v1638_v6, %v7065_v54 }
 0x31e   : > { %v1492_v39 = vsub.f32 1.5, %v1491_v55 }
 0x31f   : > { %v6034_v7 = vpop.eup %6033  ;;  %v7057_v24 = vadd.f32 1e-05, %v1449_v57  ;;  %v7060_v52 = vsub.f32 %v6915_v26, %v1375_v18  ;;  %v7091_v50 = vadd.f32 %v1654_v23, %v7080_v20  ;;  %v5909_v57 = vld [vmem:[%s9158_s5 + $0x28] sm:$0xff]  ;;  %v5916_v23 = vld [vmem:[%s9158_s5 + $0x60] sm:$0xff] }
 0x320   : > { %v1493_v11 = vmul.f32 %v6032_v37, %v1492_v39  ;;  %v1499_v28 = vmul.f32 %v6034_v7, %v1464_v2  ;;  %vm1505_vm9 = vweird.f32 %v6034_v7  ;;  %v5910_v2 = vld [vmem:[%s9158_s5 + $0x30] sm:$0xff] }
 0x321   : > { %6035 = vrsqrt.f32 %v7057_v24  ;;  %v1407_v25 = vmul.f32 %v7060_v52, %v7060_v52  ;;  %vm7108_vm11 = vmor %vm1504_vm10, %vm1505_vm9  ;;  %vm1514_vm13 = vweird.f32 %v7057_v24  ;;  %2070 = vmatpush.bf16.msra.mxu0 %v5910_v2 }
 0x322   : > { %v1497_v26 = vsel %vm1496_vm8, %v6032_v37, %v1493_v11  ;;  %v1500_v9 = vmul.f32 %v6034_v7, %v1499_v28 }
 0x323   : > { %v1639_v60 = vmul.f32 %v1497_v26, %v6874_v43  ;;  %1432 = vadd.xlane.f32.xlu2 %v1407_v25  ;;  %1357 = vadd.xlane.f32.xlu1 %v7072_v38  ;;  %v5908_v25 = vld [vmem:[%s9158_s5 + $0x20] sm:$0xff] }
 0x324   : > { %v1501_v13 = vmul.f32 0.5, %v1500_v9  ;;  %v1423_v40 = vpop.xlane.xlu2 %1422  ;;  %v1348_v42 = vpop.xlane.xlu1 %1347 }
 0x325   : > { %v1655_v27 = vmul.f32 %v1639_v60, %v7065_v54  ;;  %v1450_v29 = vmul.f32 %v1423_v40, %v6853_v14  ;;  %v1376_v0 = vmul.f32 %v6853_v14, %v1348_v42  ;;  %2071 = vmatpush.bf16.msra.mxu0 %v5909_v57 }
 0x326   : > { %v1502_v59 = vsub.f32 1.5, %v1501_v13 }
 0x327   : > { %v6036_v22 = vpop.eup %6035  ;;  %v7085_v43 = vadd.f32 1e-05, %v1450_v29  ;;  %v7088_v61 = vsub.f32 %v6939_v56, %v1376_v0  ;;  %v7094_v41 = vadd.f32 %v1655_v27, %v7080_v20  ;;  %v5907_v0 = vld [vmem:[%s9158_s5 + $0x18] sm:$0xff] }
 0x328   : > { %v1503_v45 = vmul.f32 %v6034_v7, %v1502_v59  ;;  %v1509_v30 = vmul.f32 %v6036_v22, %v7057_v24  ;;  %vm1515_vm12 = vweird.f32 %v6036_v22 }
 0x329   : > { %6037 = vrsqrt.f32 %v7085_v43  ;;  %v1408_v32 = vmul.f32 %v7088_v61, %v7088_v61  ;;  %v1686_v33 = vpack.c.bf16 %v7094_v41, %v7091_v50  ;;  %vm1516_vm14 = vmor %vm1514_vm13, %vm1515_vm12  ;;  %2072 = vmatpush.bf16.msra.mxu0 %v5908_v25  ;;  %vm1524_vm0 = vweird.f32 %v7085_v43 }
 0x32a   : > { %v1510_v56 = vmul.f32 %v6036_v22, %v1509_v30  ;;  %v1507_v47 = vsel %vm7108_vm11, %v6034_v7, %v1503_v45 }
 0x32b   : > { %1434 = vadd.xlane.f32.xlu2 %v1408_v32  ;;  %1803 = vmatmul.bf16.vlgmr.msra.gmra.mxu2 %v1686_v33  ;;  %v1640_v17 = vmul.f32 %v1507_v47, %v6897_v63  ;;  %v5917_v63 = vld [vmem:[%s9158_s5 + $0x68] sm:$0xff] }
 0x32c   : > { %v1511_v49 = vmul.f32 0.5, %v1510_v56  ;;  %1852 = vmatmul.bf16.vlgmr.msra.gmra.mxu3 %v1686_v33  ;;  %v1350_v51 = vpop.xlane.xlu2 %1349  ;;  %v1425_v37 = vpop.xlane.xlu0 %1424  ;;  %2120 = vmatpush.bf16.msra.mxu1 %v5917_v63 }
 0x32d   : > { %v1377_v8 = vmul.f32 %v6853_v14, %v1350_v51  ;;  %v1451_v53 = vmul.f32 %v1425_v37, %v6853_v14  ;;  %v1656_v6 = vmul.f32 %v1640_v17, %v7065_v54  ;;  %2073 = vmatpush.bf16.msra.mxu0 %v5907_v0  ;;  %v5906_v17 = vld [vmem:[%s9158_s5 + $0x10] sm:$0xff] }
 0x32e   : > { %v1512_v5 = vsub.f32 1.5, %v1511_v49 }
 0x32f   : > { %v6038_v44 = vpop.eup %6037  ;;  %v1467_v10 = vadd.f32 1e-05, %v1451_v53  ;;  %v7123_v55 = vsub.f32 %v6979_v1, %v1377_v8  ;;  %v7147_v13 = vadd.f32 %v1656_v6, %v7080_v20 }
 0x330   : > { %v1513_v62 = vmul.f32 %v6036_v22, %v1512_v5  ;;  %v1519_v21 = vmul.f32 %v6038_v44, %v7085_v43  ;;  %vm1525_vm15 = vweird.f32 %v6038_v44  ;;  %2121 = vmatpush.bf16.msra.mxu1 %v5916_v23 }
 0x331   : > { %6039 = vrsqrt.f32 %v1467_v10  ;;  %v1409_v18 = vmul.f32 %v7123_v55, %v7123_v55  ;;  %vm1526_vm1 = vmor %vm1524_vm0, %vm1525_vm15  ;;  %vm1534_vm3 = vweird.f32 %v1467_v10  ;;  %2074 = vmatpush.bf16.msra.mxu0 %v5906_v17 }
 0x332   : > { %v1517_v1 = vsel %vm1516_vm14, %v6036_v22, %v1513_v62  ;;  %v1520_v39 = vmul.f32 %v6038_v44, %v1519_v21  ;;  %v5914_v21 = vld [vmem:[%s9158_s5 + $0x50] sm:$0xff] }
 0x333   : > { %1436 = vadd.xlane.f32.xlu0 %v1409_v18  ;;  %v1641_v7 = vmul.f32 %v1517_v1, %v6909_v19 }
 0x334   : > { %v1521_v24 = vmul.f32 0.5, %v1520_v39  ;;  %v1352_v11 = vpop.xlane.xlu2 %1351  ;;  %v1427_v28 = vpop.xlane.xlu0 %1426 }
 0x335   : > { %v1378_v26 = vmul.f32 %v6853_v14, %v1352_v11  ;;  %v1657_v9 = vmul.f32 %v1641_v7, %v7065_v54  ;;  %v5905_v7 = vld [vmem:[%s9158_s5 + $0x8] sm:$0xff] }
 0x336   : > { %v1522_v19 = vsub.f32 1.5, %v1521_v24  ;;  %2075 = vmatpush.bf16.msra.mxu0 %v5905_v7 }
 0x337   : > { %v6040_v60 = vpop.eup %6039  ;;  %v7150_v40 = vadd.f32 %v1657_v9, %v7080_v20  ;;  %v7153_v42 = vsub.f32 %v6997_v15, %v1378_v26  ;;  %v5915_v15 = vld [vmem:[%s9158_s5 + $0x58] sm:$0xff] }
 0x338   : > { %v1523_v27 = vmul.f32 %v6038_v44, %v1522_v19  ;;  %v1529_v29 = vmul.f32 %v6040_v60, %v1467_v10  ;;  %2122 = vmatpush.bf16.msra.mxu1 %v5915_v15  ;;  %vm1535_vm2 = vweird.f32 %v6040_v60  ;;  %v5913_v19 = vld [vmem:[%s9158_s5 + $0x48] sm:$0xff] }
 0x339   : > { %v1687_v59 = vpack.c.bf16 %v7150_v40, %v7147_v13  ;;  %v1410_v22 = vmul.f32 %v7153_v42, %v7153_v42  ;;  %vm1536_vm4 = vmor %vm1534_vm3, %vm1535_vm2 }
 0x33a   : > { %v1530_v45 = vmul.f32 %v6040_v60, %v1529_v29  ;;  %v1527_v30 = vsel %vm1526_vm1, %v6038_v44, %v1523_v27  ;;  %v1452_v44 = vmul.f32 %v1427_v28, %v6853_v14 }
 0x33b   : > { %1808 = vmatmul.bf16.gmra.mxu2 %v1687_v59  ;;  %1438 = vadd.xlane.f32.xlu1 %v1410_v22  ;;  %v1642_v4 = vmul.f32 %v1527_v30, %v6933_v16 }
 0x33c   : > { %v1531_v32 = vmul.f32 0.5, %v1530_v45  ;;  %1857 = vmatmul.bf16.gmra.mxu3 %v1687_v59  ;;  %v1354_v33 = vpop.xlane.xlu0 %1353  ;;  %v1468_v10 = vadd.f32 1e-05, %v1452_v44  ;;  %2123 = vmatpush.bf16.msra.mxu1 %v5914_v21 }
 0x33d   : > { %v1379_v56 = vmul.f32 %v6853_v14, %v1354_v33  ;;  %v1658_v37 = vmul.f32 %v1642_v4, %v7065_v54 }
 0x33e   : > { %v1532_v35 = vsub.f32 1.5, %v1531_v32  ;;  %6041 = vrsqrt.f32 %v1468_v10  ;;  %vm1544_vm6 = vweird.f32 %v1468_v10 }
 0x33f   : > { %v7168_v36 = vsub.f32 %v7005_v31, %v1379_v56  ;;  %v7178_v53 = vadd.f32 %v1658_v37, %v7080_v20  ;;  %v5904_v56 = vld [vmem:[%s9158_s5] sm:$0xff] }
 0x340   : > { %v1533_v43 = vmul.f32 %v6040_v60, %v1532_v35  ;;  %2124 = vmatpush.bf16.msra.mxu1 %v5913_v19  ;;  %v5912_v35 = vld [vmem:[%s9158_s5 + $0x40] sm:$0xff]  ;;  %2076 = vmatpush.bf16.msra.mxu0 %v5904_v56 }
 0x341   : > { %v1411_v47 = vmul.f32 %v7168_v36, %v7168_v36 }
 0x342   : > { %v1537_v49 = vsel %vm1536_vm4, %v6040_v60, %v1533_v43 }
 0x343   : > { %1440 = vadd.xlane.f32.xlu2 %v1411_v47  ;;  %v1643_v51 = vmul.f32 %v1537_v49, %v6969_v48 }
 0x344   : > { %v1356_v2 = vpop.xlane.xlu0 %1355  ;;  %2125 = vmatpush.bf16.msra.mxu1 %v5912_v35 }
 0x345   : > { %v1380_v8 = vmul.f32 %v6853_v14, %v1356_v2  ;;  %v1659_v31 = vmul.f32 %v1643_v51, %v7065_v54 }
 0x347   : > { %v7181_v16 = vadd.f32 %v1659_v31, %v7080_v20  ;;  %v7184_v58 = vsub.f32 %v7011_v3, %v1380_v8  ;;  %v6042_v3 = vpop.eup %6041 }
 0x348   : > { %v1539_v62 = vmul.f32 %v6042_v3, %v1468_v10  ;;  %vm1545_vm5 = vweird.f32 %v6042_v3 }
 0x349   : > { %v1688_v5 = vpack.c.bf16 %v7181_v16, %v7178_v53  ;;  %v1412_v48 = vmul.f32 %v7184_v58, %v7184_v58  ;;  %vm1546_vm7 = vmor %vm1544_vm6, %vm1545_vm5 }
 0x34a   : > { %v1540_v57 = vmul.f32 %v6042_v3, %v1539_v62 }
 0x34b   : > { %1813 = vmatmul.bf16.gmra.mxu2 %v1688_v5  ;;  %1442 = vadd.xlane.f32.xlu0 %v1412_v48 }
 0x34c   : > { %1862 = vmatmul.bf16.gmra.mxu3 %v1688_v5  ;;  %v1541_v39 = vmul.f32 0.5, %v1540_v57 }
 0x34e   : > { %v1542_v6 = vsub.f32 1.5, %v1541_v39 }
 0x350   : > { %v1543_v26 = vmul.f32 %v6042_v3, %v1542_v6 }
 0x352   : > { %v1547_v60 = vsel %vm1546_vm7, %v6042_v3, %v1543_v26 }
 0x353   : > { %v1644_v33 = vmul.f32 %v1547_v60, %v6993_v12  ;;  %v5372_v60 = vld [vmem:[%s9166_s13 + $0x5] ss:$8 sm:$0x3] }
 0x355   : > { %v1660_v51 = vmul.f32 %v1644_v33, %v7065_v54 }
 0x357   : > { %v7224_v10 = vadd.f32 %v1660_v51, %v7080_v20 }
 0x386   : > { %v1429_v18 = vpop.xlane.xlu1 %1428 }
 0x387   : > { %v1453_v63 = vmul.f32 %v1429_v18, %v6853_v14 }
 0x389   : > { %v1469_v1 = vadd.f32 1e-05, %v1453_v63 }
 0x38b   : > { %6043 = vrsqrt.f32 %v1469_v1  ;;  %vm1554_vm9 = vweird.f32 %v1469_v1 }
 0x38e   : > { %v1431_v24 = vpop.xlane.xlu1 %1430 }
 0x38f   : > { %v1454_v11 = vmul.f32 %v1431_v24, %v6853_v14 }
 0x391   : > { %v6044_v28 = vpop.eup %6043  ;;  %v1470_v25 = vadd.f32 1e-05, %v1454_v11 }
 0x392   : > { %v1549_v9 = vmul.f32 %v6044_v28, %v1469_v1  ;;  %vm1555_vm8 = vweird.f32 %v6044_v28 }
 0x393   : > { %6045 = vrsqrt.f32 %v1470_v25  ;;  %vm1556_vm10 = vmor %vm1554_vm9, %vm1555_vm8  ;;  %vm1564_vm12 = vweird.f32 %v1470_v25 }
 0x394   : > { %v1550_v23 = vmul.f32 %v6044_v28, %v1549_v9 }
 0x396   : > { %v1551_v27 = vmul.f32 0.5, %v1550_v23  ;;  %v1433_v29 = vpop.xlane.xlu2 %1432  ;;  %v1358_v0 = vpop.xlane.xlu1 %1357 }
 0x397   : > { %v1455_v59 = vmul.f32 %v1433_v29, %v6853_v14  ;;  %v1381_v22 = vmul.f32 %v6853_v14, %v1358_v0 }
 0x398   : > { %v1552_v15 = vsub.f32 1.5, %v1551_v27 }
 0x399   : > { %v6046_v45 = vpop.eup %6045  ;;  %v1471_v30 = vadd.f32 1e-05, %v1455_v59  ;;  %v7208_v32 = vsub.f32 %v7072_v38, %v1381_v22 }
 0x39a   : > { %v1553_v4 = vmul.f32 %v6044_v28, %v1552_v15  ;;  %v1559_v43 = vmul.f32 %v6046_v45, %v1470_v25  ;;  %vm1565_vm11 = vweird.f32 %v6046_v45 }
 0x39b   : > { %6047 = vrsqrt.f32 %v1471_v30  ;;  %v1413_v47 = vmul.f32 %v7208_v32, %v7208_v32  ;;  %vm1566_vm13 = vmor %vm1564_vm12, %vm1565_vm11  ;;  %vm1574_vm15 = vweird.f32 %v1471_v30 }
 0x39c   : > { %v1557_v38 = vsel %vm1556_vm10, %v6044_v28, %v1553_v4  ;;  %v1560_v12 = vmul.f32 %v6046_v45, %v1559_v43  ;;  %v7248_v4 = vperm.slane %v5372_v60, 1 }
 0x39d   : > { %1444 = vadd.xlane.f32.xlu1 %v1413_v47  ;;  %v1645_v49 = vmul.f32 %v1557_v38, %v7042_v34 }
 0x39e   : > { %v1561_v37 = vmul.f32 0.5, %v1560_v12  ;;  %v1435_v2 = vpop.xlane.xlu2 %1434 }
 0x39f   : > { %v1456_v8 = vmul.f32 %v1435_v2, %v6853_v14  ;;  %v1661_v31 = vmul.f32 %v1645_v49, %v7065_v54 }
 0x3a0   : > { %v1562_v5 = vsub.f32 1.5, %v1561_v37 }
 0x3a1   : > { %v6048_v48 = vpop.eup %6047  ;;  %v1472_v44 = vadd.f32 1e-05, %v1456_v8  ;;  %v7227_v17 = vadd.f32 %v1661_v31, %v7080_v20 }
 0x3a2   : > { %v1563_v3 = vmul.f32 %v6046_v45, %v1562_v5  ;;  %v1569_v34 = vmul.f32 %v6048_v48, %v1471_v30  ;;  %vm1575_vm14 = vweird.f32 %v6048_v48 }
 0x3a3   : > { %6049 = vrsqrt.f32 %v1472_v44  ;;  %v1689_v62 = vpack.c.bf16 %v7227_v17, %v7224_v10  ;;  %vm1576_vm0 = vmor %vm1574_vm15, %vm1575_vm14  ;;  %vm1584_vm2 = vweird.f32 %v1472_v44 }
 0x3a4   : > { %v1570_v21 = vmul.f32 %v6048_v48, %v1569_v34  ;;  %v1567_v57 = vsel %vm1566_vm13, %v6046_v45, %v1563_v3  ;;  %v7240_v45 = vperm.slane %v5372_v60, 0 }
 0x3a5   : > { %1818 = vmatmul.bf16.gmra.mxu2 %v1689_v62  ;;  %1867 = vmatmul.bf16.gmra.mxu3 %v1689_v62  ;;  %v1646_v24 = vmul.f32 %v1567_v57, %v7049_v46 }
 0x3a6   : > { %v1571_v18 = vmul.f32 0.5, %v1570_v21  ;;  %v1437_v63 = vpop.xlane.xlu0 %1436 }
 0x3a7   : > { %v1457_v1 = vmul.f32 %v1437_v63, %v6853_v14  ;;  %v1662_v23 = vmul.f32 %v1646_v24, %v7065_v54 }
 0x3a8   : > { %v1572_v39 = vsub.f32 1.5, %v1571_v18 }
 0x3a9   : > { %v6050_v7 = vpop.eup %6049  ;;  %v1473_v6 = vadd.f32 1e-05, %v1457_v1 }
 0x3aa   : > { %v1573_v11 = vmul.f32 %v6048_v48, %v1572_v39  ;;  %v1579_v28 = vmul.f32 %v6050_v7, %v1472_v44  ;;  %vm1585_vm1 = vweird.f32 %v6050_v7 }
 0x3ab   : > { %6051 = vrsqrt.f32 %v1473_v6  ;;  %vm7252_vm3 = vmor %vm1584_vm2, %vm1585_vm1  ;;  %vm1594_vm4 = vweird.f32 %v1473_v6 }
 0x3ac   : > { %v1577_v25 = vsel %vm1576_vm0, %v6048_v48, %v1573_v11  ;;  %v1580_v26 = vmul.f32 %v6050_v7, %v1579_v28 }
 0x3ad   : > { %v1647_v9 = vmul.f32 %v1577_v25, %v7060_v52  ;;  %v7243_v52 = vadd.f32 %v1662_v23, %v7080_v20 }
 0x3ae   : > { %v1581_v19 = vmul.f32 0.5, %v1580_v26  ;;  %v1804_v27 = vpop.f32.mrf.mxu2  ;;  %v1439_v29 = vpop.xlane.xlu1 %1438 }
 0x3af   : > { %v1853_v0 = vpop.f32.mrf.mxu3  ;;  %v1458_v46 = vmul.f32 %v1439_v29, %v6853_v14  ;;  %v1663_v59 = vmul.f32 %v1647_v9, %v7065_v54  ;;  %v1805_v12 = vadd.f32 %v1804_v27, %v7240_v45 }
 0x3b0   : > { %v1582_v22 = vsub.f32 1.5, %v1581_v19  ;;  %v1854_v37 = vadd.f32 %v1853_v0, %v7248_v4 }
 0x3b1   : > { %v6052_v15 = vpop.eup %6051  ;;  %v1474_v30 = vadd.f32 1e-05, %v1458_v46  ;;  %v7246_v33 = vadd.f32 %v1663_v59, %v7080_v20  ;;  %v1893_v62 = vmax.f32 %v1805_v12, 0.0 }
 0x3b2   : > { %v1583_v56 = vmul.f32 %v6050_v7, %v1582_v22  ;;  %v1589_v35 = vmul.f32 %v6052_v15, %v1473_v6  ;;  %vm1595_vm5 = vweird.f32 %v6052_v15  ;;  %v1894_v1 = vmax.f32 %v1854_v37, 0.0 }
 0x3b3   : > { %6053 = vrsqrt.f32 %v1474_v30  ;;  %v1690_v43 = vpack.c.bf16 %v7246_v33, %v7243_v52  ;;  %vm1596_vm6 = vmor %vm1594_vm4, %vm1595_vm5  ;;  %vm1604_vm8 = vweird.f32 %v1474_v30 }
 0x3b4   : > { %v1590_v47 = vmul.f32 %v6052_v15, %v1589_v35  ;;  %v1587_v49 = vsel %vm7252_vm3, %v6050_v7, %v1583_v56 }
 0x3b5   : > { %1823 = vmatmul.bf16.gmra.mxu2 %v1690_v43  ;;  %1872 = vmatmul.bf16.gmra.mxu3 %v1690_v43  ;;  %v1648_v18 = vmul.f32 %v1587_v49, %v7088_v61 }
 0x3b6   : > { %v1591_v51 = vmul.f32 0.5, %v1590_v47  ;;  %v1806_v2 = vpop.f32.mrf.mxu2  ;;  %v1441_v8 = vpop.xlane.xlu2 %1440 }
 0x3b7   : > { %v1807_v31 = vadd.f32 %v1806_v2, %v7240_v45  ;;  %v1855_v5 = vpop.f32.mrf.mxu3  ;;  %v1459_v48 = vmul.f32 %v1441_v8, %v6853_v14  ;;  %v1664_v26 = vmul.f32 %v1648_v18, %v7065_v54 }
 0x3b8   : > { %v1592_v44 = vsub.f32 1.5, %v1591_v51  ;;  %v1856_v3 = vadd.f32 %v1855_v5, %v7248_v4 }
 0x3b9   : > { %v6054_v34 = vpop.eup %6053  ;;  %v1895_v21 = vmax.f32 %v1807_v31, 0.0  ;;  %v1475_v57 = vadd.f32 1e-05, %v1459_v48  ;;  %v7268_v29 = vadd.f32 %v1664_v26, %v7080_v20 }
 0x3ba   : > { %v1593_v63 = vmul.f32 %v6052_v15, %v1592_v44  ;;  %v1599_v39 = vmul.f32 %v6054_v34, %v1474_v30  ;;  %v1896_v7 = vmax.f32 %v1856_v3, 0.0  ;;  %vm1605_vm7 = vweird.f32 %v6054_v34 }
 0x3bb   : > { %v1925_v24 = vpack.c.bf16 %v1895_v21, %v1893_v62  ;;  %6055 = vrsqrt.f32 %v1475_v57  ;;  %vm1606_vm9 = vmor %vm1604_vm8, %vm1605_vm7  ;;  %vm1614_vm11 = vweird.f32 %v1475_v57 }
 0x3bc   : > { %v1597_v11 = vsel %vm1596_vm6, %v6052_v15, %v1593_v63  ;;  %v1600_v28 = vmul.f32 %v6054_v34, %v1599_v39  ;;  %v1926_v25 = vpack.c.bf16 %v1896_v7, %v1894_v1 }
 0x3bd   : > { %v1649_v6 = vmul.f32 %v1597_v11, %v7123_v55  ;;  %2077 = vmatmul.bf16.vlgmr.msra.gmra.mxu0 %v1925_v24 }
 0x3be   : > { %v1601_v9 = vmul.f32 0.5, %v1600_v28  ;;  %2126 = vmatmul.bf16.vlgmr.msra.gmra.mxu1 %v1926_v25  ;;  %v1809_v23 = vpop.f32.mrf.mxu2 }
 0x3bf   : > { %v1858_v19 = vpop.f32.mrf.mxu3  ;;  %v1665_v61 = vmul.f32 %v1649_v6, %v7065_v54  ;;  %v1810_v15 = vadd.f32 %v1809_v23, %v7240_v45 }
 0x3c0   : > { %v1602_v60 = vsub.f32 1.5, %v1601_v9  ;;  %v1859_v43 = vadd.f32 %v1858_v19, %v7248_v4 }
 0x3c1   : > { %v6056_v27 = vpop.eup %6055  ;;  %v7271_v0 = vadd.f32 %v1665_v61, %v7080_v20  ;;  %v1897_v37 = vmax.f32 %v1810_v15, 0.0  ;;  %v1443_v61 = vpop.xlane.xlu0 %1442 }
 0x3c2   : > { %v1603_v46 = vmul.f32 %v6054_v34, %v1602_v60  ;;  %v1609_v55 = vmul.f32 %v6056_v27, %v1475_v57  ;;  %vm1615_vm10 = vweird.f32 %v6056_v27  ;;  %v1898_v31 = vmax.f32 %v1859_v43, 0.0 }
 0x3c3   : > { %v1691_v59 = vpack.c.bf16 %v7271_v0, %v7268_v29  ;;  %vm1616_vm12 = vmor %vm1614_vm11, %vm1615_vm10  ;;  %v1460_v60 = vmul.f32 %v1443_v61, %v6853_v14 }
 0x3c4   : > { %v1610_v22 = vmul.f32 %v6056_v27, %v1609_v55  ;;  %v1607_v56 = vsel %vm1606_vm9, %v6054_v34, %v1603_v46 }
 0x3c5   : > { %1828 = vmatmul.bf16.gmra.mxu2 %v1691_v59  ;;  %1877 = vmatmul.bf16.gmra.mxu3 %v1691_v59  ;;  %v1650_v2 = vmul.f32 %v1607_v56, %v7153_v42 }
 0x3c6   : > { %v1611_v35 = vmul.f32 0.5, %v1610_v22  ;;  %v1811_v47 = vpop.f32.mrf.mxu2 }
 0x3c7   : > { %v1812_v38 = vadd.f32 %v1811_v47, %v7240_v45  ;;  %v1860_v12 = vpop.f32.mrf.mxu3  ;;  %v1666_v62 = vmul.f32 %v1650_v2, %v7065_v54 }
 0x3c8   : > { %v1612_v49 = vsub.f32 1.5, %v1611_v35  ;;  %v1861_v51 = vadd.f32 %v1860_v12, %v7248_v4 }
 0x3c9   : > { %v1899_v30 = vmax.f32 %v1812_v38, 0.0  ;;  %v7284_v42 = vadd.f32 %v1666_v62, %v7080_v20 }
 0x3ca   : > { %v1613_v8 = vmul.f32 %v6056_v27, %v1612_v49  ;;  %v1900_v5 = vmax.f32 %v1861_v51, 0.0 }
 0x3cb   : > { %v1927_v48 = vpack.c.bf16 %v1899_v30, %v1897_v37 }
 0x3cc   : > { %v1617_v44 = vsel %vm1616_vm12, %v6056_v27, %v1613_v8  ;;  %v1928_v3 = vpack.c.bf16 %v1900_v5, %v1898_v31  ;;  %v1476_v27 = vadd.f32 1e-05, %v1460_v60 }
 0x3cd   : > { %2082 = vmatmul.bf16.gmra.mxu0 %v1927_v48  ;;  %v1651_v34 = vmul.f32 %v1617_v44, %v7168_v36 }
 0x3ce   : > { %2131 = vmatmul.bf16.gmra.mxu1 %v1928_v3  ;;  %v1814_v21 = vpop.f32.mrf.mxu2  ;;  %6057 = vrsqrt.f32 %v1476_v27  ;;  %vm1624_vm14 = vweird.f32 %v1476_v27 }
 0x3cf   : > { %v1863_v18 = vpop.f32.mrf.mxu3  ;;  %v1667_v63 = vmul.f32 %v1651_v34, %v7065_v54  ;;  %v1815_v39 = vadd.f32 %v1814_v21, %v7240_v45 }
 0x3d0   : > { %v1864_v36 = vadd.f32 %v1863_v18, %v7248_v4 }
 0x3d1   : > { %v7287_v57 = vadd.f32 %v1667_v63, %v7080_v20  ;;  %v1901_v25 = vmax.f32 %v1815_v39, 0.0 }
 0x3d2   : > { %v1902_v26 = vmax.f32 %v1864_v36, 0.0 }
 0x3d3   : > { %v1692_v1 = vpack.c.bf16 %v7287_v57, %v7284_v42 }
 0x3d4   : > { %v6058_v46 = vpop.eup %6057 }
 0x3d5   : > { %1833 = vmatmul.bf16.gmra.mxu2 %v1692_v1  ;;  %1882 = vmatmul.bf16.gmra.mxu3 %v1692_v1  ;;  %v1619_v55 = vmul.f32 %v6058_v46, %v1476_v27  ;;  %vm1625_vm13 = vweird.f32 %v6058_v46 }
 0x3d6   : > { %v1816_v7 = vpop.f32.mrf.mxu2  ;;  %vm1626_vm15 = vmor %vm1624_vm14, %vm1625_vm13 }
 0x3d7   : > { %v1817_v24 = vadd.f32 %v1816_v7, %v7240_v45  ;;  %v1865_v11 = vpop.f32.mrf.mxu3  ;;  %v1620_v59 = vmul.f32 %v6058_v46, %v1619_v55 }
 0x3d8   : > { %v1866_v28 = vadd.f32 %v1865_v11, %v7248_v4 }
 0x3d9   : > { %v1903_v6 = vmax.f32 %v1817_v24, 0.0  ;;  %v1621_v35 = vmul.f32 0.5, %v1620_v59 }
 0x3da   : > { %v1904_v9 = vmax.f32 %v1866_v28, 0.0 }
 0x3db   : > { %v1929_v23 = vpack.c.bf16 %v1903_v6, %v1901_v25  ;;  %v1622_v43 = vsub.f32 1.5, %v1621_v35 }
 0x3dc   : > { %v1930_v19 = vpack.c.bf16 %v1904_v9, %v1902_v26  ;;  %v7316_v26 = vld [vmem:[%s9166_s13 + $0x6] ss:$0 sm:$0xff] }
 0x3dd   : > { %2087 = vmatmul.bf16.gmra.mxu0 %v1929_v23  ;;  %v1623_v38 = vmul.f32 %v6058_v46, %v1622_v43 }
 0x3de   : > { %2136 = vmatmul.bf16.gmra.mxu1 %v1930_v19 }
 0x3df   : > { %v1627_v51 = vsel %vm1626_vm15, %v6058_v46, %v1623_v38 }
 0x3e0   : > { %v1652_v2 = vmul.f32 %v1627_v51, %v7184_v58 }
 0x3e2   : > { %v1668_v48 = vmul.f32 %v1652_v2, %v7065_v54 }
 0x3e4   : > { %v7302_v62 = vadd.f32 %v1668_v48, %v7080_v20 }
 0x410   : > { %v1445_v22 = vpop.xlane.xlu1 %1444 }
 0x411   : > { %v1461_v15 = vmul.f32 %v1445_v22, %v6853_v14 }
 0x413   : > { %v1477_v56 = vadd.f32 1e-05, %v1461_v15 }
 0x415   : > { %6059 = vrsqrt.f32 %v1477_v56  ;;  %vm1634_vm1 = vweird.f32 %v1477_v56 }
 0x41b   : > { %v6060_v47 = vpop.eup %6059 }
 0x41c   : > { %v1629_v12 = vmul.f32 %v6060_v47, %v1477_v56  ;;  %vm1635_vm0 = vweird.f32 %v6060_v47 }
 0x41d   : > { %vm1636_vm2 = vmor %vm1634_vm1, %vm1635_vm0 }
 0x41e   : > { %v1630_v49 = vmul.f32 %v6060_v47, %v1629_v12 }
 0x420   : > { %v1631_v37 = vmul.f32 0.5, %v1630_v49 }
 0x422   : > { %v1632_v30 = vsub.f32 1.5, %v1631_v37 }
 0x424   : > { %v1633_v8 = vmul.f32 %v6060_v47, %v1632_v30 }
 0x426   : > { %v1637_v31 = vsel %vm1636_vm2, %v6060_v47, %v1633_v8 }
 0x427   : > { %v1653_v5 = vmul.f32 %v1637_v31, %v7208_v32 }
 0x428   : > { %v1819_v44 = vpop.f32.mrf.mxu2  ;;  %v1868_v3 = vpop.f32.mrf.mxu3 }
 0x429   : > { %v1669_v34 = vmul.f32 %v1653_v5, %v7065_v54  ;;  %v1820_v18 = vadd.f32 %v1819_v44, %v7240_v45  ;;  %v1869_v63 = vadd.f32 %v1868_v3, %v7248_v4 }
 0x42b   : > { %v7305_v21 = vadd.f32 %v1669_v34, %v7080_v20  ;;  %v1905_v36 = vmax.f32 %v1820_v18, 0.0  ;;  %v1906_v7 = vmax.f32 %v1869_v63, 0.0 }
 0x42d   : > { %v1693_v58 = vpack.c.bf16 %v7305_v21, %v7302_v62 }
 0x42f   : > { %1838 = vmatmul.bf16.gmra.mxu2 %v1693_v58  ;;  %1887 = vmatmul.bf16.gmra.mxu3 %v1693_v58 }
 0x430   : > { %v1821_v32 = vpop.f32.mrf.mxu2  ;;  %v1870_v1 = vpop.f32.mrf.mxu3 }
 0x431   : > { %v1822_v39 = vadd.f32 %v1821_v32, %v7240_v45  ;;  %v1871_v54 = vadd.f32 %v1870_v1, %v7248_v4 }
 0x433   : > { %v1907_v24 = vmax.f32 %v1822_v39, 0.0  ;;  %v1908_v20 = vmax.f32 %v1871_v54, 0.0 }
 0x435   : > { %v1931_v11 = vpack.c.bf16 %v1907_v24, %v1905_v36  ;;  %v1932_v28 = vpack.c.bf16 %v1908_v20, %v1906_v7 }
 0x437   : > { %2092 = vmatmul.bf16.gmra.mxu0 %v1931_v11  ;;  %2141 = vmatmul.bf16.gmra.mxu1 %v1932_v28 }
 0x438   : > { %v1824_v25 = vpop.f32.mrf.mxu2  ;;  %v1873_v6 = vpop.f32.mrf.mxu3 }
 0x439   : > { %v1825_v60 = vadd.f32 %v1824_v25, %v7240_v45  ;;  %v1874_v27 = vadd.f32 %v1873_v6, %v7248_v4 }
 0x43a   : > { %v2078_v9 = vpop.f32.mrf.mxu0 }
 0x43b   : > { %v2079_v23 = vadd.f32 %v2078_v9, %v7316_v26  ;;  %v2127_v19 = vpop.f32.mrf.mxu1  ;;  %v1909_v56 = vmax.f32 %v1825_v60, 0.0  ;;  %v1910_v43 = vmax.f32 %v1874_v27, 0.0 }
 0x43d   : > { %v2128_v61 = vadd.f32 %v2127_v19, %v2079_v23 }
 0x43f   : > { %v7322_v46 = vadd.f32 %v2128_v61, %v7091_v50 }
 0x440   : > { %v1826_v55 = vpop.f32.mrf.mxu2  ;;  %v1875_v59 = vpop.f32.mrf.mxu3 }
 0x441   : > { %v1827_v22 = vadd.f32 %v1826_v55, %v7240_v45  ;;  %v1876_v15 = vadd.f32 %v1875_v59, %v7248_v4  ;;  %2183 = vadd.xlane.f32.xlu2 %v7322_v46 }
 0x442   : > { %v2080_v35 = vpop.f32.mrf.mxu0 }
 0x443   : > { %v1911_v47 = vmax.f32 %v1827_v22, 0.0  ;;  %v1912_v38 = vmax.f32 %v1876_v15, 0.0  ;;  %v2081_v12 = vadd.f32 %v2080_v35, %v7316_v26  ;;  %v2129_v49 = vpop.f32.mrf.mxu1 }
 0x445   : > { %v2130_v51 = vadd.f32 %v2129_v49, %v2081_v12  ;;  %v1933_v37 = vpack.c.bf16 %v1911_v47, %v1909_v56  ;;  %v1934_v50 = vpack.c.bf16 %v1912_v38, %v1910_v43 }
 0x447   : > { %2097 = vmatmul.bf16.gmra.mxu0 %v1933_v37  ;;  %2146 = vmatmul.bf16.gmra.mxu1 %v1934_v50  ;;  %v7329_v30 = vadd.f32 %v2130_v51, %v7094_v41 }
 0x448   : > { %v1829_v2 = vpop.f32.mrf.mxu2  ;;  %v1878_v8 = vpop.f32.mrf.mxu3 }
 0x449   : > { %2185 = vadd.xlane.f32.xlu0 %v7329_v30  ;;  %v1830_v3 = vadd.f32 %v1829_v2, %v7240_v45  ;;  %v1879_v34 = vadd.f32 %v1878_v8, %v7248_v4 }
 0x44a   : > { %v2083_v31 = vpop.f32.mrf.mxu0 }
 0x44b   : > { %v2084_v5 = vadd.f32 %v2083_v31, %v7316_v26  ;;  %v2132_v48 = vpop.f32.mrf.mxu1  ;;  %v1913_v1 = vmax.f32 %v1830_v3, 0.0  ;;  %v1914_v54 = vmax.f32 %v1879_v34, 0.0 }
 0x44d   : > { %v2133_v44 = vadd.f32 %v2132_v48, %v2084_v5 }
 0x44f   : > { %v7336_v58 = vadd.f32 %v2133_v44, %v7147_v13 }
 0x450   : > { %v1831_v18 = vpop.f32.mrf.mxu2  ;;  %v1880_v63 = vpop.f32.mrf.mxu3 }
 0x451   : > { %v1832_v41 = vadd.f32 %v1831_v18, %v7240_v45  ;;  %v1881_v32 = vadd.f32 %v1880_v63, %v7248_v4  ;;  %2187 = vadd.xlane.f32.xlu1 %v7336_v58  ;;  %v5927_v63 = vld [vmem:[%s9159_s6 + $0x38] sm:$0xff] }
 0x452   : > { %v2085_v39 = vpop.f32.mrf.mxu0  ;;  %2616 = vmatpush.bf16.msrb.mxu2 %v5927_v63 }
 0x453   : > { %v1915_v36 = vmax.f32 %v1832_v41, 0.0  ;;  %v1916_v7 = vmax.f32 %v1881_v32, 0.0  ;;  %v2086_v24 = vadd.f32 %v2085_v39, %v7316_v26  ;;  %v2134_v20 = vpop.f32.mrf.mxu1 }
 0x455   : > { %v2135_v11 = vadd.f32 %v2134_v20, %v2086_v24  ;;  %v1935_v28 = vpack.c.bf16 %v1915_v36, %v1913_v1  ;;  %v1936_v13 = vpack.c.bf16 %v1916_v7, %v1914_v54 }
 0x457   : > { %2102 = vmatmul.bf16.gmra.mxu0 %v1935_v28  ;;  %2151 = vmatmul.bf16.gmra.mxu1 %v1936_v13  ;;  %v7343_v25 = vadd.f32 %v2135_v11, %v7150_v40 }
 0x458   : > { %v1834_v6 = vpop.f32.mrf.mxu2  ;;  %v1883_v9 = vpop.f32.mrf.mxu3 }
 0x459   : > { %2189 = vadd.xlane.f32.xlu2 %v7343_v25  ;;  %v1835_v27 = vadd.f32 %v1834_v6, %v7240_v45  ;;  %v1884_v55 = vadd.f32 %v1883_v9, %v7248_v4 }
 0x45a   : > { %v2088_v23 = vpop.f32.mrf.mxu0 }
 0x45b   : > { %v2089_v19 = vadd.f32 %v2088_v23, %v7316_v26  ;;  %v2137_v61 = vpop.f32.mrf.mxu1  ;;  %v1917_v35 = vmax.f32 %v1835_v27, 0.0  ;;  %v1918_v47 = vmax.f32 %v1884_v55, 0.0 }
 0x45d   : > { %v2138_v60 = vadd.f32 %v2137_v61, %v2089_v19 }
 0x45f   : > { %v7350_v59 = vadd.f32 %v2138_v60, %v7178_v53 }
 0x460   : > { %v1836_v22 = vpop.f32.mrf.mxu2  ;;  %v1885_v15 = vpop.f32.mrf.mxu3 }
 0x461   : > { %v1837_v40 = vadd.f32 %v1836_v22, %v7240_v45  ;;  %v1886_v56 = vadd.f32 %v1885_v15, %v7248_v4  ;;  %2191 = vadd.xlane.f32.xlu0 %v7350_v59 }
 0x462   : > { %v2090_v43 = vpop.f32.mrf.mxu0 }
 0x463   : > { %v1919_v38 = vmax.f32 %v1837_v40, 0.0  ;;  %v1920_v12 = vmax.f32 %v1886_v56, 0.0  ;;  %v2091_v49 = vadd.f32 %v2090_v43, %v7316_v26  ;;  %v2139_v51 = vpop.f32.mrf.mxu1 }
 0x465   : > { %v2140_v37 = vadd.f32 %v2139_v51, %v2091_v49  ;;  %v1937_v50 = vpack.c.bf16 %v1919_v38, %v1917_v35  ;;  %v1938_v53 = vpack.c.bf16 %v1920_v12, %v1918_v47 }
 0x467   : > { %2107 = vmatmul.bf16.gmra.mxu0 %v1937_v50  ;;  %2156 = vmatmul.bf16.gmra.mxu1 %v1938_v53  ;;  %v7357_v2 = vadd.f32 %v2140_v37, %v7181_v16 }
 0x469   : > { %2193 = vadd.xlane.f32.xlu1 %v7357_v2 }
 0x4b2   : > { %v1839_v8 = vpop.f32.mrf.mxu2  ;;  %v1888_v31 = vpop.f32.mrf.mxu3 }
 0x4b3   : > { %v1840_v41 = vadd.f32 %v1839_v8, %v7240_v45  ;;  %v1889_v32 = vadd.f32 %v1888_v31, %v7248_v4  ;;  %v5924_v31 = vld [vmem:[%s9159_s6 + $0x20] sm:$0xff] }
 0x4b4   : > { %v2093_v5 = vpop.f32.mrf.mxu0  ;;  %v2142_v48 = vpop.f32.mrf.mxu1 }
 0x4b5   : > { %v2094_v44 = vadd.f32 %v2093_v5, %v7316_v26  ;;  %v2184_v3 = vpop.xlane.xlu2 %2183  ;;  %v1921_v20 = vmax.f32 %v1840_v41, 0.0  ;;  %v1922_v28 = vmax.f32 %v1889_v32, 0.0  ;;  %v5922_v32 = vld [vmem:[%s9159_s6 + $0x10] sm:$0xff] }
 0x4b6   : > { %v2215_v34 = vmul.f32 %v2184_v3, %v6853_v14 }
 0x4b7   : > { %v2143_v18 = vadd.f32 %v2142_v48, %v2094_v44 }
 0x4b8   : > { %v7367_v16 = vsub.f32 %v7322_v46, %v2215_v34 }
 0x4b9   : > { %v7371_v1 = vadd.f32 %v2143_v18, %v7224_v10 }
 0x4ba   : > { %v1841_v39 = vpop.f32.mrf.mxu2  ;;  %v1890_v54 = vpop.f32.mrf.mxu3  ;;  %v2247_v36 = vmul.f32 %v7367_v16, %v7367_v16 }
 0x4bb   : > { %v1842_v7 = vadd.f32 %v1841_v39, %v7240_v45  ;;  %v1891_v24 = vadd.f32 %v1890_v54, %v7248_v4  ;;  %2195 = vadd.xlane.f32.xlu1 %v7371_v1 }
 0x4bc   : > { %2263 = vadd.xlane.f32.xlu2 %v2247_v36  ;;  %v2095_v46 = vpop.f32.mrf.mxu0  ;;  %v2144_v11 = vpop.f32.mrf.mxu1 }
 0x4bd   : > { %v1923_v13 = vmax.f32 %v1842_v7, 0.0  ;;  %v1924_v10 = vmax.f32 %v1891_v24, 0.0  ;;  %v2096_v6 = vadd.f32 %v2095_v46, %v7316_v26  ;;  %v2186_v9 = vpop.xlane.xlu0 %2185 }
 0x4be   : > { %v2216_v23 = vmul.f32 %v2186_v9, %v6853_v14 }
 0x4bf   : > { %v2145_v19 = vadd.f32 %v2144_v11, %v2096_v6  ;;  %v1939_v61 = vpack.c.bf16 %v1923_v13, %v1921_v20  ;;  %v1940_v60 = vpack.c.bf16 %v1924_v10, %v1922_v28 }
 0x4c0   : > { %v7381_v45 = vsub.f32 %v7329_v30, %v2216_v23 }
 0x4c1   : > { %2112 = vmatmul.bf16.gmra.mxu0 %v1939_v61  ;;  %2161 = vmatmul.bf16.gmra.mxu1 %v1940_v60  ;;  %v7384_v4 = vadd.f32 %v2145_v19, %v7227_v17  ;;  %v5926_v17 = vld [vmem:[%s9159_s6 + $0x30] sm:$0xff] }
 0x4c2   : > { %v2248_v27 = vmul.f32 %v7381_v45, %v7381_v45  ;;  %2617 = vmatpush.bf16.msrb.mxu2 %v5926_v17 }
 0x4c4   : > { %2197 = vadd.xlane.f32.xlu2 %v7384_v4  ;;  %2265 = vadd.xlane.f32.xlu0 %v2248_v27  ;;  %v2188_v55 = vpop.xlane.xlu1 %2187  ;;  %v2098_v22 = vpop.f32.mrf.mxu0 }
 0x4c5   : > { %v2217_v15 = vmul.f32 %v2188_v55, %v6853_v14  ;;  %v2099_v40 = vadd.f32 %v2098_v22, %v7316_v26  ;;  %v2147_v56 = vpop.f32.mrf.mxu1 }
 0x4c7   : > { %v7392_v30 = vsub.f32 %v7336_v58, %v2217_v15  ;;  %v2148_v35 = vadd.f32 %v2147_v56, %v2099_v40 }
 0x4c9   : > { %v7398_v43 = vadd.f32 %v2148_v35, %v7243_v52  ;;  %v2249_v47 = vmul.f32 %v7392_v30, %v7392_v30  ;;  %v5925_v52 = vld [vmem:[%s9159_s6 + $0x28] sm:$0xff] }
 0x4ca   : > { %2618 = vmatpush.bf16.msrb.mxu2 %v5925_v52 }
 0x4cc   : > { %2199 = vadd.xlane.f32.xlu2 %v7398_v43  ;;  %2267 = vadd.xlane.f32.xlu0 %v2249_v47  ;;  %v2100_v38 = vpop.f32.mrf.mxu0  ;;  %v2190_v12 = vpop.xlane.xlu2 %2189 }
 0x4cd   : > { %v2101_v58 = vadd.f32 %v2100_v38, %v7316_v26  ;;  %v2149_v49 = vpop.f32.mrf.mxu1  ;;  %v2218_v51 = vmul.f32 %v2190_v12, %v6853_v14 }
 0x4ce   : > { %2619 = vmatpush.bf16.msrb.mxu2 %v5924_v31 }
 0x4cf   : > { %v2150_v37 = vadd.f32 %v2149_v49, %v2101_v58  ;;  %v7406_v50 = vsub.f32 %v7343_v25, %v2218_v51 }
 0x4d1   : > { %v2250_v53 = vmul.f32 %v7406_v50, %v7406_v50  ;;  %v7414_v8 = vadd.f32 %v2150_v37, %v7246_v33  ;;  %v5923_v33 = vld [vmem:[%s9159_s6 + $0x18] sm:$0xff] }
 0x4d2   : > { %2620 = vmatpush.bf16.msrb.mxu2 %v5923_v33 }
 0x4d3   : > { %2269 = vadd.xlane.f32.xlu1 %v2250_v53 }
 0x4d4   : > { %2201 = vadd.xlane.f32.xlu0 %v7414_v8  ;;  %v2103_v25 = vpop.f32.mrf.mxu0  ;;  %v2192_v5 = vpop.xlane.xlu0 %2191 }
 0x4d5   : > { %v2104_v48 = vadd.f32 %v2103_v25, %v7316_v26  ;;  %v2152_v44 = vpop.f32.mrf.mxu1  ;;  %v2219_v3 = vmul.f32 %v2192_v5, %v6853_v14 }
 0x4d6   : > { %2621 = vmatpush.bf16.msrb.mxu2 %v5922_v32 }
 0x4d7   : > { %v2153_v34 = vadd.f32 %v2152_v44, %v2104_v48  ;;  %v7426_v18 = vsub.f32 %v7350_v59, %v2219_v3 }
 0x4d9   : > { %v7429_v63 = vadd.f32 %v2153_v34, %v7268_v29  ;;  %v2251_v41 = vmul.f32 %v7426_v18, %v7426_v18 }
 0x4db   : > { %2271 = vadd.xlane.f32.xlu1 %v2251_v41 }
 0x4dc   : > { %2203 = vadd.xlane.f32.xlu0 %v7429_v63  ;;  %v2194_v39 = vpop.xlane.xlu1 %2193  ;;  %v2105_v54 = vpop.f32.mrf.mxu0 }
 0x4dd   : > { %v2220_v36 = vmul.f32 %v2194_v39, %v6853_v14  ;;  %v2106_v59 = vadd.f32 %v2105_v54, %v7316_v26  ;;  %v2154_v7 = vpop.f32.mrf.mxu1 }
 0x4df   : > { %v7440_v29 = vsub.f32 %v7357_v2, %v2220_v36  ;;  %v2155_v24 = vadd.f32 %v2154_v7, %v2106_v59  ;;  %v5921_v2 = vld [vmem:[%s9159_s6 + $0x8] sm:$0xff] }
 0x4e0   : > { %2622 = vmatpush.bf16.msrb.mxu2 %v5921_v2 }
 0x4e1   : > { %v2252_v20 = vmul.f32 %v7440_v29, %v7440_v29  ;;  %v7445_v46 = vadd.f32 %v2155_v24, %v7271_v0 }
 0x4e3   : > { %2273 = vadd.xlane.f32.xlu2 %v2252_v20  ;;  %2205 = vadd.xlane.f32.xlu1 %v7445_v46 }
 0x4e4   : > { %v2108_v11 = vpop.f32.mrf.mxu0 }
 0x4e5   : > { %v2109_v28 = vadd.f32 %v2108_v11, %v7316_v26  ;;  %v2157_v13 = vpop.f32.mrf.mxu1 }
 0x4e7   : > { %v2158_v10 = vadd.f32 %v2157_v13, %v2109_v28 }
 0x4e9   : > { %v7450_v6 = vadd.f32 %v2158_v10, %v7284_v42  ;;  %v5920_v42 = vld [vmem:[%s9159_s6] sm:$0xff] }
 0x4ea   : > { %2623 = vmatpush.bf16.msrb.mxu2 %v5920_v42 }
 0x4eb   : > { %2207 = vadd.xlane.f32.xlu1 %v7450_v6 }
 0x4ec   : > { %v2110_v19 = vpop.f32.mrf.mxu0 }
 0x4ed   : > { %v2111_v55 = vadd.f32 %v2110_v19, %v7316_v26  ;;  %v2159_v15 = vpop.f32.mrf.mxu1 }
 0x4ef   : > { %v2160_v40 = vadd.f32 %v2159_v15, %v2111_v55 }
 0x4f1   : > { %v7473_v49 = vadd.f32 %v2160_v40, %v7287_v57 }
 0x52e   : > { %v2196_v0 = vpop.xlane.xlu1 %2195 }
 0x52f   : > { %v2221_v9 = vmul.f32 %v2196_v0, %v6853_v14  ;;  %v2264_v23 = vpop.xlane.xlu2 %2263 }
 0x530   : > { %v2295_v61 = vmul.f32 %v2264_v23, %v6853_v14 }
 0x531   : > { %v7459_v60 = vsub.f32 %v7371_v1, %v2221_v9 }
 0x532   : > { %v2311_v27 = vadd.f32 1e-05, %v2295_v61  ;;  %v7500_v61 = vld [vmem:[%s9166_s13 + $0x7] ss:$0 sm:$0xff] }
 0x533   : > { %v2253_v22 = vmul.f32 %v7459_v60, %v7459_v60 }
 0x534   : > { %6061 = vrsqrt.f32 %v2311_v27  ;;  %vm2333_vm4 = vweird.f32 %v2311_v27 }
 0x535   : > { %2275 = vadd.xlane.f32.xlu2 %v2253_v22 }
 0x537   : > { %v2198_v56 = vpop.xlane.xlu2 %2197  ;;  %v2266_v35 = vpop.xlane.xlu0 %2265 }
 0x538   : > { %v2222_v1 = vmul.f32 %v2198_v56, %v6853_v14  ;;  %v2296_v17 = vmul.f32 %v2266_v35, %v6853_v14  ;;  %v7518_v56 = vld [vmem:[%s9166_s13 + $0x10] ss:$0 sm:$0xff] }
 0x53a   : > { %v6062_v47 = vpop.eup %6061  ;;  %v7470_v38 = vsub.f32 %v7384_v4, %v2222_v1  ;;  %v2312_v12 = vadd.f32 1e-05, %v2296_v17 }
 0x53b   : > { %v2328_v58 = vmul.f32 %v6062_v47, %v2311_v27  ;;  %vm2334_vm3 = vweird.f32 %v6062_v47 }
 0x53c   : > { %6063 = vrsqrt.f32 %v2312_v12  ;;  %v2254_v51 = vmul.f32 %v7470_v38, %v7470_v38  ;;  %vm2335_vm5 = vmor %vm2333_vm4, %vm2334_vm3  ;;  %vm2343_vm7 = vweird.f32 %v2312_v12 }
 0x53d   : > { %v2329_v37 = vmul.f32 %v6062_v47, %v2328_v58  ;;  %2209 = vadd.xlane.f32.xlu2 %v7473_v49 }
 0x53e   : > { %2277 = vadd.xlane.f32.xlu0 %v2254_v51  ;;  %v2113_v52 = vpop.f32.mrf.mxu0  ;;  %v2162_v53 = vpop.f32.mrf.mxu1 }
 0x53f   : > { %v2330_v31 = vmul.f32 0.5, %v2329_v37  ;;  %v2200_v25 = vpop.xlane.xlu2 %2199  ;;  %v2114_v4 = vadd.f32 %v2113_v52, %v7316_v26  ;;  %v2268_v5 = vpop.xlane.xlu0 %2267 }
 0x540   : > { %v2223_v48 = vmul.f32 %v2200_v25, %v6853_v14  ;;  %v2297_v57 = vmul.f32 %v2268_v5, %v6853_v14 }
 0x541   : > { %v2331_v44 = vsub.f32 1.5, %v2330_v31  ;;  %v2163_v3 = vadd.f32 %v2162_v53, %v2114_v4 }
 0x542   : > { %v6064_v33 = vpop.eup %6063  ;;  %v7482_v34 = vsub.f32 %v7398_v43, %v2223_v48  ;;  %v7484_v41 = vadd.f32 1e-05, %v2297_v57 }
 0x543   : > { %v2332_v32 = vmul.f32 %v6062_v47, %v2331_v44  ;;  %v2338_v39 = vmul.f32 %v6064_v33, %v2312_v12  ;;  %v7487_v54 = vadd.f32 %v2163_v3, %v7302_v62  ;;  %vm2344_vm6 = vweird.f32 %v6064_v33 }
 0x544   : > { %6065 = vrsqrt.f32 %v7484_v41  ;;  %v2255_v36 = vmul.f32 %v7482_v34, %v7482_v34  ;;  %vm2345_vm8 = vmor %vm2343_vm7, %vm2344_vm6  ;;  %vm2353_vm10 = vweird.f32 %v7484_v41 }
 0x545   : > { %v2339_v59 = vmul.f32 %v6064_v33, %v2338_v39  ;;  %2211 = vadd.xlane.f32.xlu2 %v7487_v54  ;;  %v2336_v7 = vsel %vm2335_vm5, %v6062_v47, %v2332_v32 }
 0x546   : > { %2279 = vadd.xlane.f32.xlu0 %v2255_v36  ;;  %v2270_v43 = vpop.xlane.xlu1 %2269  ;;  %v2115_v24 = vpop.f32.mrf.mxu0  ;;  %v2487_v2 = vmul.f32 %v2336_v7, %v7367_v16 }
 0x547   : > { %v2340_v20 = vmul.f32 0.5, %v2339_v59  ;;  %v2298_v11 = vmul.f32 %v2270_v43, %v6853_v14  ;;  %v2116_v62 = vadd.f32 %v2115_v24, %v7316_v26  ;;  %v2202_v28 = vpop.xlane.xlu0 %2201  ;;  %v2164_v13 = vpop.f32.mrf.mxu1  ;;  %v5933_v59 = vld [vmem:[%s9160_s7 + $0x28] sm:$0xff] }
 0x548   : > { %v2224_v10 = vmul.f32 %v2202_v28, %v6853_v14  ;;  %v2503_v22 = vmul.f32 %v2487_v2, %v7500_v61  ;;  %v5932_v2 = vld [vmem:[%s9160_s7 + $0x20] sm:$0xff] }
 0x549   : > { %v2341_v0 = vsub.f32 1.5, %v2340_v20  ;;  %v2314_v9 = vadd.f32 1e-05, %v2298_v11  ;;  %v2165_v23 = vadd.f32 %v2164_v13, %v2116_v62 }
 0x54a   : > { %v6066_v19 = vpop.eup %6065  ;;  %v7503_v42 = vsub.f32 %v7414_v8, %v2224_v10  ;;  %v5935_v8 = vld [vmem:[%s9160_s7 + $0x38] sm:$0xff]  ;;  %v7526_v37 = vadd.f32 %v2503_v22, %v7518_v56 }
 0x54b   : > { %v2342_v26 = vmul.f32 %v6064_v33, %v2341_v0  ;;  %v2348_v27 = vmul.f32 %v6066_v19, %v7484_v41  ;;  %6067 = vrsqrt.f32 %v2314_v9  ;;  %v7507_v16 = vadd.f32 %v2165_v23, %v7305_v21  ;;  %2737 = vmatpush.bf16.msrb.mxu3 %v5935_v8 }
 0x54c   : > { %v2256_v55 = vmul.f32 %v7503_v42, %v7503_v42  ;;  %vm2354_vm9 = vweird.f32 %v6066_v19  ;;  %vm2363_vm13 = vweird.f32 %v2314_v9 }
 0x54d   : > { %v2346_v15 = vsel %vm2345_vm8, %v6064_v33, %v2342_v26  ;;  %v2349_v40 = vmul.f32 %v6066_v19, %v2348_v27  ;;  %vm2355_vm11 = vmor %vm2353_vm10, %vm2354_vm9  ;;  %v5931_v27 = vld [vmem:[%s9160_s7 + $0x18] sm:$0xff] }
 0x54e   : > { %v2488_v35 = vmul.f32 %v2346_v15, %v7381_v45  ;;  %2213 = vadd.xlane.f32.xlu0 %v7507_v16  ;;  %2281 = vadd.xlane.f32.xlu1 %v2256_v55  ;;  %v2272_v21 = vpop.xlane.xlu1 %2271 }
 0x54f   : > { %v2350_v1 = vmul.f32 0.5, %v2349_v40  ;;  %v2299_v17 = vmul.f32 %v2272_v21, %v6853_v14  ;;  %v2204_v47 = vpop.xlane.xlu0 %2203 }
 0x550   : > { %v2504_v12 = vmul.f32 %v2488_v35, %v7500_v61  ;;  %v2225_v58 = vmul.f32 %v2204_v47, %v6853_v14 }
 0x551   : > { %v6068_v51 = vpop.eup %6067  ;;  %v2351_v52 = vsub.f32 1.5, %v2350_v1  ;;  %v2315_v53 = vadd.f32 1e-05, %v2299_v17 }
 0x552   : > { %v7529_v45 = vadd.f32 %v2504_v12, %v7518_v56  ;;  %v2358_v31 = vmul.f32 %v6068_v51, %v2314_v9  ;;  %v7532_v25 = vsub.f32 %v7429_v63, %v2225_v58  ;;  %v5934_v63 = vld [vmem:[%s9160_s7 + $0x30] sm:$0xff]  ;;  %vm2364_vm12 = vweird.f32 %v6068_v51 }
 0x553   : > { %v2352_v4 = vmul.f32 %v6066_v19, %v2351_v52  ;;  %6069 = vrsqrt.f32 %v2315_v53  ;;  %2738 = vmatpush.bf16.msrb.mxu3 %v5934_v63  ;;  %vm2365_vm14 = vmor %vm2363_vm13, %vm2364_vm12  ;;  %vm2373_vm0 = vweird.f32 %v2315_v53 }
 0x554   : > { %v2359_v5 = vmul.f32 %v6068_v51, %v2358_v31  ;;  %v2544_v48 = vpack.c.bf16 %v7529_v45, %v7526_v37  ;;  %v2257_v57 = vmul.f32 %v7532_v25, %v7532_v25 }
 0x555   : > { %v2356_v44 = vsel %vm2355_vm11, %v6066_v19, %v2352_v4 }
 0x556   : > { %v2360_v3 = vmul.f32 0.5, %v2359_v5  ;;  %2624 = vmatmul.bf16.vlgmr.msrb.gmra.mxu2 %v2544_v48  ;;  %2283 = vadd.xlane.f32.xlu1 %v2257_v57  ;;  %v2274_v33 = vpop.xlane.xlu2 %2273  ;;  %v2206_v32 = vpop.xlane.xlu1 %2205  ;;  %v2489_v43 = vmul.f32 %v2356_v44, %v7392_v30  ;;  %v5930_v57 = vld [vmem:[%s9160_s7 + $0x10] sm:$0xff] }
 0x557   : > { %v2300_v41 = vmul.f32 %v2274_v33, %v6853_v14  ;;  %v2226_v39 = vmul.f32 %v2206_v32, %v6853_v14  ;;  %2739 = vmatpush.bf16.msrb.mxu3 %v5933_v59 }
 0x558   : > { %v2361_v36 = vsub.f32 1.5, %v2360_v3 }
 0x559   : > { %v6070_v7 = vpop.eup %6069  ;;  %v2316_v24 = vadd.f32 1e-05, %v2300_v41  ;;  %v7549_v20 = vsub.f32 %v7445_v46, %v2226_v39  ;;  %v2505_v46 = vmul.f32 %v2489_v43, %v7500_v61 }
 0x55a   : > { %v2362_v11 = vmul.f32 %v6068_v51, %v2361_v36  ;;  %v2368_v62 = vmul.f32 %v6070_v7, %v2315_v53  ;;  %vm2374_vm15 = vweird.f32 %v6070_v7 }
 0x55b   : > { %6071 = vrsqrt.f32 %v2316_v24  ;;  %v2258_v28 = vmul.f32 %v7549_v20, %v7549_v20  ;;  %2740 = vmatpush.bf16.msrb.mxu3 %v5932_v2  ;;  %vm2375_vm1 = vmor %vm2373_vm0, %vm2374_vm15  ;;  %vm2383_vm3 = vweird.f32 %v2316_v24 }
 0x55c   : > { %v2366_v13 = vsel %vm2365_vm14, %v6068_v51, %v2362_v11  ;;  %v2369_v10 = vmul.f32 %v6070_v7, %v2368_v62  ;;  %v5929_v62 = vld [vmem:[%s9160_s7 + $0x8] sm:$0xff] }
 0x55d   : > { %v2490_v30 = vmul.f32 %v2366_v13, %v7406_v50  ;;  %2285 = vadd.xlane.f32.xlu2 %v2258_v28  ;;  %v7567_v50 = vadd.f32 %v2505_v46, %v7518_v56 }
 0x55e   : > { %v2370_v0 = vmul.f32 0.5, %v2369_v10  ;;  %v2208_v9 = vpop.xlane.xlu1 %2207 }
 0x55f   : > { %v2227_v23 = vmul.f32 %v2208_v9, %v6853_v14  ;;  %v2506_v19 = vmul.f32 %v2490_v30, %v7500_v61  ;;  %2741 = vmatpush.bf16.msrb.mxu3 %v5931_v27 }
 0x560   : > { %v2371_v26 = vsub.f32 1.5, %v2370_v0 }
 0x561   : > { %v6072_v55 = vpop.eup %6071  ;;  %v7564_v22 = vsub.f32 %v7450_v6, %v2227_v23  ;;  %v7570_v15 = vadd.f32 %v2506_v19, %v7518_v56 }
 0x562   : > { %v2372_v40 = vmul.f32 %v6070_v7, %v2371_v26  ;;  %v2378_v8 = vmul.f32 %v6072_v55, %v2316_v24  ;;  %vm2384_vm2 = vweird.f32 %v6072_v55 }
 0x563   : > { %v2259_v35 = vmul.f32 %v7564_v22, %v7564_v22  ;;  %v2545_v21 = vpack.c.bf16 %v7570_v15, %v7567_v50  ;;  %vm2385_vm4 = vmor %vm2383_vm3, %vm2384_vm2  ;;  %2742 = vmatpush.bf16.msrb.mxu3 %v5930_v57 }
 0x564   : > { %v2379_v1 = vmul.f32 %v6072_v55, %v2378_v8  ;;  %v2376_v6 = vsel %vm2375_vm1, %v6070_v7, %v2372_v40 }
 0x565   : > { %2287 = vadd.xlane.f32.xlu0 %v2259_v35  ;;  %v2491_v12 = vmul.f32 %v2376_v6, %v7426_v18 }
 0x566   : > { %v2380_v17 = vmul.f32 0.5, %v2379_v1  ;;  %2629 = vmatmul.bf16.gmra.mxu2 %v2545_v21 }
 0x567   : > { %v2507_v31 = vmul.f32 %v2491_v12, %v7500_v61  ;;  %2743 = vmatpush.bf16.msrb.mxu3 %v5929_v62 }
 0x568   : > { %v2381_v47 = vsub.f32 1.5, %v2380_v17 }
 0x569   : > { %v7581_v4 = vadd.f32 %v2507_v31, %v7518_v56 }
 0x56a   : > { %v2382_v58 = vmul.f32 %v6072_v55, %v2381_v47 }
 0x56c   : > { %v2386_v51 = vsel %vm2385_vm4, %v6072_v55, %v2382_v58 }
 0x56d   : > { %v2492_v52 = vmul.f32 %v2386_v51, %v7440_v29 }
 0x56f   : > { %v2508_v53 = vmul.f32 %v2492_v52, %v7500_v61 }
 0x571   : > { %v7584_v5 = vadd.f32 %v2508_v53, %v7518_v56 }
 0x573   : > { %v2546_v48 = vpack.c.bf16 %v7584_v5, %v7581_v4 }
 0x576   : > { %2634 = vmatmul.bf16.gmra.mxu2 %v2546_v48 }
 0x5a8   : > { %v2276_v18 = vpop.xlane.xlu2 %2275 }
 0x5a9   : > { %v2301_v29 = vmul.f32 %v2276_v18, %v6853_v14 }
 0x5ab   : > { %v2317_v44 = vadd.f32 1e-05, %v2301_v29 }
 0x5ad   : > { %6073 = vrsqrt.f32 %v2317_v44  ;;  %vm2393_vm6 = vweird.f32 %v2317_v44 }
 0x5b0   : > { %v2210_v3 = vpop.xlane.xlu2 %2209 }
 0x5b1   : > { %v2228_v33 = vmul.f32 %v2210_v3, %v6853_v14  ;;  %v2278_v32 = vpop.xlane.xlu0 %2277 }
 0x5b2   : > { %v2302_v63 = vmul.f32 %v2278_v32, %v6853_v14 }
 0x5b3   : > { %v6074_v41 = vpop.eup %6073  ;;  %v7595_v39 = vsub.f32 %v7473_v49, %v2228_v33 }
 0x5b4   : > { %v2388_v36 = vmul.f32 %v6074_v41, %v2317_v44  ;;  %v2318_v59 = vadd.f32 1e-05, %v2302_v63  ;;  %vm2394_vm5 = vweird.f32 %v6074_v41 }
 0x5b5   : > { %v2260_v7 = vmul.f32 %v7595_v39, %v7595_v39  ;;  %vm2395_vm7 = vmor %vm2393_vm6, %vm2394_vm5 }
 0x5b6   : > { %v2389_v43 = vmul.f32 %v6074_v41, %v2388_v36  ;;  %6075 = vrsqrt.f32 %v2318_v59  ;;  %vm2403_vm9 = vweird.f32 %v2318_v59 }
 0x5b7   : > { %2289 = vadd.xlane.f32.xlu1 %v2260_v7 }
 0x5b8   : > { %v2390_v24 = vmul.f32 0.5, %v2389_v43  ;;  %v2212_v11 = vpop.xlane.xlu2 %2211 }
 0x5b9   : > { %v2229_v28 = vmul.f32 %v2212_v11, %v6853_v14  ;;  %v2280_v13 = vpop.xlane.xlu0 %2279 }
 0x5ba   : > { %v2391_v10 = vsub.f32 1.5, %v2390_v24  ;;  %v2303_v49 = vmul.f32 %v2280_v13, %v6853_v14 }
 0x5bb   : > { %v7605_v2 = vsub.f32 %v7487_v54, %v2229_v28  ;;  %v5928_v54 = vld [vmem:[%s9160_s7] sm:$0xff] }
 0x5bc   : > { %v6076_v30 = vpop.eup %6075  ;;  %v2319_v46 = vadd.f32 1e-05, %v2303_v49  ;;  %v2392_v0 = vmul.f32 %v6074_v41, %v2391_v10  ;;  %2744 = vmatpush.bf16.msrb.mxu3 %v5928_v54 }
 0x5bd   : > { %v2398_v9 = vmul.f32 %v6076_v30, %v2318_v59  ;;  %v2261_v23 = vmul.f32 %v7605_v2, %v7605_v2  ;;  %vm2404_vm8 = vweird.f32 %v6076_v30 }
 0x5be   : > { %6077 = vrsqrt.f32 %v2319_v46  ;;  %v2396_v26 = vsel %vm2395_vm7, %v6074_v41, %v2392_v0  ;;  %vm2405_vm10 = vmor %vm2403_vm9, %vm2404_vm8  ;;  %vm2413_vm12 = vweird.f32 %v2319_v46 }
 0x5bf   : > { %v2399_v19 = vmul.f32 %v6076_v30, %v2398_v9  ;;  %2291 = vadd.xlane.f32.xlu2 %v2261_v23  ;;  %v2493_v6 = vmul.f32 %v2396_v26, %v7459_v60 }
 0x5c1   : > { %v2400_v27 = vmul.f32 0.5, %v2399_v19  ;;  %v2282_v55 = vpop.xlane.xlu1 %2281  ;;  %v2214_v40 = vpop.xlane.xlu0 %2213  ;;  %v2509_v48 = vmul.f32 %v2493_v6, %v7500_v61 }
 0x5c2   : > { %v2304_v8 = vmul.f32 %v2282_v55, %v6853_v14  ;;  %v2230_v35 = vmul.f32 %v2214_v40, %v6853_v14 }
 0x5c3   : > { %v2401_v21 = vsub.f32 1.5, %v2400_v27  ;;  %v7625_v33 = vadd.f32 %v2509_v48, %v7518_v56 }
 0x5c4   : > { %v6078_v1 = vpop.eup %6077  ;;  %v2320_v17 = vadd.f32 1e-05, %v2304_v8  ;;  %v7616_v47 = vsub.f32 %v7507_v16, %v2230_v35 }
 0x5c5   : > { %v2402_v12 = vmul.f32 %v6076_v30, %v2401_v21  ;;  %v2408_v58 = vmul.f32 %v6078_v1, %v2319_v46  ;;  %vm2414_vm11 = vweird.f32 %v6078_v1  ;;  %v7648_v21 = vld [vmem:[%s9166_s13 + $0x11] ss:$0 sm:$0xff] }
 0x5c6   : > { %6079 = vrsqrt.f32 %v2320_v17  ;;  %v2262_v51 = vmul.f32 %v7616_v47, %v7616_v47  ;;  %vm2415_vm13 = vmor %vm2413_vm12, %vm2414_vm11  ;;  %vm2423_vm15 = vweird.f32 %v2320_v17 }
 0x5c7   : > { %v2406_v52 = vsel %vm2405_vm10, %v6076_v30, %v2402_v12  ;;  %v2409_v31 = vmul.f32 %v6078_v1, %v2408_v58 }
 0x5c8   : > { %v2494_v53 = vmul.f32 %v2406_v52, %v7470_v38  ;;  %2293 = vadd.xlane.f32.xlu0 %v2262_v51 }
 0x5c9   : > { %v2410_v60 = vmul.f32 0.5, %v2409_v31  ;;  %v2284_v18 = vpop.xlane.xlu1 %2283 }
 0x5ca   : > { %v2305_v16 = vmul.f32 %v2284_v18, %v6853_v14  ;;  %v2510_v57 = vmul.f32 %v2494_v53, %v7500_v61 }
 0x5cb   : > { %v2411_v29 = vsub.f32 1.5, %v2410_v60 }
 0x5cc   : > { %v6080_v44 = vpop.eup %6079  ;;  %v2321_v3 = vadd.f32 1e-05, %v2305_v16  ;;  %v7628_v32 = vadd.f32 %v2510_v57, %v7518_v56 }
 0x5cd   : > { %v2412_v63 = vmul.f32 %v6078_v1, %v2411_v29  ;;  %v2418_v38 = vmul.f32 %v6080_v44, %v2320_v17  ;;  %vm2424_vm14 = vweird.f32 %v6080_v44 }
 0x5ce   : > { %6081 = vrsqrt.f32 %v2321_v3  ;;  %v2547_v41 = vpack.c.bf16 %v7628_v32, %v7625_v33  ;;  %vm2425_vm0 = vmor %vm2423_vm15, %vm2424_vm14  ;;  %vm2433_vm2 = vweird.f32 %v2321_v3 }
 0x5cf   : > { %v2419_v36 = vmul.f32 %v6080_v44, %v2418_v38  ;;  %v2416_v7 = vsel %vm2415_vm13, %v6078_v1, %v2412_v63 }
 0x5d0   : > { %2639 = vmatmul.bf16.gmra.mxu2 %v2547_v41  ;;  %v2286_v59 = vpop.xlane.xlu2 %2285  ;;  %v2495_v13 = vmul.f32 %v2416_v7, %v7482_v34 }
 0x5d1   : > { %v2420_v43 = vmul.f32 0.5, %v2419_v36  ;;  %v2306_v24 = vmul.f32 %v2286_v59, %v6853_v14 }
 0x5d2   : > { %v2511_v9 = vmul.f32 %v2495_v13, %v7500_v61 }
 0x5d3   : > { %v2421_v11 = vsub.f32 1.5, %v2420_v43  ;;  %v2322_v62 = vadd.f32 1e-05, %v2306_v24 }
 0x5d4   : > { %v6082_v28 = vpop.eup %6081  ;;  %v7638_v34 = vadd.f32 %v2511_v9, %v7518_v56 }
 0x5d5   : > { %v2422_v10 = vmul.f32 %v6080_v44, %v2421_v11  ;;  %v2428_v49 = vmul.f32 %v6082_v28, %v2321_v3  ;;  %6083 = vrsqrt.f32 %v2322_v62  ;;  %vm2434_vm1 = vweird.f32 %v6082_v28 }
 0x5d6   : > { %vm2435_vm3 = vmor %vm2433_vm2, %vm2434_vm1  ;;  %vm2443_vm5 = vweird.f32 %v2322_v62 }
 0x5d7   : > { %v2426_v30 = vsel %vm2425_vm0, %v6080_v44, %v2422_v10  ;;  %v2429_v46 = vmul.f32 %v6082_v28, %v2428_v49 }
 0x5d8   : > { %v2496_v0 = vmul.f32 %v2426_v30, %v7503_v42  ;;  %v2288_v24 = vpop.xlane.xlu0 %2287 }
 0x5d9   : > { %v2430_v23 = vmul.f32 0.5, %v2429_v46  ;;  %v2625_v19 = vpop.f32.mrf.mxu2  ;;  %v2307_v11 = vmul.f32 %v2288_v24, %v6853_v14 }
 0x5da   : > { %v2512_v26 = vmul.f32 %v2496_v0, %v7500_v61  ;;  %v2626_v58 = vadd.f32 %v2625_v19, %v7648_v21 }
 0x5db   : > { %v6084_v27 = vpop.eup %6083  ;;  %v2431_v55 = vsub.f32 1.5, %v2430_v23 }
 0x5dc   : > { %v2438_v40 = vmul.f32 %v6084_v27, %v2322_v62  ;;  %v7641_v54 = vadd.f32 %v2512_v26, %v7518_v56  ;;  %vm2444_vm4 = vweird.f32 %v6084_v27  ;;  %v2323_v62 = vadd.f32 1e-05, %v2307_v11 }
 0x5dd   : > { %v2432_v8 = vmul.f32 %v6082_v28, %v2431_v55  ;;  %vm2445_vm6 = vmor %vm2443_vm5, %vm2444_vm4 }
 0x5de   : > { %v2439_v35 = vmul.f32 %v6084_v27, %v2438_v40  ;;  %v2548_v42 = vpack.c.bf16 %v7641_v54, %v7638_v34  ;;  %6085 = vrsqrt.f32 %v2323_v62  ;;  %vm2453_vm8 = vweird.f32 %v2323_v62 }
 0x5df   : > { %v2436_v1 = vsel %vm2435_vm3, %v6082_v28, %v2432_v8 }
 0x5e0   : > { %v2440_v6 = vmul.f32 0.5, %v2439_v35  ;;  %2644 = vmatmul.bf16.gmra.mxu2 %v2548_v42  ;;  %v2497_v52 = vmul.f32 %v2436_v1, %v7532_v25 }
 0x5e1   : > { %v2627_v17 = vpop.f32.mrf.mxu2 }
 0x5e2   : > { %v2441_v12 = vsub.f32 1.5, %v2440_v6  ;;  %v2628_v51 = vadd.f32 %v2627_v17, %v7648_v21  ;;  %v2513_v18 = vmul.f32 %v2497_v52, %v7500_v61 }
 0x5e4   : > { %v2442_v31 = vmul.f32 %v6084_v27, %v2441_v12  ;;  %v2665_v53 = vpack.c.bf16 %v2628_v51, %v2626_v58  ;;  %v7657_v29 = vadd.f32 %v2513_v18, %v7518_v56  ;;  %v6086_v28 = vpop.eup %6085 }
 0x5e5   : > { %v2448_v13 = vmul.f32 %v6086_v28, %v2323_v62  ;;  %vm2454_vm7 = vweird.f32 %v6086_v28 }
 0x5e6   : > { %v2446_v48 = vsel %vm2445_vm6, %v6084_v27, %v2442_v31  ;;  %2745 = vmatmul.bf16.vlgmr.msrb.gmra.mxu3 %v2665_v53  ;;  %vm2455_vm9 = vmor %vm2453_vm8, %vm2454_vm7 }
 0x5e7   : > { %v2498_v60 = vmul.f32 %v2446_v48, %v7549_v20  ;;  %v2449_v10 = vmul.f32 %v6086_v28, %v2448_v13 }
 0x5e9   : > { %v2630_v16 = vpop.f32.mrf.mxu2  ;;  %v2514_v57 = vmul.f32 %v2498_v60, %v7500_v61  ;;  %v2450_v0 = vmul.f32 0.5, %v2449_v10 }
 0x5ea   : > { %v2631_v63 = vadd.f32 %v2630_v16, %v7648_v21 }
 0x5eb   : > { %v7660_v44 = vadd.f32 %v2514_v57, %v7518_v56  ;;  %v2451_v9 = vsub.f32 1.5, %v2450_v0 }
 0x5ed   : > { %v2549_v25 = vpack.c.bf16 %v7660_v44, %v7657_v29  ;;  %v2452_v55 = vmul.f32 %v6086_v28, %v2451_v9 }
 0x5ef   : > { %v2456_v35 = vsel %vm2455_vm9, %v6086_v28, %v2452_v55 }
 0x5f0   : > { %2649 = vmatmul.bf16.gmra.mxu2 %v2549_v25  ;;  %v2499_v58 = vmul.f32 %v2456_v35, %v7564_v22 }
 0x5f1   : > { %v2632_v3 = vpop.f32.mrf.mxu2 }
 0x5f2   : > { %v2633_v20 = vadd.f32 %v2632_v3, %v7648_v21  ;;  %v2515_v18 = vmul.f32 %v2499_v58, %v7500_v61 }
 0x5f4   : > { %v2666_v38 = vpack.c.bf16 %v2633_v20, %v2631_v63  ;;  %v7677_v3 = vadd.f32 %v2515_v18, %v7518_v56 }
 0x5f6   : > { %2750 = vmatmul.bf16.gmra.mxu3 %v2666_v38 }
 0x5f9   : > { %v2635_v41 = vpop.f32.mrf.mxu2 }
 0x5fa   : > { %v2636_v59 = vadd.f32 %v2635_v41, %v7648_v21 }
 0x601   : > { %v2637_v36 = vpop.f32.mrf.mxu2 }
 0x602   : > { %v2638_v7 = vadd.f32 %v2637_v36, %v7648_v21 }
 0x604   : > { %v2667_v43 = vpack.c.bf16 %v2638_v7, %v2636_v59 }
 0x606   : > { %2755 = vmatmul.bf16.gmra.mxu3 %v2667_v43 }
 0x62a   : > { %v2290_v49 = vpop.xlane.xlu1 %2289 }
 0x62b   : > { %v2308_v30 = vmul.f32 %v2290_v49, %v6853_v14 }
 0x62d   : > { %v2324_v46 = vadd.f32 1e-05, %v2308_v30 }
 0x62f   : > { %6087 = vrsqrt.f32 %v2324_v46  ;;  %vm2463_vm11 = vweird.f32 %v2324_v46 }
 0x632   : > { %v2292_v23 = vpop.xlane.xlu2 %2291 }
 0x633   : > { %v2309_v19 = vmul.f32 %v2292_v23, %v6853_v14 }
 0x635   : > { %v6088_v26 = vpop.eup %6087  ;;  %v2325_v27 = vadd.f32 1e-05, %v2309_v19 }
 0x636   : > { %v2458_v40 = vmul.f32 %v6088_v26, %v2324_v46  ;;  %vm2464_vm10 = vweird.f32 %v6088_v26 }
 0x637   : > { %6089 = vrsqrt.f32 %v2325_v27  ;;  %vm2465_vm12 = vmor %vm2463_vm11, %vm2464_vm10  ;;  %vm2473_vm14 = vweird.f32 %v2325_v27 }
 0x638   : > { %v2459_v8 = vmul.f32 %v6088_v26, %v2458_v40 }
 0x63a   : > { %v2460_v42 = vmul.f32 0.5, %v2459_v8 }
 0x63b   : > { %v2294_v1 = vpop.xlane.xlu0 %2293 }
 0x63c   : > { %v2461_v6 = vsub.f32 1.5, %v2460_v42  ;;  %v2310_v17 = vmul.f32 %v2294_v1, %v6853_v14 }
 0x63d   : > { %v6090_v12 = vpop.eup %6089 }
 0x63e   : > { %v2462_v51 = vmul.f32 %v6088_v26, %v2461_v6  ;;  %v2468_v52 = vmul.f32 %v6090_v12, %v2325_v27  ;;  %v2326_v31 = vadd.f32 1e-05, %v2310_v17  ;;  %vm2474_vm13 = vweird.f32 %v6090_v12 }
 0x63f   : > { %vm2475_vm15 = vmor %vm2473_vm14, %vm2474_vm13 }
 0x640   : > { %v2466_v53 = vsel %vm2465_vm12, %v6088_v26, %v2462_v51  ;;  %v2469_v48 = vmul.f32 %v6090_v12, %v2468_v52  ;;  %6091 = vrsqrt.f32 %v2326_v31  ;;  %vm2483_vm1 = vweird.f32 %v2326_v31 }
 0x641   : > { %v2500_v60 = vmul.f32 %v2466_v53, %v7595_v39 }
 0x642   : > { %v2470_v16 = vmul.f32 0.5, %v2469_v48 }
 0x643   : > { %v2516_v57 = vmul.f32 %v2500_v60, %v7500_v61 }
 0x644   : > { %v2471_v25 = vsub.f32 1.5, %v2470_v16 }
 0x645   : > { %v7680_v22 = vadd.f32 %v2516_v57, %v7518_v56 }
 0x646   : > { %v6092_v63 = vpop.eup %6091  ;;  %v2472_v20 = vmul.f32 %v6090_v12, %v2471_v25 }
 0x647   : > { %v2478_v38 = vmul.f32 %v6092_v63, %v2326_v31  ;;  %v2550_v41 = vpack.c.bf16 %v7680_v22, %v7677_v3  ;;  %vm2484_vm0 = vweird.f32 %v6092_v63 }
 0x648   : > { %v2476_v36 = vsel %vm2475_vm15, %v6090_v12, %v2472_v20  ;;  %vm2485_vm2 = vmor %vm2483_vm1, %vm2484_vm0 }
 0x649   : > { %v2479_v39 = vmul.f32 %v6092_v63, %v2478_v38  ;;  %2654 = vmatmul.bf16.gmra.mxu2 %v2550_v41  ;;  %v2501_v43 = vmul.f32 %v2476_v36, %v7605_v2 }
 0x64b   : > { %v2480_v59 = vmul.f32 0.5, %v2479_v39  ;;  %v2517_v28 = vmul.f32 %v2501_v43, %v7500_v61  ;;  %v5688_v43 = vld [vmem:[%s9161_s8 + $0x70] sm:$0xf] }
 0x64d   : > { %v2481_v7 = vsub.f32 1.5, %v2480_v59  ;;  %v7689_v49 = vadd.f32 %v2517_v28, %v7518_v56 }
 0x64f   : > { %v2482_v24 = vmul.f32 %v6092_v63, %v2481_v7 }
 0x651   : > { %v2486_v11 = vsel %vm2485_vm2, %v6092_v63, %v2482_v24  ;;  %v5951_v24 = vld [vmem:[%s9161_s8 + $0x74] sm:$0xf0] }
 0x652   : > { %v2502_v62 = vmul.f32 %v2486_v11, %v7616_v47  ;;  %v5950_v11 = vld [vmem:[%s9161_s8 + $0x74] sm:$0xf] }
 0x653   : > { %v2640_v13 = vpop.f32.mrf.mxu2 }
 0x654   : > { %v2518_v10 = vmul.f32 %v2502_v62, %v7500_v61  ;;  %v2641_v0 = vadd.f32 %v2640_v13, %v7648_v21  ;;  %v7701_v61 = vld [vmem:[%s9166_s13 + $0x12] ss:$0 sm:$0xff]  ;;  %v5689_v13 = vor.u32 %v5951_v24, %v5688_v43 }
 0x656   : > { %v7692_v30 = vadd.f32 %v2518_v10, %v7518_v56  ;;  %v5690_v10 = vld [vmem:[%s9161_s8 + $0x78] sm:$0xf0]  ;;  %3263 = vmatpush.bf16.msrb.mxu0 %v5689_v13 }
 0x658   : > { %v2551_v2 = vpack.c.bf16 %v7692_v30, %v7689_v49 }
 0x65a   : > { %2659 = vmatmul.bf16.gmra.mxu2 %v2551_v2 }
 0x65b   : > { %v2642_v46 = vpop.f32.mrf.mxu2 }
 0x65c   : > { %v2643_v47 = vadd.f32 %v2642_v46, %v7648_v21 }
 0x65e   : > { %v2668_v9 = vpack.c.bf16 %v2643_v47, %v2641_v0  ;;  %v5693_v47 = vor.u32 %v5950_v11, %v5690_v10 }
 0x660   : > { %2760 = vmatmul.bf16.gmra.mxu3 %v2668_v9  ;;  %3312 = vmatpush.bf16.msrb.mxu1 %v5693_v47 }
 0x663   : > { %v2645_v23 = vpop.f32.mrf.mxu2 }
 0x664   : > { %v2646_v27 = vadd.f32 %v2645_v23, %v7648_v21 }
 0x669   : > { %v2746_v19 = vpop.f32.mrf.mxu3 }
 0x66a   : > { %v2747_v56 = vadd.f32 %v2746_v19, %v7701_v61 }
 0x66b   : > { %v2647_v26 = vpop.f32.mrf.mxu2 }
 0x66c   : > { %v2648_v55 = vadd.f32 %v2647_v26, %v7648_v21  ;;  %v2786_v40 = vadd.f32 %v2747_v56, %v7526_v37 }
 0x66e   : > { %v2669_v8 = vpack.c.bf16 %v2648_v55, %v2646_v27  ;;  %2802 = vadd.xlane.f32.xlu1 %v2786_v40  ;;  %v5680_v55 = vld [vmem:[%s9161_s8 + $0x60] sm:$0xf] }
 0x670   : > { %2765 = vmatmul.bf16.gmra.mxu3 %v2669_v8  ;;  %v5948_v8 = vld [vmem:[%s9161_s8 + $0x64] sm:$0xf] }
 0x671   : > { %v2748_v35 = vpop.f32.mrf.mxu3 }
 0x672   : > { %v2749_v42 = vadd.f32 %v2748_v35, %v7701_v61 }
 0x673   : > { %v2650_v1 = vpop.f32.mrf.mxu2 }
 0x674   : > { %v2787_v6 = vadd.f32 %v2749_v42, %v7529_v45  ;;  %v2651_v51 = vadd.f32 %v2650_v1, %v7648_v21  ;;  %v5672_v1 = vld [vmem:[%s9161_s8 + $0x50] sm:$0xf] }
 0x676   : > { %2804 = vadd.xlane.f32.xlu2 %v2787_v6 }
 0x679   : > { %v2751_v17 = vpop.f32.mrf.mxu3 }
 0x67a   : > { %v2752_v12 = vadd.f32 %v2751_v17, %v7701_v61 }
 0x67b   : > { %v2652_v58 = vpop.f32.mrf.mxu2 }
 0x67c   : > { %v2653_v52 = vadd.f32 %v2652_v58, %v7648_v21  ;;  %v7713_v37 = vadd.f32 %v2752_v12, %v7567_v50  ;;  %v5946_v58 = vld [vmem:[%s9161_s8 + $0x54] sm:$0xf] }
 0x67e   : > { %v2670_v31 = vpack.c.bf16 %v2653_v52, %v2651_v51  ;;  %2806 = vadd.xlane.f32.xlu0 %v7713_v37  ;;  %v5674_v51 = vld [vmem:[%s9161_s8 + $0x58] sm:$0xf0] }
 0x680   : > { %2770 = vmatmul.bf16.gmra.mxu3 %v2670_v31 }
 0x681   : > { %v2753_v53 = vpop.f32.mrf.mxu3 }
 0x682   : > { %v2754_v48 = vadd.f32 %v2753_v53, %v7701_v61 }
 0x684   : > { %v7718_v45 = vadd.f32 %v2754_v48, %v7570_v15 }
 0x686   : > { %2808 = vadd.xlane.f32.xlu1 %v7718_v45 }
 0x689   : > { %v2756_v60 = vpop.f32.mrf.mxu3 }
 0x68a   : > { %v2757_v18 = vadd.f32 %v2756_v60, %v7701_v61  ;;  %v5664_v60 = vld [vmem:[%s9161_s8 + $0x40] sm:$0xf] }
 0x68c   : > { %v7723_v16 = vadd.f32 %v2757_v18, %v7581_v4  ;;  %v5945_v18 = vld [vmem:[%s9161_s8 + $0x44] sm:$0xf0] }
 0x68e   : > { %2810 = vadd.xlane.f32.xlu2 %v7723_v16 }
 0x691   : > { %v2758_v50 = vpop.f32.mrf.mxu3 }
 0x692   : > { %v2759_v57 = vadd.f32 %v2758_v50, %v7701_v61  ;;  %v5677_v50 = vor.u32 %v5946_v58, %v5674_v51 }
 0x694   : > { %v7728_v25 = vadd.f32 %v2759_v57, %v7584_v5 }
 0x696   : > { %2812 = vadd.xlane.f32.xlu0 %v7728_v25 }
 0x6cc   : > { %v2655_v15 = vpop.f32.mrf.mxu2 }
 0x6cd   : > { %v2656_v20 = vadd.f32 %v2655_v15, %v7648_v21 }
 0x6d4   : > { %v2657_v63 = vpop.f32.mrf.mxu2 }
 0x6d5   : > { %v2658_v38 = vadd.f32 %v2657_v63, %v7648_v21  ;;  %v5666_v63 = vld [vmem:[%s9161_s8 + $0x48] sm:$0xf0] }
 0x6d7   : > { %v2671_v41 = vpack.c.bf16 %v2658_v38, %v2656_v20  ;;  %v5665_v20 = vor.u32 %v5945_v18, %v5664_v60  ;;  %v5943_v38 = vld [vmem:[%s9161_s8 + $0x34] sm:$0xf0]  ;;  %v5632_v18 = vld [vmem:[%s9161_s8] sm:$0xf] }
 0x6d9   : > { %2775 = vmatmul.bf16.gmra.mxu3 %v2671_v41 }
 0x6dd   : > { %v2660_v4 = vpop.f32.mrf.mxu2 }
 0x6de   : > { %v2661_v62 = vadd.f32 %v2660_v4, %v7648_v21 }
 0x6e1   : > { %v2803_v39 = vpop.xlane.xlu1 %2802 }
 0x6e2   : > { %v2834_v36 = vmul.f32 %v2803_v39, %v6853_v14 }
 0x6e3   : > { %v2761_v59 = vpop.f32.mrf.mxu3 }
 0x6e4   : > { %v7734_v7 = vsub.f32 %v2786_v40, %v2834_v36  ;;  %v2762_v5 = vadd.f32 %v2761_v59, %v7701_v61  ;;  %v5949_v40 = vld [vmem:[%s9161_s8 + $0x64] sm:$0xf0]  ;;  %v5942_v36 = vld [vmem:[%s9161_s8 + $0x34] sm:$0xf]  ;;  %v5658_v59 = vld [vmem:[%s9161_s8 + $0x38] sm:$0xf0] }
 0x6e5   : > { %v2662_v28 = vpop.f32.mrf.mxu2  ;;  %v5681_v42 = vor.u32 %v5949_v40, %v5680_v55  ;;  %v5661_v13 = vor.u32 %v5942_v36, %v5658_v59 }
 0x6e6   : > { %v2663_v2 = vadd.f32 %v2662_v28, %v7648_v21  ;;  %v2866_v46 = vmul.f32 %v7734_v7, %v7734_v7  ;;  %v7754_v0 = vadd.f32 %v2762_v5, %v7625_v33  ;;  %v5941_v28 = vld [vmem:[%s9161_s8 + $0x24] sm:$0xf0] }
 0x6e7   : > { %3264 = vmatpush.bf16.msrb.mxu0 %v5681_v42 }
 0x6e8   : > { %v2672_v9 = vpack.c.bf16 %v2663_v2, %v2661_v62  ;;  %2882 = vadd.xlane.f32.xlu1 %v2866_v46  ;;  %2814 = vadd.xlane.f32.xlu0 %v7754_v0  ;;  %v5648_v62 = vld [vmem:[%s9161_s8 + $0x20] sm:$0xf]  ;;  %v5650_v46 = vld [vmem:[%s9161_s8 + $0x28] sm:$0xf0] }
 0x6e9   : > { %v2805_v23 = vpop.xlane.xlu2 %2804  ;;  %v5649_v47 = vor.u32 %v5941_v28, %v5648_v62 }
 0x6ea   : > { %v2835_v19 = vmul.f32 %v2805_v23, %v6853_v14  ;;  %2780 = vmatmul.bf16.gmra.mxu3 %v2672_v9 }
 0x6eb   : > { %v2763_v56 = vpop.f32.mrf.mxu3 }
 0x6ec   : > { %v7758_v26 = vsub.f32 %v2787_v6, %v2835_v19  ;;  %v2764_v21 = vadd.f32 %v2763_v56, %v7701_v61  ;;  %v5947_v6 = vld [vmem:[%s9161_s8 + $0x54] sm:$0xf0] }
 0x6ed   : > { %v5673_v31 = vor.u32 %v5947_v6, %v5672_v1 }
 0x6ee   : > { %v2867_v33 = vmul.f32 %v7758_v26, %v7758_v26  ;;  %v7764_v27 = vadd.f32 %v2764_v21, %v7628_v32  ;;  %v5682_v32 = vld [vmem:[%s9161_s8 + $0x68] sm:$0xf0] }
 0x6ef   : > { %v5685_v12 = vor.u32 %v5948_v8, %v5682_v32  ;;  %3265 = vmatpush.bf16.msrb.mxu0 %v5673_v31 }
 0x6f0   : > { %2884 = vadd.xlane.f32.xlu2 %v2867_v33  ;;  %2816 = vadd.xlane.f32.xlu1 %v7764_v27 }
 0x6f1   : > { %v2807_v35 = vpop.xlane.xlu0 %2806  ;;  %3313 = vmatpush.bf16.msrb.mxu1 %v5685_v12 }
 0x6f2   : > { %v2836_v17 = vmul.f32 %v2807_v35, %v6853_v14 }
 0x6f3   : > { %v2766_v52 = vpop.f32.mrf.mxu3  ;;  %3266 = vmatpush.bf16.msrb.mxu0 %v5665_v20 }
 0x6f4   : > { %v7793_v53 = vsub.f32 %v7713_v37, %v2836_v17  ;;  %v2767_v48 = vadd.f32 %v2766_v52, %v7701_v61  ;;  %v5944_v37 = vld [vmem:[%s9161_s8 + $0x44] sm:$0xf]  ;;  %v5642_v17 = vld [vmem:[%s9161_s8 + $0x18] sm:$0xf0] }
 0x6f5   : > { %3314 = vmatpush.bf16.msrb.mxu1 %v5677_v50  ;;  %v5669_v4 = vor.u32 %v5944_v37, %v5666_v63  ;;  %v5937_v50 = vld [vmem:[%s9161_s8 + $0x4] sm:$0xf0] }
 0x6f6   : > { %v7803_v57 = vadd.f32 %v2767_v48, %v7638_v34  ;;  %v2868_v15 = vmul.f32 %v7793_v53, %v7793_v53  ;;  %v5656_v34 = vld [vmem:[%s9161_s8 + $0x30] sm:$0xf]  ;;  %v5633_v20 = vor.u32 %v5937_v50, %v5632_v18 }
 0x6f7   : > { %v5657_v43 = vor.u32 %v5943_v38, %v5656_v34  ;;  %v5634_v34 = vld [vmem:[%s9161_s8 + $0x8] sm:$0xf0]  ;;  %v7948_v18 = vld [vmem:[%s9166_s13 + $0x13] ss:$0 sm:$0xff] }
 0x6f8   : > { %2818 = vadd.xlane.f32.xlu1 %v7803_v57  ;;  %2886 = vadd.xlane.f32.xlu2 %v2868_v15  ;;  %v5936_v15 = vld [vmem:[%s9161_s8 + $0x4] sm:$0xf] }
 0x6f9   : > { %v2809_v41 = vpop.xlane.xlu1 %2808  ;;  %3315 = vmatpush.bf16.msrb.mxu1 %v5669_v4  ;;  %3267 = vmatpush.bf16.msrb.mxu0 %v5657_v43 }
 0x6fa   : > { %v2837_v39 = vmul.f32 %v2809_v41, %v6853_v14  ;;  %v5637_v41 = vor.u32 %v5936_v15, %v5634_v34 }
 0x6fb   : > { %v2768_v5 = vpop.f32.mrf.mxu3 }
 0x6fc   : > { %v7828_v24 = vsub.f32 %v7718_v45, %v2837_v39  ;;  %v2769_v11 = vadd.f32 %v2768_v5, %v7701_v61  ;;  %v5940_v45 = vld [vmem:[%s9161_s8 + $0x24] sm:$0xf] }
 0x6fd   : > { %3316 = vmatpush.bf16.msrb.mxu1 %v5661_v13  ;;  %v5653_v23 = vor.u32 %v5940_v45, %v5650_v46  ;;  %3268 = vmatpush.bf16.msrb.mxu0 %v5649_v47 }
 0x6fe   : > { %v2869_v10 = vmul.f32 %v7828_v24, %v7828_v24  ;;  %v7840_v2 = vadd.f32 %v2769_v11, %v7641_v54 }
 0x700   : > { %2888 = vadd.xlane.f32.xlu0 %v2869_v10  ;;  %2820 = vadd.xlane.f32.xlu2 %v7840_v2 }
 0x701   : > { %v2811_v9 = vpop.xlane.xlu2 %2810  ;;  %3317 = vmatpush.bf16.msrb.mxu1 %v5653_v23 }
 0x702   : > { %v2838_v19 = vmul.f32 %v2811_v9, %v6853_v14 }
 0x703   : > { %v2771_v54 = vpop.f32.mrf.mxu3 }
 0x704   : > { %v7851_v56 = vsub.f32 %v7723_v16, %v2838_v19  ;;  %v2772_v21 = vadd.f32 %v2771_v54, %v7701_v61 }
 0x706   : > { %v2870_v33 = vmul.f32 %v7851_v56, %v7851_v56  ;;  %v7857_v55 = vadd.f32 %v2772_v21, %v7657_v29  ;;  %v5640_v29 = vld [vmem:[%s9161_s8 + $0x10] sm:$0xf] }
 0x708   : > { %2890 = vadd.xlane.f32.xlu0 %v2870_v33  ;;  %2822 = vadd.xlane.f32.xlu2 %v7857_v55 }
 0x709   : > { %v2813_v40 = vpop.xlane.xlu0 %2812 }
 0x70a   : > { %v2839_v8 = vmul.f32 %v2813_v40, %v6853_v14 }
 0x70b   : > { %v2773_v35 = vpop.f32.mrf.mxu3 }
 0x70c   : > { %v7862_v42 = vsub.f32 %v7728_v25, %v2839_v8  ;;  %v2774_v16 = vadd.f32 %v2773_v35, %v7701_v61  ;;  %v5939_v25 = vld [vmem:[%s9161_s8 + $0x14] sm:$0xf0] }
 0x70d   : > { %v5641_v6 = vor.u32 %v5939_v25, %v5640_v29 }
 0x70e   : > { %v7866_v32 = vadd.f32 %v2774_v16, %v7660_v44  ;;  %v2871_v1 = vmul.f32 %v7862_v42, %v7862_v42  ;;  %v5938_v44 = vld [vmem:[%s9161_s8 + $0x14] sm:$0xf] }
 0x70f   : > { %3269 = vmatpush.bf16.msrb.mxu0 %v5641_v6  ;;  %v5645_v12 = vor.u32 %v5938_v44, %v5642_v17 }
 0x710   : > { %2824 = vadd.xlane.f32.xlu0 %v7866_v32  ;;  %2892 = vadd.xlane.f32.xlu1 %v2871_v1 }
 0x711   : > { %3318 = vmatpush.bf16.msrb.mxu1 %v5645_v12 }
 0x713   : > { %3270 = vmatpush.bf16.msrb.mxu0 %v5633_v20 }
 0x715   : > { %3319 = vmatpush.bf16.msrb.mxu1 %v5637_v41  ;;  %v5959_v41 = vld [vmem:[%s9162_s9 + $0x38] sm:$0xff] }
 0x716   : > { %3537 = vmatpush.bf16.msra.mxu2 %v5959_v41 }
 0x75b   : > { %v2883_v58 = vpop.xlane.xlu1 %2882  ;;  %v2815_v51 = vpop.xlane.xlu0 %2814 }
 0x75c   : > { %v2914_v52 = vmul.f32 %v2883_v58, %v6853_v14  ;;  %v2840_v31 = vmul.f32 %v2815_v51, %v6853_v14  ;;  %v2776_v48 = vpop.f32.mrf.mxu3 }
 0x75d   : > { %v2777_v60 = vadd.f32 %v2776_v48, %v7701_v61 }
 0x75e   : > { %v2930_v37 = vadd.f32 1e-05, %v2914_v52  ;;  %v7896_v63 = vsub.f32 %v7754_v0, %v2840_v31 }
 0x75f   : > { %v7902_v38 = vadd.f32 %v2777_v60, %v7677_v3 }
 0x760   : > { %6093 = vrsqrt.f32 %v2930_v37  ;;  %v2872_v4 = vmul.f32 %v7896_v63, %v7896_v63  ;;  %vm2952_vm4 = vweird.f32 %v2930_v37 }
 0x761   : > { %2826 = vadd.xlane.f32.xlu0 %v7902_v38 }
 0x762   : > { %2894 = vadd.xlane.f32.xlu1 %v2872_v4  ;;  %v7971_v4 = vld [vmem:[%s9166_s13 + $0x14] ss:$0 sm:$0xff] }
 0x763   : > { %v2885_v0 = vpop.xlane.xlu2 %2884  ;;  %v2817_v39 = vpop.xlane.xlu1 %2816 }
 0x764   : > { %v2915_v36 = vmul.f32 %v2885_v0, %v6853_v14  ;;  %v2841_v59 = vmul.f32 %v2817_v39, %v6853_v14  ;;  %v2778_v5 = vpop.f32.mrf.mxu3 }
 0x765   : > { %v2779_v3 = vadd.f32 %v2778_v5, %v7701_v61 }
 0x766   : > { %v6094_v43 = vpop.eup %6093  ;;  %v2931_v11 = vadd.f32 1e-05, %v2915_v36  ;;  %v7911_v62 = vsub.f32 %v7764_v27, %v2841_v59 }
 0x767   : > { %v2947_v28 = vmul.f32 %v6094_v43, %v2930_v37  ;;  %v7914_v13 = vadd.f32 %v2779_v3, %v7680_v22  ;;  %vm2953_vm3 = vweird.f32 %v6094_v43  ;;  %v5958_v3 = vld [vmem:[%s9162_s9 + $0x30] sm:$0xff] }
 0x768   : > { %6095 = vrsqrt.f32 %v2931_v11  ;;  %v2873_v10 = vmul.f32 %v7911_v62, %v7911_v62  ;;  %vm2954_vm5 = vmor %vm2952_vm4, %vm2953_vm3  ;;  %vm2962_vm7 = vweird.f32 %v2931_v11  ;;  %3538 = vmatpush.bf16.msra.mxu2 %v5958_v3 }
 0x769   : > { %v2948_v45 = vmul.f32 %v6094_v43, %v2947_v28 }
 0x76a   : > { %2896 = vadd.xlane.f32.xlu2 %v2873_v10  ;;  %2828 = vadd.xlane.f32.xlu1 %v7914_v13 }
 0x76b   : > { %v2949_v46 = vmul.f32 0.5, %v2948_v45  ;;  %v2819_v47 = vpop.xlane.xlu1 %2818  ;;  %v2887_v9 = vpop.xlane.xlu2 %2886 }
 0x76c   : > { %v2842_v23 = vmul.f32 %v2819_v47, %v6853_v14  ;;  %v2916_v27 = vmul.f32 %v2887_v9, %v6853_v14 }
 0x76d   : > { %v2950_v19 = vsub.f32 1.5, %v2949_v46  ;;  %v2781_v54 = vpop.f32.mrf.mxu3 }
 0x76e   : > { %v6096_v21 = vpop.eup %6095  ;;  %v7922_v22 = vsub.f32 %v7803_v57, %v2842_v23  ;;  %v7924_v33 = vadd.f32 1e-05, %v2916_v27  ;;  %v2782_v40 = vadd.f32 %v2781_v54, %v7701_v61 }
 0x76f   : > { %v2951_v8 = vmul.f32 %v6094_v43, %v2950_v19  ;;  %v2957_v35 = vmul.f32 %v6096_v21, %v2931_v11  ;;  %vm2963_vm6 = vweird.f32 %v6096_v21 }
 0x770   : > { %6097 = vrsqrt.f32 %v7924_v33  ;;  %v2874_v16 = vmul.f32 %v7922_v22, %v7922_v22  ;;  %v7931_v1 = vadd.f32 %v2782_v40, %v7689_v49  ;;  %vm2964_vm8 = vmor %vm2962_vm7, %vm2963_vm6  ;;  %vm2972_vm10 = vweird.f32 %v7924_v33  ;;  %v5965_v40 = vld [vmem:[%s9162_s9 + $0x68] sm:$0xff] }
 0x771   : > { %v2958_v29 = vmul.f32 %v6096_v21, %v2957_v35  ;;  %v2955_v57 = vsel %vm2954_vm5, %v6094_v43, %v2951_v8  ;;  %v5966_v43 = vld [vmem:[%s9162_s9 + $0x70] sm:$0xff] }
 0x772   : > { %2898 = vadd.xlane.f32.xlu2 %v2874_v16  ;;  %2830 = vadd.xlane.f32.xlu1 %v7931_v1  ;;  %v3106_v49 = vmul.f32 %v2955_v57, %v7734_v7 }
 0x773   : > { %v2959_v25 = vmul.f32 0.5, %v2958_v29  ;;  %v2821_v6 = vpop.xlane.xlu2 %2820  ;;  %v2889_v44 = vpop.xlane.xlu0 %2888 }
 0x774   : > { %v2843_v17 = vmul.f32 %v2821_v6, %v6853_v14  ;;  %v2917_v12 = vmul.f32 %v2889_v44, %v6853_v14  ;;  %v3122_v20 = vmul.f32 %v3106_v49, %v7948_v18  ;;  %v5964_v6 = vld [vmem:[%s9162_s9 + $0x60] sm:$0xff] }
 0x775   : > { %v2960_v58 = vsub.f32 1.5, %v2959_v25  ;;  %v2783_v51 = vpop.f32.mrf.mxu3  ;;  %v5956_v25 = vld [vmem:[%s9162_s9 + $0x20] sm:$0xff] }
 0x776   : > { %v7936_v52 = vpop.eup %6097  ;;  %v7940_v31 = vsub.f32 %v7840_v2, %v2843_v17  ;;  %v7942_v48 = vadd.f32 1e-05, %v2917_v12  ;;  %v2784_v60 = vadd.f32 %v2783_v51, %v7701_v61  ;;  %v7983_v10 = vadd.f32 %v3122_v20, %v7971_v4 }
 0x777   : > { %v2961_v50 = vmul.f32 %v6096_v21, %v2960_v58  ;;  %v2967_v15 = vmul.f32 %v7936_v52, %v7924_v33  ;;  %vm2973_vm9 = vweird.f32 %v7936_v52 }
 0x778   : > { %6099 = vrsqrt.f32 %v7942_v48  ;;  %v7954_v7 = vadd.f32 %v2784_v60, %v7692_v30  ;;  %v2875_v2 = vmul.f32 %v7940_v31, %v7940_v31  ;;  %v5967_v30 = vld [vmem:[%s9162_s9 + $0x78] sm:$0xff]  ;;  %vm7999_vm11 = vmor %vm2972_vm10, %vm2973_vm9  ;;  %vm2982_vm13 = vweird.f32 %v7942_v48 }
 0x779   : > { %v2965_v61 = vsel %vm2964_vm8, %v6096_v21, %v2961_v50  ;;  %v2968_v37 = vmul.f32 %v7936_v52, %v2967_v15  ;;  %3586 = vmatpush.bf16.msra.mxu3 %v5967_v30  ;;  %v5957_v21 = vld [vmem:[%s9162_s9 + $0x28] sm:$0xff]  ;;  %v5955_v50 = vld [vmem:[%s9162_s9 + $0x18] sm:$0xff] }
 0x77a   : > { %v3107_v34 = vmul.f32 %v2965_v61, %v7758_v26  ;;  %2832 = vadd.xlane.f32.xlu2 %v7954_v7  ;;  %2900 = vadd.xlane.f32.xlu0 %v2875_v2 }
 0x77b   : > { %v2969_v0 = vmul.f32 0.5, %v2968_v37  ;;  %v2823_v39 = vpop.xlane.xlu2 %2822  ;;  %v2891_v36 = vpop.xlane.xlu0 %2890  ;;  %3539 = vmatpush.bf16.msra.mxu2 %v5957_v21 }
 0x77c   : > { %v3123_v26 = vmul.f32 %v3107_v34, %v7948_v18  ;;  %v2844_v59 = vmul.f32 %v2823_v39, %v6853_v14  ;;  %v2918_v5 = vmul.f32 %v2891_v36, %v6853_v14 }
 0x77d   : > { %v2970_v11 = vsub.f32 1.5, %v2969_v0  ;;  %3587 = vmatpush.bf16.msra.mxu3 %v5966_v43 }
 0x77e   : > { %v6100_v28 = vpop.eup %6099  ;;  %v7986_v45 = vadd.f32 %v3123_v26, %v7971_v4  ;;  %v7989_v46 = vsub.f32 %v7857_v55, %v2844_v59  ;;  %v2934_v47 = vadd.f32 1e-05, %v2918_v5 }
 0x77f   : > { %v2971_v9 = vmul.f32 %v7936_v52, %v2970_v11  ;;  %v2977_v23 = vmul.f32 %v6100_v28, %v7942_v48  ;;  %vm2983_vm12 = vweird.f32 %v6100_v28  ;;  %3540 = vmatpush.bf16.msra.mxu2 %v5956_v25 }
 0x780   : > { %6101 = vrsqrt.f32 %v2934_v47  ;;  %v3154_v27 = vpack.c.bf16 %v7986_v45, %v7983_v10  ;;  %v2876_v19 = vmul.f32 %v7989_v46, %v7989_v46  ;;  %vm2984_vm14 = vmor %vm2982_vm13, %vm2983_vm12  ;;  %vm2992_vm0 = vweird.f32 %v2934_v47 }
 0x781   : > { %v2978_v55 = vmul.f32 %v6100_v28, %v2977_v23  ;;  %v2975_v8 = vsel %vm7999_vm11, %v7936_v52, %v2971_v9  ;;  %3588 = vmatpush.bf16.msra.mxu3 %v5965_v40 }
 0x782   : > { %3271 = vmatmul.bf16.vlgmr.msrb.gmra.mxu0 %v3154_v27  ;;  %3320 = vmatmul.bf16.vlgmr.msrb.gmra.mxu1 %v3154_v27  ;;  %v3108_v12 = vmul.f32 %v2975_v8, %v7793_v53  ;;  %v5963_v53 = vld [vmem:[%s9162_s9 + $0x58] sm:$0xff] }
 0x783   : > { %v2979_v33 = vmul.f32 0.5, %v2978_v55  ;;  %2902 = vadd.xlane.f32.xlu0 %v2876_v19  ;;  %v2893_v35 = vpop.xlane.xlu1 %2892  ;;  %v2825_v16 = vpop.xlane.xlu0 %2824  ;;  %3541 = vmatpush.bf16.msra.mxu2 %v5955_v50  ;;  %v5962_v55 = vld [vmem:[%s9162_s9 + $0x50] sm:$0xff] }
 0x784   : > { %v2919_v29 = vmul.f32 %v2893_v35, %v6853_v14  ;;  %v2845_v57 = vmul.f32 %v2825_v16, %v6853_v14  ;;  %v3124_v2 = vmul.f32 %v3108_v12, %v7948_v18 }
 0x785   : > { %v2980_v44 = vsub.f32 1.5, %v2979_v33  ;;  %3589 = vmatpush.bf16.msra.mxu3 %v5964_v6 }
 0x786   : > { %v6102_v17 = vpop.eup %6101  ;;  %v2935_v58 = vadd.f32 1e-05, %v2919_v29  ;;  %v8022_v51 = vsub.f32 %v7866_v32, %v2845_v57  ;;  %v8037_v41 = vadd.f32 %v3124_v2, %v7971_v4 }
 0x787   : > { %v2981_v52 = vmul.f32 %v6100_v28, %v2980_v44  ;;  %v2987_v49 = vmul.f32 %v6102_v17, %v2934_v47  ;;  %vm2993_vm15 = vweird.f32 %v6102_v17 }
 0x788   : > { %6103 = vrsqrt.f32 %v2935_v58  ;;  %v2877_v60 = vmul.f32 %v8022_v51, %v8022_v51  ;;  %vm2994_vm1 = vmor %vm2992_vm0, %vm2993_vm15  ;;  %vm3002_vm3 = vweird.f32 %v2935_v58 }
 0x789   : > { %v2985_v32 = vsel %vm2984_vm14, %v6100_v28, %v2981_v52  ;;  %v2988_v15 = vmul.f32 %v6102_v17, %v2987_v49  ;;  %3590 = vmatpush.bf16.msra.mxu3 %v5963_v53  ;;  %v5953_v52 = vld [vmem:[%s9162_s9 + $0x8] sm:$0xff] }
 0x78a   : > { %v3109_v48 = vmul.f32 %v2985_v32, %v7828_v24  ;;  %2904 = vadd.xlane.f32.xlu1 %v2877_v60  ;;  %v5961_v49 = vld [vmem:[%s9162_s9 + $0x48] sm:$0xff] }
 0x78b   : > { %v2989_v61 = vmul.f32 0.5, %v2988_v15 }
 0x78c   : > { %v3125_v37 = vmul.f32 %v3109_v48, %v7948_v18 }
 0x78d   : > { %v2990_v20 = vsub.f32 1.5, %v2989_v61  ;;  %3591 = vmatpush.bf16.msra.mxu3 %v5962_v55 }
 0x78e   : > { %v6104_v34 = vpop.eup %6103  ;;  %v8040_v30 = vadd.f32 %v3125_v37, %v7971_v4 }
 0x78f   : > { %v2991_v0 = vmul.f32 %v6102_v17, %v2990_v20  ;;  %v2997_v39 = vmul.f32 %v6104_v34, %v2935_v58  ;;  %vm3003_vm2 = vweird.f32 %v6104_v34 }
 0x790   : > { %v3155_v24 = vpack.c.bf16 %v8040_v30, %v8037_v41  ;;  %vm3004_vm4 = vmor %vm3002_vm3, %vm3003_vm2 }
 0x791   : > { %v2998_v36 = vmul.f32 %v6104_v34, %v2997_v39  ;;  %v2995_v26 = vsel %vm2994_vm1, %v6102_v17, %v2991_v0  ;;  %3592 = vmatpush.bf16.msra.mxu3 %v5961_v49  ;;  %v5952_v0 = vld [vmem:[%s9162_s9] sm:$0xff] }
 0x792   : > { %3276 = vmatmul.bf16.gmra.mxu0 %v3155_v24  ;;  %3325 = vmatmul.bf16.gmra.mxu1 %v3155_v24  ;;  %v3110_v3 = vmul.f32 %v2995_v26, %v7851_v56  ;;  %v5960_v39 = vld [vmem:[%s9162_s9 + $0x40] sm:$0xff] }
 0x793   : > { %v2999_v59 = vmul.f32 0.5, %v2998_v36 }
 0x794   : > { %v3126_v9 = vmul.f32 %v3110_v3, %v7948_v18 }
 0x795   : > { %v3000_v5 = vsub.f32 1.5, %v2999_v59  ;;  %3593 = vmatpush.bf16.msra.mxu3 %v5960_v39 }
 0x796   : > { %v8049_v23 = vadd.f32 %v3126_v9, %v7971_v4 }
 0x797   : > { %v3001_v43 = vmul.f32 %v6104_v34, %v3000_v5 }
 0x799   : > { %v3005_v11 = vsel %vm3004_vm4, %v6104_v34, %v3001_v43 }
 0x79a   : > { %v3111_v28 = vmul.f32 %v3005_v11, %v7862_v42  ;;  %v5954_v42 = vld [vmem:[%s9162_s9 + $0x10] sm:$0xff] }
 0x79b   : > { %3542 = vmatpush.bf16.msra.mxu2 %v5954_v42 }
 0x79c   : > { %v3127_v47 = vmul.f32 %v3111_v28, %v7948_v18 }
 0x79e   : > { %v8052_v27 = vadd.f32 %v3127_v47, %v7971_v4 }
 0x79f   : > { %3543 = vmatpush.bf16.msra.mxu2 %v5953_v52 }
 0x7a0   : > { %v3156_v19 = vpack.c.bf16 %v8052_v27, %v8049_v23 }
 0x7a2   : > { %3281 = vmatmul.bf16.gmra.mxu0 %v3156_v19  ;;  %3330 = vmatmul.bf16.gmra.mxu1 %v3156_v19 }
 0x7a3   : > { %3544 = vmatpush.bf16.msra.mxu2 %v5952_v0 }
 0x7d4   : > { %v2827_v56 = vpop.xlane.xlu0 %2826 }
 0x7d5   : > { %v2895_v54 = vpop.xlane.xlu1 %2894  ;;  %v2846_v21 = vmul.f32 %v2827_v56, %v6853_v14 }
 0x7d6   : > { %v2920_v40 = vmul.f32 %v2895_v54, %v6853_v14 }
 0x7d7   : > { %v8065_v8 = vsub.f32 %v7902_v38, %v2846_v21 }
 0x7d8   : > { %v2936_v33 = vadd.f32 1e-05, %v2920_v40 }
 0x7d9   : > { %v2878_v35 = vmul.f32 %v8065_v8, %v8065_v8 }
 0x7da   : > { %6105 = vrsqrt.f32 %v2936_v33  ;;  %vm3012_vm6 = vweird.f32 %v2936_v33 }
 0x7db   : > { %2906 = vadd.xlane.f32.xlu2 %v2878_v35 }
 0x7dd   : > { %v2897_v16 = vpop.xlane.xlu2 %2896  ;;  %v2829_v29 = vpop.xlane.xlu1 %2828 }
 0x7de   : > { %v2921_v57 = vmul.f32 %v2897_v16, %v6853_v14  ;;  %v2847_v25 = vmul.f32 %v2829_v29, %v6853_v14 }
 0x7e0   : > { %v6106_v6 = vpop.eup %6105  ;;  %v2937_v44 = vadd.f32 1e-05, %v2921_v57  ;;  %v8072_v17 = vsub.f32 %v7914_v13, %v2847_v25 }
 0x7e1   : > { %v3007_v12 = vmul.f32 %v6106_v6, %v2936_v33  ;;  %vm3013_vm5 = vweird.f32 %v6106_v6 }
 0x7e2   : > { %6107 = vrsqrt.f32 %v2937_v44  ;;  %v2879_v38 = vmul.f32 %v8072_v17, %v8072_v17  ;;  %vm3014_vm7 = vmor %vm3012_vm6, %vm3013_vm5  ;;  %vm3022_vm9 = vweird.f32 %v2937_v44 }
 0x7e3   : > { %v3008_v58 = vmul.f32 %v6106_v6, %v3007_v12 }
 0x7e4   : > { %2908 = vadd.xlane.f32.xlu0 %v2879_v38 }
 0x7e5   : > { %v3009_v60 = vmul.f32 0.5, %v3008_v58  ;;  %v2899_v50 = vpop.xlane.xlu2 %2898  ;;  %v2831_v53 = vpop.xlane.xlu1 %2830 }
 0x7e6   : > { %v2922_v13 = vmul.f32 %v2899_v50, %v6853_v14  ;;  %v2848_v32 = vmul.f32 %v2831_v53, %v6853_v14  ;;  %v5565_v50 = vld [vmem:[%s9166_s13 + $0x15] ss:$8 sm:$0x3] }
 0x7e7   : > { %v3010_v15 = vsub.f32 1.5, %v3009_v60 }
 0x7e8   : > { %v6108_v48 = vpop.eup %6107  ;;  %v2938_v2 = vadd.f32 1e-05, %v2922_v13  ;;  %v8085_v61 = vsub.f32 %v7931_v1, %v2848_v32 }
 0x7e9   : > { %v3011_v37 = vmul.f32 %v6106_v6, %v3010_v15  ;;  %v3017_v20 = vmul.f32 %v6108_v48, %v2937_v44  ;;  %vm3023_vm8 = vweird.f32 %v6108_v48 }
 0x7ea   : > { %6109 = vrsqrt.f32 %v2938_v2  ;;  %v2880_v34 = vmul.f32 %v8085_v61, %v8085_v61  ;;  %vm3024_vm10 = vmor %vm3022_vm9, %vm3023_vm8  ;;  %vm3032_vm12 = vweird.f32 %v2938_v2 }
 0x7eb   : > { %v3018_v24 = vmul.f32 %v6108_v48, %v3017_v20  ;;  %v3015_v1 = vsel %vm3014_vm7, %v6106_v6, %v3011_v37  ;;  %v8120_v20 = vperm.slane %v5565_v50, 0 }
 0x7ec   : > { %2910 = vadd.xlane.f32.xlu1 %v2880_v34  ;;  %v3112_v28 = vmul.f32 %v3015_v1, %v7896_v63  ;;  %v8122_v34 = vperm.slane %v5565_v50, 1 }
 0x7ed   : > { %v3019_v36 = vmul.f32 0.5, %v3018_v24  ;;  %v2833_v26 = vpop.xlane.xlu2 %2832  ;;  %v2901_v59 = vpop.xlane.xlu0 %2900 }
 0x7ee   : > { %v2849_v5 = vmul.f32 %v2833_v26, %v6853_v14  ;;  %v2923_v3 = vmul.f32 %v2901_v59, %v6853_v14  ;;  %v3128_v40 = vmul.f32 %v3112_v28, %v7948_v18 }
 0x7ef   : > { %v3020_v43 = vsub.f32 1.5, %v3019_v36 }
 0x7f0   : > { %v6110_v11 = vpop.eup %6109  ;;  %v8099_v9 = vsub.f32 %v7954_v7, %v2849_v5  ;;  %v2939_v47 = vadd.f32 1e-05, %v2923_v3  ;;  %v8108_v57 = vadd.f32 %v3128_v40, %v7971_v4 }
 0x7f1   : > { %v3021_v19 = vmul.f32 %v6108_v48, %v3020_v43  ;;  %v3027_v56 = vmul.f32 %v6110_v11, %v2938_v2  ;;  %vm3033_vm11 = vweird.f32 %v6110_v11 }
 0x7f2   : > { %6111 = vrsqrt.f32 %v2939_v47  ;;  %v2881_v42 = vmul.f32 %v8099_v9, %v8099_v9  ;;  %vm3034_vm13 = vmor %vm3032_vm12, %vm3033_vm11  ;;  %vm3042_vm15 = vweird.f32 %v2939_v47 }
 0x7f3   : > { %v3025_v55 = vsel %vm3024_vm10, %v6108_v48, %v3021_v19  ;;  %v3028_v54 = vmul.f32 %v6110_v11, %v3027_v56 }
 0x7f4   : > { %v3113_v21 = vmul.f32 %v3025_v55, %v7911_v62  ;;  %2912 = vadd.xlane.f32.xlu2 %v2881_v42 }
 0x7f5   : > { %v3029_v63 = vmul.f32 0.5, %v3028_v54 }
 0x7f6   : > { %v2903_v33 = vpop.xlane.xlu0 %2902  ;;  %v3129_v7 = vmul.f32 %v3113_v21, %v7948_v18 }
 0x7f7   : > { %v3030_v35 = vsub.f32 1.5, %v3029_v63  ;;  %v2924_v16 = vmul.f32 %v2903_v33, %v6853_v14 }
 0x7f8   : > { %v6112_v29 = vpop.eup %6111  ;;  %v8111_v25 = vadd.f32 %v3129_v7, %v7971_v4 }
 0x7f9   : > { %v3031_v6 = vmul.f32 %v6110_v11, %v3030_v35  ;;  %v3037_v62 = vmul.f32 %v6112_v29, %v2939_v47  ;;  %v2940_v44 = vadd.f32 1e-05, %v2924_v16  ;;  %vm3043_vm14 = vweird.f32 %v6112_v29 }
 0x7fa   : > { %v3157_v12 = vpack.c.bf16 %v8111_v25, %v8108_v57  ;;  %vm3044_vm0 = vmor %vm3042_vm15, %vm3043_vm14 }
 0x7fb   : > { %v3038_v38 = vmul.f32 %v6112_v29, %v3037_v62  ;;  %6113 = vrsqrt.f32 %v2940_v44  ;;  %v3035_v58 = vsel %vm3034_vm13, %v6110_v11, %v3031_v6  ;;  %vm3052_vm2 = vweird.f32 %v2940_v44 }
 0x7fc   : > { %3286 = vmatmul.bf16.gmra.mxu0 %v3157_v12  ;;  %3335 = vmatmul.bf16.gmra.mxu1 %v3157_v12  ;;  %v3114_v53 = vmul.f32 %v3035_v58, %v7922_v22 }
 0x7fd   : > { %v3039_v52 = vmul.f32 0.5, %v3038_v38  ;;  %v2905_v49 = vpop.xlane.xlu1 %2904 }
 0x7fe   : > { %v2925_v60 = vmul.f32 %v2905_v49, %v6853_v14  ;;  %v3130_v24 = vmul.f32 %v3114_v53, %v7948_v18 }
 0x7ff   : > { %v3040_v13 = vsub.f32 1.5, %v3039_v52  ;;  %v3272_v32 = vpop.f32.mrf.mxu0  ;;  %v3321_v15 = vpop.f32.mrf.mxu1 }
 0x800   : > { %v2941_v48 = vadd.f32 1e-05, %v2925_v60  ;;  %v3273_v36 = vadd.f32 %v3272_v32, %v8120_v20  ;;  %v3322_v26 = vadd.f32 %v3321_v15, %v8122_v34  ;;  %v8130_v11 = vadd.f32 %v3130_v24, %v7971_v4 }
 0x801   : > { %v6114_v2 = vpop.eup %6113  ;;  %v3041_v37 = vmul.f32 %v6112_v29, %v3040_v13 }
 0x802   : > { %v3047_v0 = vmul.f32 %v6114_v2, %v2940_v44  ;;  %6115 = vrsqrt.f32 %v2941_v48  ;;  %vm3053_vm1 = vweird.f32 %v6114_v2  ;;  %v3361_v55 = vmax.f32 %v3273_v36, 0.0 }
 0x803   : > { %v3045_v39 = vsel %vm3044_vm0, %v6112_v29, %v3041_v37  ;;  %v3362_v54 = vmax.f32 %v3322_v26, 0.0  ;;  %vm3054_vm3 = vmor %vm3052_vm2, %vm3053_vm1  ;;  %vm3062_vm5 = vweird.f32 %v2941_v48 }
 0x804   : > { %v3115_v22 = vmul.f32 %v3045_v39, %v7940_v31  ;;  %v3048_v1 = vmul.f32 %v6114_v2, %v3047_v0 }
 0x806   : > { %v3049_v59 = vmul.f32 0.5, %v3048_v1  ;;  %v3131_v5 = vmul.f32 %v3115_v22, %v7948_v18 }
 0x807   : > { %v3274_v3 = vpop.f32.mrf.mxu0  ;;  %v3323_v43 = vpop.f32.mrf.mxu1 }
 0x808   : > { %v6116_v28 = vpop.eup %6115  ;;  %v3050_v47 = vsub.f32 1.5, %v3049_v59  ;;  %v3275_v19 = vadd.f32 %v3274_v3, %v8120_v20  ;;  %v3324_v56 = vadd.f32 %v3323_v43, %v8122_v34  ;;  %v8135_v31 = vadd.f32 %v3131_v5, %v7971_v4 }
 0x809   : > { %v3057_v42 = vmul.f32 %v6116_v28, %v2941_v48  ;;  %vm3063_vm4 = vweird.f32 %v6116_v28 }
 0x80a   : > { %v3051_v21 = vmul.f32 %v6114_v2, %v3050_v47  ;;  %v3363_v40 = vmax.f32 %v3275_v19, 0.0  ;;  %v3364_v63 = vmax.f32 %v3324_v56, 0.0  ;;  %v3158_v33 = vpack.c.bf16 %v8135_v31, %v8130_v11  ;;  %vm3064_vm6 = vmor %vm3062_vm5, %vm3063_vm4 }
 0x80b   : > { %v3058_v7 = vmul.f32 %v6116_v28, %v3057_v42 }
 0x80c   : > { %v3393_v35 = vpack.c.bf16 %v3363_v40, %v3361_v55  ;;  %v3394_v16 = vpack.c.bf16 %v3364_v63, %v3362_v54  ;;  %3291 = vmatmul.bf16.gmra.mxu0 %v3158_v33  ;;  %3340 = vmatmul.bf16.gmra.mxu1 %v3158_v33  ;;  %v3055_v29 = vsel %vm3054_vm3, %v6114_v2, %v3051_v21 }
 0x80d   : > { %v3059_v6 = vmul.f32 0.5, %v3058_v7  ;;  %v3116_v58 = vmul.f32 %v3055_v29, %v7989_v46 }
 0x80e   : > { %3545 = vmatmul.bf16.vlgmr.msra.gmra.mxu2 %v3393_v35  ;;  %3594 = vmatmul.bf16.vlgmr.msra.gmra.mxu3 %v3394_v16 }
 0x80f   : > { %v3060_v62 = vsub.f32 1.5, %v3059_v6  ;;  %v3277_v12 = vpop.f32.mrf.mxu0  ;;  %v3326_v38 = vpop.f32.mrf.mxu1  ;;  %v3132_v60 = vmul.f32 %v3116_v58, %v7948_v18 }
 0x810   : > { %v3278_v50 = vadd.f32 %v3277_v12, %v8120_v20  ;;  %v3327_v53 = vadd.f32 %v3326_v38, %v8122_v34 }
 0x811   : > { %v3061_v52 = vmul.f32 %v6116_v28, %v3060_v62  ;;  %v8148_v48 = vadd.f32 %v3132_v60, %v7971_v4 }
 0x812   : > { %v3366_v0 = vmax.f32 %v3327_v53, 0.0 }
 0x813   : > { %v3065_v44 = vsel %vm3064_vm6, %v6116_v28, %v3061_v52 }
 0x814   : > { %v3117_v49 = vmul.f32 %v3065_v44, %v8022_v51  ;;  %v3365_v51 = vmax.f32 %v3278_v50, 0.0 }
 0x816   : > { %v3133_v13 = vmul.f32 %v3117_v49, %v7948_v18 }
 0x817   : > { %v3279_v32 = vpop.f32.mrf.mxu0  ;;  %v3328_v15 = vpop.f32.mrf.mxu1 }
 0x818   : > { %v3280_v2 = vadd.f32 %v3279_v32, %v8120_v20  ;;  %v3329_v46 = vadd.f32 %v3328_v15, %v8122_v34  ;;  %v8151_v37 = vadd.f32 %v3133_v13, %v7971_v4 }
 0x81a   : > { %v3367_v39 = vmax.f32 %v3280_v2, 0.0  ;;  %v3368_v24 = vmax.f32 %v3329_v46, 0.0  ;;  %v3159_v22 = vpack.c.bf16 %v8151_v37, %v8148_v48 }
 0x81c   : > { %3296 = vmatmul.bf16.gmra.mxu0 %v3159_v22  ;;  %3345 = vmatmul.bf16.gmra.mxu1 %v3159_v22  ;;  %v3395_v1 = vpack.c.bf16 %v3367_v39, %v3365_v51  ;;  %v3396_v36 = vpack.c.bf16 %v3368_v24, %v3366_v0 }
 0x81e   : > { %3550 = vmatmul.bf16.gmra.mxu2 %v3395_v1  ;;  %3599 = vmatmul.bf16.gmra.mxu3 %v3396_v36 }
 0x81f   : > { %v3282_v26 = vpop.f32.mrf.mxu0  ;;  %v3331_v59 = vpop.f32.mrf.mxu1 }
 0x820   : > { %v3283_v5 = vadd.f32 %v3282_v26, %v8120_v20  ;;  %v3332_v3 = vadd.f32 %v3331_v59, %v8122_v34 }
 0x822   : > { %v3369_v56 = vmax.f32 %v3283_v5, 0.0  ;;  %v3370_v42 = vmax.f32 %v3332_v3, 0.0 }
 0x827   : > { %v3284_v43 = vpop.f32.mrf.mxu0  ;;  %v3333_v28 = vpop.f32.mrf.mxu1 }
 0x828   : > { %v3285_v47 = vadd.f32 %v3284_v43, %v8120_v20  ;;  %v3334_v19 = vadd.f32 %v3333_v28, %v8122_v34 }
 0x82a   : > { %v3371_v55 = vmax.f32 %v3285_v47, 0.0  ;;  %v3372_v54 = vmax.f32 %v3334_v19, 0.0 }
 0x82c   : > { %v3397_v21 = vpack.c.bf16 %v3371_v55, %v3369_v56  ;;  %v3398_v40 = vpack.c.bf16 %v3372_v54, %v3370_v42 }
 0x82e   : > { %3555 = vmatmul.bf16.gmra.mxu2 %v3397_v21  ;;  %3604 = vmatmul.bf16.gmra.mxu3 %v3398_v40 }
 0x84e   : > { %v2907_v63 = vpop.xlane.xlu2 %2906 }
 0x84f   : > { %v2926_v33 = vmul.f32 %v2907_v63, %v6853_v14 }
 0x851   : > { %v2942_v7 = vadd.f32 1e-05, %v2926_v33 }
 0x853   : > { %6117 = vrsqrt.f32 %v2942_v7  ;;  %vm3072_vm8 = vweird.f32 %v2942_v7 }
 0x857   : > { %v2909_v35 = vpop.xlane.xlu0 %2908 }
 0x858   : > { %v2927_v16 = vmul.f32 %v2909_v35, %v6853_v14 }
 0x859   : > { %v6118_v29 = vpop.eup %6117 }
 0x85a   : > { %v3067_v6 = vmul.f32 %v6118_v29, %v2942_v7  ;;  %v2943_v62 = vadd.f32 1e-05, %v2927_v16  ;;  %vm3073_vm7 = vweird.f32 %v6118_v29 }
 0x85b   : > { %vm3074_vm9 = vmor %vm3072_vm8, %vm3073_vm7 }
 0x85c   : > { %v3068_v12 = vmul.f32 %v6118_v29, %v3067_v6  ;;  %6119 = vrsqrt.f32 %v2943_v62  ;;  %vm3082_vm11 = vweird.f32 %v2943_v62 }
 0x85e   : > { %v3069_v38 = vmul.f32 0.5, %v3068_v12 }
 0x85f   : > { %v2911_v58 = vpop.xlane.xlu1 %2910 }
 0x860   : > { %v3070_v52 = vsub.f32 1.5, %v3069_v38  ;;  %v2928_v44 = vmul.f32 %v2911_v58, %v6853_v14 }
 0x862   : > { %v6120_v49 = vpop.eup %6119  ;;  %v2944_v60 = vadd.f32 1e-05, %v2928_v44  ;;  %v3071_v50 = vmul.f32 %v6118_v29, %v3070_v52 }
 0x863   : > { %v3077_v53 = vmul.f32 %v6120_v49, %v2943_v62  ;;  %vm3083_vm10 = vweird.f32 %v6120_v49 }
 0x864   : > { %6121 = vrsqrt.f32 %v2944_v60  ;;  %v3075_v32 = vsel %vm3074_vm9, %v6118_v29, %v3071_v50  ;;  %vm3084_vm12 = vmor %vm3082_vm11, %vm3083_vm10  ;;  %vm3092_vm14 = vweird.f32 %v2944_v60 }
 0x865   : > { %v3078_v13 = vmul.f32 %v6120_v49, %v3077_v53  ;;  %v3118_v39 = vmul.f32 %v3075_v32, %v8065_v8 }
 0x867   : > { %v3079_v15 = vmul.f32 0.5, %v3078_v13  ;;  %v2913_v2 = vpop.xlane.xlu2 %2912  ;;  %v3134_v5 = vmul.f32 %v3118_v39, %v7948_v18 }
 0x868   : > { %v2929_v46 = vmul.f32 %v2913_v2, %v6853_v14 }
 0x869   : > { %v3080_v51 = vsub.f32 1.5, %v3079_v15  ;;  %v8168_v19 = vadd.f32 %v3134_v5, %v7971_v4 }
 0x86a   : > { %v6122_v0 = vpop.eup %6121  ;;  %v2945_v24 = vadd.f32 1e-05, %v2929_v46 }
 0x86b   : > { %v3081_v22 = vmul.f32 %v6120_v49, %v3080_v51  ;;  %v3087_v1 = vmul.f32 %v6122_v0, %v2944_v60  ;;  %vm3093_vm13 = vweird.f32 %v6122_v0 }
 0x86c   : > { %6123 = vrsqrt.f32 %v2945_v24  ;;  %vm3094_vm15 = vmor %vm3092_vm14, %vm3093_vm13  ;;  %vm3102_vm1 = vweird.f32 %v2945_v24 }
 0x86d   : > { %v3085_v36 = vsel %vm3084_vm12, %v6120_v49, %v3081_v22  ;;  %v3088_v26 = vmul.f32 %v6122_v0, %v3087_v1 }
 0x86e   : > { %v3119_v59 = vmul.f32 %v3085_v36, %v8072_v17 }
 0x86f   : > { %v3089_v3 = vmul.f32 0.5, %v3088_v26 }
 0x870   : > { %v3135_v43 = vmul.f32 %v3119_v59, %v7948_v18 }
 0x871   : > { %v3090_v28 = vsub.f32 1.5, %v3089_v3 }
 0x872   : > { %v6124_v47 = vpop.eup %6123  ;;  %v8171_v8 = vadd.f32 %v3135_v43, %v7971_v4 }
 0x873   : > { %v3091_v56 = vmul.f32 %v6122_v0, %v3090_v28  ;;  %v3097_v42 = vmul.f32 %v6124_v47, %v2945_v24  ;;  %vm3103_vm0 = vweird.f32 %v6124_v47 }
 0x874   : > { %v3160_v55 = vpack.c.bf16 %v8171_v8, %v8168_v19  ;;  %vm3104_vm2 = vmor %vm3102_vm1, %vm3103_vm0 }
 0x875   : > { %v3098_v17 = vmul.f32 %v6124_v47, %v3097_v42  ;;  %v3095_v54 = vsel %vm3094_vm15, %v6122_v0, %v3091_v56  ;;  %v8196_v0 = vld [vmem:[%s9166_s13 + $0x16] ss:$0 sm:$0xff] }
 0x876   : > { %3301 = vmatmul.bf16.gmra.mxu0 %v3160_v55  ;;  %3350 = vmatmul.bf16.gmra.mxu1 %v3160_v55  ;;  %v3120_v7 = vmul.f32 %v3095_v54, %v8085_v61 }
 0x877   : > { %v3099_v21 = vmul.f32 0.5, %v3098_v17 }
 0x878   : > { %v3136_v6 = vmul.f32 %v3120_v7, %v7948_v18 }
 0x879   : > { %v3100_v40 = vsub.f32 1.5, %v3099_v21  ;;  %v3287_v63 = vpop.f32.mrf.mxu0  ;;  %v3336_v33 = vpop.f32.mrf.mxu1 }
 0x87a   : > { %v3288_v62 = vadd.f32 %v3287_v63, %v8120_v20  ;;  %v3337_v12 = vadd.f32 %v3336_v33, %v8122_v34  ;;  %v8184_v49 = vadd.f32 %v3136_v6, %v7971_v4 }
 0x87b   : > { %v3101_v35 = vmul.f32 %v6124_v47, %v3100_v40 }
 0x87c   : > { %v3374_v50 = vmax.f32 %v3337_v12, 0.0 }
 0x87d   : > { %v3105_v16 = vsel %vm3104_vm2, %v6124_v47, %v3101_v35 }
 0x87e   : > { %v3121_v29 = vmul.f32 %v3105_v16, %v8099_v9  ;;  %v3373_v9 = vmax.f32 %v3288_v62, 0.0 }
 0x880   : > { %v3137_v38 = vmul.f32 %v3121_v29, %v7948_v18 }
 0x881   : > { %v3289_v58 = vpop.f32.mrf.mxu0  ;;  %v3338_v52 = vpop.f32.mrf.mxu1 }
 0x882   : > { %v3290_v44 = vadd.f32 %v3289_v58, %v8120_v20  ;;  %v3339_v61 = vadd.f32 %v3338_v52, %v8122_v34  ;;  %v8187_v60 = vadd.f32 %v3137_v38, %v7971_v4 }
 0x884   : > { %v3375_v53 = vmax.f32 %v3290_v44, 0.0  ;;  %v3376_v13 = vmax.f32 %v3339_v61, 0.0  ;;  %v3161_v32 = vpack.c.bf16 %v8187_v60, %v8184_v49 }
 0x886   : > { %3306 = vmatmul.bf16.gmra.mxu0 %v3161_v32  ;;  %3355 = vmatmul.bf16.gmra.mxu1 %v3161_v32  ;;  %v3399_v18 = vpack.c.bf16 %v3375_v53, %v3373_v9  ;;  %v3400_v15 = vpack.c.bf16 %v3376_v13, %v3374_v50 }
 0x888   : > { %3560 = vmatmul.bf16.gmra.mxu2 %v3399_v18  ;;  %3609 = vmatmul.bf16.gmra.mxu3 %v3400_v15 }
 0x889   : > { %v3292_v2 = vpop.f32.mrf.mxu0  ;;  %v3341_v46 = vpop.f32.mrf.mxu1 }
 0x88a   : > { %v3293_v51 = vadd.f32 %v3292_v2, %v8120_v20  ;;  %v3342_v4 = vadd.f32 %v3341_v46, %v8122_v34 }
 0x88c   : > { %v3377_v5 = vmax.f32 %v3293_v51, 0.0  ;;  %v3378_v3 = vmax.f32 %v3342_v4, 0.0 }
 0x891   : > { %v3294_v39 = vpop.f32.mrf.mxu0  ;;  %v3343_v24 = vpop.f32.mrf.mxu1 }
 0x892   : > { %v3295_v22 = vadd.f32 %v3294_v39, %v8120_v20  ;;  %v3344_v1 = vadd.f32 %v3343_v24, %v8122_v34  ;;  %v3546_v36 = vpop.f32.mrf.mxu2  ;;  %v3595_v26 = vpop.f32.mrf.mxu3 }
 0x893   : > { %v3547_v59 = vadd.f32 %v3546_v36, %v8196_v0 }
 0x894   : > { %v3379_v43 = vmax.f32 %v3295_v22, 0.0  ;;  %v3380_v28 = vmax.f32 %v3344_v1, 0.0 }
 0x895   : > { %v3596_v47 = vadd.f32 %v3595_v26, %v3547_v59 }
 0x896   : > { %v3401_v56 = vpack.c.bf16 %v3379_v43, %v3377_v5  ;;  %v3402_v42 = vpack.c.bf16 %v3380_v28, %v3378_v3 }
 0x897   : > { %v8202_v55 = vadd.f32 %v3596_v47, %v7983_v10 }
 0x898   : > { %3565 = vmatmul.bf16.gmra.mxu2 %v3401_v56  ;;  %3614 = vmatmul.bf16.gmra.mxu3 %v3402_v42 }
 0x899   : > { %3651 = vadd.xlane.f32.xlu0 %v8202_v55  ;;  %v3297_v17 = vpop.f32.mrf.mxu0  ;;  %v3346_v54 = vpop.f32.mrf.mxu1 }
 0x89a   : > { %v3548_v21 = vpop.f32.mrf.mxu2  ;;  %v3597_v40 = vpop.f32.mrf.mxu3  ;;  %v3298_v35 = vadd.f32 %v3297_v17, %v8120_v20  ;;  %v3347_v16 = vadd.f32 %v3346_v54, %v8122_v34 }
 0x89b   : > { %v3549_v63 = vadd.f32 %v3548_v21, %v8196_v0 }
 0x89c   : > { %v3381_v52 = vmax.f32 %v3298_v35, 0.0  ;;  %v3382_v44 = vmax.f32 %v3347_v16, 0.0 }
 0x89d   : > { %v3598_v33 = vadd.f32 %v3597_v40, %v3549_v63 }
 0x89f   : > { %v8207_v7 = vadd.f32 %v3598_v33, %v7986_v45 }
 0x8a1   : > { %3653 = vadd.xlane.f32.xlu1 %v8207_v7  ;;  %v3299_v10 = vpop.f32.mrf.mxu0  ;;  %v3348_v29 = vpop.f32.mrf.mxu1 }
 0x8a2   : > { %v3300_v6 = vadd.f32 %v3299_v10, %v8120_v20  ;;  %v3349_v62 = vadd.f32 %v3348_v29, %v8122_v34  ;;  %v3551_v12 = vpop.f32.mrf.mxu2  ;;  %v3600_v38 = vpop.f32.mrf.mxu3 }
 0x8a3   : > { %v3552_v58 = vadd.f32 %v3551_v12, %v8196_v0 }
 0x8a4   : > { %v3383_v45 = vmax.f32 %v3300_v6, 0.0  ;;  %v3384_v61 = vmax.f32 %v3349_v62, 0.0 }
 0x8a5   : > { %v3601_v9 = vadd.f32 %v3600_v38, %v3552_v58 }
 0x8a6   : > { %v3403_v50 = vpack.c.bf16 %v3383_v45, %v3381_v52  ;;  %v3404_v53 = vpack.c.bf16 %v3384_v61, %v3382_v44 }
 0x8a7   : > { %v8216_v13 = vadd.f32 %v3601_v9, %v8037_v41 }
 0x8a8   : > { %3570 = vmatmul.bf16.gmra.mxu2 %v3403_v50  ;;  %3619 = vmatmul.bf16.gmra.mxu3 %v3404_v53 }
 0x8a9   : > { %3655 = vadd.xlane.f32.xlu2 %v8216_v13 }
 0x8aa   : > { %v3553_v32 = vpop.f32.mrf.mxu2  ;;  %v3602_v18 = vpop.f32.mrf.mxu3 }
 0x8ab   : > { %v3554_v15 = vadd.f32 %v3553_v32, %v8196_v0 }
 0x8ad   : > { %v3603_v2 = vadd.f32 %v3602_v18, %v3554_v15 }
 0x8af   : > { %v8221_v46 = vadd.f32 %v3603_v2, %v8040_v30 }
 0x8b1   : > { %3657 = vadd.xlane.f32.xlu0 %v8221_v46 }
 0x8b2   : > { %v3556_v51 = vpop.f32.mrf.mxu2  ;;  %v3605_v4 = vpop.f32.mrf.mxu3 }
 0x8b3   : > { %v3557_v39 = vadd.f32 %v3556_v51, %v8196_v0 }
 0x8b5   : > { %v3606_v41 = vadd.f32 %v3605_v4, %v3557_v39 }
 0x8b7   : > { %v8226_v24 = vadd.f32 %v3606_v41, %v8049_v23 }
 0x8b9   : > { %3659 = vadd.xlane.f32.xlu1 %v8226_v24 }
 0x8ba   : > { %v3558_v22 = vpop.f32.mrf.mxu2  ;;  %v3607_v36 = vpop.f32.mrf.mxu3 }
 0x8bb   : > { %v3559_v1 = vadd.f32 %v3558_v22, %v8196_v0 }
 0x8bd   : > { %v3608_v26 = vadd.f32 %v3607_v36, %v3559_v1 }
 0x8bf   : > { %v8231_v30 = vadd.f32 %v3608_v26, %v8052_v27 }
 0x8c1   : > { %3661 = vadd.xlane.f32.xlu2 %v8231_v30 }
 0x8f3   : > { %v3302_v59 = vpop.f32.mrf.mxu0  ;;  %v3351_v5 = vpop.f32.mrf.mxu1 }
 0x8f4   : > { %v3303_v3 = vadd.f32 %v3302_v59, %v8120_v20  ;;  %v3352_v43 = vadd.f32 %v3351_v5, %v8122_v34 }
 0x8f6   : > { %v3385_v42 = vmax.f32 %v3303_v3, 0.0  ;;  %v3386_v17 = vmax.f32 %v3352_v43, 0.0 }
 0x8fb   : > { %v3304_v23 = vpop.f32.mrf.mxu0  ;;  %v3353_v28 = vpop.f32.mrf.mxu1 }
 0x8fc   : > { %v3305_v47 = vadd.f32 %v3304_v23, %v8120_v20  ;;  %v3354_v56 = vadd.f32 %v3353_v28, %v8122_v34 }
 0x8fe   : > { %v3387_v54 = vmax.f32 %v3305_v47, 0.0  ;;  %v3388_v21 = vmax.f32 %v3354_v56, 0.0 }
 0x900   : > { %v3405_v27 = vpack.c.bf16 %v3387_v54, %v3385_v42  ;;  %v3406_v40 = vpack.c.bf16 %v3388_v21, %v3386_v17 }
 0x902   : > { %3575 = vmatmul.bf16.gmra.mxu2 %v3405_v27  ;;  %3624 = vmatmul.bf16.gmra.mxu3 %v3406_v40 }
 0x903   : > { %v3307_v63 = vpop.f32.mrf.mxu0  ;;  %v3356_v33 = vpop.f32.mrf.mxu1 }
 0x904   : > { %v3308_v35 = vadd.f32 %v3307_v63, %v8120_v20  ;;  %v3357_v16 = vadd.f32 %v3356_v33, %v8122_v34 }
 0x906   : > { %v3389_v58 = vmax.f32 %v3308_v35, 0.0  ;;  %v3390_v45 = vmax.f32 %v3357_v16, 0.0 }
 0x90b   : > { %v3309_v10 = vpop.f32.mrf.mxu0  ;;  %v3358_v29 = vpop.f32.mrf.mxu1 }
 0x90c   : > { %v3310_v6 = vadd.f32 %v3309_v10, %v8120_v20  ;;  %v3359_v62 = vadd.f32 %v3358_v29, %v8122_v34  ;;  %v3561_v12 = vpop.f32.mrf.mxu2  ;;  %v3610_v38 = vpop.f32.mrf.mxu3 }
 0x90d   : > { %v3562_v52 = vadd.f32 %v3561_v12, %v8196_v0  ;;  %v3652_v44 = vpop.xlane.xlu0 %3651 }
 0x90e   : > { %v3391_v61 = vmax.f32 %v3310_v6, 0.0  ;;  %v3392_v9 = vmax.f32 %v3359_v62, 0.0  ;;  %v3683_v50 = vmul.f32 %v3652_v44, %v6853_v14  ;;  %v5975_v44 = vld [vmem:[%s9163_s10 + $0x38] sm:$0xff] }
 0x90f   : > { %v3611_v53 = vadd.f32 %v3610_v38, %v3562_v52  ;;  %4076 = vmatpush.bf16.msra.mxu0 %v5975_v44 }
 0x910   : > { %v3407_v32 = vpack.c.bf16 %v3391_v61, %v3389_v58  ;;  %v3408_v18 = vpack.c.bf16 %v3392_v9, %v3390_v45  ;;  %v8245_v15 = vsub.f32 %v8202_v55, %v3683_v50  ;;  %v5973_v45 = vld [vmem:[%s9163_s10 + $0x28] sm:$0xff]  ;;  %v5971_v61 = vld [vmem:[%s9163_s10 + $0x18] sm:$0xff]  ;;  %v5970_v9 = vld [vmem:[%s9163_s10 + $0x10] sm:$0xff] }
 0x911   : > { %v8248_v20 = vadd.f32 %v3611_v53, %v8108_v57 }
 0x912   : > { %3580 = vmatmul.bf16.gmra.mxu2 %v3407_v32  ;;  %3629 = vmatmul.bf16.gmra.mxu3 %v3408_v18  ;;  %v3715_v34 = vmul.f32 %v8245_v15, %v8245_v15  ;;  %v5969_v32 = vld [vmem:[%s9163_s10 + $0x8] sm:$0xff] }
 0x913   : > { %3663 = vadd.xlane.f32.xlu2 %v8248_v20 }
 0x914   : > { %3731 = vadd.xlane.f32.xlu0 %v3715_v34  ;;  %v3563_v2 = vpop.f32.mrf.mxu2  ;;  %v3612_v51 = vpop.f32.mrf.mxu3 }
 0x915   : > { %v3564_v4 = vadd.f32 %v3563_v2, %v8196_v0  ;;  %v3654_v39 = vpop.xlane.xlu1 %3653 }
 0x916   : > { %v3684_v41 = vmul.f32 %v3654_v39, %v6853_v14 }
 0x917   : > { %v3613_v55 = vadd.f32 %v3612_v51, %v3564_v4 }
 0x918   : > { %v8256_v22 = vsub.f32 %v8207_v7, %v3684_v41 }
 0x919   : > { %v8259_v57 = vadd.f32 %v3613_v55, %v8111_v25  ;;  %v5968_v55 = vld [vmem:[%s9163_s10] sm:$0xff] }
 0x91a   : > { %v3716_v1 = vmul.f32 %v8256_v22, %v8256_v22 }
 0x91c   : > { %3733 = vadd.xlane.f32.xlu1 %v3716_v1  ;;  %3665 = vadd.xlane.f32.xlu0 %v8259_v57  ;;  %v3656_v36 = vpop.xlane.xlu2 %3655  ;;  %v3566_v26 = vpop.f32.mrf.mxu2 }
 0x91d   : > { %v3685_v59 = vmul.f32 %v3656_v36, %v6853_v14  ;;  %v3567_v5 = vadd.f32 %v3566_v26, %v8196_v0  ;;  %v3615_v3 = vpop.f32.mrf.mxu3 }
 0x91f   : > { %v8267_v43 = vsub.f32 %v8216_v13, %v3685_v59  ;;  %v3616_v7 = vadd.f32 %v3615_v3, %v3567_v5 }
 0x921   : > { %v3717_v25 = vmul.f32 %v8267_v43, %v8267_v43  ;;  %v8272_v23 = vadd.f32 %v3616_v7, %v8130_v11 }
 0x924   : > { %3735 = vadd.xlane.f32.xlu1 %v3717_v25  ;;  %3667 = vadd.xlane.f32.xlu0 %v8272_v23  ;;  %v3568_v28 = vpop.f32.mrf.mxu2  ;;  %v3658_v47 = vpop.xlane.xlu0 %3657 }
 0x925   : > { %v3569_v56 = vadd.f32 %v3568_v28, %v8196_v0  ;;  %v3617_v42 = vpop.f32.mrf.mxu3  ;;  %v3686_v17 = vmul.f32 %v3658_v47, %v6853_v14 }
 0x927   : > { %v3618_v54 = vadd.f32 %v3617_v42, %v3569_v56  ;;  %v8278_v13 = vsub.f32 %v8221_v46, %v3686_v17 }
 0x929   : > { %v8281_v21 = vadd.f32 %v3618_v54, %v8135_v31  ;;  %v3718_v11 = vmul.f32 %v8278_v13, %v8278_v13 }
 0x92b   : > { %3737 = vadd.xlane.f32.xlu2 %v3718_v11 }
 0x92c   : > { %3669 = vadd.xlane.f32.xlu1 %v8281_v21  ;;  %v3660_v27 = vpop.xlane.xlu1 %3659  ;;  %v3571_v40 = vpop.f32.mrf.mxu2 }
 0x92d   : > { %v3687_v63 = vmul.f32 %v3660_v27, %v6853_v14  ;;  %v3572_v33 = vadd.f32 %v3571_v40, %v8196_v0  ;;  %v3620_v35 = vpop.f32.mrf.mxu3 }
 0x92f   : > { %v8289_v16 = vsub.f32 %v8226_v24, %v3687_v63  ;;  %v3621_v46 = vadd.f32 %v3620_v35, %v3572_v33 }
 0x931   : > { %v8292_v31 = vadd.f32 %v3621_v46, %v8148_v48  ;;  %v3719_v10 = vmul.f32 %v8289_v16, %v8289_v16 }
 0x933   : > { %3739 = vadd.xlane.f32.xlu2 %v3719_v10 }
 0x934   : > { %3671 = vadd.xlane.f32.xlu1 %v8292_v31  ;;  %v3662_v29 = vpop.xlane.xlu2 %3661  ;;  %v3573_v6 = vpop.f32.mrf.mxu2 }
 0x935   : > { %v3688_v62 = vmul.f32 %v3662_v29, %v6853_v14  ;;  %v3574_v12 = vadd.f32 %v3573_v6, %v8196_v0  ;;  %v3622_v38 = vpop.f32.mrf.mxu3 }
 0x937   : > { %v8300_v24 = vsub.f32 %v8231_v30, %v3688_v62  ;;  %v3623_v58 = vadd.f32 %v3622_v38, %v3574_v12  ;;  %v5974_v30 = vld [vmem:[%s9163_s10 + $0x30] sm:$0xff] }
 0x938   : > { %4077 = vmatpush.bf16.msra.mxu0 %v5974_v30 }
 0x939   : > { %v3720_v48 = vmul.f32 %v8300_v24, %v8300_v24  ;;  %v8305_v52 = vadd.f32 %v3623_v58, %v8151_v37  ;;  %v5972_v37 = vld [vmem:[%s9163_s10 + $0x20] sm:$0xff] }
 0x93b   : > { %3741 = vadd.xlane.f32.xlu0 %v3720_v48  ;;  %3673 = vadd.xlane.f32.xlu2 %v8305_v52 }
 0x93c   : > { %4078 = vmatpush.bf16.msra.mxu0 %v5973_v45 }
 0x940   : > { %4079 = vmatpush.bf16.msra.mxu0 %v5972_v37 }
 0x944   : > { %4080 = vmatpush.bf16.msra.mxu0 %v5971_v61 }
 0x948   : > { %4081 = vmatpush.bf16.msra.mxu0 %v5970_v9 }
 0x94c   : > { %4082 = vmatpush.bf16.msra.mxu0 %v5969_v32 }
 0x950   : > { %4083 = vmatpush.bf16.msra.mxu0 %v5968_v55  ;;  %v8378_v55 = vld [vmem:[%s9166_s13 + $0x17] ss:$0 sm:$0xff] }
 0x985   : > { %v3576_v50 = vpop.f32.mrf.mxu2  ;;  %v3625_v53 = vpop.f32.mrf.mxu3 }
 0x986   : > { %v3664_v18 = vpop.xlane.xlu2 %3663  ;;  %v3577_v34 = vadd.f32 %v3576_v50, %v8196_v0 }
 0x987   : > { %v3689_v2 = vmul.f32 %v3664_v18, %v6853_v14  ;;  %v3732_v51 = vpop.xlane.xlu0 %3731 }
 0x988   : > { %v3626_v4 = vadd.f32 %v3625_v53, %v3577_v34  ;;  %v3763_v39 = vmul.f32 %v3732_v51, %v6853_v14 }
 0x989   : > { %v8333_v41 = vsub.f32 %v8248_v20, %v3689_v2 }
 0x98a   : > { %v3779_v1 = vadd.f32 1e-05, %v3763_v39  ;;  %v8339_v36 = vadd.f32 %v3626_v4, %v8168_v19 }
 0x98b   : > { %v3721_v26 = vmul.f32 %v8333_v41, %v8333_v41 }
 0x98c   : > { %6125 = vrsqrt.f32 %v3779_v1  ;;  %3675 = vadd.xlane.f32.xlu2 %v8339_v36  ;;  %vm3801_vm4 = vweird.f32 %v3779_v1 }
 0x98d   : > { %3743 = vadd.xlane.f32.xlu0 %v3721_v26  ;;  %v3578_v59 = vpop.f32.mrf.mxu2  ;;  %v3627_v5 = vpop.f32.mrf.mxu3 }
 0x98e   : > { %v3579_v20 = vadd.f32 %v3578_v59, %v8196_v0 }
 0x98f   : > { %v3734_v3 = vpop.xlane.xlu1 %3733  ;;  %v3666_v7 = vpop.xlane.xlu0 %3665 }
 0x990   : > { %v3764_v25 = vmul.f32 %v3734_v3, %v6853_v14  ;;  %v3628_v28 = vadd.f32 %v3627_v5, %v3579_v20  ;;  %v3690_v19 = vmul.f32 %v3666_v7, %v6853_v14 }
 0x992   : > { %v6126_v47 = vpop.eup %6125  ;;  %v3780_v56 = vadd.f32 1e-05, %v3764_v25  ;;  %v8348_v42 = vsub.f32 %v8259_v57, %v3690_v19  ;;  %v8351_v17 = vadd.f32 %v3628_v28, %v8171_v8 }
 0x993   : > { %v3796_v54 = vmul.f32 %v6126_v47, %v3779_v1  ;;  %vm3802_vm3 = vweird.f32 %v6126_v47 }
 0x994   : > { %6127 = vrsqrt.f32 %v3780_v56  ;;  %v3722_v11 = vmul.f32 %v8348_v42, %v8348_v42  ;;  %vm3803_vm5 = vmor %vm3801_vm4, %vm3802_vm3  ;;  %vm3811_vm7 = vweird.f32 %v3780_v56 }
 0x995   : > { %v3797_v27 = vmul.f32 %v6126_v47, %v3796_v54  ;;  %3677 = vadd.xlane.f32.xlu0 %v8351_v17  ;;  %v3581_v40 = vpop.f32.mrf.mxu2  ;;  %v3630_v63 = vpop.f32.mrf.mxu3 }
 0x996   : > { %3745 = vadd.xlane.f32.xlu1 %v3722_v11  ;;  %v3582_v33 = vadd.f32 %v3581_v40, %v8196_v0 }
 0x997   : > { %v3798_v35 = vmul.f32 0.5, %v3797_v27  ;;  %v3736_v46 = vpop.xlane.xlu1 %3735  ;;  %v3668_v57 = vpop.xlane.xlu0 %3667 }
 0x998   : > { %v3765_v10 = vmul.f32 %v3736_v46, %v6853_v14  ;;  %v3631_v8 = vadd.f32 %v3630_v63, %v3582_v33  ;;  %v3691_v29 = vmul.f32 %v3668_v57, %v6853_v14 }
 0x999   : > { %v3799_v6 = vsub.f32 1.5, %v3798_v35 }
 0x99a   : > { %v6128_v62 = vpop.eup %6127  ;;  %v8359_v12 = vadd.f32 1e-05, %v3765_v10  ;;  %v8362_v38 = vsub.f32 %v8272_v23, %v3691_v29  ;;  %v8365_v58 = vadd.f32 %v3631_v8, %v8184_v49 }
 0x99b   : > { %v3800_v48 = vmul.f32 %v6126_v47, %v3799_v6  ;;  %v3806_v44 = vmul.f32 %v6128_v62, %v3780_v56  ;;  %vm3812_vm6 = vweird.f32 %v6128_v62 }
 0x99c   : > { %6129 = vrsqrt.f32 %v8359_v12  ;;  %v3723_v30 = vmul.f32 %v8362_v38, %v8362_v38  ;;  %vm3813_vm8 = vmor %vm3811_vm7, %vm3812_vm6  ;;  %vm3821_vm10 = vweird.f32 %v8359_v12 }
 0x99d   : > { %v3807_v45 = vmul.f32 %v6128_v62, %v3806_v44  ;;  %3679 = vadd.xlane.f32.xlu0 %v8365_v58  ;;  %v3583_v37 = vpop.f32.mrf.mxu2  ;;  %v3804_v61 = vsel %vm3803_vm5, %v6126_v47, %v3800_v48  ;;  %v3632_v53 = vpop.f32.mrf.mxu3 }
 0x99e   : > { %3747 = vadd.xlane.f32.xlu1 %v3723_v30  ;;  %v3584_v23 = vadd.f32 %v3583_v37, %v8196_v0  ;;  %v3738_v9 = vpop.xlane.xlu2 %3737  ;;  %v3955_v2 = vmul.f32 %v3804_v61, %v8245_v15 }
 0x99f   : > { %v3808_v49 = vmul.f32 0.5, %v3807_v45  ;;  %v3670_v50 = vpop.xlane.xlu1 %3669  ;;  %v3766_v32 = vmul.f32 %v3738_v9, %v6853_v14 }
 0x9a0   : > { %v3692_v18 = vmul.f32 %v3670_v50, %v6853_v14  ;;  %v3633_v34 = vadd.f32 %v3632_v53, %v3584_v23  ;;  %v3971_v5 = vmul.f32 %v3955_v2, %v8378_v55 }
 0x9a1   : > { %v3809_v51 = vsub.f32 1.5, %v3808_v49  ;;  %v3782_v4 = vadd.f32 1e-05, %v3766_v32 }
 0x9a2   : > { %v6130_v39 = vpop.eup %6129  ;;  %v8381_v0 = vsub.f32 %v8281_v21, %v3692_v18  ;;  %v8384_v1 = vadd.f32 %v3633_v34, %v8187_v60  ;;  %v8393_v21 = vld [vmem:[%s9166_s13 + $0x20] ss:$0 sm:$0xff] }
 0x9a3   : > { %v3810_v26 = vmul.f32 %v6128_v62, %v3809_v51  ;;  %v3816_v59 = vmul.f32 %v6130_v39, %v8359_v12  ;;  %6131 = vrsqrt.f32 %v3782_v4  ;;  %v3987_v11 = vadd.f32 %v3971_v5, %v8393_v21 }
 0x9a4   : > { %v3724_v15 = vmul.f32 %v8381_v0, %v8381_v0  ;;  %vm3822_vm9 = vweird.f32 %v6130_v39  ;;  %vm3831_vm13 = vweird.f32 %v3782_v4 }
 0x9a5   : > { %v3814_v20 = vsel %vm3813_vm8, %v6128_v62, %v3810_v26  ;;  %v3817_v3 = vmul.f32 %v6130_v39, %v3816_v59  ;;  %vm3823_vm11 = vmor %vm3821_vm10, %vm3822_vm9 }
 0x9a6   : > { %v3956_v60 = vmul.f32 %v3814_v20, %v8256_v22  ;;  %3749 = vadd.xlane.f32.xlu2 %v3724_v15  ;;  %3681 = vadd.xlane.f32.xlu1 %v8384_v1  ;;  %v3740_v7 = vpop.xlane.xlu2 %3739 }
 0x9a7   : > { %v3818_v25 = vmul.f32 0.5, %v3817_v3  ;;  %v3672_v28 = vpop.xlane.xlu1 %3671  ;;  %v3767_v19 = vmul.f32 %v3740_v7, %v6853_v14 }
 0x9a8   : > { %v3972_v47 = vmul.f32 %v3956_v60, %v8378_v55  ;;  %v3693_v56 = vmul.f32 %v3672_v28, %v6853_v14 }
 0x9a9   : > { %v6132_v54 = vpop.eup %6131  ;;  %v3819_v27 = vsub.f32 1.5, %v3818_v25  ;;  %v3783_v40 = vadd.f32 1e-05, %v3767_v19 }
 0x9aa   : > { %v3988_v63 = vadd.f32 %v3972_v47, %v8393_v21  ;;  %v3826_v22 = vmul.f32 %v6132_v54, %v3782_v4  ;;  %v8403_v33 = vsub.f32 %v8292_v31, %v3693_v56  ;;  %vm3832_vm12 = vweird.f32 %v6132_v54 }
 0x9ab   : > { %v3820_v35 = vmul.f32 %v6130_v39, %v3819_v27  ;;  %6133 = vrsqrt.f32 %v3783_v40  ;;  %vm3833_vm14 = vmor %vm3831_vm13, %vm3832_vm12  ;;  %vm3841_vm0 = vweird.f32 %v3783_v40 }
 0x9ac   : > { %v3827_v46 = vmul.f32 %v6132_v54, %v3826_v22  ;;  %v3725_v57 = vmul.f32 %v8403_v33, %v8403_v33  ;;  %v4003_v10 = vpack.c.bf16 %v3988_v63, %v3987_v11 }
 0x9ad   : > { %v3824_v8 = vsel %vm3823_vm11, %v6130_v39, %v3820_v35 }
 0x9ae   : > { %v3828_v29 = vmul.f32 0.5, %v3827_v46  ;;  %3751 = vadd.xlane.f32.xlu2 %v3725_v57  ;;  %4084 = vmatmul.bf16.vlgmr.msra.gmra.mxu0 %v4003_v10  ;;  %v3674_v6 = vpop.xlane.xlu2 %3673  ;;  %v3742_v62 = vpop.xlane.xlu0 %3741  ;;  %v3957_v12 = vmul.f32 %v3824_v8, %v8267_v43  ;;  %v5979_v57 = vld [vmem:[%s9164_s11 + $0x18] sm:$0xff] }
 0x9af   : > { %v3694_v48 = vmul.f32 %v3674_v6, %v6853_v14  ;;  %v3768_v31 = vmul.f32 %v3742_v62, %v6853_v14  ;;  %4211 = vmatpush.bf16.msra.mxu1 %v5979_v57 }
 0x9b0   : > { %v3829_v44 = vsub.f32 1.5, %v3828_v29  ;;  %v3973_v32 = vmul.f32 %v3957_v12, %v8378_v55 }
 0x9b1   : > { %v6134_v30 = vpop.eup %6133  ;;  %v8412_v45 = vsub.f32 %v8305_v52, %v3694_v48  ;;  %v3784_v37 = vadd.f32 1e-05, %v3768_v31  ;;  %v5978_v48 = vld [vmem:[%s9164_s11 + $0x10] sm:$0xff] }
 0x9b2   : > { %v3830_v61 = vmul.f32 %v6132_v54, %v3829_v44  ;;  %v3836_v23 = vmul.f32 %v6134_v30, %v3783_v40  ;;  %v3989_v2 = vadd.f32 %v3973_v32, %v8393_v21  ;;  %vm3842_vm15 = vweird.f32 %v6134_v30 }
 0x9b3   : > { %6135 = vrsqrt.f32 %v3784_v37  ;;  %v3726_v9 = vmul.f32 %v8412_v45, %v8412_v45  ;;  %vm3843_vm1 = vmor %vm3841_vm0, %vm3842_vm15  ;;  %vm3851_vm3 = vweird.f32 %v3784_v37  ;;  %4212 = vmatpush.bf16.msra.mxu1 %v5978_v48 }
 0x9b4   : > { %v3834_v49 = vsel %vm3833_vm14, %v6132_v54, %v3830_v61  ;;  %v3837_v50 = vmul.f32 %v6134_v30, %v3836_v23 }
 0x9b5   : > { %v3958_v53 = vmul.f32 %v3834_v49, %v8278_v13  ;;  %3753 = vadd.xlane.f32.xlu0 %v3726_v9 }
 0x9b6   : > { %v3838_v43 = vmul.f32 0.5, %v3837_v50 }
 0x9b7   : > { %v3974_v52 = vmul.f32 %v3958_v53, %v8378_v55 }
 0x9b8   : > { %v3839_v18 = vsub.f32 1.5, %v3838_v43 }
 0x9b9   : > { %v6136_v34 = vpop.eup %6135  ;;  %v3990_v51 = vadd.f32 %v3974_v52, %v8393_v21  ;;  %v5976_v52 = vld [vmem:[%s9164_s11] sm:$0xff] }
 0x9ba   : > { %v3840_v4 = vmul.f32 %v6134_v30, %v3839_v18  ;;  %v3846_v39 = vmul.f32 %v6136_v34, %v3784_v37  ;;  %vm3852_vm2 = vweird.f32 %v6136_v34  ;;  %v5977_v37 = vld [vmem:[%s9164_s11 + $0x8] sm:$0xff] }
 0x9bb   : > { %v4004_v26 = vpack.c.bf16 %v3990_v51, %v3989_v2  ;;  %vm3853_vm4 = vmor %vm3851_vm3, %vm3852_vm2  ;;  %4213 = vmatpush.bf16.msra.mxu1 %v5977_v37  ;;  %v8479_v37 = vld [vmem:[%s9166_s13 + $0x21] ss:$0 sm:$0xff] }
 0x9bc   : > { %v3847_v59 = vmul.f32 %v6136_v34, %v3846_v39  ;;  %v3844_v13 = vsel %vm3843_vm1, %v6134_v30, %v3840_v4 }
 0x9bd   : > { %v3959_v20 = vmul.f32 %v3844_v13, %v8289_v16 }
 0x9be   : > { %v3848_v15 = vmul.f32 0.5, %v3847_v59  ;;  %4089 = vmatmul.bf16.gmra.mxu0 %v4004_v26 }
 0x9bf   : > { %v3975_v25 = vmul.f32 %v3959_v20, %v8378_v55  ;;  %4214 = vmatpush.bf16.msra.mxu1 %v5976_v52 }
 0x9c0   : > { %v3849_v5 = vsub.f32 1.5, %v3848_v15 }
 0x9c1   : > { %v3991_v19 = vadd.f32 %v3975_v25, %v8393_v21 }
 0x9c2   : > { %v3850_v3 = vmul.f32 %v6136_v34, %v3849_v5 }
 0x9c4   : > { %v3854_v60 = vsel %vm3853_vm4, %v6136_v34, %v3850_v3  ;;  %vm9181_vm4 = vcmask 523264  }
 0x9c5   : > { %v3960_v7 = vmul.f32 %v3854_v60, %v8300_v24 }
 0x9c7   : > { %v3976_v28 = vmul.f32 %v3960_v7, %v8378_v55 }
 0x9c9   : > { %v3992_v47 = vadd.f32 %v3976_v28, %v8393_v21 }
 0x9cb   : > { %v4005_v56 = vpack.c.bf16 %v3992_v47, %v3991_v19 }
 0x9ce   : > { %4094 = vmatmul.bf16.gmra.mxu0 %v4005_v56 }
 0x9ff   : > { %v3676_v54 = vpop.xlane.xlu2 %3675 }
 0xa00   : > { %v3695_v11 = vmul.f32 %v3676_v54, %v6853_v14  ;;  %v3744_v16 = vpop.xlane.xlu0 %3743 }
 0xa01   : > { %v3769_v27 = vmul.f32 %v3744_v16, %v6853_v14 }
 0xa02   : > { %v8430_v40 = vsub.f32 %v8339_v36, %v3695_v11 }
 0xa03   : > { %v3785_v24 = vadd.f32 1e-05, %v3769_v27 }
 0xa04   : > { %v3727_v63 = vmul.f32 %v8430_v40, %v8430_v40 }
 0xa05   : > { %6137 = vrsqrt.f32 %v3785_v24  ;;  %vm3861_vm6 = vweird.f32 %v3785_v24 }
 0xa06   : > { %3755 = vadd.xlane.f32.xlu1 %v3727_v63 }
 0xa08   : > { %v3678_v22 = vpop.xlane.xlu0 %3677 }
 0xa09   : > { %v3746_v35 = vpop.xlane.xlu1 %3745  ;;  %v3696_v46 = vmul.f32 %v3678_v22, %v6853_v14 }
 0xa0a   : > { %v3770_v10 = vmul.f32 %v3746_v35, %v6853_v14 }
 0xa0b   : > { %v6138_v8 = vpop.eup %6137  ;;  %v8440_v36 = vsub.f32 %v8351_v17, %v3696_v46 }
 0xa0c   : > { %v3856_v29 = vmul.f32 %v6138_v8, %v3785_v24  ;;  %v3786_v6 = vadd.f32 1e-05, %v3770_v10  ;;  %vm3862_vm5 = vweird.f32 %v6138_v8 }
 0xa0d   : > { %v3728_v62 = vmul.f32 %v8440_v36, %v8440_v36  ;;  %vm3863_vm7 = vmor %vm3861_vm6, %vm3862_vm5 }
 0xa0e   : > { %v3857_v31 = vmul.f32 %v6138_v8, %v3856_v29  ;;  %6139 = vrsqrt.f32 %v3786_v6  ;;  %vm3871_vm9 = vweird.f32 %v3786_v6 }
 0xa0f   : > { %3757 = vadd.xlane.f32.xlu2 %v3728_v62 }
 0xa10   : > { %v3858_v44 = vmul.f32 0.5, %v3857_v31  ;;  %v3680_v30 = vpop.xlane.xlu0 %3679 }
 0xa11   : > { %v3748_v12 = vpop.xlane.xlu1 %3747  ;;  %v3697_v17 = vmul.f32 %v3680_v30, %v6853_v14 }
 0xa12   : > { %v3859_v61 = vsub.f32 1.5, %v3858_v44  ;;  %v3771_v23 = vmul.f32 %v3748_v12, %v6853_v14 }
 0xa13   : > { %v8453_v9 = vsub.f32 %v8365_v58, %v3697_v17 }
 0xa14   : > { %v6140_v49 = vpop.eup %6139  ;;  %v3787_v50 = vadd.f32 1e-05, %v3771_v23  ;;  %v3860_v53 = vmul.f32 %v6138_v8, %v3859_v61 }
 0xa15   : > { %v3866_v32 = vmul.f32 %v6140_v49, %v3786_v6  ;;  %v3729_v43 = vmul.f32 %v8453_v9, %v8453_v9  ;;  %vm3872_vm8 = vweird.f32 %v6140_v49 }
 0xa16   : > { %6141 = vrsqrt.f32 %v3787_v50  ;;  %v3864_v58 = vsel %vm3863_vm7, %v6138_v8, %v3860_v53  ;;  %vm3873_vm10 = vmor %vm3871_vm9, %vm3872_vm8  ;;  %vm3881_vm12 = vweird.f32 %v3787_v50 }
 0xa17   : > { %v3867_v18 = vmul.f32 %v6140_v49, %v3866_v32  ;;  %3759 = vadd.xlane.f32.xlu0 %v3729_v43  ;;  %v3961_v13 = vmul.f32 %v3864_v58, %v8333_v41 }
 0xa19   : > { %v3868_v34 = vmul.f32 0.5, %v3867_v18  ;;  %v3750_v2 = vpop.xlane.xlu2 %3749  ;;  %v3682_v51 = vpop.xlane.xlu1 %3681  ;;  %v3977_v19 = vmul.f32 %v3961_v13, %v8378_v55 }
 0xa1a   : > { %v3772_v4 = vmul.f32 %v3750_v2, %v6853_v14  ;;  %v3698_v39 = vmul.f32 %v3682_v51, %v6853_v14 }
 0xa1b   : > { %v3869_v26 = vsub.f32 1.5, %v3868_v34  ;;  %v3993_v27 = vadd.f32 %v3977_v19, %v8393_v21 }
 0xa1c   : > { %v6142_v59 = vpop.eup %6141  ;;  %v3788_v15 = vadd.f32 1e-05, %v3772_v4  ;;  %v8464_v5 = vsub.f32 %v8384_v1, %v3698_v39 }
 0xa1d   : > { %v3870_v20 = vmul.f32 %v6140_v49, %v3869_v26  ;;  %v3876_v3 = vmul.f32 %v6142_v59, %v3787_v50  ;;  %vm3882_vm11 = vweird.f32 %v6142_v59 }
 0xa1e   : > { %6143 = vrsqrt.f32 %v3788_v15  ;;  %v3730_v60 = vmul.f32 %v8464_v5, %v8464_v5  ;;  %vm3883_vm13 = vmor %vm3881_vm12, %vm3882_vm11  ;;  %vm3891_vm15 = vweird.f32 %v3788_v15 }
 0xa1f   : > { %v3874_v7 = vsel %vm3873_vm10, %v6140_v49, %v3870_v20  ;;  %v3877_v25 = vmul.f32 %v6142_v59, %v3876_v3 }
 0xa20   : > { %v3962_v28 = vmul.f32 %v3874_v7, %v8348_v42  ;;  %3761 = vadd.xlane.f32.xlu1 %v3730_v60 }
 0xa21   : > { %v3878_v41 = vmul.f32 0.5, %v3877_v25  ;;  %v3752_v47 = vpop.xlane.xlu2 %3751 }
 0xa22   : > { %v3773_v1 = vmul.f32 %v3752_v47, %v6853_v14  ;;  %v3978_v56 = vmul.f32 %v3962_v28, %v8378_v55 }
 0xa23   : > { %v3879_v54 = vsub.f32 1.5, %v3878_v41 }
 0xa24   : > { %v6144_v11 = vpop.eup %6143  ;;  %v3789_v16 = vadd.f32 1e-05, %v3773_v1  ;;  %v3994_v24 = vadd.f32 %v3978_v56, %v8393_v21 }
 0xa25   : > { %v3880_v63 = vmul.f32 %v6142_v59, %v3879_v54  ;;  %v3886_v22 = vmul.f32 %v6144_v11, %v3788_v15  ;;  %vm3892_vm14 = vweird.f32 %v6144_v11 }
 0xa26   : > { %6145 = vrsqrt.f32 %v3789_v16  ;;  %v4006_v42 = vpack.c.bf16 %v3994_v24, %v3993_v27  ;;  %vm3893_vm0 = vmor %vm3891_vm15, %vm3892_vm14  ;;  %vm3901_vm2 = vweird.f32 %v3789_v16 }
 0xa27   : > { %v3887_v35 = vmul.f32 %v6144_v11, %v3886_v22  ;;  %v3884_v46 = vsel %vm3883_vm13, %v6142_v59, %v3880_v63 }
 0xa28   : > { %4099 = vmatmul.bf16.gmra.mxu0 %v4006_v42  ;;  %v3754_v57 = vpop.xlane.xlu0 %3753  ;;  %v3963_v29 = vmul.f32 %v3884_v46, %v8362_v38 }
 0xa29   : > { %v3888_v10 = vmul.f32 0.5, %v3887_v35  ;;  %v3774_v8 = vmul.f32 %v3754_v57, %v6853_v14 }
 0xa2a   : > { %v3979_v61 = vmul.f32 %v3963_v29, %v8378_v55 }
 0xa2b   : > { %v3889_v6 = vsub.f32 1.5, %v3888_v10  ;;  %v3790_v62 = vadd.f32 1e-05, %v3774_v8  ;;  %v4085_v48 = vpop.f32.mrf.mxu0 }
 0xa2c   : > { %v6146_v31 = vpop.eup %6145  ;;  %v8484_v49 = vadd.f32 %v4085_v48, %v8479_v37  ;;  %v3995_v52 = vadd.f32 %v3979_v61, %v8393_v21 }
 0xa2d   : > { %v3890_v44 = vmul.f32 %v6144_v11, %v3889_v6  ;;  %v3896_v30 = vmul.f32 %v6146_v31, %v3789_v16  ;;  %6147 = vrsqrt.f32 %v3790_v62  ;;  %vm3902_vm1 = vweird.f32 %v6146_v31 }
 0xa2e   : > { %v9185_v51 = vmax.f32 %v8484_v49, 0.0  ;;  %vm3903_vm3 = vmor %vm3901_vm2, %vm3902_vm1  ;;  %vm3911_vm6 = vweird.f32 %v3790_v62 }
 0xa2f   : > { %v3894_v12 = vsel %vm3893_vm0, %v6144_v11, %v3890_v44  ;;  %v3897_v17 = vmul.f32 %v6146_v31, %v3896_v30 }
 0xa30   : > { %v3964_v38 = vmul.f32 %v3894_v12, %v8381_v0 }
 0xa31   : > { %v3898_v23 = vmul.f32 0.5, %v3897_v17 }
 0xa32   : > { %v3980_v50 = vmul.f32 %v3964_v38, %v8378_v55 }
 0xa33   : > { %v6148_v53 = vpop.eup %6147  ;;  %v3899_v32 = vsub.f32 1.5, %v3898_v23  ;;  %v4087_v43 = vpop.f32.mrf.mxu0 }
 0xa34   : > { %v3906_v18 = vmul.f32 %v6148_v53, %v3790_v62  ;;  %v8489_v58 = vadd.f32 %v4087_v43, %v8479_v37  ;;  %v3996_v34 = vadd.f32 %v3980_v50, %v8393_v21  ;;  %vm3912_vm5 = vweird.f32 %v6148_v53 }
 0xa35   : > { %v3900_v2 = vmul.f32 %v6146_v31, %v3899_v32  ;;  %vm3913_vm7 = vmor %vm3911_vm6, %vm3912_vm5 }
 0xa36   : > { %v3907_v0 = vmul.f32 %v6148_v53, %v3906_v18  ;;  %v9186_v4 = vmax.f32 %v8489_v58, 0.0  ;;  %v4007_v39 = vpack.c.bf16 %v3996_v34, %v3995_v52 }
 0xa37   : > { %v3904_v26 = vsel %vm3903_vm3, %v6146_v31, %v3900_v2 }
 0xa38   : > { %v3908_v59 = vmul.f32 0.5, %v3907_v0  ;;  %v4141_v13 = vpack.c.bf16 %v9186_v4, %v9185_v51  ;;  %4104 = vmatmul.bf16.gmra.mxu0 %v4007_v39  ;;  %v3965_v20 = vmul.f32 %v3904_v26, %v8403_v33  ;;  %v6366_v51 = vmov 0  }
 0xa39   : > { %6024 = vset.pattern.permute.xlu2 %v6366_v51  ;;  %6026 = vset.pattern.permute.xlu0 %v6366_v51 }
 0xa3a   : > { %v3909_v15 = vsub.f32 1.5, %v3908_v59  ;;  %5806 = vmatmul.msk.bf16.vlgmr.msra.gmra.mxu1 %vm9181_vm4, %v4141_v13  ;;  %v3981_v28 = vmul.f32 %v3965_v20, %v8378_v55  ;;  %6025 = vset.pattern.permute.xlu1 %v6366_v51 }
 0xa3b   : > { %v4090_v3 = vpop.f32.mrf.mxu0 }
 0xa3c   : > { %v3910_v60 = vmul.f32 %v6148_v53, %v3909_v15  ;;  %v8504_v41 = vadd.f32 %v4090_v3, %v8479_v37  ;;  %v3997_v1 = vadd.f32 %v3981_v28, %v8393_v21 }
 0xa3e   : > { %v3914_v7 = vsel %vm3913_vm7, %v6148_v53, %v3910_v60  ;;  %v9183_v11 = vmax.f32 %v8504_v41, 0.0 }
 0xa3f   : > { %v3966_v25 = vmul.f32 %v3914_v7, %v8412_v45 }
 0xa41   : > { %v3982_v19 = vmul.f32 %v3966_v25, %v8378_v55 }
 0xa43   : > { %v4092_v47 = vpop.f32.mrf.mxu0  ;;  %v3998_v56 = vadd.f32 %v3982_v19, %v8393_v21 }
 0xa44   : > { %v8509_v33 = vadd.f32 %v4092_v47, %v8479_v37 }
 0xa45   : > { %v4008_v54 = vpack.c.bf16 %v3998_v56, %v3997_v1 }
 0xa46   : > { %v9182_v45 = vmax.f32 %v8509_v33, 0.0 }
 0xa48   : > { %v4142_v16 = vpack.c.bf16 %v9182_v45, %v9183_v11  ;;  %4109 = vmatmul.bf16.gmra.mxu0 %v4008_v54 }
 0xa4a   : > { %5807 = vmatmul.msk.bf16.gmra.mxu1 %vm9181_vm4, %v4142_v16 }
 0xa4b   : > { %v4095_v27 = vpop.f32.mrf.mxu0 }
 0xa4c   : > { %v8519_v24 = vadd.f32 %v4095_v27, %v8479_v37 }
 0xa4e   : > { %v9180_v42 = vmax.f32 %v8519_v24, 0.0 }
 0xa53   : > { %v4097_v63 = vpop.f32.mrf.mxu0 }
 0xa54   : > { %v8522_v22 = vadd.f32 %v4097_v63, %v8479_v37 }
 0xa56   : > { %v9179_v35 = vmax.f32 %v8522_v22, 0.0 }
 0xa58   : > { %v4143_v46 = vpack.c.bf16 %v9179_v35, %v9180_v42 }
 0xa5a   : > { %5808 = vmatmul.msk.bf16.gmra.mxu1 %vm9181_vm4, %v4143_v46 }
 0xa79   : > { %v3756_v57 = vpop.xlane.xlu1 %3755 }
 0xa7a   : > { %v3775_v10 = vmul.f32 %v3756_v57, %v6853_v14 }
 0xa7c   : > { %v3791_v8 = vadd.f32 1e-05, %v3775_v10 }
 0xa7e   : > { %6149 = vrsqrt.f32 %v3791_v8  ;;  %vm3921_vm9 = vweird.f32 %v3791_v8 }
 0xa82   : > { %v3758_v29 = vpop.xlane.xlu2 %3757 }
 0xa83   : > { %v3776_v6 = vmul.f32 %v3758_v29, %v6853_v14 }
 0xa84   : > { %v6150_v62 = vpop.eup %6149 }
 0xa85   : > { %v3916_v48 = vmul.f32 %v6150_v62, %v3791_v8  ;;  %v3792_v31 = vadd.f32 1e-05, %v3776_v6  ;;  %vm3922_vm8 = vweird.f32 %v6150_v62 }
 0xa86   : > { %vm3923_vm10 = vmor %vm3921_vm9, %vm3922_vm8 }
 0xa87   : > { %v3917_v44 = vmul.f32 %v6150_v62, %v3916_v48  ;;  %6151 = vrsqrt.f32 %v3792_v31  ;;  %vm3931_vm12 = vweird.f32 %v3792_v31 }
 0xa89   : > { %v3918_v30 = vmul.f32 0.5, %v3917_v44 }
 0xa8a   : > { %v3760_v12 = vpop.xlane.xlu0 %3759 }
 0xa8b   : > { %v3919_v17 = vsub.f32 1.5, %v3918_v30  ;;  %v3777_v61 = vmul.f32 %v3760_v12, %v6853_v14 }
 0xa8d   : > { %v6152_v38 = vpop.eup %6151  ;;  %v3793_v23 = vadd.f32 1e-05, %v3777_v61  ;;  %v3920_v50 = vmul.f32 %v6150_v62, %v3919_v17  ;;  %v8563_v61 = vld [vmem:[%s9166_s13 + $0x22] ss:$0 sm:$0xff] }
 0xa8e   : > { %v3926_v53 = vmul.f32 %v6152_v38, %v3792_v31  ;;  %vm3932_vm11 = vweird.f32 %v6152_v38 }
 0xa8f   : > { %6153 = vrsqrt.f32 %v3793_v23  ;;  %v3924_v43 = vsel %vm3923_vm10, %v6150_v62, %v3920_v50  ;;  %vm3933_vm13 = vmor %vm3931_vm12, %vm3932_vm11  ;;  %vm3941_vm15 = vweird.f32 %v3793_v23 }
 0xa90   : > { %v3927_v32 = vmul.f32 %v6152_v38, %v3926_v53  ;;  %v3967_v39 = vmul.f32 %v3924_v43, %v8430_v40 }
 0xa92   : > { %v3928_v52 = vmul.f32 0.5, %v3927_v32  ;;  %v3983_v60 = vmul.f32 %v3967_v39, %v8378_v55 }
 0xa93   : > { %v3762_v18 = vpop.xlane.xlu1 %3761 }
 0xa94   : > { %v3929_v34 = vsub.f32 1.5, %v3928_v52  ;;  %v3778_v2 = vmul.f32 %v3762_v18, %v6853_v14  ;;  %v3999_v14 = vadd.f32 %v3983_v60, %v8393_v21 }
 0xa95   : > { %v6154_v0 = vpop.eup %6153 }
 0xa96   : > { %v3930_v26 = vmul.f32 %v6152_v38, %v3929_v34  ;;  %v3936_v59 = vmul.f32 %v6154_v0, %v3793_v23  ;;  %v3794_v13 = vadd.f32 1e-05, %v3778_v2  ;;  %vm3942_vm14 = vweird.f32 %v6154_v0 }
 0xa97   : > { %vm3943_vm0 = vmor %vm3941_vm15, %vm3942_vm14 }
 0xa98   : > { %v3934_v15 = vsel %vm3933_vm13, %v6152_v38, %v3930_v26  ;;  %v3937_v20 = vmul.f32 %v6154_v0, %v3936_v59  ;;  %6155 = vrsqrt.f32 %v3794_v13  ;;  %vm3951_vm2 = vweird.f32 %v3794_v13 }
 0xa99   : > { %v3968_v3 = vmul.f32 %v3934_v15, %v8440_v36 }
 0xa9a   : > { %v3938_v7 = vmul.f32 0.5, %v3937_v20 }
 0xa9b   : > { %v3984_v25 = vmul.f32 %v3968_v3, %v8378_v55 }
 0xa9c   : > { %v3939_v28 = vsub.f32 1.5, %v3938_v7 }
 0xa9d   : > { %v4000_v40 = vadd.f32 %v3984_v25, %v8393_v21 }
 0xa9e   : > { %v6156_v19 = vpop.eup %6155  ;;  %v3940_v47 = vmul.f32 %v6154_v0, %v3939_v28 }
 0xa9f   : > { %v3946_v1 = vmul.f32 %v6156_v19, %v3794_v13  ;;  %v4009_v56 = vpack.c.bf16 %v4000_v40, %v3999_v14  ;;  %vm3952_vm1 = vweird.f32 %v6156_v19 }
 0xaa0   : > { %v3944_v36 = vsel %vm3943_vm0, %v6154_v0, %v3940_v47  ;;  %vm3953_vm3 = vmor %vm3951_vm2, %vm3952_vm1 }
 0xaa1   : > { %v3947_v54 = vmul.f32 %v6156_v19, %v3946_v1  ;;  %4114 = vmatmul.bf16.gmra.mxu0 %v4009_v56  ;;  %v3969_v46 = vmul.f32 %v3944_v36, %v8453_v9 }
 0xaa3   : > { %v3948_v16 = vmul.f32 0.5, %v3947_v54  ;;  %v3985_v29 = vmul.f32 %v3969_v46, %v8378_v55 }
 0xaa5   : > { %v3949_v27 = vsub.f32 1.5, %v3948_v16  ;;  %v4100_v63 = vpop.f32.mrf.mxu0  ;;  %v4001_v44 = vadd.f32 %v3985_v29, %v8393_v21 }
 0xaa6   : > { %v8545_v6 = vadd.f32 %v4100_v63, %v8479_v37 }
 0xaa7   : > { %v3950_v57 = vmul.f32 %v6156_v19, %v3949_v27 }
 0xaa8   : > { %v9178_v30 = vmax.f32 %v8545_v6, 0.0 }
 0xaa9   : > { %v3954_v10 = vsel %vm3953_vm3, %v6156_v19, %v3950_v57 }
 0xaaa   : > { %v3970_v8 = vmul.f32 %v3954_v10, %v8464_v5 }
 0xaac   : > { %v3986_v62 = vmul.f32 %v3970_v8, %v8378_v55 }
 0xaad   : > { %v4102_v48 = vpop.f32.mrf.mxu0 }
 0xaae   : > { %v8549_v31 = vadd.f32 %v4102_v48, %v8479_v37  ;;  %v4002_v9 = vadd.f32 %v3986_v62, %v8393_v21 }
 0xab0   : > { %9202 = vst [vmem:[#allocation11_spill] sm:$0xff] %v8549_v31  ;;  %v9176_v12 = vmax.f32 %v8549_v31, 0.0  ;;  %v4010_v5 = vpack.c.bf16 %v4002_v9, %v4001_v44 }
 0xab2   : > { %v4144_v17 = vpack.c.bf16 %v9176_v12, %v9178_v30  ;;  %4119 = vmatmul.bf16.gmra.mxu0 %v4010_v5 }
 0xab4   : > { %5809 = vmatmul.msk.bf16.gmra.mxu1 %vm9181_vm4, %v4144_v17 }
 0xab5   : > { %v4105_v55 = vpop.f32.mrf.mxu0 }
 0xab6   : > { %v8570_v50 = vadd.f32 %v4105_v55, %v8479_v37 }
 0xab7   : > { %v4216_v21 = vpop.f32.mrf.mxu1 }
 0xab8   : > { %v8566_v38 = vadd.f32 %v4216_v21, %v8563_v61  ;;  %v9177_v52 = vmax.f32 %v8570_v50, 0.0 }
 0xaba   : > { %v5814_v23 = vmul.f32 -1.442695, %v8566_v38 }
 0xabc   : > { %6157 = vpow2.f32 %v5814_v23 }
 0xabd   : > { %v4107_v53 = vpop.f32.mrf.mxu0 }
 0xabe   : > { %v8573_v32 = vadd.f32 %v4107_v53, %v8479_v37 }
 0xabf   : > { %v4218_v43 = vpop.f32.mrf.mxu1 }
 0xac0   : > { %9203 = vst [vmem:[#allocation12_spill] sm:$0xff] %v8573_v32  ;;  %v9175_v18 = vmax.f32 %v8573_v32, 0.0  ;;  %v8578_v34 = vadd.f32 %v4218_v43, %v8563_v61 }
 0xac2   : > { %v6158_v2 = vpop.eup %6157  ;;  %v4145_v0 = vpack.c.bf16 %v9175_v18, %v9177_v52  ;;  %v5815_v39 = vmul.f32 -1.442695, %v8578_v34 }
 0xac3   : > { %v4320_v26 = vadd.f32 1.0, %v6158_v2 }
 0xac4   : > { %6159 = vpow2.f32 %v5815_v39  ;;  %5810 = vmatmul.msk.bf16.gmra.mxu1 %vm9181_vm4, %v4145_v0 }
 0xac5   : > { %6161 = vrcp.f32 %v4320_v26  ;;  %v4110_v59 = vpop.f32.mrf.mxu0  ;;  %v4345_v56 = vand.u32 2147483647, %v4320_v26  ;;  %v4347_v54 = vand.u32 2147483648, %v4320_v26  ;;  %vm4341_vm6 = vweird.f32 %v4320_v26 }
 0xac6   : > { %v8591_v25 = vadd.f32 %v4110_v59, %v8479_v37 }
 0xac7   : > { %v4221_v13 = vpop.f32.mrf.mxu1  ;;  %v4348_v62 = vor.u32 1.1754944e-38, %v4347_v54  ;;  %vm4346_vm8 = vcmp.eq.f32.partialorder %v4345_v56, 8.507059e+37 }
 0xac8   : > { %v8587_v15 = vadd.f32 %v4221_v13, %v8563_v61  ;;  %9204 = vst [vmem:[#allocation13_spill] sm:$0xff] %v8591_v25  ;;  %v9173_v47 = vmax.f32 %v8591_v25, 0.0 }
 0xaca   : > { %v6160_v20 = vpop.eup %6159  ;;  %v5816_v3 = vmul.f32 -1.442695, %v8587_v15 }
 0xacb   : > { %v6162_v60 = vpop.eup %6161  ;;  %v4321_v7 = vadd.f32 1.0, %v6160_v20 }
 0xacc   : > { %6163 = vpow2.f32 %v5816_v3  ;;  %v4337_v28 = vmul.f32 %v6162_v60, %v4320_v26  ;;  %vm4342_vm5 = vweird.f32 %v6162_v60 }
 0xacd   : > { %6165 = vrcp.f32 %v4321_v7  ;;  %v4112_v14 = vpop.f32.mrf.mxu0  ;;  %vm4343_vm7 = vmor %vm4341_vm6, %vm4342_vm5  ;;  %v4362_v55 = vand.u32 2147483648, %v4321_v7  ;;  %v4360_v53 = vand.u32 2147483647, %v4321_v7  ;;  %vm4356_vm10 = vweird.f32 %v4321_v7 }
 0xace   : > { %v8594_v40 = vadd.f32 %v4112_v14, %v8479_v37  ;;  %v4338_v19 = vsub.f32 1.0, %v4337_v28 }
 0xacf   : > { %v4223_v1 = vpop.f32.mrf.mxu1  ;;  %v4363_v59 = vor.u32 1.1754944e-38, %v4362_v55  ;;  %vm4361_vm12 = vcmp.eq.f32.partialorder %v4360_v53, 8.507059e+37 }
 0xad0   : > { %9205 = vst [vmem:[#allocation14_spill] sm:$0xff] %v8594_v40  ;;  %v9174_v36 = vmax.f32 %v8594_v40, 0.0  ;;  %v8599_v16 = vadd.f32 %v4223_v1, %v8563_v61  ;;  %v4339_v27 = vmul.f32 %v6162_v60, %v4338_v19 }
 0xad2   : > { %v6164_v63 = vpop.eup %6163  ;;  %v4146_v46 = vpack.c.bf16 %v9174_v36, %v9173_v47  ;;  %v5817_v57 = vmul.f32 -1.442695, %v8599_v16  ;;  %v4340_v10 = vadd.f32 %v6162_v60, %v4339_v27 }
 0xad3   : > { %v6166_v8 = vpop.eup %6165  ;;  %v4322_v29 = vadd.f32 1.0, %v6164_v63 }
 0xad4   : > { %6167 = vpow2.f32 %v5817_v57  ;;  %5811 = vmatmul.msk.bf16.gmra.mxu1 %vm9181_vm4, %v4146_v46  ;;  %v4344_v48 = vsel %vm4343_vm7, %v6162_v60, %v4340_v10  ;;  %v4352_v44 = vmul.f32 %v6166_v8, %v4321_v7  ;;  %vm4357_vm9 = vweird.f32 %v6166_v8 }
 0xad5   : > { %6169 = vrcp.f32 %v4322_v29  ;;  %v4349_v9 = vsel %vm4346_vm8, %v4348_v62, %v4344_v48  ;;  %vm4358_vm11 = vmor %vm4356_vm10, %vm4357_vm9  ;;  %v4377_v14 = vand.u32 2147483648, %v4322_v29  ;;  %v4375_v7 = vand.u32 2147483647, %v4322_v29 }
 0xad6   : > { %4592 = vrot.lane.b32.xlu2 %v4349_v9, %s6365_s22  ;;  %v4353_v5 = vsub.f32 1.0, %v4352_v44  ;;  %vm4371_vm14 = vweird.f32 %v4322_v29 }
 0xad7   : > { %v4226_v17 = vpop.f32.mrf.mxu1  ;;  %v4378_v57 = vor.u32 1.1754944e-38, %v4377_v14  ;;  %vm4376_vm0 = vcmp.eq.f32.partialorder %v4375_v7, 8.507059e+37 }
 0xad8   : > { %v8609_v21 = vadd.f32 %v4226_v17, %v8563_v61  ;;  %v4354_v23 = vmul.f32 %v6166_v8, %v4353_v5 }
 0xada   : > { %v6168_v43 = vpop.eup %6167  ;;  %v5818_v2 = vmul.f32 -1.442695, %v8609_v21  ;;  %v4355_v0 = vadd.f32 %v6166_v8, %v4354_v23 }
 0xadb   : > { %v6170_v39 = vpop.eup %6169  ;;  %v4323_v26 = vadd.f32 1.0, %v6168_v43 }
 0xadc   : > { %6171 = vpow2.f32 %v5818_v2  ;;  %v4359_v13 = vsel %vm4358_vm11, %v6166_v8, %v4355_v0  ;;  %v4367_v20 = vmul.f32 %v6170_v39, %v4322_v29  ;;  %vm4372_vm13 = vweird.f32 %v6170_v39 }
 0xadd   : > { %6173 = vrcp.f32 %v4323_v26  ;;  %v4364_v3 = vsel %vm4361_vm12, %v4363_v59, %v4359_v13  ;;  %vm4373_vm15 = vmor %vm4371_vm14, %vm4372_vm13  ;;  %v4392_v44 = vand.u32 2147483648, %v4323_v26  ;;  %v4390_v5 = vand.u32 2147483647, %v4323_v26 }
 0xade   : > { %4594 = vrot.lane.b32.xlu0 %v4364_v3, %s6365_s22  ;;  %v4368_v60 = vsub.f32 1.0, %v4367_v20  ;;  %vm4386_vm2 = vweird.f32 %v4323_v26 }
 0xadf   : > { %v4228_v28 = vpop.f32.mrf.mxu1  ;;  %v4393_v53 = vor.u32 1.1754944e-38, %v4392_v44  ;;  %vm4391_vm5 = vcmp.eq.f32.partialorder %v4390_v5, 8.507059e+37 }
 0xae0   : > { %v8614_v19 = vadd.f32 %v4228_v28, %v8563_v61  ;;  %v4369_v1 = vmul.f32 %v6170_v39, %v4368_v60 }
 0xae2   : > { %v6172_v56 = vpop.eup %6171  ;;  %v5819_v54 = vmul.f32 -1.442695, %v8614_v19  ;;  %v4370_v27 = vadd.f32 %v6170_v39, %v4369_v1 }
 0xae3   : > { %v6174_v63 = vpop.eup %6173  ;;  %v4324_v46 = vadd.f32 1.0, %v6172_v56 }
 0xae4   : > { %6175 = vpow2.f32 %v5819_v54  ;;  %v4374_v10 = vsel %vm4373_vm15, %v6170_v39, %v4370_v27  ;;  %v4382_v8 = vmul.f32 %v6174_v63, %v4323_v26  ;;  %vm4387_vm1 = vweird.f32 %v6174_v63 }
 0xae5   : > { %6177 = vrcp.f32 %v4324_v46  ;;  %v4379_v62 = vsel %vm4376_vm0, %v4378_v57, %v4374_v10  ;;  %vm4388_vm3 = vmor %vm4386_vm2, %vm4387_vm1  ;;  %v4407_v59 = vand.u32 2147483648, %v4324_v46  ;;  %v4405_v20 = vand.u32 2147483647, %v4324_v46 }
 0xae6   : > { %4596 = vrot.lane.b32.xlu1 %v4379_v62, %s6365_s22  ;;  %v4383_v48 = vsub.f32 1.0, %v4382_v8  ;;  %vm4401_vm7 = vweird.f32 %v4324_v46 }
 0xae7   : > { %v4408_v26 = vor.u32 1.1754944e-38, %v4407_v59  ;;  %vm4406_vm9 = vcmp.eq.f32.partialorder %v4405_v20, 8.507059e+37 }
 0xae8   : > { %v4384_v9 = vmul.f32 %v6174_v63, %v4383_v48 }
 0xaea   : > { %v6176_v17 = vpop.eup %6175  ;;  %v4385_v55 = vadd.f32 %v6174_v63, %v4384_v9 }
 0xaeb   : > { %v6178_v29 = vpop.eup %6177  ;;  %v4325_v23 = vadd.f32 1.0, %v6176_v17 }
 0xaec   : > { %v4389_v43 = vsel %vm4388_vm3, %v6174_v63, %v4385_v55  ;;  %v4397_v2 = vmul.f32 %v6178_v29, %v4324_v46  ;;  %vm4402_vm6 = vweird.f32 %v6178_v29 }
 0xaed   : > { %6179 = vrcp.f32 %v4325_v23  ;;  %v4394_v0 = vsel %vm4391_vm5, %v4393_v53, %v4389_v43  ;;  %vm4403_vm8 = vmor %vm4401_vm7, %vm4402_vm6  ;;  %v4422_v56 = vand.u32 2147483648, %v4325_v23  ;;  %v4420_v27 = vand.u32 2147483647, %v4325_v23 }
 0xaee   : > { %4598 = vrot.lane.b32.xlu2 %v4394_v0, %s6365_s22  ;;  %v4398_v39 = vsub.f32 1.0, %v4397_v2  ;;  %vm4416_vm11 = vweird.f32 %v4325_v23 }
 0xaef   : > { %v4423_v57 = vor.u32 1.1754944e-38, %v4422_v56  ;;  %vm4421_vm13 = vcmp.eq.f32.partialorder %v4420_v27, 8.507059e+37 }
 0xaf0   : > { %v4399_v13 = vmul.f32 %v6178_v29, %v4398_v39 }
 0xaf2   : > { %v4400_v3 = vadd.f32 %v6178_v29, %v4399_v13 }
 0xaf3   : > { %v6180_v60 = vpop.eup %6179 }
 0xaf4   : > { %v4404_v28 = vsel %vm4403_vm8, %v6178_v29, %v4400_v3  ;;  %v4412_v14 = vmul.f32 %v6180_v60, %v4325_v23  ;;  %vm4417_vm10 = vweird.f32 %v6180_v60 }
 0xaf5   : > { %v4409_v1 = vsel %vm4406_vm9, %v4408_v26, %v4404_v28  ;;  %vm4418_vm12 = vmor %vm4416_vm11, %vm4417_vm10 }
 0xaf6   : > { %4600 = vrot.lane.b32.xlu0 %v4409_v1, %s6365_s22  ;;  %v4413_v7 = vsub.f32 1.0, %v4412_v14 }
 0xaf8   : > { %v4414_v54 = vmul.f32 %v6180_v60, %v4413_v7 }
 0xafa   : > { %v4415_v63 = vadd.f32 %v6180_v60, %v4414_v54 }
 0xafc   : > { %v4419_v10 = vsel %vm4418_vm12, %v6180_v60, %v4415_v63 }
 0xafd   : > { %v4424_v46 = vsel %vm4421_vm13, %v4423_v57, %v4419_v10 }
 0xafe   : > { %4602 = vrot.lane.b32.xlu2 %v4424_v46, %s6365_s22 }
 0xb1e   : > { %v4115_v8 = vpop.f32.mrf.mxu0 }
 0xb1f   : > { %v8622_v62 = vadd.f32 %v4115_v8, %v8479_v37 }
 0xb21   : > { %9206 = vst [vmem:[#allocation15_spill] sm:$0xff] %v8622_v62  ;;  %v9172_v9 = vmax.f32 %v8622_v62, 0.0 }
 0xb26   : > { %v4117_v48 = vpop.f32.mrf.mxu0 }
 0xb27   : > { %v8625_v44 = vadd.f32 %v4117_v48, %v8479_v37 }
 0xb29   : > { %9207 = vst [vmem:[#allocation16_spill] sm:$0xff] %v8625_v44  ;;  %v9170_v5 = vmax.f32 %v8625_v44, 0.0 }
 0xb2b   : > { %v4147_v17 = vpack.c.bf16 %v9170_v5, %v9172_v9 }
 0xb2d   : > { %5812 = vmatmul.msk.bf16.gmra.mxu1 %vm9181_vm4, %v4147_v17 }
 0xb2f   : > { %v4120_v55 = vpop.f32.mrf.mxu0 }
 0xb30   : > { %v8639_v43 = vadd.f32 %v4120_v55, %v8479_v37 }
 0xb31   : > { %v4231_v29 = vpop.f32.mrf.mxu1 }
 0xb32   : > { %v8635_v23 = vadd.f32 %v4231_v29, %v8563_v61  ;;  %9208 = vst [vmem:[#allocation17_spill] sm:$0xff] %v8639_v43  ;;  %v9171_v59 = vmax.f32 %v8639_v43, 0.0 }
 0xb34   : > { %v5820_v53 = vmul.f32 -1.442695, %v8635_v23 }
 0xb36   : > { %6181 = vpow2.f32 %v5820_v53 }
 0xb37   : > { %v4122_v2 = vpop.f32.mrf.mxu0 }
 0xb38   : > { %v8642_v0 = vadd.f32 %v4122_v2, %v8479_v37 }
 0xb39   : > { %v4233_v39 = vpop.f32.mrf.mxu1 }
 0xb3a   : > { %9209 = vst [vmem:[#allocation18_spill] sm:$0xff] %v8642_v0  ;;  %v9169_v13 = vmax.f32 %v8642_v0, 0.0  ;;  %v8647_v20 = vadd.f32 %v4233_v39, %v8563_v61 }
 0xb3c   : > { %v6182_v3 = vpop.eup %6181  ;;  %v4148_v60 = vpack.c.bf16 %v9169_v13, %v9171_v59  ;;  %v5821_v26 = vmul.f32 -1.442695, %v8647_v20 }
 0xb3d   : > { %v4326_v28 = vadd.f32 1.0, %v6182_v3 }
 0xb3e   : > { %6183 = vpow2.f32 %v5821_v26  ;;  %5813 = vmatmul.msk.bf16.gmra.mxu1 %vm9181_vm4, %v4148_v60 }
 0xb3f   : > { %6185 = vrcp.f32 %v4326_v28  ;;  %v4437_v10 = vand.u32 2147483648, %v4326_v28  ;;  %v4435_v48 = vand.u32 2147483647, %v4326_v28  ;;  %vm4431_vm15 = vweird.f32 %v4326_v28 }
 0xb41   : > { %v4236_v37 = vpop.f32.mrf.mxu1  ;;  %v4438_v39 = vor.u32 1.1754944e-38, %v4437_v10  ;;  %vm4436_vm1 = vcmp.eq.f32.partialorder %v4435_v48, 8.507059e+37 }
 0xb42   : > { %v8656_v14 = vadd.f32 %v4236_v37, %v8563_v61 }
 0xb44   : > { %v6184_v1 = vpop.eup %6183  ;;  %v5822_v7 = vmul.f32 -1.442695, %v8656_v14 }
 0xb45   : > { %v6186_v56 = vpop.eup %6185  ;;  %v4327_v54 = vadd.f32 1.0, %v6184_v1 }
 0xb46   : > { %6187 = vpow2.f32 %v5822_v7  ;;  %v4427_v27 = vmul.f32 %v6186_v56, %v4326_v28  ;;  %vm4432_vm14 = vweird.f32 %v6186_v56 }
 0xb47   : > { %6189 = vrcp.f32 %v4327_v54  ;;  %vm4433_vm0 = vmor %vm4431_vm15, %vm4432_vm14  ;;  %v4452_v7 = vand.u32 2147483648, %v4327_v54  ;;  %v4450_v28 = vand.u32 2147483647, %v4327_v54  ;;  %vm4446_vm3 = vweird.f32 %v4327_v54 }
 0xb48   : > { %v4428_v63 = vsub.f32 1.0, %v4427_v27 }
 0xb49   : > { %v4238_v57 = vpop.f32.mrf.mxu1  ;;  %vm4451_vm6 = vcmp.eq.f32.partialorder %v4450_v28, 8.507059e+37 }
 0xb4a   : > { %v8660_v46 = vadd.f32 %v4238_v57, %v8563_v61  ;;  %v4429_v8 = vmul.f32 %v6186_v56, %v4428_v63 }
 0xb4c   : > { %v6188_v17 = vpop.eup %6187  ;;  %v5823_v55 = vmul.f32 -1.442695, %v8660_v46  ;;  %v4430_v29 = vadd.f32 %v6186_v56, %v4429_v8 }
 0xb4d   : > { %v6190_v53 = vpop.eup %6189  ;;  %v4328_v2 = vadd.f32 1.0, %v6188_v17  ;;  %v4453_v17 = vor.u32 1.1754944e-38, %v4452_v7 }
 0xb4e   : > { %6191 = vpow2.f32 %v5823_v55  ;;  %v4434_v3 = vsel %vm4433_vm0, %v6186_v56, %v4430_v29  ;;  %v4442_v60 = vmul.f32 %v6190_v53, %v4327_v54  ;;  %vm4447_vm2 = vweird.f32 %v6190_v53 }
 0xb4f   : > { %6193 = vrcp.f32 %v4328_v2  ;;  %v4439_v26 = vsel %vm4436_vm1, %v4438_v39, %v4434_v3  ;;  %vm4448_vm5 = vmor %vm4446_vm3, %vm4447_vm2  ;;  %v4465_v54 = vand.u32 2147483647, %v4328_v2  ;;  %vm4461_vm8 = vweird.f32 %v4328_v2 }
 0xb50   : > { %4604 = vrot.lane.b32.xlu1 %v4439_v26, %s6365_s22  ;;  %v4443_v37 = vsub.f32 1.0, %v4442_v60  ;;  %v4467_v26 = vand.u32 2147483648, %v4328_v2 }
 0xb51   : > { %v4241_v1 = vpop.f32.mrf.mxu1  ;;  %vm4466_vm10 = vcmp.eq.f32.partialorder %v4465_v54, 8.507059e+37 }
 0xb52   : > { %v8665_v27 = vadd.f32 %v4241_v1, %v8563_v61  ;;  %v4444_v63 = vmul.f32 %v6190_v53, %v4443_v37 }
 0xb54   : > { %v6192_v57 = vpop.eup %6191  ;;  %v5824_v10 = vmul.f32 -1.442695, %v8665_v27  ;;  %v4445_v8 = vadd.f32 %v6190_v53, %v4444_v63 }
 0xb55   : > { %v6194_v56 = vpop.eup %6193  ;;  %v4329_v48 = vadd.f32 1.0, %v6192_v57 }
 0xb56   : > { %6195 = vpow2.f32 %v5824_v10  ;;  %v4449_v55 = vsel %vm4448_vm5, %v6190_v53, %v4445_v8  ;;  %v4457_v29 = vmul.f32 %v6194_v56, %v4328_v2  ;;  %vm4462_vm7 = vweird.f32 %v6194_v56 }
 0xb57   : > { %6197 = vrcp.f32 %v4329_v48  ;;  %v4454_v39 = vsel %vm4451_vm6, %v4453_v17, %v4449_v55  ;;  %vm4463_vm9 = vmor %vm4461_vm8, %vm4462_vm7  ;;  %v4468_v10 = vor.u32 1.1754944e-38, %v4467_v26  ;;  %vm4476_vm12 = vweird.f32 %v4329_v48 }
 0xb58   : > { %4606 = vrot.lane.b32.xlu0 %v4454_v39, %s6365_s22  ;;  %v4458_v3 = vsub.f32 1.0, %v4457_v29  ;;  %v4482_v39 = vand.u32 2147483648, %v4329_v48 }
 0xb59   : > { %v4243_v60 = vpop.f32.mrf.mxu1 }
 0xb5a   : > { %v8670_v37 = vadd.f32 %v4243_v60, %v8563_v61  ;;  %v4459_v1 = vmul.f32 %v6194_v56, %v4458_v3  ;;  %v4480_v60 = vand.u32 2147483647, %v4329_v48  ;;  %v4483_v26 = vor.u32 1.1754944e-38, %v4482_v39 }
 0xb5c   : > { %v6196_v63 = vpop.eup %6195  ;;  %v5825_v7 = vmul.f32 -1.442695, %v8670_v37  ;;  %v4460_v57 = vadd.f32 %v6194_v56, %v4459_v1  ;;  %vm4481_vm14 = vcmp.eq.f32.partialorder %v4480_v60, 8.507059e+37 }
 0xb5d   : > { %v6198_v53 = vpop.eup %6197  ;;  %v4330_v28 = vadd.f32 1.0, %v6196_v63 }
 0xb5e   : > { %6199 = vpow2.f32 %v5825_v7  ;;  %v4464_v8 = vsel %vm4463_vm9, %v6194_v56, %v4460_v57  ;;  %v4472_v17 = vmul.f32 %v6198_v53, %v4329_v48  ;;  %vm4477_vm11 = vweird.f32 %v6198_v53 }
 0xb5f   : > { %6201 = vrcp.f32 %v4330_v28  ;;  %v4469_v55 = vsel %vm4466_vm10, %v4468_v10, %v4464_v8  ;;  %vm4478_vm13 = vmor %vm4476_vm12, %vm4477_vm11  ;;  %v4497_v10 = vand.u32 2147483648, %v4330_v28  ;;  %vm4491_vm0 = vweird.f32 %v4330_v28 }
 0xb60   : > { %4608 = vrot.lane.b32.xlu2 %v4469_v55, %s6365_s22  ;;  %v4473_v29 = vsub.f32 1.0, %v4472_v17  ;;  %v4495_v17 = vand.u32 2147483647, %v4330_v28 }
 0xb61   : > { %v4498_v48 = vor.u32 1.1754944e-38, %v4497_v10 }
 0xb62   : > { %v4474_v3 = vmul.f32 %v6198_v53, %v4473_v29  ;;  %vm4496_vm2 = vcmp.eq.f32.partialorder %v4495_v17, 8.507059e+37 }
 0xb64   : > { %v6200_v13 = vpop.eup %6199  ;;  %v4475_v1 = vadd.f32 %v6198_v53, %v4474_v3 }
 0xb65   : > { %v6202_v2 = vpop.eup %6201  ;;  %v4331_v63 = vadd.f32 1.0, %v6200_v13 }
 0xb66   : > { %v4479_v7 = vsel %vm4478_vm13, %v6198_v53, %v4475_v1  ;;  %v4487_v56 = vmul.f32 %v6202_v2, %v4330_v28  ;;  %vm4492_vm15 = vweird.f32 %v6202_v2 }
 0xb67   : > { %6203 = vrcp.f32 %v4331_v63  ;;  %v4484_v54 = vsel %vm4481_vm14, %v4483_v26, %v4479_v7  ;;  %vm4493_vm1 = vmor %vm4491_vm0, %vm4492_vm15  ;;  %v4512_v60 = vand.u32 2147483648, %v4331_v63  ;;  %v4510_v26 = vand.u32 2147483647, %v4331_v63 }
 0xb68   : > { %4610 = vrot.lane.b32.xlu1 %v4484_v54, %s6365_s22  ;;  %v4488_v57 = vsub.f32 1.0, %v4487_v56  ;;  %vm4506_vm5 = vweird.f32 %v4331_v63 }
 0xb69   : > { %v4513_v56 = vor.u32 1.1754944e-38, %v4512_v60  ;;  %vm4511_vm7 = vcmp.eq.f32.partialorder %v4510_v26, 8.507059e+37 }
 0xb6a   : > { %v4489_v8 = vmul.f32 %v6202_v2, %v4488_v57 }
 0xb6c   : > { %v4490_v55 = vadd.f32 %v6202_v2, %v4489_v8 }
 0xb6d   : > { %v6204_v29 = vpop.eup %6203 }
 0xb6e   : > { %v4494_v13 = vsel %vm4493_vm1, %v6202_v2, %v4490_v55  ;;  %v4502_v39 = vmul.f32 %v6204_v29, %v4331_v63  ;;  %vm4507_vm3 = vweird.f32 %v6204_v29 }
 0xb6f   : > { %v4499_v53 = vsel %vm4496_vm2, %v4498_v48, %v4494_v13  ;;  %vm4508_vm6 = vmor %vm4506_vm5, %vm4507_vm3 }
 0xb70   : > { %4612 = vrot.lane.b32.xlu0 %v4499_v53, %s6365_s22  ;;  %v4503_v3 = vsub.f32 1.0, %v4502_v39 }
 0xb72   : > { %v4504_v1 = vmul.f32 %v6204_v29, %v4503_v3 }
 0xb74   : > { %v4505_v7 = vadd.f32 %v6204_v29, %v4504_v1 }
 0xb76   : > { %v4509_v54 = vsel %vm4508_vm6, %v6204_v29, %v4505_v7 }
 0xb77   : > { %v4514_v28 = vsel %vm4511_vm7, %v4513_v56, %v4509_v54 }
 0xb78   : > { %4614 = vrot.lane.b32.xlu2 %v4514_v28, %s6365_s22 }
 0xbaa   : > { %v4246_v2 = vpop.f32.mrf.mxu1 }
 0xbab   : > { %v8678_v57 = vadd.f32 %v4246_v2, %v8563_v61 }
 0xbad   : > { %v5826_v10 = vmul.f32 -1.442695, %v8678_v57 }
 0xbaf   : > { %6205 = vpow2.f32 %v5826_v10 }
 0xbb2   : > { %v4248_v8 = vpop.f32.mrf.mxu1 }
 0xbb3   : > { %v8682_v17 = vadd.f32 %v4248_v8, %v8563_v61 }
 0xbb5   : > { %v6206_v55 = vpop.eup %6205  ;;  %v5827_v63 = vmul.f32 -1.442695, %v8682_v17 }
 0xbb6   : > { %v4332_v48 = vadd.f32 1.0, %v6206_v55 }
 0xbb7   : > { %6207 = vpow2.f32 %v5827_v63 }
 0xbb8   : > { %6209 = vrcp.f32 %v4332_v48  ;;  %v4527_v7 = vand.u32 2147483648, %v4332_v48  ;;  %v4525_v28 = vand.u32 2147483647, %v4332_v48  ;;  %vm4521_vm9 = vweird.f32 %v4332_v48 }
 0xbba   : > { %v4528_v63 = vor.u32 1.1754944e-38, %v4527_v7  ;;  %vm4526_vm11 = vcmp.eq.f32.partialorder %v4525_v28, 8.507059e+37 }
 0xbbb   : > { %v4251_v29 = vpop.f32.mrf.mxu1 }
 0xbbc   : > { %v8686_v13 = vadd.f32 %v4251_v29, %v8563_v61 }
 0xbbd   : > { %v6208_v39 = vpop.eup %6207 }
 0xbbe   : > { %v6210_v53 = vpop.eup %6209  ;;  %v4333_v3 = vadd.f32 1.0, %v6208_v39  ;;  %v5828_v60 = vmul.f32 -1.442695, %v8686_v13 }
 0xbbf   : > { %v4517_v1 = vmul.f32 %v6210_v53, %v4332_v48  ;;  %vm4522_vm8 = vweird.f32 %v6210_v53 }
 0xbc0   : > { %6211 = vrcp.f32 %v4333_v3  ;;  %vm4523_vm10 = vmor %vm4521_vm9, %vm4522_vm8  ;;  %v4540_v48 = vand.u32 2147483647, %v4333_v3  ;;  %vm4536_vm13 = vweird.f32 %v4333_v3 }
 0xbc1   : > { %6213 = vpow2.f32 %v5828_v60  ;;  %v4518_v26 = vsub.f32 1.0, %v4517_v1 }
 0xbc2   : > { %vm4541_vm15 = vcmp.eq.f32.partialorder %v4540_v48, 8.507059e+37 }
 0xbc3   : > { %v4253_v56 = vpop.f32.mrf.mxu1  ;;  %v4519_v54 = vmul.f32 %v6210_v53, %v4518_v26 }
 0xbc4   : > { %v8690_v2 = vadd.f32 %v4253_v56, %v8563_v61  ;;  %v4542_v61 = vand.u32 2147483648, %v4333_v3 }
 0xbc5   : > { %v4520_v10 = vadd.f32 %v6210_v53, %v4519_v54 }
 0xbc6   : > { %v6212_v8 = vpop.eup %6211  ;;  %v5829_v55 = vmul.f32 -1.442695, %v8690_v2  ;;  %v4543_v7 = vor.u32 1.1754944e-38, %v4542_v61 }
 0xbc7   : > { %v6214_v29 = vpop.eup %6213  ;;  %v4524_v39 = vsel %vm4523_vm10, %v6210_v53, %v4520_v10  ;;  %v4532_v60 = vmul.f32 %v6212_v8, %v4333_v3  ;;  %vm4537_vm12 = vweird.f32 %v6212_v8  ;;  %vm4806_vm10 = vcmask 7168  }
 0xbc8   : > { %v4334_v1 = vadd.f32 1.0, %v6214_v29  ;;  %6215 = vpow2.f32 %v5829_v55  ;;  %v4529_v5 = vsel %vm4526_vm11, %v4528_v63, %v4524_v39  ;;  %vm4538_vm14 = vmor %vm4536_vm13, %vm4537_vm12 }
 0xbc9   : > { %4616 = vrot.lane.b32.xlu1 %v4529_v5, %s6365_s22  ;;  %v4533_v26 = vsub.f32 1.0, %v4532_v60 }
 0xbca   : > { %6217 = vrcp.f32 %v4334_v1  ;;  %v4557_v63 = vand.u32 2147483648, %v4334_v1  ;;  %v4555_v39 = vand.u32 2147483647, %v4334_v1  ;;  %vm4551_vm1 = vweird.f32 %v4334_v1 }
 0xbcb   : > { %v4534_v56 = vmul.f32 %v6212_v8, %v4533_v26 }
 0xbcc   : > { %v4558_v3 = vor.u32 1.1754944e-38, %v4557_v63  ;;  %vm4556_vm3 = vcmp.eq.f32.partialorder %v4555_v39, 8.507059e+37 }
 0xbcd   : > { %v4535_v54 = vadd.f32 %v6212_v8, %v4534_v56 }
 0xbce   : > { %v6216_v59 = vpop.eup %6215 }
 0xbcf   : > { %v4335_v9 = vadd.f32 1.0, %v6216_v59  ;;  %v4539_v53 = vsel %vm4538_vm14, %v6212_v8, %v4535_v54 }
 0xbd0   : > { %v6218_v28 = vpop.eup %6217  ;;  %v4544_v10 = vsel %vm4541_vm15, %v4543_v7, %v4539_v53 }
 0xbd1   : > { %6219 = vrcp.f32 %v4335_v9  ;;  %4618 = vrot.lane.b32.xlu0 %v4544_v10, %s6365_s22  ;;  %v4547_v5 = vmul.f32 %v6218_v28, %v4334_v1  ;;  %vm4552_vm0 = vweird.f32 %v6218_v28  ;;  %v4572_v48 = vand.u32 2147483648, %v4335_v9 }
 0xbd2   : > { %vm4553_vm2 = vmor %vm4551_vm1, %vm4552_vm0  ;;  %v4570_v7 = vand.u32 2147483647, %v4335_v9  ;;  %vm4566_vm6 = vweird.f32 %v4335_v9  ;;  %6221 = vtanh.f32 %v8566_v38 }
 0xbd3   : > { %v4548_v55 = vsub.f32 1.0, %v4547_v5  ;;  %v4573_v10 = vor.u32 1.1754944e-38, %v4572_v48  ;;  %6223 = vtanh.f32 %v8599_v16 }
 0xbd4   : > { %vm4571_vm8 = vcmp.eq.f32.partialorder %v4570_v7, 8.507059e+37  ;;  %6225 = vtanh.f32 %v8578_v34 }
 0xbd5   : > { %v4549_v29 = vmul.f32 %v6218_v28, %v4548_v55  ;;  %6227 = vtanh.f32 %v8587_v15 }
 0xbd6   : > { %6229 = vtanh.f32 %v8635_v23 }
 0xbd7   : > { %v6220_v60 = vpop.eup %6219  ;;  %v4550_v26 = vadd.f32 %v6218_v28, %v4549_v29  ;;  %v8702_v29 = vld [vmem:[%s9166_s13 + $0x23] ss:$0 sm:$0xff]  ;;  %6231 = vtanh.f32 %v8609_v21 }
 0xbd8   : > { %v4562_v61 = vmul.f32 %v6220_v60, %v4335_v9  ;;  %vm4567_vm5 = vweird.f32 %v6220_v60  ;;  %v6222_v55 = vpop.eup %6221  ;;  %6233 = vtanh.f32 %v8614_v19 }
 0xbd9   : > { %v4554_v59 = vsel %vm4553_vm2, %v6218_v28, %v4550_v26  ;;  %vm4568_vm7 = vmor %vm4566_vm6, %vm4567_vm5  ;;  %v4593_v28 = vpop.permute.xlu2 %4592  ;;  %v4595_v26 = vpop.permute.xlu0 %4594  ;;  %6235 = vtanh.f32 %v8660_v46 }
 0xbda   : > { %v4559_v8 = vsel %vm4556_vm3, %v4558_v3, %v4554_v59  ;;  %v4563_v56 = vsub.f32 1.0, %v4562_v61  ;;  %v4640_v63 = vmul.f32 %v6222_v55, %v4593_v28  ;;  %v6224_v3 = vpop.eup %6223  ;;  %6237 = vtanh.f32 %v8647_v20 }
 0xbdb   : > { %4620 = vrot.lane.b32.xlu2 %v4559_v8, %s6365_s22  ;;  %v6226_v61 = vpop.eup %6225  ;;  %6239 = vtanh.f32 %v8656_v14 }
 0xbdc   : > { %v4564_v54 = vmul.f32 %v6220_v60, %v4563_v56  ;;  %v4657_v9 = vmul.f32 %v8702_v29, %v4640_v63  ;;  %v4641_v16 = vmul.f32 %v6226_v61, %v4595_v26  ;;  %v6228_v48 = vpop.eup %6227  ;;  %6241 = vtanh.f32 %v8665_v27 }
 0xbdd   : > { %v6230_v7 = vpop.eup %6229  ;;  %6243 = vtanh.f32 %v8670_v37 }
 0xbde   : > { %v4565_v53 = vadd.f32 %v6220_v60, %v4564_v54  ;;  %v4673_v59 = vsel %vm9181_vm4, %v4657_v9, 0.0  ;;  %v4658_v56 = vmul.f32 %v8702_v29, %v4641_v16  ;;  %6245 = vtanh.f32 %v8686_v13 }
 0xbdf   : > { %6247 = vtanh.f32 %v8678_v57 }
 0xbe0   : > { %v4569_v5 = vsel %vm4568_vm7, %v6220_v60, %v4565_v53  ;;  %v4597_v60 = vpop.permute.xlu1 %4596  ;;  %v6232_v53 = vpop.eup %6231  ;;  %v4676_v21 = vsel %vm9181_vm4, %v4658_v56, 0.0  ;;  %6249 = vtanh.f32 %v8682_v17 }
 0xbe1   : > { %v4574_v1 = vsel %vm4571_vm8, %v4573_v10, %v4569_v5  ;;  %v4599_v39 = vpop.permute.xlu2 %4598  ;;  %v4601_v54 = vpop.permute.xlu0 %4600  ;;  %v4642_v23 = vmul.f32 %v6228_v48, %v4597_v60  ;;  %6251 = vtanh.f32 %v8690_v2 }
 0xbe2   : > { %4622 = vrot.lane.b32.xlu1 %v4574_v1, %s6365_s22  ;;  %v4643_v38 = vmul.f32 %v6224_v3, %v4599_v39  ;;  %v4644_v5 = vmul.f32 %v6232_v53, %v4601_v54  ;;  %v6234_v63 = vpop.eup %6233 }
 0xbe3   : > { %v4659_v19 = vmul.f32 %v8702_v29, %v4642_v23  ;;  %v6236_v26 = vpop.eup %6235 }
 0xbe4   : > { %v4660_v34 = vmul.f32 %v8702_v29, %v4643_v38  ;;  %v4661_v28 = vmul.f32 %v8702_v29, %v4644_v5  ;;  %v6238_v46 = vpop.eup %6237 }
 0xbe6   : > { %v4682_v10 = vsel %vm9181_vm4, %v4660_v34, 0.0  ;;  %v4685_v38 = vsel %vm9181_vm4, %v4661_v28, 0.0 }
 0xbe8   : > { %v4605_v8 = vpop.permute.xlu1 %4604 }
 0xbe9   : > { %v4646_v15 = vmul.f32 %v6230_v7, %v4605_v8  ;;  %v4603_v9 = vpop.permute.xlu2 %4602  ;;  %v4607_v39 = vpop.permute.xlu0 %4606 }
 0xbea   : > { %v4645_v61 = vmul.f32 %v6234_v63, %v4603_v9  ;;  %v4647_v20 = vmul.f32 %v6238_v46, %v4607_v39  ;;  %v6240_v8 = vpop.eup %6239 }
 0xbeb   : > { %v4663_v1 = vmul.f32 %v8702_v29, %v4646_v15  ;;  %v6242_v54 = vpop.eup %6241 }
 0xbec   : > { %v4662_v34 = vmul.f32 %v8702_v29, %v4645_v61  ;;  %v4664_v14 = vmul.f32 %v8702_v29, %v4647_v20 }
 0xbed   : > { %v4691_v3 = vsel %vm9181_vm4, %v4663_v1, 0.0  ;;  %v6244_v1 = vpop.eup %6243 }
 0xbee   : > { %v4688_v27 = vsel %vm9181_vm4, %v4662_v34, 0.0  ;;  %v6246_v37 = vpop.eup %6245 }
 0xbf0   : > { %v4611_v55 = vpop.permute.xlu1 %4610 }
 0xbf1   : > { %v4649_v60 = vmul.f32 %v6236_v26, %v4611_v55  ;;  %v4609_v56 = vpop.permute.xlu2 %4608  ;;  %v4613_v48 = vpop.permute.xlu0 %4612 }
 0xbf2   : > { %v4648_v53 = vmul.f32 %v6240_v8, %v4609_v56  ;;  %v4650_v15 = vmul.f32 %v6242_v54, %v4613_v48 }
 0xbf3   : > { %v4666_v16 = vmul.f32 %v8702_v29, %v4649_v60 }
 0xbf4   : > { %v4665_v23 = vmul.f32 %v8702_v29, %v4648_v53  ;;  %v4667_v5 = vmul.f32 %v8702_v29, %v4650_v15 }
 0xbf5   : > { %v4700_v7 = vsel %vm9181_vm4, %v4666_v16, 0.0 }
 0xbf6   : > { %v4703_v55 = vsel %vm9181_vm4, %v4667_v5, 0.0  ;;  %v4739_v5 = vlaneseq }
 0xbfb   : > { %4674 = vadd.xlane.f32.xlu0 %v4673_v59  ;;  %v4679_v59 = vsel %vm9181_vm4, %v4659_v19, 0.0  ;;  %v4697_v19 = vsel %vm9181_vm4, %v4665_v23, 0.0 }
 0xc03   : > { %4683 = vadd.xlane.f32.xlu0 %v4682_v10  ;;  %v4694_v10 = vsel %vm9181_vm4, %v4664_v14, 0.0 }
 0xc04   : > { %4677 = vadd.xlane.f32.xlu2 %v4676_v21  ;;  %v4615_v21 = vpop.permute.xlu2 %4614 }
 0xc05   : > { %v4651_v28 = vmul.f32 %v6244_v1, %v4615_v21  ;;  %v8753_v1 = vshrl.u32 %v4739_v5, 7 }
 0xc07   : > { %v4668_v63 = vmul.f32 %v8702_v29, %v4651_v28  ;;  %v4755_v35 = vadd.s32 120, %v8753_v1 }
 0xc09   : > { %v4706_v9 = vsel %vm9181_vm4, %v4668_v63, 0.0  ;;  %v4744_v63 = vadd.s32 32, %v8753_v1 }
 0xc0b   : > { %4692 = vadd.xlane.f32.xlu0 %v4691_v3  ;;  %v6248_v3 = vpop.eup %6247 }
 0xc0c   : > { %4686 = vadd.xlane.f32.xlu2 %v4685_v38  ;;  %4680 = vadd.xlane.f32.xlu1 %v4679_v59  ;;  %v6250_v13 = vpop.eup %6249 }
 0xc0d   : > { %v6252_v8 = vpop.eup %6251 }
 0xc13   : > { %4701 = vadd.xlane.f32.xlu0 %v4700_v7 }
 0xc14   : > { %4695 = vadd.xlane.f32.xlu2 %v4694_v10  ;;  %4689 = vadd.xlane.f32.xlu1 %v4688_v27 }
 0xc1c   : > { %4704 = vadd.xlane.f32.xlu2 %v4703_v55  ;;  %4698 = vadd.xlane.f32.xlu1 %v4697_v19  ;;  %v8757_v55 = vstv %s5830_s26  ;;  %v4743_v19 = vadd.s32 24, %v8753_v1 }
 0xc1d   : > { %v8912_v45 = vadd.s32 %v8757_v55, %v4755_v35 }
 0xc24   : > { %4707 = vadd.xlane.f32.xlu1 %v4706_v9  ;;  %v4742_v9 = vadd.s32 16, %v8753_v1 }
 0xc35   : > { %v4621_v39 = vpop.permute.xlu2 %4620 }
 0xc36   : > { %v4654_v26 = vmul.f32 %v6246_v37, %v4621_v39  ;;  %v4746_v37 = vadd.s32 48, %v8753_v1  ;;  %v4747_v39 = vadd.s32 56, %v8753_v1 }
 0xc38   : > { %v4671_v46 = vmul.f32 %v8702_v29, %v4654_v26  ;;  %v8767_v26 = vadd.s32 %v8757_v55, %v8753_v1 }
 0xc3a   : > { %v4715_v60 = vsel %vm9181_vm4, %v4671_v46, 0.0  ;;  %v4745_v46 = vadd.s32 40, %v8753_v1  ;;  %vm4773_vm9 = vcmp.lt.s32.totalorder %v8767_v26, 200 }
 0xc3b   : > { %4716 = vadd.xlane.f32.xlu1 %v4715_v60  ;;  %v4617_v61 = vpop.permute.xlu1 %4616  ;;  %v8773_v60 = vld [vmem:[%s9166_s13 + $0x24] ss:$0 sm:$0xff] }
 0xc3c   : > { %v4652_v20 = vmul.f32 %v6248_v3, %v4617_v61  ;;  %v8779_v61 = vadd.s32 %v8757_v55, %v4743_v19 }
 0xc3e   : > { %v4669_v38 = vmul.f32 %v8702_v29, %v4652_v20  ;;  %v8782_v20 = vadd.s32 %v8757_v55, %v4744_v63  ;;  %vm4776_vm12 = vcmp.lt.s32.totalorder %v8779_v61, 200 }
 0xc40   : > { %v4709_v59 = vsel %vm9181_vm4, %v4669_v38, 0.0  ;;  %v8785_v38 = vadd.s32 %v8757_v55, %v4742_v9  ;;  %vm4777_vm13 = vcmp.lt.s32.totalorder %v8782_v20, 200 }
 0xc41   : > { %4710 = vadd.xlane.f32.xlu0 %v4709_v59  ;;  %v4749_v59 = vadd.s32 72, %v8753_v1 }
 0xc42   : > { %vm4775_vm14 = vcmp.lt.s32.totalorder %v8785_v38, 200 }
 0xc43   : > { %v4619_v16 = vpop.permute.xlu0 %4618  ;;  %v8809_v5 = vadd.s32 %v8757_v55, %v4749_v59 }
 0xc44   : > { %v4653_v57 = vmul.f32 %v6250_v13, %v4619_v16  ;;  %v4750_v13 = vadd.s32 80, %v8753_v1  ;;  %v8790_v16 = vadd.s32 %v8757_v55, %v4746_v37  ;;  %v4753_v37 = vadd.s32 104, %v8753_v1 }
 0xc45   : > { %vm4782_vm2 = vcmp.lt.s32.totalorder %v8809_v5, 200 }
 0xc46   : > { %v4670_v34 = vmul.f32 %v8702_v29, %v4653_v57  ;;  %v8793_v57 = vadd.s32 %v8757_v55, %v4747_v39  ;;  %vm4779_vm15 = vcmp.lt.s32.totalorder %v8790_v16, 200 }
 0xc48   : > { %v4712_v14 = vsel %vm9181_vm4, %v4670_v34, 0.0  ;;  %v4748_v34 = vadd.s32 64, %v8753_v1  ;;  %vm4780_vm0 = vcmp.lt.s32.totalorder %v8793_v57, 200 }
 0xc49   : > { %4713 = vadd.xlane.f32.xlu2 %v4712_v14  ;;  %v4751_v14 = vadd.s32 88, %v8753_v1 }
 0xc54   : > { %v4623_v56 = vpop.permute.xlu1 %4622 }
 0xc55   : > { %v4655_v48 = vmul.f32 %v6252_v8, %v4623_v56  ;;  %v8800_v56 = vadd.s32 %v8757_v55, %v4745_v46 }
 0xc57   : > { %v4672_v17 = vmul.f32 %v8702_v29, %v4655_v48  ;;  %v4741_v29 = vadd.s32 8, %v8753_v1  ;;  %vm4778_vm1 = vcmp.lt.s32.totalorder %v8800_v56, 200 }
 0xc59   : > { %v4718_v54 = vsel %vm9181_vm4, %v4672_v17, 0.0  ;;  %v8776_v3 = vadd.s32 %v8757_v55, %v4741_v29  ;;  %v8812_v29 = vadd.s32 %v8757_v55, %v4750_v13 }
 0xc5a   : > { %4719 = vadd.xlane.f32.xlu0 %v4718_v54 }
 0xc5b   : > { %vm4774_vm11 = vcmp.lt.s32.totalorder %v8776_v3, 200  ;;  %vm4783_vm3 = vcmp.lt.s32.totalorder %v8812_v29, 200 }
 0xc6e   : > { %v4675_v53 = vpop.xlane.xlu0 %4674 }
 0xc6f   : > { %v4722_v8 = vadd.f32 %v8773_v60, %v4675_v53 }
 0xc71   : > { %v8824_v63 = vsel %vm4773_vm9, %v4722_v8, -inf }
 0xc76   : > { %v4684_v27 = vpop.xlane.xlu0 %4683 }
 0xc77   : > { %v4678_v7 = vpop.xlane.xlu2 %4677  ;;  %v4725_v54 = vadd.f32 %v8773_v60, %v4684_v27  ;;  %v8820_v27 = vadd.s32 %v8757_v55, %v4751_v14  ;;  %v8845_v14 = vsel %vm4806_vm10, %v8824_v63, -inf }
 0xc78   : > { %v4723_v17 = vadd.f32 %v8773_v60, %v4678_v7  ;;  %v8817_v7 = vadd.s32 %v8757_v55, %v4748_v34  ;;  %v4752_v34 = vadd.s32 96, %v8753_v1 }
 0xc79   : > { %v8835_v46 = vsel %vm4776_vm12, %v4725_v54, -inf  ;;  %vm4784_vm6 = vcmp.lt.s32.totalorder %v8820_v27, 200  ;;  %v8859_v54 = vadd.s32 %v8757_v55, %v4753_v37 }
 0xc7a   : > { %v8831_v39 = vsel %vm4774_vm11, %v4723_v17, -inf  ;;  %vm4781_vm5 = vcmp.lt.s32.totalorder %v8817_v7, 200  ;;  %v8877_v30 = vadd.s32 %v8757_v55, %v4752_v34 }
 0xc7b   : > { %vm9184_vm7 = vcmp.lt.s32.totalorder %v8859_v54, 200 }
 0xc7c   : > { %vm4785_vm4 = vcmp.lt.s32.totalorder %v8877_v30, 200 }
 0xc7e   : > { %v4693_v2 = vpop.xlane.xlu0 %4692 }
 0xc7f   : > { %v4681_v15 = vpop.xlane.xlu1 %4680  ;;  %v4687_v10 = vpop.xlane.xlu2 %4686  ;;  %v4728_v9 = vadd.f32 %v8773_v60, %v4693_v2  ;;  %v4754_v2 = vadd.s32 112, %v8753_v1 }
 0xc80   : > { %v4724_v59 = vadd.f32 %v8773_v60, %v4681_v15  ;;  %v4726_v8 = vadd.f32 %v8773_v60, %v4687_v10  ;;  %v4808_v15 = vsel %vm4806_vm10, %v8831_v39, -inf }
 0xc81   : > { %v8856_v17 = vsel %vm4779_vm15, %v4728_v9, -inf  ;;  %v8874_v52 = vadd.s32 %v8757_v55, %v4754_v2 }
 0xc82   : > { %v8863_v10 = vsel %vm4775_vm14, %v4724_v59, -inf  ;;  %v4815_v34 = vsel %vm4806_vm10, %v8856_v17, -inf }
 0xc83   : > { %v4809_v2 = vsel %vm4806_vm10, %v8863_v10, -inf  ;;  %vm9195_vm8 = vcmp.lt.s32.totalorder %v8874_v52, 200 }
 0xc84   : > { %v4816_v11 = vmax.f32 %v4809_v2, %v4815_v34 }
 0xc86   : > { %v4702_v53 = vpop.xlane.xlu0 %4701 }
 0xc87   : > { %v4690_v23 = vpop.xlane.xlu1 %4689  ;;  %v8751_v21 = vpop.xlane.xlu2 %4695  ;;  %v4731_v12 = vadd.f32 %v8773_v60, %v4702_v53 }
 0xc88   : > { %v4727_v13 = vadd.f32 %v8773_v60, %v4690_v23  ;;  %v4810_v23 = vsel %vm4806_vm10, %v8835_v46, -inf  ;;  %v4729_v36 = vadd.f32 %v8773_v60, %v8751_v21  ;;  %v8882_v21 = vsel %vm4777_vm13, %v4726_v8, -inf }
 0xc8a   : > { %v8869_v18 = vsel %vm4778_vm1, %v4727_v13, -inf  ;;  %v8897_v8 = vsel %vm4780_vm0, %v4729_v36, -inf }
 0xc8b   : > { %v4813_v1 = vsel %vm4806_vm10, %v8869_v18, -inf  ;;  %v4817_v35 = vsel %vm4806_vm10, %v8897_v8, -inf }
 0xc8c   : > { %v4814_v36 = vmax.f32 %v4808_v15, %v4813_v1  ;;  %v4818_v4 = vmax.f32 %v4810_v23, %v4817_v35 }
 0xc8f   : > { %v8755_v28 = vpop.xlane.xlu1 %4698  ;;  %v4705_v48 = vpop.xlane.xlu2 %4704 }
 0xc90   : > { %v4732_v9 = vadd.f32 %v8773_v60, %v4705_v48  ;;  %v4730_v13 = vadd.f32 %v8773_v60, %v8755_v28  ;;  %v8901_v28 = vsel %vm4782_vm2, %v4731_v12, -inf }
 0xc91   : > { %v4821_v55 = vsel %vm4806_vm10, %v8901_v28, -inf }
 0xc92   : > { %v8907_v42 = vsel %vm4783_vm3, %v4732_v9, -inf  ;;  %v8916_v12 = vsel %vm4781_vm5, %v4730_v13, -inf }
 0xc93   : > { %v4823_v15 = vsel %vm4806_vm10, %v8907_v42, -inf }
 0xc94   : > { %v4824_v44 = vmax.f32 %v4816_v11, %v4823_v15 }
 0xc97   : > { %v4708_v19 = vpop.xlane.xlu1 %4707 }
 0xc98   : > { %v4733_v53 = vadd.f32 %v8773_v60, %v4708_v19 }
 0xcae   : > { %v4717_v37 = vpop.xlane.xlu1 %4716 }
 0xcb4   : > { %v4711_v59 = vpop.xlane.xlu0 %4710 }
 0xcb5   : > { %v4734_v19 = vadd.f32 %v8773_v60, %v4711_v59  ;;  %v4811_v59 = vsel %vm4806_vm10, %v8882_v21, -inf }
 0xcbc   : > { %v4714_v47 = vpop.xlane.xlu2 %4713 }
 0xcbd   : > { %v4735_v48 = vadd.f32 %v8773_v60, %v4714_v47  ;;  %v4736_v47 = vadd.f32 %v8773_v60, %v4717_v37  ;;  %v8920_v37 = vsel %vm4784_vm6, %v4733_v53, -inf  ;;  %v8940_v53 = vsel %vm4785_vm4, %v4734_v19, -inf }
 0xcbe   : > { %v4825_v2 = vsel %vm4806_vm10, %v8920_v37, -inf  ;;  %v4822_v19 = vmax.f32 %v4814_v36, %v4821_v55  ;;  %v4827_v62 = vsel %vm4806_vm10, %v8940_v53, -inf }
 0xcbf   : > { %v8924_v9 = vsel %vm9184_vm7, %v4735_v48, -inf  ;;  %v8936_v13 = vsel %vm9195_vm8, %v4736_v47, -inf  ;;  %v4819_v48 = vsel %vm4806_vm10, %v8916_v12, -inf  ;;  %vm4788_vm7 = vcmp.lt.s32.totalorder %v8912_v45, 200 }
 0xcc0   : > { %v4829_v34 = vsel %vm4806_vm10, %v8924_v9, -inf  ;;  %v4812_v47 = vmax.f32 %v8845_v14, %v4811_v59  ;;  %v4831_v43 = vsel %vm4806_vm10, %v8936_v13, -inf  ;;  %v4826_v40 = vmax.f32 %v4818_v4, %v4825_v2  ;;  %v4805_v4 = vld [vmem:[#allocation2] sm:$0x1] }
 0xcc1   : > { %v4830_v32 = vmax.f32 %v4822_v19, %v4829_v34  ;;  %v4832_v23 = vmax.f32 %v4824_v44, %v4831_v43  ;;  %vm4955_vm8 = vcmask 0  }
 0xcc2   : > { %v4820_v25 = vmax.f32 %v4812_v47, %v4819_v48 }
 0xccd   : > { %v4720_v1 = vpop.xlane.xlu0 %4719 }
 0xcce   : > { %v4737_v0 = vadd.f32 %v8773_v60, %v4720_v1  ;;  %v4828_v60 = vmax.f32 %v4820_v25, %v4827_v62 }
 0xcd0   : > { %v8957_v31 = vsel %vm4788_vm7, %v4737_v0, -inf  ;;  %v4835_v11 = vmax.f32 %v4828_v60, %v4830_v32 }
 0xcd1   : > { %v4833_v14 = vsel %vm4806_vm10, %v8957_v31, -inf }
 0xcd2   : > { %v4834_v51 = vmax.f32 %v4826_v40, %v4833_v14 }
 0xcd4   : > { %v4836_v36 = vmax.f32 %v4832_v23, %v4834_v51 }
 0xcd6   : > { %v4837_v59 = vmax.f32 %v4835_v11, %v4836_v36 }
 0xcd8   : > { %v4838_v35 = vrot.slane %v4837_v59, 4 }
 0xcda   : > { %v4839_v55 = vmax.f32 %v4837_v59, %v4838_v35 }
 0xcdc   : > { %v4840_v15 = vrot.slane %v4839_v55, 2 }
 0xcde   : > { %v4841_v1 = vmax.f32 %v4839_v55, %v4840_v15 }
 0xce0   : > { %v4842_v48 = vrot.slane %v4841_v1, 1 }
 0xce2   : > { %v4843_v2 = vmax.f32 %v4841_v1, %v4842_v48 }
 0xce4   : > { %v4844_v34 = vmax.f32 %v4805_v4, %v4843_v2 }
 0xce6   : > { %v4845_v0 = vsub.f32 %v4805_v4, %v4844_v34  ;;  %v8961_v47 = vperm.slane %v4844_v34, 0  ;;  %5101 = vst.msk [vmem:[#allocation2] sm:$0x1] %vm4955_vm8, %v4844_v34 }
 0xce8   : > { %v4846_v44 = vmul.f32 1.442695, %v4845_v0  ;;  %v4852_v32 = vsub.f32 %v8831_v39, %v8961_v47  ;;  %v4851_v25 = vsub.f32 %v8824_v63, %v8961_v47  ;;  %v4853_v40 = vsub.f32 %v8863_v10, %v8961_v47 }
 0xce9   : > { %v4854_v62 = vsub.f32 %v8835_v46, %v8961_v47  ;;  %v4855_v14 = vsub.f32 %v8882_v21, %v8961_v47  ;;  %v4859_v60 = vsub.f32 %v8916_v12, %v8961_v47  ;;  %v4856_v39 = vsub.f32 %v8869_v18, %v8961_v47 }
 0xcea   : > { %6253 = vpow2.f32 %v4846_v44  ;;  %v4869_v43 = vmul.f32 1.442695, %v4852_v32  ;;  %v4867_v19 = vmul.f32 1.442695, %v4851_v25  ;;  %v4871_v23 = vmul.f32 1.442695, %v4853_v40 }
 0xceb   : > { %v4873_v63 = vmul.f32 1.442695, %v4854_v62  ;;  %v4857_v10 = vsub.f32 %v8856_v17, %v8961_v47  ;;  %v4875_v46 = vmul.f32 1.442695, %v4855_v14  ;;  %v4883_v51 = vmul.f32 1.442695, %v4859_v60 }
 0xcec   : > { %6255 = vpow2.f32 %v4869_v43  ;;  %v4858_v11 = vsub.f32 %v8897_v8, %v8961_v47  ;;  %v4877_v36 = vmul.f32 1.442695, %v4856_v39  ;;  %v4860_v18 = vsub.f32 %v8901_v28, %v8961_v47 }
 0xced   : > { %6257 = vpow2.f32 %v4867_v19  ;;  %v4879_v12 = vmul.f32 1.442695, %v4857_v10  ;;  %v4862_v17 = vsub.f32 %v8920_v37, %v8961_v47  ;;  %v4861_v15 = vsub.f32 %v8907_v42, %v8961_v47 }
 0xcee   : > { %6259 = vpow2.f32 %v4871_v23  ;;  %v4881_v35 = vmul.f32 1.442695, %v4858_v11  ;;  %v4885_v3 = vmul.f32 1.442695, %v4860_v18  ;;  %v4863_v25 = vsub.f32 %v8940_v53, %v8961_v47 }
 0xcef   : > { %6261 = vpow2.f32 %v4873_v63  ;;  %v4889_v0 = vmul.f32 1.442695, %v4862_v17  ;;  %v4887_v26 = vmul.f32 1.442695, %v4861_v15  ;;  %v4864_v14 = vsub.f32 %v8924_v9, %v8961_v47 }
 0xcf0   : > { %v8982_v21 = vpop.eup %6253  ;;  %6263 = vpow2.f32 %v4875_v46  ;;  %v4865_v53 = vsub.f32 %v8936_v13, %v8961_v47  ;;  %v4891_v63 = vmul.f32 1.442695, %v4863_v25  ;;  %v4866_v56 = vsub.f32 %v8957_v31, %v8961_v47 }
 0xcf1   : > { %4960 = vperm.xlu2 %6024, %v8982_v21   ;;  %6265 = vpow2.f32 %v4883_v51  ;;  %v4893_v13 = vmul.f32 1.442695, %v4864_v14 }
 0xcf2   : > { %v6256_v59 = vpop.eup %6255  ;;  %6267 = vpow2.f32 %v4877_v36  ;;  %v4895_v7 = vmul.f32 1.442695, %v4865_v53 }
 0xcf3   : > { %v6258_v55 = vpop.eup %6257  ;;  %v4900_v8 = vsel %vm4774_vm11, %v6256_v59, 0.0  ;;  %6269 = vpow2.f32 %v4879_v12  ;;  %vm9211_vm11 = vcmp.lt.s32.totalorder %v8874_v52, 200 }
 0xcf4   : > { %v6260_v1 = vpop.eup %6259  ;;  %4972 = vperm.xlu0 %6026, %v4900_v8   ;;  %v4918_v48 = vsel %vm4806_vm10, %v4900_v8, 0.0  ;;  %v4899_v28 = vsel %vm4773_vm9, %v6258_v55, 0.0  ;;  %6271 = vpow2.f32 %v4881_v35  ;;  %v4897_v35 = vmul.f32 1.442695, %v4866_v56 }
 0xcf5   : > { %4967 = vperm.xlu1 %6025, %v4899_v28   ;;  %v4917_v37 = vsel %vm4806_vm10, %v4899_v28, 0.0  ;;  %v4901_v4 = vsel %vm4775_vm14, %v6260_v1, 0.0  ;;  %v6262_v2 = vpop.eup %6261  ;;  %6273 = vpow2.f32 %v4885_v3  ;;  %vm9210_vm9 = vcmp.lt.s32.totalorder %v8859_v54, 200 }
 0xcf6   : > { %v4919_v34 = vadd.f32 %v4918_v48, %v4917_v37  ;;  %v6264_v42 = vpop.eup %6263  ;;  %v4920_v44 = vsel %vm4806_vm10, %v4901_v4, 0.0  ;;  %v4902_v32 = vsel %vm4776_vm12, %v6262_v2, 0.0  ;;  %6275 = vpow2.f32 %v4889_v0 }
 0xcf7   : > { %v6266_v40 = vpop.eup %6265  ;;  %v4903_v38 = vsel %vm4777_vm13, %v6264_v42, 0.0  ;;  %v4922_v19 = vsel %vm4806_vm10, %v4902_v32, 0.0  ;;  %6277 = vpow2.f32 %v4887_v26  ;;  %v9212_v56 = vmax.f32 %v8489_v58, 0.0 }
 0xcf8   : > { %v4921_v62 = vadd.f32 %v4920_v44, %v4919_v34  ;;  %v6268_v43 = vpop.eup %6267  ;;  %v4907_v20 = vsel %vm4781_vm5, %v6266_v40, 0.0  ;;  %v4924_v39 = vsel %vm4806_vm10, %v4903_v38, 0.0  ;;  %6279 = vpow2.f32 %v4891_v63 }
 0xcf9   : > { %4977 = vperm.xlu2 %6024, %v4901_v4   ;;  %v6270_v23 = vpop.eup %6269  ;;  %v4904_v60 = vsel %vm4778_vm1, %v6268_v43, 0.0  ;;  %6281 = vpow2.f32 %v4893_v13  ;;  %v4932_v57 = vsel %vm4806_vm10, %v4907_v20, 0.0  ;;  %v9213_v13 = vmax.f32 %v8484_v49, 0.0 }
 0xcfa   : > { %v4923_v61 = vadd.f32 %v4922_v19, %v4921_v62  ;;  %v6272_v10 = vpop.eup %6271  ;;  %v4905_v9 = vsel %vm4779_vm15, %v6270_v23, 0.0  ;;  %v4926_v51 = vsel %vm4806_vm10, %v4904_v60, 0.0  ;;  %6283 = vpow2.f32 %v4895_v7 }
 0xcfb   : > { %v4906_v36 = vsel %vm4780_vm0, %v6272_v10, 0.0  ;;  %v6274_v12 = vpop.eup %6273  ;;  %v4928_v18 = vsel %vm4806_vm10, %v4905_v9, 0.0  ;;  %6285 = vpow2.f32 %v4897_v35  ;;  %v9220_v49 = vmax.f32 %v8519_v24, 0.0 }
 0xcfc   : > { %5007 = vperm.xlu0 %6026, %v4907_v20   ;;  %v4925_v46 = vadd.f32 %v4924_v39, %v4923_v61  ;;  %v6276_v59 = vpop.eup %6275  ;;  %v4930_v31 = vsel %vm4806_vm10, %v4906_v36, 0.0  ;;  %v4908_v55 = vsel %vm4782_vm2, %v6274_v12, 0.0  ;;  %v4915_v61 = vld [vmem:[#allocation3] sm:$0x1]  ;;  %v9216_v12 = vmax.f32 %v8504_v41, 0.0 }
 0xcfd   : > { %4982 = vperm.xlu1 %6025, %v4902_v32   ;;  %v6278_v17 = vpop.eup %6277  ;;  %v4910_v8 = vsel %vm4784_vm6, %v6276_v59, 0.0  ;;  %v4934_v28 = vsel %vm4806_vm10, %v4908_v55, 0.0  ;;  %v4916_v45 = vmul.f32 %v8982_v21, %v4915_v61  ;;  %v9217_v59 = vmax.f32 %v8509_v33, 0.0 }
 0xcfe   : > { %v4927_v11 = vadd.f32 %v4926_v51, %v4925_v46  ;;  %v4909_v1 = vsel %vm4783_vm3, %v6278_v17, 0.0  ;;  %v6280_v48 = vpop.eup %6279  ;;  %v4938_v34 = vsel %vm4806_vm10, %v4910_v8, 0.0 }
 0xcff   : > { %v6282_v4 = vpop.eup %6281  ;;  %v4936_v5 = vsel %vm4806_vm10, %v4909_v1, 0.0  ;;  %v4911_v27 = vsel %vm4785_vm4, %v6280_v48, 0.0  ;;  %vm9214_vm4 = vcmask 523264  }
 0xd00   : > { %v4929_v16 = vadd.f32 %v4928_v18, %v4927_v11  ;;  %v6284_v3 = vpop.eup %6283  ;;  %v4912_v29 = vsel %vm9210_vm9, %v6282_v4, 0.0  ;;  %v4940_v32 = vsel %vm4806_vm10, %v4911_v27, 0.0  ;;  %vm9218_vm12 = vmmov %vm9214_vm4  ;;  %v9224_v4 = vmax.f32 %v8545_v6, 0.0 }
 0xd01   : > { %4987 = vperm.xlu2 %6024, %v4903_v38   ;;  %v6286_v42 = vpop.eup %6285  ;;  %v4913_v44 = vsel %vm9211_vm11, %v6284_v3, 0.0  ;;  %v4942_v25 = vsel %vm4806_vm10, %v4912_v29, 0.0  ;;  %vm9219_vm13 = vmmov %vm9214_vm4 }
 0xd02   : > { %v4931_v47 = vadd.f32 %v4930_v31, %v4929_v16  ;;  %v4914_v30 = vsel %vm4788_vm7, %v6286_v42, 0.0  ;;  %v4944_v62 = vsel %vm4806_vm10, %v4913_v44, 0.0  ;;  %vm9222_vm14 = vmmov %vm9214_vm4 }
 0xd03   : > { %v4946_v38 = vsel %vm4806_vm10, %v4914_v30, 0.0  ;;  %vm9215_vm10 = vmmov %vm9214_vm4 }
 0xd04   : > { %5022 = vperm.xlu0 %6026, %v4910_v8   ;;  %v4933_v15 = vadd.f32 %v4932_v57, %v4931_v47  ;;  %vm9223_vm15 = vmmov %vm9214_vm4 }
 0xd05   : > { %4992 = vperm.xlu1 %6025, %v4904_v60   ;;  %vm9225_vm0 = vmmov %vm9214_vm4 }
 0xd06   : > { %v4935_v37 = vadd.f32 %v4934_v28, %v4933_v15  ;;  %v9221_v15 = vmax.f32 %v8522_v22, 0.0  ;;  %vm9229_vm1 = vmmov %vm9225_vm0 }
 0xd07   : > { %vm9232_vm2 = vmmov %vm9225_vm0 }
 0xd08   : > { %v4937_v2 = vadd.f32 %v4936_v5, %v4935_v37  ;;  %vm9233_vm3 = vmmov %vm9225_vm0 }
 0xd09   : > { %4997 = vperm.xlu2 %6024, %v4905_v9   ;;  %vm9238_vm5 = vmmov %vm9225_vm0 }
 0xd0a   : > { %v4939_v0 = vadd.f32 %v4938_v34, %v4937_v2  ;;  %vm9241_vm6 = vmmov %vm9225_vm0 }
 0xd0b   : > { %vm9242_vm7 = vmmov %vm9225_vm0 }
 0xd0c   : > { %5037 = vperm.xlu0 %6026, %v4913_v44   ;;  %v4941_v26 = vadd.f32 %v4940_v32, %v4939_v0  ;;  %v9227_v0 = vld [vmem:[#allocation11_spill] sm:$0xff]  ;;  %vm9250_vm9 = vmmov %vm9225_vm0 }
 0xd0d   : > { %5002 = vperm.xlu1 %6025, %v4906_v36   ;;  %v9228_v22 = vmax.f32 %v9227_v0, 0.0  ;;  %vm9251_vm11 = vmmov %vm9225_vm0 }
 0xd0e   : > { %v4943_v40 = vadd.f32 %v4942_v25, %v4941_v26  ;;  %v9230_v25 = vld [vmem:[#allocation12_spill] sm:$0xff] }
 0xd10   : > { %v4945_v54 = vadd.f32 %v4944_v62, %v4943_v40  ;;  %v9231_v40 = vmax.f32 %v9230_v25, 0.0 }
 0xd11   : > { %5012 = vperm.xlu2 %6024, %v4908_v55  }
 0xd12   : > { %v4947_v43 = vadd.f32 %v4946_v38, %v4945_v54 }
 0xd14   : > { %v4948_v52 = vrot.slane %v4947_v43, 4 }
 0xd15   : > { %5017 = vperm.xlu1 %6025, %v4909_v1  }
 0xd16   : > { %v4949_v19 = vadd.f32 %v4948_v52, %v4947_v43 }
 0xd18   : > { %v4950_v14 = vrot.slane %v4949_v19, 2 }
 0xd19   : > { %5027 = vperm.xlu2 %6024, %v4911_v27   ;;  %v9226_v27 = vmax.f32 %v8570_v50, 0.0  ;;  %v9234_v50 = vld [vmem:[#allocation14_spill] sm:$0xff] }
 0xd1a   : > { %v4951_v23 = vadd.f32 %v4950_v14, %v4949_v19  ;;  %v9235_v52 = vmax.f32 %v9234_v50, 0.0  ;;  %v9236_v14 = vld [vmem:[#allocation13_spill] sm:$0xff] }
 0xd1c   : > { %v4952_v60 = vrot.slane %v4951_v23, 1 }
 0xd1d   : > { %5032 = vperm.xlu1 %6025, %v4912_v29  }
 0xd1e   : > { %v4953_v53 = vadd.f32 %v4952_v60, %v4951_v23  ;;  %v9237_v23 = vmax.f32 %v9236_v14, 0.0 }
 0xd20   : > { %v4954_v20 = vadd.f32 %v4953_v53, %v4916_v45 }
 0xd21   : > { %5042 = vperm.xlu2 %6024, %v4914_v30  }
 0xd22   : > { %4956 = vst.msk [vmem:[#allocation3] sm:$0x1] %vm4955_vm8, %v4954_v20  ;;  %v9239_v20 = vld [vmem:[#allocation15_spill] sm:$0xff]  ;;  %vm9249_vm8 = vmmov %vm9225_vm0 }
 0xd4b   : > { %v9049_v39 = vpop.permute.xlu2 %4960 }
 0xd53   : > { %v4978_v63 = vpop.permute.xlu2 %4977 }
 0xd54   : > { %v5047_v18 = vmul.f32 %v4978_v63, %v9216_v12  ;;  %v9240_v63 = vmax.f32 %v9239_v20, 0.0  ;;  %v9245_v12 = vld [vmem:[#allocation16_spill] sm:$0xff] }
 0xd56   : > { %v5064_v31 = vsel %vm9218_vm12, %v5047_v18, 0.0  ;;  %v9246_v18 = vmax.f32 %v9245_v12, 0.0 }
 0xd5b   : > { %v4988_v10 = vpop.permute.xlu2 %4987 }
 0xd5c   : > { %v5049_v55 = vmul.f32 %v4988_v10, %v9220_v49 }
 0xd5e   : > { %v5068_v48 = vsel %vm9222_vm14, %v5049_v55, 0.0 }
 0xd63   : > { %v4998_v17 = vpop.permute.xlu2 %4997 }
 0xd64   : > { %v5051_v5 = vmul.f32 %v4998_v17, %v9224_v4  ;;  %v9247_v17 = vld [vmem:[#allocation18_spill] sm:$0xff] }
 0xd66   : > { %v4973_v46 = vpop.permute.xlu0 %4972  ;;  %v5072_v24 = vsel %vm9225_vm0, %v5051_v5, 0.0 }
 0xd67   : > { %v4968_v9 = vpop.permute.xlu1 %4967  ;;  %v5046_v51 = vmul.f32 %v4973_v46, %v9212_v56 }
 0xd68   : > { %v5045_v11 = vmul.f32 %v4968_v9, %v9213_v13 }
 0xd69   : > { %v5062_v7 = vsel %vm9214_vm4, %v5046_v51, 0.0  ;;  %vm5099_vm4 = vcmask 516096  }
 0xd6a   : > { %v5061_v21 = vsel %vm9215_vm10, %v5045_v11, 0.0 }
 0xd6b   : > { %v5063_v35 = vadd.f32 %v5062_v7, %v5061_v21  ;;  %v5013_v28 = vpop.permute.xlu2 %5012  ;;  %v9243_v7 = vld [vmem:[#allocation17_spill] sm:$0xff] }
 0xd6c   : > { %v5054_v30 = vmul.f32 %v5013_v28, %v9231_v40  ;;  %v9244_v21 = vmax.f32 %v9243_v7, 0.0  ;;  %v4957_v28 = vld [vmem:[#allocation4] sm:$0x1] }
 0xd6d   : > { %v5065_v47 = vadd.f32 %v5064_v31, %v5063_v35  ;;  %v9248_v35 = vmax.f32 %v9247_v17, 0.0 }
 0xd6e   : > { %v5008_v41 = vpop.permute.xlu0 %5007  ;;  %v5078_v43 = vsel %vm9233_vm3, %v5054_v30, 0.0 }
 0xd6f   : > { %v4983_v36 = vpop.permute.xlu1 %4982  ;;  %v5053_v34 = vmul.f32 %v5008_v41, %v9226_v27 }
 0xd70   : > { %v5048_v16 = vmul.f32 %v4983_v36, %v9217_v59 }
 0xd71   : > { %v5076_v6 = vsel %vm9232_vm2, %v5053_v34, 0.0 }
 0xd72   : > { %v5066_v58 = vsel %vm9219_vm13, %v5048_v16, 0.0 }
 0xd73   : > { %v5067_v57 = vadd.f32 %v5066_v58, %v5065_v47  ;;  %v5028_v62 = vpop.permute.xlu2 %5027 }
 0xd74   : > { %v5057_v10 = vmul.f32 %v5028_v62, %v9240_v63 }
 0xd75   : > { %v5069_v37 = vadd.f32 %v5068_v48, %v5067_v57  ;;  %v4963_v48 = vperm.slane %v9049_v39, 0 }
 0xd76   : > { %v5023_v32 = vpop.permute.xlu0 %5022  ;;  %v5084_v11 = vsel %vm9242_vm7, %v5057_v10, 0.0 }
 0xd77   : > { %v4993_v8 = vpop.permute.xlu1 %4992  ;;  %v5056_v19 = vmul.f32 %v5023_v32, %v9235_v52  ;;  %v4964_v4 = vmul.f32 %v4963_v48, %v4957_v28 }
 0xd78   : > { %v5050_v1 = vmul.f32 %v4993_v8, %v9221_v15 }
 0xd79   : > { %v5082_v46 = vsel %vm9241_vm6, %v5056_v19, 0.0 }
 0xd7a   : > { %v5070_v33 = vsel %vm9223_vm15, %v5050_v1, 0.0 }
 0xd7b   : > { %v5071_v3 = vadd.f32 %v5070_v33, %v5069_v37  ;;  %v5043_v51 = vpop.permute.xlu2 %5042 }
 0xd7c   : > { %v5060_v31 = vmul.f32 %v5043_v51, %v9248_v35 }
 0xd7d   : > { %v5073_v42 = vadd.f32 %v5072_v24, %v5071_v3 }
 0xd7e   : > { %v5038_v9 = vpop.permute.xlu0 %5037  ;;  %v5090_v57 = vsel %vm9251_vm11, %v5060_v31, 0.0 }
 0xd7f   : > { %v5003_v2 = vpop.permute.xlu1 %5002  ;;  %v5059_v36 = vmul.f32 %v5038_v9, %v9244_v21 }
 0xd80   : > { %v5052_v29 = vmul.f32 %v5003_v2, %v9228_v22 }
 0xd81   : > { %v5088_v49 = vsel %vm9250_vm9, %v5059_v36, 0.0 }
 0xd82   : > { %v5074_v44 = vsel %vm9229_vm1, %v5052_v29, 0.0 }
 0xd83   : > { %v5075_v26 = vadd.f32 %v5074_v44, %v5073_v42 }
 0xd85   : > { %v5077_v54 = vadd.f32 %v5076_v6, %v5075_v26 }
 0xd87   : > { %v5018_v38 = vpop.permute.xlu1 %5017  ;;  %v5079_v60 = vadd.f32 %v5078_v43, %v5077_v54 }
 0xd88   : > { %v5055_v61 = vmul.f32 %v5018_v38, %v9237_v23 }
 0xd8a   : > { %v5080_v53 = vsel %vm9238_vm5, %v5055_v61, 0.0 }
 0xd8b   : > { %v5081_v45 = vadd.f32 %v5080_v53, %v5079_v60 }
 0xd8d   : > { %v5083_v56 = vadd.f32 %v5082_v46, %v5081_v45 }
 0xd8f   : > { %v5033_v13 = vpop.permute.xlu1 %5032  ;;  %v5085_v16 = vadd.f32 %v5084_v11, %v5083_v56 }
 0xd90   : > { %v5058_v59 = vmul.f32 %v5033_v13, %v9246_v18 }
 0xd92   : > { %v5086_v58 = vsel %vm9249_vm8, %v5058_v59, 0.0 }
 0xd93   : > { %v5087_v47 = vadd.f32 %v5086_v58, %v5085_v16 }
 0xd95   : > { %v5089_v55 = vadd.f32 %v5088_v49, %v5087_v47 }
 0xd97   : > { %v5091_v8 = vadd.f32 %v5090_v57, %v5089_v55 }
 0xd99   : > { %v5092_v15 = vrot.slane %v5091_v8, 4 }
 0xd9b   : > { %v5093_v1 = vadd.f32 %v5092_v15, %v5091_v8 }
 0xd9d   : > { %v5094_v41 = vrot.slane %v5093_v1, 2 }
 0xd9f   : > { %v5095_v33 = vadd.f32 %v5094_v41, %v5093_v1 }
 0xda1   : > { %v5096_v37 = vrot.slane %v5095_v33, 1 }
 0xda3   : > { %v5097_v5 = vadd.f32 %v5096_v37, %v5095_v33  ;;  %5105 = sbr.rel (%p5831_p5) target bundleno = 3763 (0xeb3), region = 84 }
 0xda5   : > { %v5098_v3 = vadd.f32 %v5097_v5, %v4964_v4 }
 0xda7   : > { %5100 = vst.msk [vmem:[#allocation4] sm:$0x1] %vm5099_vm4, %v5098_v3 }
 0xda8   : > { %v5107_v2 = vld [vmem:[#allocation3] sm:$0x1]  ;;  %v6367_v24 = vmov 0   ;;  %v5137_v39 = vld [vmem:[%s9165_s12 + $0x38] sm:$0xff]  ;;  %v5136_v27 = vld [vmem:[%s9165_s12 + $0x30] sm:$0xff]  ;;  %vm9252_vm15 = vcmask 523264  }
 0xda9   : > { %6287 = vset.pattern.permute.xlu0 %v6367_v24  ;;  %5150 = vmatpush.msra.mxu0 %v5137_v39  ;;  %v5135_v34 = vld [vmem:[%s9165_s12 + $0x28] sm:$0xff]  ;;  %v5134_v0 = vld [vmem:[%s9165_s12 + $0x20] sm:$0xff]  ;;  %v5133_v22 = vld [vmem:[%s9165_s12 + $0x18] sm:$0xff]  ;;  %vm5162_vm0 = vcmask 16384  }
 0xdaa   : > { %5110 = vperm.xlu0 %6287, %v5107_v2   ;;  %v5132_v29 = vld [vmem:[%s9165_s12 + $0x10] sm:$0xff]  ;;  %v5131_v42 = vld [vmem:[%s9165_s12 + $0x8] sm:$0xff]  ;;  %v5130_v44 = vld [vmem:[%s9165_s12] sm:$0xff] }
 0xdab   : > { %5151 = vmatpush.msra.mxu0 %v5136_v27  ;;  %v5138_v23 = vld [vmem:[%s9166_s13 + $0x25] ss:$0 sm:$0xff] }
 0xdad   : > { %5152 = vmatpush.msra.mxu0 %v5135_v34 }
 0xdae   : > { %v5106_v43 = vld [vmem:[#allocation4] sm:$0x1] }
 0xdaf   : > { %5153 = vmatpush.msra.mxu0 %v5134_v0 }
 0xdb1   : > { %5154 = vmatpush.msra.mxu0 %v5133_v22 }
 0xdb3   : > { %5155 = vmatpush.msra.mxu0 %v5132_v29 }
 0xdb5   : > { %5156 = vmatpush.msra.mxu0 %v5131_v42 }
 0xdb7   : > { %5157 = vmatpush.msra.mxu0 %v5130_v44 }
 0xe1c   : > { %v5111_v32 = vpop.permute.xlu0 %5110 }
 0xe1d   : > { %v5113_v26 = vperm.slane %v5111_v32, 0 }
 0xe1f   : > { %6288 = vrcp.f32 %v5113_v26  ;;  %v5125_v6 = vand.u32 2147483648, %v5113_v26  ;;  %v5123_v54 = vand.u32 2147483647, %v5113_v26  ;;  %vm5119_vm12 = vweird.f32 %v5113_v26 }
 0xe21   : > { %v5126_v50 = vor.u32 1.1754944e-38, %v5125_v6  ;;  %vm5124_vm14 = vcmp.eq.f32.partialorder %v5123_v54, 8.507059e+37 }
 0xe25   : > { %v6289_v25 = vpop.eup %6288 }
 0xe26   : > { %v5115_v40 = vmul.f32 %v6289_v25, %v5113_v26  ;;  %vm5120_vm10 = vweird.f32 %v6289_v25 }
 0xe27   : > { %vm5121_vm13 = vmor %vm5119_vm12, %vm5120_vm10 }
 0xe28   : > { %v5116_v30 = vsub.f32 1.0, %v5115_v40 }
 0xe2a   : > { %v5117_v62 = vmul.f32 %v6289_v25, %v5116_v30 }
 0xe2c   : > { %v5118_v38 = vadd.f32 %v6289_v25, %v5117_v62 }
 0xe2e   : > { %v5122_v52 = vsel %vm5121_vm13, %v6289_v25, %v5118_v38 }
 0xe2f   : > { %v5127_v19 = vsel %vm5124_vm14, %v5126_v50, %v5122_v52 }
 0xe30   : > { %v5128_v14 = vmul.f32 %v5127_v19, %v5106_v43 }
 0xe32   : > { %5129 = vst.msk [vmem:[#allocation7] sm:$0x1] %vm5099_vm4, %v5128_v14  ;;  %5832 = vmatmul.msk.f32.vlgmr.msra.gmra.mxu0 %vm9252_vm15, %v5128_v14 }
 0xeaf   : > { %v5159_v61 = vpop.f32.mrf.mxu0 }
 0xeb0   : > { %v5160_v60 = vadd.f32 %v5159_v61, %v5138_v23 }
 0xeb2   : > { %5163 = vst.msk [vmem:[#allocation5] sm:$0x1] %vm5162_vm0, %v5160_v60 }
 0xeb3 PF: > { %p6004_p6 = scmp.eq.s32.totalorder %s6456_s19, 1  ;;  %s6368_s21 = smov [#allocation5]  }
 0xeb4   : > { %s5170_s24 = sshll.u32 %s6368_s21, 4  ;;  %s5172_s25 = sshll.u32 %s9167_s14, 4  ;;  %s5171_s24 = int_to_ptr.vmem [resolvable:$true] %s5170_s24  ;;  %s5173_s25 = int_to_ptr.hbm [resolvable:$true] %s5172_s25 }
 0xeb5   : > { %5997 = dma.vmem_to_hbm [thread:$0]  (%p6004_p6), %s5171_s24, 16, %s5173_s25, [#allocation6]  }
 0xeb6   : > { %s5184_s28 = sshll.u32 %s9168_s15, 4  ;;  %s6369_s29 = smov [#allocation7]   ;;  %s5185_s28 = int_to_ptr.hbm [resolvable:$true] %s5184_s28 }
 0xeb7   : > { %s5182_s30 = sshll.u32 %s6369_s29, 4  ;;  %s5183_s30 = int_to_ptr.vmem [resolvable:$true] %s5182_s30 }
 0xeb8   : > { %5999 = dma.vmem_to_hbm [thread:$0]  (%p6004_p6), %s5183_s30, 16, %s5185_s28, [#allocation8]  }
 0xeb9   : > { %6351 = dma.done.wait (%p6004_p6), [#allocation6], 16  }
 0xeba   : > { %6353 = vsyncadd (%p6004_p6), [#allocation6], 4294967280 }
 0xebb   : > { %6355 = dma.done.wait (%p6004_p6), [#allocation8], 16  }
 0xebc   : > { %6357 = vsyncadd (%p6004_p6), [#allocation8], 4294967280 }
 0xebd PF: > { %s28_s18 = sadd.s32 1, %s6360_s18  }
 0xebe   : > { %p25_p7 = scmp.ge.s32.totalorder %s28_s18, 4  }
 0xec0   :  { %27 = sbr.rel (!%p25_p7) target bundleno = 2 (0x2), region = 121 }
 0xec5   :  { %5203 = vsyncpa [#allocation6], 1 }
 0xec6   :  { %5205 = vsyncpa [#allocation6 + $0x1], 1 }
 0xec7   :  { %5206 = vsyncpa [#allocation8], 1 }

</bundles_post_ra>
